<compile_context>
chip_gen: v6e
topology: v6e:2x2x1
jax: 0.10.0
libtpu: 0.0.40
codegen_flags: <defaults>
</compile_context>

<pallas_src>
import functools

import jax
import jax.numpy as jnp
from jax import lax
from jax.experimental import pallas as pl
from jax.experimental.pallas import tpu as pltpu

EPS = 1e-6


# --------------------------------------------------------------------------
# kernel-side helpers
# --------------------------------------------------------------------------
def _l2norm(x):
    n = jnp.sqrt(jnp.sum(x * x, axis=-1, keepdims=True))
    return x * pl.reciprocal(n + EPS)          # matches torch: x * (1/(norm+eps))


def _gelu(x):
    # TODO(synk): MultiExpertLayer source not provided; assumed per-expert
    # Linear -> GELU(tanh) -> Linear MLP (standard soft-MoE expert layer).
    return jax.nn.gelu(x, approximate=True)


def _entmax15(z, n_bisect=12, n_newton=2):
    """Exact 1.5-entmax over the last axis (slots lane-resident).

    tau solves sum_j relu((z_j - max)/2 - tau)^2 == 1, the unique root of a
    convex, decreasing, C1 piecewise-quadratic.  12 bisections bracket tau to
    2^-12; two Newton steps (monotone from below by convexity) polish it to
    ~1e-9 — same accuracy as 30 bisections at roughly half the VPU passes.
    """
    zmax = jnp.max(z, axis=-1, keepdims=True)
    z = (z - zmax) * 0.5
    lo = jnp.full_like(zmax, -1.0)             # f(lo) >= 0 (max term alone = 1)
    hi = jnp.zeros_like(zmax)                  # f(hi) < 0

    def bisect(_, carry):
        lo, hi = carry
        mid = 0.5 * (lo + hi)
        t = jnp.maximum(z - mid, 0.0)
        ge = jnp.sum(t * t, axis=-1, keepdims=True) >= 1.0
        return jnp.where(ge, mid, lo), jnp.where(ge, hi, mid)

    lo, hi = lax.fori_loop(0, n_bisect, bisect, (lo, hi), unroll=True)
    tau = 0.5 * (lo + hi)
    for _ in range(n_newton):                  # tau += (sum t^2 - 1) / (2 sum t)
        t = jnp.maximum(z - tau, 0.0)
        f = jnp.sum(t * t, axis=-1, keepdims=True) - 1.0
        g = 2.0 * jnp.sum(t, axis=-1, keepdims=True)
        tau = tau + f / jnp.maximum(g, 1e-30)
    p = jnp.maximum(z - tau, 0.0)
    return p * p


# --------------------------------------------------------------------------
# Fused kernel: logits + dispatch softmax + slot dispatch + expert MLPs
#               + entmax-1.5 combine weights + combine matmul
# --------------------------------------------------------------------------
def _fused_moe_kernel(x_ref, qn_d_ref, qn_c_ref,
                      w1c_ref, b1c_ref, w2c_ref, b2c_ref,
                      w1u_ref, b1u_ref, w2u_ref, b2u_ref,
                      out_ref, *, n_core, n_univ, S, bt):
    E = n_core + n_univ
    ES = E * S
    x = x_ref[...].astype(jnp.float32)          # (bt, N, D)
    N, D = x.shape[1], x.shape[2]

    key = _l2norm(x)                            # f32 elementwise (v5e friendly)
    key_bf = key.astype(jnp.bfloat16)
    x_bf = x.astype(jnp.bfloat16)

    # ---- combine logits: ONE canonical (bt*N, D)@(D, ES) matmul (big M rows,
    #      phi pre-transposed & pre-scaled host-side), then exact 1.5-entmax
    #      over the slot (lane) axis.
    logits_c = jnp.dot(key_bf.reshape(bt * N, D), qn_c_ref[...],
                       preferred_element_type=jnp.float32)
    cw = _entmax15(logits_c.reshape(bt, N, ES))        # (bt, N, ES) f32
    cw_bf = cw.astype(jnp.bfloat16)

    # ---- dispatch path per batch element: logits in (ES, N) layout via the
    #      q.k^T (rhs-contracted) form — no transpose of the N-sized key —
    #      softmax over the token (lane) axis, then a canonical (ES,N)@(N,D)
    #      slot matmul.
    qn_d = qn_d_ref[...]                        # (ES, D) bf16, dispatch-scaled
    slots = []
    for b in range(bt):
        lt = lax.dot_general(qn_d, key_bf[b], (((1,), (1,)), ((), ())),
                             preferred_element_type=jnp.float32)     # (ES, N)
        m = jnp.max(lt, axis=1, keepdims=True)
        p = jnp.exp(lt - m)
        dw = p * (1.0 / jnp.sum(p, axis=1, keepdims=True))           # exact
        slots.append(jnp.dot(dw.astype(jnp.bfloat16), x_bf[b],
                             preferred_element_type=jnp.float32))    # (ES, D)

    # ---- expert banks: static unrolled loop over experts (no block-diagonal
    #      masking, no wasted MXU work); each expert's bt*S slot rows across
    #      the batch tile are stacked so the MXU sees more M rows.
    def run_bank(e0, n_e, w1_ref, b1_ref, w2_ref, b2_ref):
        outs = []
        for e in range(n_e):
            lo = (e0 + e) * S
            rows = jnp.concatenate(
                [slots[b][lo:lo + S, :] for b in range(bt)],
                axis=0).astype(jnp.bfloat16)                          # (bt*S, D)
            h = jnp.dot(rows, w1_ref[e], preferred_element_type=jnp.float32)
            h = _gelu(h + b1_ref[e])
            o = jnp.dot(h.astype(jnp.bfloat16), w2_ref[e],
                        preferred_element_type=jnp.float32) + b2_ref[e]
            outs.append(o)                                            # (bt*S, D)
        return outs

    eout = (run_bank(0, n_core, w1c_ref, b1c_ref, w2c_ref, b2c_ref)
            + run_bank(n_core, n_univ, w1u_ref, b1u_ref, w2u_ref, b2u_ref))

    # ---- combine: ONE canonical (N, ES)@(ES, D) matmul per batch element,
    #      both banks concatenated into a single (ES, D) operand.
    for b in range(bt):
        eo_b = jnp.concatenate(
            [eout[e][b * S:(b + 1) * S, :] for e in range(E)],
            axis=0).astype(jnp.bfloat16)                              # (ES, D)
        out_b = jnp.dot(cw_bf[b], eo_b, preferred_element_type=jnp.float32)
        out_ref[b] = out_b.astype(out_ref.dtype)


# --------------------------------------------------------------------------
# Wrapper
# --------------------------------------------------------------------------
def _vmem_budget_bytes():
    try:  # generation-aware (v7x has 64 MiB per core, v5e/v6e 128 MiB)
        cap = pltpu.get_tpu_info().vmem_capacity_bytes
    except Exception:
        cap = 64 * 1024 * 1024
    return int(min(96 * 1024 * 1024, (cap * 3) // 4))


def _pick_batch_tile(B, N, D, ES, S, out_itemsize, budget):
    """Largest batch tile that (a) keeps >=2 grid steps when B>=2 so both v7x
    TensorCores get 'parallel' work, (b) keeps double-buffered x/out blocks +
    f32 routing intermediates well inside the VMEM budget, (c) stops growing
    once the expert matmuls already see plenty of M rows."""
    best = 1
    for bt in range(1, B + 1):
        if B % bt:
            continue
        if B >= 2 and (B // bt) < 2:
            continue
        blocks = 2 * bt * N * D * (4 + out_itemsize)      # pipelined x/out
        inter = 4 * bt * N * ES * 4 + 2 * bt * N * D * 4  # logits/cw/dw/key
        if blocks + inter > budget // 2:
            continue
        best = bt
        if bt * S >= 256:
            break
    return best


def dual_path_soft_moe(x, params, *, n_core, n_univ, slots_per_expert):
    is_conv = (x.ndim == 4)
    if is_conv:
        Bc, Hh, Ww, Dc = x.shape
        x = x.reshape(Bc, Hh * Ww, Dc)
    B, N, D = x.shape
    S = slots_per_expert
    E = n_core + n_univ
    ES = E * S
    out_dtype = x.dtype

    # Host-side prep: l2-normalize phi once (batch invariant), fold the two
    # logit scales into the two phi copies, pre-transpose the combine copy,
    # cast all matmul weights to bf16 (MXU-peak operands, half the VMEM),
    # keep biases in f32 (added onto the f32 accumulator).
    inv_s0 = 1.0 / params["scale0"]
    inv_s1 = 1.0 / params["scale1"]
    phi = params["phi"].astype(jnp.float32).reshape(ES, D)
    qn = phi * (1.0 / (jnp.sqrt(jnp.sum(phi * phi, axis=-1, keepdims=True)) + EPS))
    qn_d = (qn * inv_s0).astype(jnp.bfloat16)                  # (ES, D)
    qn_c = jnp.transpose(qn * inv_s1).astype(jnp.bfloat16)     # (D, ES)

    w1c = params["w1c"].astype(jnp.bfloat16)                   # (n_core, D, Hc)
    w2c = params["w2c"].astype(jnp.bfloat16)                   # (n_core, Hc, D)
    b1c = params["b1c"].astype(jnp.float32)[:, None, :]        # (n_core, 1, Hc)
    b2c = params["b2c"].astype(jnp.float32)[:, None, :]        # (n_core, 1, D)
    w1u = params["w1u"].astype(jnp.bfloat16)
    w2u = params["w2u"].astype(jnp.bfloat16)
    b1u = params["b1u"].astype(jnp.float32)[:, None, :]
    b2u = params["b2u"].astype(jnp.float32)[:, None, :]

    budget = _vmem_budget_bytes()
    bt = _pick_batch_tile(B, N, D, ES, S, jnp.dtype(out_dtype).itemsize, budget)
    grid = (B // bt,)

    kernel = functools.partial(_fused_moe_kernel, n_core=n_core, n_univ=n_univ,
                               S=S, bt=bt)
    consts = (qn_d, qn_c, w1c, b1c, w2c, b2c, w1u, b1u, w2u, b2u)

    def call(single_buffer_consts):
        def const_spec(a):
            nd = a.ndim
            idx = lambda i, _nd=nd: (0,) * _nd
            if single_buffer_consts:
                # grid-invariant operands: single-buffered (halves their VMEM
                # footprint; matters at production dims / v7x's 64 MiB).
                return pl.BlockSpec(a.shape, idx, pipeline_mode=pl.Buffered(1))
            return pl.BlockSpec(a.shape, idx)

        return pl.pallas_call(
            kernel,
            out_shape=jax.ShapeDtypeStruct((B, N, D), out_dtype),
            grid=grid,
            in_specs=[pl.BlockSpec((bt, N, D), lambda i: (i, 0, 0))]
                     + [const_spec(a) for a in consts],
            out_specs=pl.BlockSpec((bt, N, D), lambda i: (i, 0, 0)),
            compiler_params=pltpu.CompilerParams(
                dimension_semantics=("parallel",),
                vmem_limit_bytes=budget),
        )(x, *consts)

    try:
        out = call(True)
    except Exception:
        out = call(False)   # jax build without single-buffer pipeline_mode

    if is_conv:
        out = out.reshape(Bc, Hh, Ww, Dc)
    return out


# --------------------------------------------------------------------------
# Pure-JAX reference (mirrors the PyTorch forward; sort-based entmax-1.5)
# --------------------------------------------------------------------------
def _l2norm_ref(x):
    n = jnp.sqrt(jnp.sum(x * x, axis=-1, keepdims=True))
    return x * (1.0 / (n + EPS))


def entmax15_ref(x, axis=-1):
    assert axis == -1
    x = x - jnp.max(x, axis=-1, keepdims=True)
    x = x / 2.0
    K = x.shape[-1]
    x_srt = -jnp.sort(-x, axis=-1)                       # descending
    rho = jnp.arange(1, K + 1, dtype=x.dtype)
    mean = jnp.cumsum(x_srt, axis=-1) / rho
    mean_sq = jnp.cumsum(x_srt * x_srt, axis=-1) / rho
    ss = rho * (mean_sq - mean * mean)
    delta = (1.0 - ss) / rho
    tau = mean - jnp.sqrt(jnp.clip(delta, 0.0, None))
    support = jnp.sum((tau <= x_srt).astype(jnp.int32), axis=-1, keepdims=True)
    tau_star = jnp.take_along_axis(tau, support - 1, axis=-1)
    y = jnp.clip(x - tau_star, 0.0, None)
    return y * y


def reference_forward(x, params, *, n_core, n_univ, S):
    E = n_core + n_univ
    phi = params["phi"]
    key = _l2norm_ref(x)
    q = _l2norm_ref(phi)
    logits = jnp.einsum('bnd,esd->bnes', key, q, precision='highest')
    d_log = logits / params["scale0"]
    c_log = logits / params["scale1"]
    mx = jnp.max(d_log, axis=-3, keepdims=True)
    ex = jnp.exp(d_log - mx)
    dw = ex / jnp.sum(ex, axis=-3, keepdims=True)
    cw = entmax15_ref(c_log.reshape(*c_log.shape[:-2], E * S), axis=-1)
    slots = jnp.einsum('bnd,bnes->besd', x, dw, precision='highest')

    def expert(sl, w1, b1, w2, b2):
        h = jnp.einsum('besd,edh->besh', sl, w1, precision='highest')
        h = h + b1[None, :, None, :]
        h = jax.nn.gelu(h, approximate=True)
        o = jnp.einsum('besh,ehd->besd', h, w2, precision='highest')
        return o + b2[None, :, None, :]

    core_out = expert(slots[:, :n_core], params["w1c"], params["b1c"],
                      params["w2c"], params["b2c"])
    univ_out = expert(slots[:, n_core:], params["w1u"], params["b1u"],
                      params["w2u"], params["b2u"])
    out = jnp.concatenate([core_out, univ_out], axis=1)
    out = out.reshape(out.shape[0], E * S, -1)
    return jnp.einsum('bsd,bns->bnd', out, cw, precision='highest')


if __name__ == "__main__":
    B, N, D = 2, 64, 32
    num_experts_arg = 4
    S = 2                                   # slots_per_expert
    n_core = num_experts_arg // 2           # 2
    n_univ = n_core * 4                     # univ_factor = 1/4 -> 8
    E = n_core + n_univ                     # 10
    Hc = 4 * D                              # int(4 * compress_ratio * dim) = 128
    Hu = int(4 * 0.25 * D)                  # int(4 * univ_factor * dim)    = 32

    root = jax.random.PRNGKey(0)
    ks = jax.random.split(root, 12)
    x = jax.random.normal(ks[0], (B, N, D), jnp.float32)

    # phi: orthogonal init over flattened (E, S*D), like nn.init.orthogonal_
    a = jax.random.normal(ks[1], (S * D, E), jnp.float32)
    qmat, _ = jnp.linalg.qr(a)
    phi = qmat.T.reshape(E, S, D).astype(jnp.float32)

    params = dict(
        phi=phi,
        w1c=0.05 * jax.random.normal(ks[2], (n_core, D, Hc), jnp.float32),
        b1c=0.01 * jax.random.normal(ks[3], (n_core, Hc), jnp.float32),
        w2c=0.05 * jax.random.normal(ks[4], (n_core, Hc, D), jnp.float32),
        b2c=0.01 * jax.random.normal(ks[5], (n_core, D), jnp.float32),
        w1u=0.05 * jax.random.normal(ks[6], (n_univ, D, Hu), jnp.float32),
        b1u=0.01 * jax.random.normal(ks[7], (n_univ, Hu), jnp.float32),
        w2u=0.05 * jax.random.normal(ks[8], (n_univ, Hu, D), jnp.float32),
        b2u=0.01 * jax.random.normal(ks[9], (n_univ, D), jnp.float32),
        scale0=0.5,
        scale1=0.5,
    )

    out = dual_path_soft_moe(x, params, n_core=n_core, n_univ=n_univ,
                             slots_per_expert=S)
    out = jax.block_until_ready(out)

    ref = jax.block_until_ready(
        reference_forward(x, params, n_core=n_core, n_univ=n_univ, S=S))
    err = float(jnp.max(jnp.abs(out.astype(jnp.float32) - ref)))
    assert out.shape == (B, N, D), out.shape
    # bf16 MXU operands (f32 accumulate) give ~1e-3 abs deviation at these
    # magnitudes vs the all-f32 reference.
    assert err < 2.5e-2, f"max abs err {err}"
    print("KERNEL_OK")
</pallas_src>

<mosaic_0001>
module attributes {stable_mosaic.version = 11 : i64} {
  func.func @_fused_moe_kernel(%arg0: i32, %arg1: memref<1x64x32xf32, #tpu.memory_space<vmem>>, %arg2: memref<20x32xbf16, #tpu.memory_space<vmem>>, %arg3: memref<32x20xbf16, #tpu.memory_space<vmem>>, %arg4: memref<2x32x128xbf16, #tpu.memory_space<vmem>>, %arg5: memref<2x1x128xf32, #tpu.memory_space<vmem>>, %arg6: memref<2x128x32xbf16, #tpu.memory_space<vmem>>, %arg7: memref<2x1x32xf32, #tpu.memory_space<vmem>>, %arg8: memref<8x32x32xbf16, #tpu.memory_space<vmem>>, %arg9: memref<8x1x32xf32, #tpu.memory_space<vmem>>, %arg10: memref<8x32x32xbf16, #tpu.memory_space<vmem>>, %arg11: memref<8x1x32xf32, #tpu.memory_space<vmem>>, %arg12: memref<1x64x32xf32, #tpu.memory_space<vmem>>) attributes {dimension_semantics = [#tpu.dimension_semantics<parallel>], iteration_bounds = array<i64: 2>, scalar_prefetch = 0 : i64, scratch_operands = 0 : i64, tpu.core_type = #tpu.core_type<tc>, window_params = [{transform_indices = @transform_0, window_bounds = array<i64: 1, 64, 32>}, {pipeline_mode = #tpu.pipeline_mode<synchronous>, transform_indices = @transform_1, window_bounds = array<i64: 20, 32>}, {pipeline_mode = #tpu.pipeline_mode<synchronous>, transform_indices = @transform_2, window_bounds = array<i64: 32, 20>}, {pipeline_mode = #tpu.pipeline_mode<synchronous>, transform_indices = @transform_3, window_bounds = array<i64: 2, 32, 128>}, {pipeline_mode = #tpu.pipeline_mode<synchronous>, transform_indices = @transform_4, window_bounds = array<i64: 2, 1, 128>}, {pipeline_mode = #tpu.pipeline_mode<synchronous>, transform_indices = @transform_5, window_bounds = array<i64: 2, 128, 32>}, {pipeline_mode = #tpu.pipeline_mode<synchronous>, transform_indices = @transform_6, window_bounds = array<i64: 2, 1, 32>}, {pipeline_mode = #tpu.pipeline_mode<synchronous>, transform_indices = @transform_7, window_bounds = array<i64: 8, 32, 32>}, {pipeline_mode = #tpu.pipeline_mode<synchronous>, transform_indices = @transform_8, window_bounds = array<i64: 8, 1, 32>}, {pipeline_mode = #tpu.pipeline_mode<synchronous>, transform_indices = @transform_9, window_bounds = array<i64: 8, 32, 32>}, {pipeline_mode = #tpu.pipeline_mode<synchronous>, transform_indices = @transform_10, window_bounds = array<i64: 8, 1, 32>}, {transform_indices = @transform_11, window_bounds = array<i64: 1, 64, 32>}]} {
    %c0 = arith.constant 0 : index
    %c0_0 = arith.constant 0 : index
    %c0_1 = arith.constant 0 : index
    %0 = vector.load %arg1[%c0, %c0_0, %c0_1] : memref<1x64x32xf32, #tpu.memory_space<vmem>>, vector<1x64x32xf32>
    %1 = arith.mulf %0, %0 : vector<1x64x32xf32>
    %cst = arith.constant dense<0.000000e+00> : vector<1x64xf32>
    %2 = vector.multi_reduction <add>, %1, %cst [2] : vector<1x64x32xf32> to vector<1x64xf32>
    %3 = vector.shape_cast %2 : vector<1x64xf32> to vector<1x64x1xf32>
    %4 = math.sqrt %3 : vector<1x64x1xf32>
    %cst_2 = arith.constant 9.99999997E-7 : f32
    %5 = vector.broadcast %cst_2 : f32 to vector<1x64x1xf32>
    %6 = arith.addf %4, %5 : vector<1x64x1xf32>
    %7 = tpu.reciprocal %6 : vector<1x64x1xf32> -> vector<1x64x1xf32>
    %8 = vector.broadcast %7 : vector<1x64x1xf32> to vector<1x64x32xf32>
    %9 = arith.mulf %0, %8 : vector<1x64x32xf32>
    %10 = arith.truncf %9 : vector<1x64x32xf32> to vector<1x64x32xbf16>
    %11 = arith.truncf %0 : vector<1x64x32xf32> to vector<1x64x32xbf16>
    %12 = vector.shape_cast %10 : vector<1x64x32xbf16> to vector<64x32xbf16>
    %c0_3 = arith.constant 0 : index
    %c0_4 = arith.constant 0 : index
    %13 = vector.load %arg3[%c0_3, %c0_4] : memref<32x20xbf16, #tpu.memory_space<vmem>>, vector<32x20xbf16>
    %cst_5 = arith.constant dense<0.000000e+00> : vector<64x20xf32>
    %14 = tpu.matmul %12, %13, %cst_5 {dimension_numbers = #tpu.dot_dimension_numbers<[1], [0], [0], [1], [0, 0, 1, 1], [], []>} : vector<64x32xbf16>, vector<32x20xbf16>, vector<64x20xf32> -> vector<64x20xf32>
    %15 = vector.shape_cast %14 : vector<64x20xf32> to vector<1x64x20xf32>
    %cst_6 = arith.constant dense<0xFF800000> : vector<1x64xf32>
    %16 = vector.multi_reduction <maximumf>, %15, %cst_6 [2] : vector<1x64x20xf32> to vector<1x64xf32>
    %17 = vector.shape_cast %16 : vector<1x64xf32> to vector<1x64x1xf32>
    %18 = vector.broadcast %17 : vector<1x64x1xf32> to vector<1x64x20xf32>
    %19 = arith.subf %15, %18 : vector<1x64x20xf32>
    %cst_7 = arith.constant 5.000000e-01 : f32
    %20 = vector.broadcast %cst_7 : f32 to vector<1x64x20xf32>
    %21 = arith.mulf %19, %20 : vector<1x64x20xf32>
    %cst_8 = arith.constant -1.000000e+00 : f32
    %22 = vector.broadcast %cst_8 : f32 to vector<1x64x1xf32>
    %cst_9 = arith.constant 0.000000e+00 : f32
    %23 = vector.broadcast %cst_9 : f32 to vector<1x64x1xf32>
    %c0_i32 = arith.constant 0 : i32
    %24 = arith.addf %22, %23 : vector<1x64x1xf32>
    %cst_10 = arith.constant 5.000000e-01 : f32
    %25 = vector.broadcast %cst_10 : f32 to vector<1x64x1xf32>
    %26 = arith.mulf %25, %24 : vector<1x64x1xf32>
    %27 = vector.broadcast %26 : vector<1x64x1xf32> to vector<1x64x20xf32>
    %28 = arith.subf %21, %27 : vector<1x64x20xf32>
    %cst_11 = arith.constant 0.000000e+00 : f32
    %29 = vector.broadcast %cst_11 : f32 to vector<1x64x20xf32>
    %30 = arith.maximumf %28, %29 : vector<1x64x20xf32>
    %31 = arith.mulf %30, %30 : vector<1x64x20xf32>
    %cst_12 = arith.constant dense<0.000000e+00> : vector<1x64xf32>
    %32 = vector.multi_reduction <add>, %31, %cst_12 [2] : vector<1x64x20xf32> to vector<1x64xf32>
    %33 = vector.shape_cast %32 : vector<1x64xf32> to vector<1x64x1xf32>
    %cst_13 = arith.constant 1.000000e+00 : f32
    %34 = vector.broadcast %cst_13 : f32 to vector<1x64x1xf32>
    %35 = arith.cmpf oge, %33, %34 : vector<1x64x1xf32>
    %36 = arith.select %35, %26, %22 : vector<1x64x1xi1>, vector<1x64x1xf32>
    %37 = arith.select %35, %23, %26 : vector<1x64x1xi1>, vector<1x64x1xf32>
    %c1_i32 = arith.constant 1 : i32
    %38 = arith.addf %36, %37 : vector<1x64x1xf32>
    %cst_14 = arith.constant 5.000000e-01 : f32
    %39 = vector.broadcast %cst_14 : f32 to vector<1x64x1xf32>
    %40 = arith.mulf %39, %38 : vector<1x64x1xf32>
    %41 = vector.broadcast %40 : vector<1x64x1xf32> to vector<1x64x20xf32>
    %42 = arith.subf %21, %41 : vector<1x64x20xf32>
    %cst_15 = arith.constant 0.000000e+00 : f32
    %43 = vector.broadcast %cst_15 : f32 to vector<1x64x20xf32>
    %44 = arith.maximumf %42, %43 : vector<1x64x20xf32>
    %45 = arith.mulf %44, %44 : vector<1x64x20xf32>
    %cst_16 = arith.constant dense<0.000000e+00> : vector<1x64xf32>
    %46 = vector.multi_reduction <add>, %45, %cst_16 [2] : vector<1x64x20xf32> to vector<1x64xf32>
    %47 = vector.shape_cast %46 : vector<1x64xf32> to vector<1x64x1xf32>
    %cst_17 = arith.constant 1.000000e+00 : f32
    %48 = vector.broadcast %cst_17 : f32 to vector<1x64x1xf32>
    %49 = arith.cmpf oge, %47, %48 : vector<1x64x1xf32>
    %50 = arith.select %49, %40, %36 : vector<1x64x1xi1>, vector<1x64x1xf32>
    %51 = arith.select %49, %37, %40 : vector<1x64x1xi1>, vector<1x64x1xf32>
    %c2_i32 = arith.constant 2 : i32
    %52 = arith.addf %50, %51 : vector<1x64x1xf32>
    %cst_18 = arith.constant 5.000000e-01 : f32
    %53 = vector.broadcast %cst_18 : f32 to vector<1x64x1xf32>
    %54 = arith.mulf %53, %52 : vector<1x64x1xf32>
    %55 = vector.broadcast %54 : vector<1x64x1xf32> to vector<1x64x20xf32>
    %56 = arith.subf %21, %55 : vector<1x64x20xf32>
    %cst_19 = arith.constant 0.000000e+00 : f32
    %57 = vector.broadcast %cst_19 : f32 to vector<1x64x20xf32>
    %58 = arith.maximumf %56, %57 : vector<1x64x20xf32>
    %59 = arith.mulf %58, %58 : vector<1x64x20xf32>
    %cst_20 = arith.constant dense<0.000000e+00> : vector<1x64xf32>
    %60 = vector.multi_reduction <add>, %59, %cst_20 [2] : vector<1x64x20xf32> to vector<1x64xf32>
    %61 = vector.shape_cast %60 : vector<1x64xf32> to vector<1x64x1xf32>
    %cst_21 = arith.constant 1.000000e+00 : f32
    %62 = vector.broadcast %cst_21 : f32 to vector<1x64x1xf32>
    %63 = arith.cmpf oge, %61, %62 : vector<1x64x1xf32>
    %64 = arith.select %63, %54, %50 : vector<1x64x1xi1>, vector<1x64x1xf32>
    %65 = arith.select %63, %51, %54 : vector<1x64x1xi1>, vector<1x64x1xf32>
    %c3_i32 = arith.constant 3 : i32
    %66 = arith.addf %64, %65 : vector<1x64x1xf32>
    %cst_22 = arith.constant 5.000000e-01 : f32
    %67 = vector.broadcast %cst_22 : f32 to vector<1x64x1xf32>
    %68 = arith.mulf %67, %66 : vector<1x64x1xf32>
    %69 = vector.broadcast %68 : vector<1x64x1xf32> to vector<1x64x20xf32>
    %70 = arith.subf %21, %69 : vector<1x64x20xf32>
    %cst_23 = arith.constant 0.000000e+00 : f32
    %71 = vector.broadcast %cst_23 : f32 to vector<1x64x20xf32>
    %72 = arith.maximumf %70, %71 : vector<1x64x20xf32>
    %73 = arith.mulf %72, %72 : vector<1x64x20xf32>
    %cst_24 = arith.constant dense<0.000000e+00> : vector<1x64xf32>
    %74 = vector.multi_reduction <add>, %73, %cst_24 [2] : vector<1x64x20xf32> to vector<1x64xf32>
    %75 = vector.shape_cast %74 : vector<1x64xf32> to vector<1x64x1xf32>
    %cst_25 = arith.constant 1.000000e+00 : f32
    %76 = vector.broadcast %cst_25 : f32 to vector<1x64x1xf32>
    %77 = arith.cmpf oge, %75, %76 : vector<1x64x1xf32>
    %78 = arith.select %77, %68, %64 : vector<1x64x1xi1>, vector<1x64x1xf32>
    %79 = arith.select %77, %65, %68 : vector<1x64x1xi1>, vector<1x64x1xf32>
    %c4_i32 = arith.constant 4 : i32
    %80 = arith.addf %78, %79 : vector<1x64x1xf32>
    %cst_26 = arith.constant 5.000000e-01 : f32
    %81 = vector.broadcast %cst_26 : f32 to vector<1x64x1xf32>
    %82 = arith.mulf %81, %80 : vector<1x64x1xf32>
    %83 = vector.broadcast %82 : vector<1x64x1xf32> to vector<1x64x20xf32>
    %84 = arith.subf %21, %83 : vector<1x64x20xf32>
    %cst_27 = arith.constant 0.000000e+00 : f32
    %85 = vector.broadcast %cst_27 : f32 to vector<1x64x20xf32>
    %86 = arith.maximumf %84, %85 : vector<1x64x20xf32>
    %87 = arith.mulf %86, %86 : vector<1x64x20xf32>
    %cst_28 = arith.constant dense<0.000000e+00> : vector<1x64xf32>
    %88 = vector.multi_reduction <add>, %87, %cst_28 [2] : vector<1x64x20xf32> to vector<1x64xf32>
    %89 = vector.shape_cast %88 : vector<1x64xf32> to vector<1x64x1xf32>
    %cst_29 = arith.constant 1.000000e+00 : f32
    %90 = vector.broadcast %cst_29 : f32 to vector<1x64x1xf32>
    %91 = arith.cmpf oge, %89, %90 : vector<1x64x1xf32>
    %92 = arith.select %91, %82, %78 : vector<1x64x1xi1>, vector<1x64x1xf32>
    %93 = arith.select %91, %79, %82 : vector<1x64x1xi1>, vector<1x64x1xf32>
    %c5_i32 = arith.constant 5 : i32
    %94 = arith.addf %92, %93 : vector<1x64x1xf32>
    %cst_30 = arith.constant 5.000000e-01 : f32
    %95 = vector.broadcast %cst_30 : f32 to vector<1x64x1xf32>
    %96 = arith.mulf %95, %94 : vector<1x64x1xf32>
    %97 = vector.broadcast %96 : vector<1x64x1xf32> to vector<1x64x20xf32>
    %98 = arith.subf %21, %97 : vector<1x64x20xf32>
    %cst_31 = arith.constant 0.000000e+00 : f32
    %99 = vector.broadcast %cst_31 : f32 to vector<1x64x20xf32>
    %100 = arith.maximumf %98, %99 : vector<1x64x20xf32>
    %101 = arith.mulf %100, %100 : vector<1x64x20xf32>
    %cst_32 = arith.constant dense<0.000000e+00> : vector<1x64xf32>
    %102 = vector.multi_reduction <add>, %101, %cst_32 [2] : vector<1x64x20xf32> to vector<1x64xf32>
    %103 = vector.shape_cast %102 : vector<1x64xf32> to vector<1x64x1xf32>
    %cst_33 = arith.constant 1.000000e+00 : f32
    %104 = vector.broadcast %cst_33 : f32 to vector<1x64x1xf32>
    %105 = arith.cmpf oge, %103, %104 : vector<1x64x1xf32>
    %106 = arith.select %105, %96, %92 : vector<1x64x1xi1>, vector<1x64x1xf32>
    %107 = arith.select %105, %93, %96 : vector<1x64x1xi1>, vector<1x64x1xf32>
    %c6_i32 = arith.constant 6 : i32
    %108 = arith.addf %106, %107 : vector<1x64x1xf32>
    %cst_34 = arith.constant 5.000000e-01 : f32
    %109 = vector.broadcast %cst_34 : f32 to vector<1x64x1xf32>
    %110 = arith.mulf %109, %108 : vector<1x64x1xf32>
    %111 = vector.broadcast %110 : vector<1x64x1xf32> to vector<1x64x20xf32>
    %112 = arith.subf %21, %111 : vector<1x64x20xf32>
    %cst_35 = arith.constant 0.000000e+00 : f32
    %113 = vector.broadcast %cst_35 : f32 to vector<1x64x20xf32>
    %114 = arith.maximumf %112, %113 : vector<1x64x20xf32>
    %115 = arith.mulf %114, %114 : vector<1x64x20xf32>
    %cst_36 = arith.constant dense<0.000000e+00> : vector<1x64xf32>
    %116 = vector.multi_reduction <add>, %115, %cst_36 [2] : vector<1x64x20xf32> to vector<1x64xf32>
    %117 = vector.shape_cast %116 : vector<1x64xf32> to vector<1x64x1xf32>
    %cst_37 = arith.constant 1.000000e+00 : f32
    %118 = vector.broadcast %cst_37 : f32 to vector<1x64x1xf32>
    %119 = arith.cmpf oge, %117, %118 : vector<1x64x1xf32>
    %120 = arith.select %119, %110, %106 : vector<1x64x1xi1>, vector<1x64x1xf32>
    %121 = arith.select %119, %107, %110 : vector<1x64x1xi1>, vector<1x64x1xf32>
    %c7_i32 = arith.constant 7 : i32
    %122 = arith.addf %120, %121 : vector<1x64x1xf32>
    %cst_38 = arith.constant 5.000000e-01 : f32
    %123 = vector.broadcast %cst_38 : f32 to vector<1x64x1xf32>
    %124 = arith.mulf %123, %122 : vector<1x64x1xf32>
    %125 = vector.broadcast %124 : vector<1x64x1xf32> to vector<1x64x20xf32>
    %126 = arith.subf %21, %125 : vector<1x64x20xf32>
    %cst_39 = arith.constant 0.000000e+00 : f32
    %127 = vector.broadcast %cst_39 : f32 to vector<1x64x20xf32>
    %128 = arith.maximumf %126, %127 : vector<1x64x20xf32>
    %129 = arith.mulf %128, %128 : vector<1x64x20xf32>
    %cst_40 = arith.constant dense<0.000000e+00> : vector<1x64xf32>
    %130 = vector.multi_reduction <add>, %129, %cst_40 [2] : vector<1x64x20xf32> to vector<1x64xf32>
    %131 = vector.shape_cast %130 : vector<1x64xf32> to vector<1x64x1xf32>
    %cst_41 = arith.constant 1.000000e+00 : f32
    %132 = vector.broadcast %cst_41 : f32 to vector<1x64x1xf32>
    %133 = arith.cmpf oge, %131, %132 : vector<1x64x1xf32>
    %134 = arith.select %133, %124, %120 : vector<1x64x1xi1>, vector<1x64x1xf32>
    %135 = arith.select %133, %121, %124 : vector<1x64x1xi1>, vector<1x64x1xf32>
    %c8_i32 = arith.constant 8 : i32
    %136 = arith.addf %134, %135 : vector<1x64x1xf32>
    %cst_42 = arith.constant 5.000000e-01 : f32
    %137 = vector.broadcast %cst_42 : f32 to vector<1x64x1xf32>
    %138 = arith.mulf %137, %136 : vector<1x64x1xf32>
    %139 = vector.broadcast %138 : vector<1x64x1xf32> to vector<1x64x20xf32>
    %140 = arith.subf %21, %139 : vector<1x64x20xf32>
    %cst_43 = arith.constant 0.000000e+00 : f32
    %141 = vector.broadcast %cst_43 : f32 to vector<1x64x20xf32>
    %142 = arith.maximumf %140, %141 : vector<1x64x20xf32>
    %143 = arith.mulf %142, %142 : vector<1x64x20xf32>
    %cst_44 = arith.constant dense<0.000000e+00> : vector<1x64xf32>
    %144 = vector.multi_reduction <add>, %143, %cst_44 [2] : vector<1x64x20xf32> to vector<1x64xf32>
    %145 = vector.shape_cast %144 : vector<1x64xf32> to vector<1x64x1xf32>
    %cst_45 = arith.constant 1.000000e+00 : f32
    %146 = vector.broadcast %cst_45 : f32 to vector<1x64x1xf32>
    %147 = arith.cmpf oge, %145, %146 : vector<1x64x1xf32>
    %148 = arith.select %147, %138, %134 : vector<1x64x1xi1>, vector<1x64x1xf32>
    %149 = arith.select %147, %135, %138 : vector<1x64x1xi1>, vector<1x64x1xf32>
    %c9_i32 = arith.constant 9 : i32
    %150 = arith.addf %148, %149 : vector<1x64x1xf32>
    %cst_46 = arith.constant 5.000000e-01 : f32
    %151 = vector.broadcast %cst_46 : f32 to vector<1x64x1xf32>
    %152 = arith.mulf %151, %150 : vector<1x64x1xf32>
    %153 = vector.broadcast %152 : vector<1x64x1xf32> to vector<1x64x20xf32>
    %154 = arith.subf %21, %153 : vector<1x64x20xf32>
    %cst_47 = arith.constant 0.000000e+00 : f32
    %155 = vector.broadcast %cst_47 : f32 to vector<1x64x20xf32>
    %156 = arith.maximumf %154, %155 : vector<1x64x20xf32>
    %157 = arith.mulf %156, %156 : vector<1x64x20xf32>
    %cst_48 = arith.constant dense<0.000000e+00> : vector<1x64xf32>
    %158 = vector.multi_reduction <add>, %157, %cst_48 [2] : vector<1x64x20xf32> to vector<1x64xf32>
    %159 = vector.shape_cast %158 : vector<1x64xf32> to vector<1x64x1xf32>
    %cst_49 = arith.constant 1.000000e+00 : f32
    %160 = vector.broadcast %cst_49 : f32 to vector<1x64x1xf32>
    %161 = arith.cmpf oge, %159, %160 : vector<1x64x1xf32>
    %162 = arith.select %161, %152, %148 : vector<1x64x1xi1>, vector<1x64x1xf32>
    %163 = arith.select %161, %149, %152 : vector<1x64x1xi1>, vector<1x64x1xf32>
    %c10_i32 = arith.constant 10 : i32
    %164 = arith.addf %162, %163 : vector<1x64x1xf32>
    %cst_50 = arith.constant 5.000000e-01 : f32
    %165 = vector.broadcast %cst_50 : f32 to vector<1x64x1xf32>
    %166 = arith.mulf %165, %164 : vector<1x64x1xf32>
    %167 = vector.broadcast %166 : vector<1x64x1xf32> to vector<1x64x20xf32>
    %168 = arith.subf %21, %167 : vector<1x64x20xf32>
    %cst_51 = arith.constant 0.000000e+00 : f32
    %169 = vector.broadcast %cst_51 : f32 to vector<1x64x20xf32>
    %170 = arith.maximumf %168, %169 : vector<1x64x20xf32>
    %171 = arith.mulf %170, %170 : vector<1x64x20xf32>
    %cst_52 = arith.constant dense<0.000000e+00> : vector<1x64xf32>
    %172 = vector.multi_reduction <add>, %171, %cst_52 [2] : vector<1x64x20xf32> to vector<1x64xf32>
    %173 = vector.shape_cast %172 : vector<1x64xf32> to vector<1x64x1xf32>
    %cst_53 = arith.constant 1.000000e+00 : f32
    %174 = vector.broadcast %cst_53 : f32 to vector<1x64x1xf32>
    %175 = arith.cmpf oge, %173, %174 : vector<1x64x1xf32>
    %176 = arith.select %175, %166, %162 : vector<1x64x1xi1>, vector<1x64x1xf32>
    %177 = arith.select %175, %163, %166 : vector<1x64x1xi1>, vector<1x64x1xf32>
    %c11_i32 = arith.constant 11 : i32
    %178 = arith.addf %176, %177 : vector<1x64x1xf32>
    %cst_54 = arith.constant 5.000000e-01 : f32
    %179 = vector.broadcast %cst_54 : f32 to vector<1x64x1xf32>
    %180 = arith.mulf %179, %178 : vector<1x64x1xf32>
    %181 = vector.broadcast %180 : vector<1x64x1xf32> to vector<1x64x20xf32>
    %182 = arith.subf %21, %181 : vector<1x64x20xf32>
    %cst_55 = arith.constant 0.000000e+00 : f32
    %183 = vector.broadcast %cst_55 : f32 to vector<1x64x20xf32>
    %184 = arith.maximumf %182, %183 : vector<1x64x20xf32>
    %185 = arith.mulf %184, %184 : vector<1x64x20xf32>
    %cst_56 = arith.constant dense<0.000000e+00> : vector<1x64xf32>
    %186 = vector.multi_reduction <add>, %185, %cst_56 [2] : vector<1x64x20xf32> to vector<1x64xf32>
    %187 = vector.shape_cast %186 : vector<1x64xf32> to vector<1x64x1xf32>
    %cst_57 = arith.constant 1.000000e+00 : f32
    %188 = vector.broadcast %cst_57 : f32 to vector<1x64x1xf32>
    %189 = arith.cmpf oge, %187, %188 : vector<1x64x1xf32>
    %190 = arith.select %189, %180, %176 : vector<1x64x1xi1>, vector<1x64x1xf32>
    %191 = arith.select %189, %177, %180 : vector<1x64x1xi1>, vector<1x64x1xf32>
    %192 = arith.addf %190, %191 : vector<1x64x1xf32>
    %cst_58 = arith.constant 5.000000e-01 : f32
    %193 = vector.broadcast %cst_58 : f32 to vector<1x64x1xf32>
    %194 = arith.mulf %193, %192 : vector<1x64x1xf32>
    %195 = vector.broadcast %194 : vector<1x64x1xf32> to vector<1x64x20xf32>
    %196 = arith.subf %21, %195 : vector<1x64x20xf32>
    %cst_59 = arith.constant 0.000000e+00 : f32
    %197 = vector.broadcast %cst_59 : f32 to vector<1x64x20xf32>
    %198 = arith.maximumf %196, %197 : vector<1x64x20xf32>
    %199 = arith.mulf %198, %198 : vector<1x64x20xf32>
    %cst_60 = arith.constant dense<0.000000e+00> : vector<1x64xf32>
    %200 = vector.multi_reduction <add>, %199, %cst_60 [2] : vector<1x64x20xf32> to vector<1x64xf32>
    %201 = vector.shape_cast %200 : vector<1x64xf32> to vector<1x64x1xf32>
    %cst_61 = arith.constant 1.000000e+00 : f32
    %202 = vector.broadcast %cst_61 : f32 to vector<1x64x1xf32>
    %203 = arith.subf %201, %202 : vector<1x64x1xf32>
    %cst_62 = arith.constant dense<0.000000e+00> : vector<1x64xf32>
    %204 = vector.multi_reduction <add>, %198, %cst_62 [2] : vector<1x64x20xf32> to vector<1x64xf32>
    %205 = vector.shape_cast %204 : vector<1x64xf32> to vector<1x64x1xf32>
    %cst_63 = arith.constant 2.000000e+00 : f32
    %206 = vector.broadcast %cst_63 : f32 to vector<1x64x1xf32>
    %207 = arith.mulf %206, %205 : vector<1x64x1xf32>
    %cst_64 = arith.constant 1.000000e-30 : f32
    %208 = vector.broadcast %cst_64 : f32 to vector<1x64x1xf32>
    %209 = arith.maximumf %207, %208 : vector<1x64x1xf32>
    %210 = arith.divf %203, %209 : vector<1x64x1xf32>
    %211 = arith.addf %194, %210 : vector<1x64x1xf32>
    %212 = vector.broadcast %211 : vector<1x64x1xf32> to vector<1x64x20xf32>
    %213 = arith.subf %21, %212 : vector<1x64x20xf32>
    %cst_65 = arith.constant 0.000000e+00 : f32
    %214 = vector.broadcast %cst_65 : f32 to vector<1x64x20xf32>
    %215 = arith.maximumf %213, %214 : vector<1x64x20xf32>
    %216 = arith.mulf %215, %215 : vector<1x64x20xf32>
    %cst_66 = arith.constant dense<0.000000e+00> : vector<1x64xf32>
    %217 = vector.multi_reduction <add>, %216, %cst_66 [2] : vector<1x64x20xf32> to vector<1x64xf32>
    %218 = vector.shape_cast %217 : vector<1x64xf32> to vector<1x64x1xf32>
    %cst_67 = arith.constant 1.000000e+00 : f32
    %219 = vector.broadcast %cst_67 : f32 to vector<1x64x1xf32>
    %220 = arith.subf %218, %219 : vector<1x64x1xf32>
    %cst_68 = arith.constant dense<0.000000e+00> : vector<1x64xf32>
    %221 = vector.multi_reduction <add>, %215, %cst_68 [2] : vector<1x64x20xf32> to vector<1x64xf32>
    %222 = vector.shape_cast %221 : vector<1x64xf32> to vector<1x64x1xf32>
    %cst_69 = arith.constant 2.000000e+00 : f32
    %223 = vector.broadcast %cst_69 : f32 to vector<1x64x1xf32>
    %224 = arith.mulf %223, %222 : vector<1x64x1xf32>
    %cst_70 = arith.constant 1.000000e-30 : f32
    %225 = vector.broadcast %cst_70 : f32 to vector<1x64x1xf32>
    %226 = arith.maximumf %224, %225 : vector<1x64x1xf32>
    %227 = arith.divf %220, %226 : vector<1x64x1xf32>
    %228 = arith.addf %211, %227 : vector<1x64x1xf32>
    %229 = vector.broadcast %228 : vector<1x64x1xf32> to vector<1x64x20xf32>
    %230 = arith.subf %21, %229 : vector<1x64x20xf32>
    %cst_71 = arith.constant 0.000000e+00 : f32
    %231 = vector.broadcast %cst_71 : f32 to vector<1x64x20xf32>
    %232 = arith.maximumf %230, %231 : vector<1x64x20xf32>
    %233 = arith.mulf %232, %232 : vector<1x64x20xf32>
    %234 = arith.truncf %233 : vector<1x64x20xf32> to vector<1x64x20xbf16>
    %c0_72 = arith.constant 0 : index
    %c0_73 = arith.constant 0 : index
    %235 = vector.load %arg2[%c0_72, %c0_73] : memref<20x32xbf16, #tpu.memory_space<vmem>>, vector<20x32xbf16>
    %236 = vector.shape_cast %10 : vector<1x64x32xbf16> to vector<64x32xbf16>
    %cst_74 = arith.constant dense<0.000000e+00> : vector<20x64xf32>
    %237 = tpu.matmul %235, %236, %cst_74 {dimension_numbers = #tpu.dot_dimension_numbers<[1], [1], [0], [0], [0, 0, 1, 0], [], []>} : vector<20x32xbf16>, vector<64x32xbf16>, vector<20x64xf32> -> vector<20x64xf32>
    %cst_75 = arith.constant dense<0xFF800000> : vector<20xf32>
    %238 = vector.multi_reduction <maximumf>, %237, %cst_75 [1] : vector<20x64xf32> to vector<20xf32>
    %239 = vector.shape_cast %238 : vector<20xf32> to vector<20x1xf32>
    %240 = vector.broadcast %239 : vector<20x1xf32> to vector<20x64xf32>
    %241 = arith.subf %237, %240 : vector<20x64xf32>
    %242 = math.exp %241 : vector<20x64xf32>
    %cst_76 = arith.constant dense<0.000000e+00> : vector<20xf32>
    %243 = vector.multi_reduction <add>, %242, %cst_76 [1] : vector<20x64xf32> to vector<20xf32>
    %244 = vector.shape_cast %243 : vector<20xf32> to vector<20x1xf32>
    %cst_77 = arith.constant 1.000000e+00 : f32
    %245 = vector.broadcast %cst_77 : f32 to vector<20x1xf32>
    %246 = arith.divf %245, %244 : vector<20x1xf32>
    %247 = vector.broadcast %246 : vector<20x1xf32> to vector<20x64xf32>
    %248 = arith.mulf %242, %247 : vector<20x64xf32>
    %249 = arith.truncf %248 : vector<20x64xf32> to vector<20x64xbf16>
    %250 = vector.shape_cast %11 : vector<1x64x32xbf16> to vector<64x32xbf16>
    %cst_78 = arith.constant dense<0.000000e+00> : vector<20x32xf32>
    %251 = tpu.matmul %249, %250, %cst_78 {dimension_numbers = #tpu.dot_dimension_numbers<[1], [0], [0], [1], [0, 0, 1, 1], [], []>} : vector<20x64xbf16>, vector<64x32xbf16>, vector<20x32xf32> -> vector<20x32xf32>
    %252 = vector.extract_strided_slice %251 {offsets = [0, 0], sizes = [2, 32], strides = [1, 1]} : vector<20x32xf32> to vector<2x32xf32>
    %253 = arith.truncf %252 : vector<2x32xf32> to vector<2x32xbf16>
    %c0_79 = arith.constant 0 : index
    %c0_80 = arith.constant 0 : index
    %c0_81 = arith.constant 0 : index
    %254 = vector.load %arg4[%c0_79, %c0_80, %c0_81] : memref<2x32x128xbf16, #tpu.memory_space<vmem>>, vector<1x32x128xbf16>
    %255 = vector.shape_cast %254 : vector<1x32x128xbf16> to vector<32x128xbf16>
    %cst_82 = arith.constant dense<0.000000e+00> : vector<2x128xf32>
    %256 = tpu.matmul %253, %255, %cst_82 {dimension_numbers = #tpu.dot_dimension_numbers<[1], [0], [0], [1], [0, 0, 1, 1], [], []>} : vector<2x32xbf16>, vector<32x128xbf16>, vector<2x128xf32> -> vector<2x128xf32>
    %c0_83 = arith.constant 0 : index
    %c0_84 = arith.constant 0 : index
    %c0_85 = arith.constant 0 : index
    %257 = vector.load %arg5[%c0_83, %c0_84, %c0_85] : memref<2x1x128xf32, #tpu.memory_space<vmem>>, vector<1x1x128xf32>
    %258 = vector.shape_cast %257 : vector<1x1x128xf32> to vector<1x128xf32>
    %259 = vector.broadcast %258 : vector<1x128xf32> to vector<2x128xf32>
    %260 = arith.addf %256, %259 : vector<2x128xf32>
    %261 = arith.mulf %260, %260 : vector<2x128xf32>
    %262 = arith.mulf %260, %261 : vector<2x128xf32>
    %cst_86 = arith.constant 4.471500e-02 : f32
    %263 = vector.broadcast %cst_86 : f32 to vector<2x128xf32>
    %264 = arith.mulf %263, %262 : vector<2x128xf32>
    %265 = arith.addf %260, %264 : vector<2x128xf32>
    %cst_87 = arith.constant 0.797884583 : f32
    %266 = vector.broadcast %cst_87 : f32 to vector<2x128xf32>
    %267 = arith.mulf %266, %265 : vector<2x128xf32>
    %268 = math.tanh %267 : vector<2x128xf32>
    %cst_88 = arith.constant 1.000000e+00 : f32
    %269 = vector.broadcast %cst_88 : f32 to vector<2x128xf32>
    %270 = arith.addf %269, %268 : vector<2x128xf32>
    %cst_89 = arith.constant 5.000000e-01 : f32
    %271 = vector.broadcast %cst_89 : f32 to vector<2x128xf32>
    %272 = arith.mulf %271, %270 : vector<2x128xf32>
    %273 = arith.mulf %260, %272 : vector<2x128xf32>
    %274 = arith.truncf %273 : vector<2x128xf32> to vector<2x128xbf16>
    %c0_90 = arith.constant 0 : index
    %c0_91 = arith.constant 0 : index
    %c0_92 = arith.constant 0 : index
    %275 = vector.load %arg6[%c0_90, %c0_91, %c0_92] : memref<2x128x32xbf16, #tpu.memory_space<vmem>>, vector<1x128x32xbf16>
    %276 = vector.shape_cast %275 : vector<1x128x32xbf16> to vector<128x32xbf16>
    %cst_93 = arith.constant dense<0.000000e+00> : vector<2x32xf32>
    %277 = tpu.matmul %274, %276, %cst_93 {dimension_numbers = #tpu.dot_dimension_numbers<[1], [0], [0], [1], [0, 0, 1, 1], [], []>} : vector<2x128xbf16>, vector<128x32xbf16>, vector<2x32xf32> -> vector<2x32xf32>
    %c0_94 = arith.constant 0 : index
    %c0_95 = arith.constant 0 : index
    %c0_96 = arith.constant 0 : index
    %278 = vector.load %arg7[%c0_94, %c0_95, %c0_96] : memref<2x1x32xf32, #tpu.memory_space<vmem>>, vector<1x1x32xf32>
    %279 = vector.shape_cast %278 : vector<1x1x32xf32> to vector<1x32xf32>
    %280 = vector.broadcast %279 : vector<1x32xf32> to vector<2x32xf32>
    %281 = arith.addf %277, %280 : vector<2x32xf32>
    %282 = vector.extract_strided_slice %251 {offsets = [2, 0], sizes = [2, 32], strides = [1, 1]} : vector<20x32xf32> to vector<2x32xf32>
    %283 = arith.truncf %282 : vector<2x32xf32> to vector<2x32xbf16>
    %c1 = arith.constant 1 : index
    %c0_97 = arith.constant 0 : index
    %c0_98 = arith.constant 0 : index
    %284 = vector.load %arg4[%c1, %c0_97, %c0_98] : memref<2x32x128xbf16, #tpu.memory_space<vmem>>, vector<1x32x128xbf16>
    %285 = vector.shape_cast %284 : vector<1x32x128xbf16> to vector<32x128xbf16>
    %cst_99 = arith.constant dense<0.000000e+00> : vector<2x128xf32>
    %286 = tpu.matmul %283, %285, %cst_99 {dimension_numbers = #tpu.dot_dimension_numbers<[1], [0], [0], [1], [0, 0, 1, 1], [], []>} : vector<2x32xbf16>, vector<32x128xbf16>, vector<2x128xf32> -> vector<2x128xf32>
    %c1_100 = arith.constant 1 : index
    %c0_101 = arith.constant 0 : index
    %c0_102 = arith.constant 0 : index
    %287 = vector.load %arg5[%c1_100, %c0_101, %c0_102] : memref<2x1x128xf32, #tpu.memory_space<vmem>>, vector<1x1x128xf32>
    %288 = vector.shape_cast %287 : vector<1x1x128xf32> to vector<1x128xf32>
    %289 = vector.broadcast %288 : vector<1x128xf32> to vector<2x128xf32>
    %290 = arith.addf %286, %289 : vector<2x128xf32>
    %291 = arith.mulf %290, %290 : vector<2x128xf32>
    %292 = arith.mulf %290, %291 : vector<2x128xf32>
    %cst_103 = arith.constant 4.471500e-02 : f32
    %293 = vector.broadcast %cst_103 : f32 to vector<2x128xf32>
    %294 = arith.mulf %293, %292 : vector<2x128xf32>
    %295 = arith.addf %290, %294 : vector<2x128xf32>
    %cst_104 = arith.constant 0.797884583 : f32
    %296 = vector.broadcast %cst_104 : f32 to vector<2x128xf32>
    %297 = arith.mulf %296, %295 : vector<2x128xf32>
    %298 = math.tanh %297 : vector<2x128xf32>
    %cst_105 = arith.constant 1.000000e+00 : f32
    %299 = vector.broadcast %cst_105 : f32 to vector<2x128xf32>
    %300 = arith.addf %299, %298 : vector<2x128xf32>
    %cst_106 = arith.constant 5.000000e-01 : f32
    %301 = vector.broadcast %cst_106 : f32 to vector<2x128xf32>
    %302 = arith.mulf %301, %300 : vector<2x128xf32>
    %303 = arith.mulf %290, %302 : vector<2x128xf32>
    %304 = arith.truncf %303 : vector<2x128xf32> to vector<2x128xbf16>
    %c1_107 = arith.constant 1 : index
    %c0_108 = arith.constant 0 : index
    %c0_109 = arith.constant 0 : index
    %305 = vector.load %arg6[%c1_107, %c0_108, %c0_109] : memref<2x128x32xbf16, #tpu.memory_space<vmem>>, vector<1x128x32xbf16>
    %306 = vector.shape_cast %305 : vector<1x128x32xbf16> to vector<128x32xbf16>
    %cst_110 = arith.constant dense<0.000000e+00> : vector<2x32xf32>
    %307 = tpu.matmul %304, %306, %cst_110 {dimension_numbers = #tpu.dot_dimension_numbers<[1], [0], [0], [1], [0, 0, 1, 1], [], []>} : vector<2x128xbf16>, vector<128x32xbf16>, vector<2x32xf32> -> vector<2x32xf32>
    %c1_111 = arith.constant 1 : index
    %c0_112 = arith.constant 0 : index
    %c0_113 = arith.constant 0 : index
    %308 = vector.load %arg7[%c1_111, %c0_112, %c0_113] : memref<2x1x32xf32, #tpu.memory_space<vmem>>, vector<1x1x32xf32>
    %309 = vector.shape_cast %308 : vector<1x1x32xf32> to vector<1x32xf32>
    %310 = vector.broadcast %309 : vector<1x32xf32> to vector<2x32xf32>
    %311 = arith.addf %307, %310 : vector<2x32xf32>
    %312 = vector.extract_strided_slice %251 {offsets = [4, 0], sizes = [2, 32], strides = [1, 1]} : vector<20x32xf32> to vector<2x32xf32>
    %313 = arith.truncf %312 : vector<2x32xf32> to vector<2x32xbf16>
    %c0_114 = arith.constant 0 : index
    %c0_115 = arith.constant 0 : index
    %c0_116 = arith.constant 0 : index
    %314 = vector.load %arg8[%c0_114, %c0_115, %c0_116] : memref<8x32x32xbf16, #tpu.memory_space<vmem>>, vector<1x32x32xbf16>
    %315 = vector.shape_cast %314 : vector<1x32x32xbf16> to vector<32x32xbf16>
    %cst_117 = arith.constant dense<0.000000e+00> : vector<2x32xf32>
    %316 = tpu.matmul %313, %315, %cst_117 {dimension_numbers = #tpu.dot_dimension_numbers<[1], [0], [0], [1], [0, 0, 1, 1], [], []>} : vector<2x32xbf16>, vector<32x32xbf16>, vector<2x32xf32> -> vector<2x32xf32>
    %c0_118 = arith.constant 0 : index
    %c0_119 = arith.constant 0 : index
    %c0_120 = arith.constant 0 : index
    %317 = vector.load %arg9[%c0_118, %c0_119, %c0_120] : memref<8x1x32xf32, #tpu.memory_space<vmem>>, vector<1x1x32xf32>
    %318 = vector.shape_cast %317 : vector<1x1x32xf32> to vector<1x32xf32>
    %319 = vector.broadcast %318 : vector<1x32xf32> to vector<2x32xf32>
    %320 = arith.addf %316, %319 : vector<2x32xf32>
    %321 = arith.mulf %320, %320 : vector<2x32xf32>
    %322 = arith.mulf %320, %321 : vector<2x32xf32>
    %cst_121 = arith.constant 4.471500e-02 : f32
    %323 = vector.broadcast %cst_121 : f32 to vector<2x32xf32>
    %324 = arith.mulf %323, %322 : vector<2x32xf32>
    %325 = arith.addf %320, %324 : vector<2x32xf32>
    %cst_122 = arith.constant 0.797884583 : f32
    %326 = vector.broadcast %cst_122 : f32 to vector<2x32xf32>
    %327 = arith.mulf %326, %325 : vector<2x32xf32>
    %328 = math.tanh %327 : vector<2x32xf32>
    %cst_123 = arith.constant 1.000000e+00 : f32
    %329 = vector.broadcast %cst_123 : f32 to vector<2x32xf32>
    %330 = arith.addf %329, %328 : vector<2x32xf32>
    %cst_124 = arith.constant 5.000000e-01 : f32
    %331 = vector.broadcast %cst_124 : f32 to vector<2x32xf32>
    %332 = arith.mulf %331, %330 : vector<2x32xf32>
    %333 = arith.mulf %320, %332 : vector<2x32xf32>
    %334 = arith.truncf %333 : vector<2x32xf32> to vector<2x32xbf16>
    %c0_125 = arith.constant 0 : index
    %c0_126 = arith.constant 0 : index
    %c0_127 = arith.constant 0 : index
    %335 = vector.load %arg10[%c0_125, %c0_126, %c0_127] : memref<8x32x32xbf16, #tpu.memory_space<vmem>>, vector<1x32x32xbf16>
    %336 = vector.shape_cast %335 : vector<1x32x32xbf16> to vector<32x32xbf16>
    %cst_128 = arith.constant dense<0.000000e+00> : vector<2x32xf32>
    %337 = tpu.matmul %334, %336, %cst_128 {dimension_numbers = #tpu.dot_dimension_numbers<[1], [0], [0], [1], [0, 0, 1, 1], [], []>} : vector<2x32xbf16>, vector<32x32xbf16>, vector<2x32xf32> -> vector<2x32xf32>
    %c0_129 = arith.constant 0 : index
    %c0_130 = arith.constant 0 : index
    %c0_131 = arith.constant 0 : index
    %338 = vector.load %arg11[%c0_129, %c0_130, %c0_131] : memref<8x1x32xf32, #tpu.memory_space<vmem>>, vector<1x1x32xf32>
    %339 = vector.shape_cast %338 : vector<1x1x32xf32> to vector<1x32xf32>
    %340 = vector.broadcast %339 : vector<1x32xf32> to vector<2x32xf32>
    %341 = arith.addf %337, %340 : vector<2x32xf32>
    %342 = vector.extract_strided_slice %251 {offsets = [6, 0], sizes = [2, 32], strides = [1, 1]} : vector<20x32xf32> to vector<2x32xf32>
    %343 = arith.truncf %342 : vector<2x32xf32> to vector<2x32xbf16>
    %c1_132 = arith.constant 1 : index
    %c0_133 = arith.constant 0 : index
    %c0_134 = arith.constant 0 : index
    %344 = vector.load %arg8[%c1_132, %c0_133, %c0_134] : memref<8x32x32xbf16, #tpu.memory_space<vmem>>, vector<1x32x32xbf16>
    %345 = vector.shape_cast %344 : vector<1x32x32xbf16> to vector<32x32xbf16>
    %cst_135 = arith.constant dense<0.000000e+00> : vector<2x32xf32>
    %346 = tpu.matmul %343, %345, %cst_135 {dimension_numbers = #tpu.dot_dimension_numbers<[1], [0], [0], [1], [0, 0, 1, 1], [], []>} : vector<2x32xbf16>, vector<32x32xbf16>, vector<2x32xf32> -> vector<2x32xf32>
    %c1_136 = arith.constant 1 : index
    %c0_137 = arith.constant 0 : index
    %c0_138 = arith.constant 0 : index
    %347 = vector.load %arg9[%c1_136, %c0_137, %c0_138] : memref<8x1x32xf32, #tpu.memory_space<vmem>>, vector<1x1x32xf32>
    %348 = vector.shape_cast %347 : vector<1x1x32xf32> to vector<1x32xf32>
    %349 = vector.broadcast %348 : vector<1x32xf32> to vector<2x32xf32>
    %350 = arith.addf %346, %349 : vector<2x32xf32>
    %351 = arith.mulf %350, %350 : vector<2x32xf32>
    %352 = arith.mulf %350, %351 : vector<2x32xf32>
    %cst_139 = arith.constant 4.471500e-02 : f32
    %353 = vector.broadcast %cst_139 : f32 to vector<2x32xf32>
    %354 = arith.mulf %353, %352 : vector<2x32xf32>
    %355 = arith.addf %350, %354 : vector<2x32xf32>
    %cst_140 = arith.constant 0.797884583 : f32
    %356 = vector.broadcast %cst_140 : f32 to vector<2x32xf32>
    %357 = arith.mulf %356, %355 : vector<2x32xf32>
    %358 = math.tanh %357 : vector<2x32xf32>
    %cst_141 = arith.constant 1.000000e+00 : f32
    %359 = vector.broadcast %cst_141 : f32 to vector<2x32xf32>
    %360 = arith.addf %359, %358 : vector<2x32xf32>
    %cst_142 = arith.constant 5.000000e-01 : f32
    %361 = vector.broadcast %cst_142 : f32 to vector<2x32xf32>
    %362 = arith.mulf %361, %360 : vector<2x32xf32>
    %363 = arith.mulf %350, %362 : vector<2x32xf32>
    %364 = arith.truncf %363 : vector<2x32xf32> to vector<2x32xbf16>
    %c1_143 = arith.constant 1 : index
    %c0_144 = arith.constant 0 : index
    %c0_145 = arith.constant 0 : index
    %365 = vector.load %arg10[%c1_143, %c0_144, %c0_145] : memref<8x32x32xbf16, #tpu.memory_space<vmem>>, vector<1x32x32xbf16>
    %366 = vector.shape_cast %365 : vector<1x32x32xbf16> to vector<32x32xbf16>
    %cst_146 = arith.constant dense<0.000000e+00> : vector<2x32xf32>
    %367 = tpu.matmul %364, %366, %cst_146 {dimension_numbers = #tpu.dot_dimension_numbers<[1], [0], [0], [1], [0, 0, 1, 1], [], []>} : vector<2x32xbf16>, vector<32x32xbf16>, vector<2x32xf32> -> vector<2x32xf32>
    %c1_147 = arith.constant 1 : index
    %c0_148 = arith.constant 0 : index
    %c0_149 = arith.constant 0 : index
    %368 = vector.load %arg11[%c1_147, %c0_148, %c0_149] : memref<8x1x32xf32, #tpu.memory_space<vmem>>, vector<1x1x32xf32>
    %369 = vector.shape_cast %368 : vector<1x1x32xf32> to vector<1x32xf32>
    %370 = vector.broadcast %369 : vector<1x32xf32> to vector<2x32xf32>
    %371 = arith.addf %367, %370 : vector<2x32xf32>
    %372 = vector.extract_strided_slice %251 {offsets = [8, 0], sizes = [2, 32], strides = [1, 1]} : vector<20x32xf32> to vector<2x32xf32>
    %373 = arith.truncf %372 : vector<2x32xf32> to vector<2x32xbf16>
    %c2 = arith.constant 2 : index
    %c0_150 = arith.constant 0 : index
    %c0_151 = arith.constant 0 : index
    %374 = vector.load %arg8[%c2, %c0_150, %c0_151] : memref<8x32x32xbf16, #tpu.memory_space<vmem>>, vector<1x32x32xbf16>
    %375 = vector.shape_cast %374 : vector<1x32x32xbf16> to vector<32x32xbf16>
    %cst_152 = arith.constant dense<0.000000e+00> : vector<2x32xf32>
    %376 = tpu.matmul %373, %375, %cst_152 {dimension_numbers = #tpu.dot_dimension_numbers<[1], [0], [0], [1], [0, 0, 1, 1], [], []>} : vector<2x32xbf16>, vector<32x32xbf16>, vector<2x32xf32> -> vector<2x32xf32>
    %c2_153 = arith.constant 2 : index
    %c0_154 = arith.constant 0 : index
    %c0_155 = arith.constant 0 : index
    %377 = vector.load %arg9[%c2_153, %c0_154, %c0_155] : memref<8x1x32xf32, #tpu.memory_space<vmem>>, vector<1x1x32xf32>
    %378 = vector.shape_cast %377 : vector<1x1x32xf32> to vector<1x32xf32>
    %379 = vector.broadcast %378 : vector<1x32xf32> to vector<2x32xf32>
    %380 = arith.addf %376, %379 : vector<2x32xf32>
    %381 = arith.mulf %380, %380 : vector<2x32xf32>
    %382 = arith.mulf %380, %381 : vector<2x32xf32>
    %cst_156 = arith.constant 4.471500e-02 : f32
    %383 = vector.broadcast %cst_156 : f32 to vector<2x32xf32>
    %384 = arith.mulf %383, %382 : vector<2x32xf32>
    %385 = arith.addf %380, %384 : vector<2x32xf32>
    %cst_157 = arith.constant 0.797884583 : f32
    %386 = vector.broadcast %cst_157 : f32 to vector<2x32xf32>
    %387 = arith.mulf %386, %385 : vector<2x32xf32>
    %388 = math.tanh %387 : vector<2x32xf32>
    %cst_158 = arith.constant 1.000000e+00 : f32
    %389 = vector.broadcast %cst_158 : f32 to vector<2x32xf32>
    %390 = arith.addf %389, %388 : vector<2x32xf32>
    %cst_159 = arith.constant 5.000000e-01 : f32
    %391 = vector.broadcast %cst_159 : f32 to vector<2x32xf32>
    %392 = arith.mulf %391, %390 : vector<2x32xf32>
    %393 = arith.mulf %380, %392 : vector<2x32xf32>
    %394 = arith.truncf %393 : vector<2x32xf32> to vector<2x32xbf16>
    %c2_160 = arith.constant 2 : index
    %c0_161 = arith.constant 0 : index
    %c0_162 = arith.constant 0 : index
    %395 = vector.load %arg10[%c2_160, %c0_161, %c0_162] : memref<8x32x32xbf16, #tpu.memory_space<vmem>>, vector<1x32x32xbf16>
    %396 = vector.shape_cast %395 : vector<1x32x32xbf16> to vector<32x32xbf16>
    %cst_163 = arith.constant dense<0.000000e+00> : vector<2x32xf32>
    %397 = tpu.matmul %394, %396, %cst_163 {dimension_numbers = #tpu.dot_dimension_numbers<[1], [0], [0], [1], [0, 0, 1, 1], [], []>} : vector<2x32xbf16>, vector<32x32xbf16>, vector<2x32xf32> -> vector<2x32xf32>
    %c2_164 = arith.constant 2 : index
    %c0_165 = arith.constant 0 : index
    %c0_166 = arith.constant 0 : index
    %398 = vector.load %arg11[%c2_164, %c0_165, %c0_166] : memref<8x1x32xf32, #tpu.memory_space<vmem>>, vector<1x1x32xf32>
    %399 = vector.shape_cast %398 : vector<1x1x32xf32> to vector<1x32xf32>
    %400 = vector.broadcast %399 : vector<1x32xf32> to vector<2x32xf32>
    %401 = arith.addf %397, %400 : vector<2x32xf32>
    %402 = vector.extract_strided_slice %251 {offsets = [10, 0], sizes = [2, 32], strides = [1, 1]} : vector<20x32xf32> to vector<2x32xf32>
    %403 = arith.truncf %402 : vector<2x32xf32> to vector<2x32xbf16>
    %c3 = arith.constant 3 : index
    %c0_167 = arith.constant 0 : index
    %c0_168 = arith.constant 0 : index
    %404 = vector.load %arg8[%c3, %c0_167, %c0_168] : memref<8x32x32xbf16, #tpu.memory_space<vmem>>, vector<1x32x32xbf16>
    %405 = vector.shape_cast %404 : vector<1x32x32xbf16> to vector<32x32xbf16>
    %cst_169 = arith.constant dense<0.000000e+00> : vector<2x32xf32>
    %406 = tpu.matmul %403, %405, %cst_169 {dimension_numbers = #tpu.dot_dimension_numbers<[1], [0], [0], [1], [0, 0, 1, 1], [], []>} : vector<2x32xbf16>, vector<32x32xbf16>, vector<2x32xf32> -> vector<2x32xf32>
    %c3_170 = arith.constant 3 : index
    %c0_171 = arith.constant 0 : index
    %c0_172 = arith.constant 0 : index
    %407 = vector.load %arg9[%c3_170, %c0_171, %c0_172] : memref<8x1x32xf32, #tpu.memory_space<vmem>>, vector<1x1x32xf32>
    %408 = vector.shape_cast %407 : vector<1x1x32xf32> to vector<1x32xf32>
    %409 = vector.broadcast %408 : vector<1x32xf32> to vector<2x32xf32>
    %410 = arith.addf %406, %409 : vector<2x32xf32>
    %411 = arith.mulf %410, %410 : vector<2x32xf32>
    %412 = arith.mulf %410, %411 : vector<2x32xf32>
    %cst_173 = arith.constant 4.471500e-02 : f32
    %413 = vector.broadcast %cst_173 : f32 to vector<2x32xf32>
    %414 = arith.mulf %413, %412 : vector<2x32xf32>
    %415 = arith.addf %410, %414 : vector<2x32xf32>
    %cst_174 = arith.constant 0.797884583 : f32
    %416 = vector.broadcast %cst_174 : f32 to vector<2x32xf32>
    %417 = arith.mulf %416, %415 : vector<2x32xf32>
    %418 = math.tanh %417 : vector<2x32xf32>
    %cst_175 = arith.constant 1.000000e+00 : f32
    %419 = vector.broadcast %cst_175 : f32 to vector<2x32xf32>
    %420 = arith.addf %419, %418 : vector<2x32xf32>
    %cst_176 = arith.constant 5.000000e-01 : f32
    %421 = vector.broadcast %cst_176 : f32 to vector<2x32xf32>
    %422 = arith.mulf %421, %420 : vector<2x32xf32>
    %423 = arith.mulf %410, %422 : vector<2x32xf32>
    %424 = arith.truncf %423 : vector<2x32xf32> to vector<2x32xbf16>
    %c3_177 = arith.constant 3 : index
    %c0_178 = arith.constant 0 : index
    %c0_179 = arith.constant 0 : index
    %425 = vector.load %arg10[%c3_177, %c0_178, %c0_179] : memref<8x32x32xbf16, #tpu.memory_space<vmem>>, vector<1x32x32xbf16>
    %426 = vector.shape_cast %425 : vector<1x32x32xbf16> to vector<32x32xbf16>
    %cst_180 = arith.constant dense<0.000000e+00> : vector<2x32xf32>
    %427 = tpu.matmul %424, %426, %cst_180 {dimension_numbers = #tpu.dot_dimension_numbers<[1], [0], [0], [1], [0, 0, 1, 1], [], []>} : vector<2x32xbf16>, vector<32x32xbf16>, vector<2x32xf32> -> vector<2x32xf32>
    %c3_181 = arith.constant 3 : index
    %c0_182 = arith.constant 0 : index
    %c0_183 = arith.constant 0 : index
    %428 = vector.load %arg11[%c3_181, %c0_182, %c0_183] : memref<8x1x32xf32, #tpu.memory_space<vmem>>, vector<1x1x32xf32>
    %429 = vector.shape_cast %428 : vector<1x1x32xf32> to vector<1x32xf32>
    %430 = vector.broadcast %429 : vector<1x32xf32> to vector<2x32xf32>
    %431 = arith.addf %427, %430 : vector<2x32xf32>
    %432 = vector.extract_strided_slice %251 {offsets = [12, 0], sizes = [2, 32], strides = [1, 1]} : vector<20x32xf32> to vector<2x32xf32>
    %433 = arith.truncf %432 : vector<2x32xf32> to vector<2x32xbf16>
    %c4 = arith.constant 4 : index
    %c0_184 = arith.constant 0 : index
    %c0_185 = arith.constant 0 : index
    %434 = vector.load %arg8[%c4, %c0_184, %c0_185] : memref<8x32x32xbf16, #tpu.memory_space<vmem>>, vector<1x32x32xbf16>
    %435 = vector.shape_cast %434 : vector<1x32x32xbf16> to vector<32x32xbf16>
    %cst_186 = arith.constant dense<0.000000e+00> : vector<2x32xf32>
    %436 = tpu.matmul %433, %435, %cst_186 {dimension_numbers = #tpu.dot_dimension_numbers<[1], [0], [0], [1], [0, 0, 1, 1], [], []>} : vector<2x32xbf16>, vector<32x32xbf16>, vector<2x32xf32> -> vector<2x32xf32>
    %c4_187 = arith.constant 4 : index
    %c0_188 = arith.constant 0 : index
    %c0_189 = arith.constant 0 : index
    %437 = vector.load %arg9[%c4_187, %c0_188, %c0_189] : memref<8x1x32xf32, #tpu.memory_space<vmem>>, vector<1x1x32xf32>
    %438 = vector.shape_cast %437 : vector<1x1x32xf32> to vector<1x32xf32>
    %439 = vector.broadcast %438 : vector<1x32xf32> to vector<2x32xf32>
    %440 = arith.addf %436, %439 : vector<2x32xf32>
    %441 = arith.mulf %440, %440 : vector<2x32xf32>
    %442 = arith.mulf %440, %441 : vector<2x32xf32>
    %cst_190 = arith.constant 4.471500e-02 : f32
    %443 = vector.broadcast %cst_190 : f32 to vector<2x32xf32>
    %444 = arith.mulf %443, %442 : vector<2x32xf32>
    %445 = arith.addf %440, %444 : vector<2x32xf32>
    %cst_191 = arith.constant 0.797884583 : f32
    %446 = vector.broadcast %cst_191 : f32 to vector<2x32xf32>
    %447 = arith.mulf %446, %445 : vector<2x32xf32>
    %448 = math.tanh %447 : vector<2x32xf32>
    %cst_192 = arith.constant 1.000000e+00 : f32
    %449 = vector.broadcast %cst_192 : f32 to vector<2x32xf32>
    %450 = arith.addf %449, %448 : vector<2x32xf32>
    %cst_193 = arith.constant 5.000000e-01 : f32
    %451 = vector.broadcast %cst_193 : f32 to vector<2x32xf32>
    %452 = arith.mulf %451, %450 : vector<2x32xf32>
    %453 = arith.mulf %440, %452 : vector<2x32xf32>
    %454 = arith.truncf %453 : vector<2x32xf32> to vector<2x32xbf16>
    %c4_194 = arith.constant 4 : index
    %c0_195 = arith.constant 0 : index
    %c0_196 = arith.constant 0 : index
    %455 = vector.load %arg10[%c4_194, %c0_195, %c0_196] : memref<8x32x32xbf16, #tpu.memory_space<vmem>>, vector<1x32x32xbf16>
    %456 = vector.shape_cast %455 : vector<1x32x32xbf16> to vector<32x32xbf16>
    %cst_197 = arith.constant dense<0.000000e+00> : vector<2x32xf32>
    %457 = tpu.matmul %454, %456, %cst_197 {dimension_numbers = #tpu.dot_dimension_numbers<[1], [0], [0], [1], [0, 0, 1, 1], [], []>} : vector<2x32xbf16>, vector<32x32xbf16>, vector<2x32xf32> -> vector<2x32xf32>
    %c4_198 = arith.constant 4 : index
    %c0_199 = arith.constant 0 : index
    %c0_200 = arith.constant 0 : index
    %458 = vector.load %arg11[%c4_198, %c0_199, %c0_200] : memref<8x1x32xf32, #tpu.memory_space<vmem>>, vector<1x1x32xf32>
    %459 = vector.shape_cast %458 : vector<1x1x32xf32> to vector<1x32xf32>
    %460 = vector.broadcast %459 : vector<1x32xf32> to vector<2x32xf32>
    %461 = arith.addf %457, %460 : vector<2x32xf32>
    %462 = vector.extract_strided_slice %251 {offsets = [14, 0], sizes = [2, 32], strides = [1, 1]} : vector<20x32xf32> to vector<2x32xf32>
    %463 = arith.truncf %462 : vector<2x32xf32> to vector<2x32xbf16>
    %c5 = arith.constant 5 : index
    %c0_201 = arith.constant 0 : index
    %c0_202 = arith.constant 0 : index
    %464 = vector.load %arg8[%c5, %c0_201, %c0_202] : memref<8x32x32xbf16, #tpu.memory_space<vmem>>, vector<1x32x32xbf16>
    %465 = vector.shape_cast %464 : vector<1x32x32xbf16> to vector<32x32xbf16>
    %cst_203 = arith.constant dense<0.000000e+00> : vector<2x32xf32>
    %466 = tpu.matmul %463, %465, %cst_203 {dimension_numbers = #tpu.dot_dimension_numbers<[1], [0], [0], [1], [0, 0, 1, 1], [], []>} : vector<2x32xbf16>, vector<32x32xbf16>, vector<2x32xf32> -> vector<2x32xf32>
    %c5_204 = arith.constant 5 : index
    %c0_205 = arith.constant 0 : index
    %c0_206 = arith.constant 0 : index
    %467 = vector.load %arg9[%c5_204, %c0_205, %c0_206] : memref<8x1x32xf32, #tpu.memory_space<vmem>>, vector<1x1x32xf32>
    %468 = vector.shape_cast %467 : vector<1x1x32xf32> to vector<1x32xf32>
    %469 = vector.broadcast %468 : vector<1x32xf32> to vector<2x32xf32>
    %470 = arith.addf %466, %469 : vector<2x32xf32>
    %471 = arith.mulf %470, %470 : vector<2x32xf32>
    %472 = arith.mulf %470, %471 : vector<2x32xf32>
    %cst_207 = arith.constant 4.471500e-02 : f32
    %473 = vector.broadcast %cst_207 : f32 to vector<2x32xf32>
    %474 = arith.mulf %473, %472 : vector<2x32xf32>
    %475 = arith.addf %470, %474 : vector<2x32xf32>
    %cst_208 = arith.constant 0.797884583 : f32
    %476 = vector.broadcast %cst_208 : f32 to vector<2x32xf32>
    %477 = arith.mulf %476, %475 : vector<2x32xf32>
    %478 = math.tanh %477 : vector<2x32xf32>
    %cst_209 = arith.constant 1.000000e+00 : f32
    %479 = vector.broadcast %cst_209 : f32 to vector<2x32xf32>
    %480 = arith.addf %479, %478 : vector<2x32xf32>
    %cst_210 = arith.constant 5.000000e-01 : f32
    %481 = vector.broadcast %cst_210 : f32 to vector<2x32xf32>
    %482 = arith.mulf %481, %480 : vector<2x32xf32>
    %483 = arith.mulf %470, %482 : vector<2x32xf32>
    %484 = arith.truncf %483 : vector<2x32xf32> to vector<2x32xbf16>
    %c5_211 = arith.constant 5 : index
    %c0_212 = arith.constant 0 : index
    %c0_213 = arith.constant 0 : index
    %485 = vector.load %arg10[%c5_211, %c0_212, %c0_213] : memref<8x32x32xbf16, #tpu.memory_space<vmem>>, vector<1x32x32xbf16>
    %486 = vector.shape_cast %485 : vector<1x32x32xbf16> to vector<32x32xbf16>
    %cst_214 = arith.constant dense<0.000000e+00> : vector<2x32xf32>
    %487 = tpu.matmul %484, %486, %cst_214 {dimension_numbers = #tpu.dot_dimension_numbers<[1], [0], [0], [1], [0, 0, 1, 1], [], []>} : vector<2x32xbf16>, vector<32x32xbf16>, vector<2x32xf32> -> vector<2x32xf32>
    %c5_215 = arith.constant 5 : index
    %c0_216 = arith.constant 0 : index
    %c0_217 = arith.constant 0 : index
    %488 = vector.load %arg11[%c5_215, %c0_216, %c0_217] : memref<8x1x32xf32, #tpu.memory_space<vmem>>, vector<1x1x32xf32>
    %489 = vector.shape_cast %488 : vector<1x1x32xf32> to vector<1x32xf32>
    %490 = vector.broadcast %489 : vector<1x32xf32> to vector<2x32xf32>
    %491 = arith.addf %487, %490 : vector<2x32xf32>
    %492 = vector.extract_strided_slice %251 {offsets = [16, 0], sizes = [2, 32], strides = [1, 1]} : vector<20x32xf32> to vector<2x32xf32>
    %493 = arith.truncf %492 : vector<2x32xf32> to vector<2x32xbf16>
    %c6 = arith.constant 6 : index
    %c0_218 = arith.constant 0 : index
    %c0_219 = arith.constant 0 : index
    %494 = vector.load %arg8[%c6, %c0_218, %c0_219] : memref<8x32x32xbf16, #tpu.memory_space<vmem>>, vector<1x32x32xbf16>
    %495 = vector.shape_cast %494 : vector<1x32x32xbf16> to vector<32x32xbf16>
    %cst_220 = arith.constant dense<0.000000e+00> : vector<2x32xf32>
    %496 = tpu.matmul %493, %495, %cst_220 {dimension_numbers = #tpu.dot_dimension_numbers<[1], [0], [0], [1], [0, 0, 1, 1], [], []>} : vector<2x32xbf16>, vector<32x32xbf16>, vector<2x32xf32> -> vector<2x32xf32>
    %c6_221 = arith.constant 6 : index
    %c0_222 = arith.constant 0 : index
    %c0_223 = arith.constant 0 : index
    %497 = vector.load %arg9[%c6_221, %c0_222, %c0_223] : memref<8x1x32xf32, #tpu.memory_space<vmem>>, vector<1x1x32xf32>
    %498 = vector.shape_cast %497 : vector<1x1x32xf32> to vector<1x32xf32>
    %499 = vector.broadcast %498 : vector<1x32xf32> to vector<2x32xf32>
    %500 = arith.addf %496, %499 : vector<2x32xf32>
    %501 = arith.mulf %500, %500 : vector<2x32xf32>
    %502 = arith.mulf %500, %501 : vector<2x32xf32>
    %cst_224 = arith.constant 4.471500e-02 : f32
    %503 = vector.broadcast %cst_224 : f32 to vector<2x32xf32>
    %504 = arith.mulf %503, %502 : vector<2x32xf32>
    %505 = arith.addf %500, %504 : vector<2x32xf32>
    %cst_225 = arith.constant 0.797884583 : f32
    %506 = vector.broadcast %cst_225 : f32 to vector<2x32xf32>
    %507 = arith.mulf %506, %505 : vector<2x32xf32>
    %508 = math.tanh %507 : vector<2x32xf32>
    %cst_226 = arith.constant 1.000000e+00 : f32
    %509 = vector.broadcast %cst_226 : f32 to vector<2x32xf32>
    %510 = arith.addf %509, %508 : vector<2x32xf32>
    %cst_227 = arith.constant 5.000000e-01 : f32
    %511 = vector.broadcast %cst_227 : f32 to vector<2x32xf32>
    %512 = arith.mulf %511, %510 : vector<2x32xf32>
    %513 = arith.mulf %500, %512 : vector<2x32xf32>
    %514 = arith.truncf %513 : vector<2x32xf32> to vector<2x32xbf16>
    %c6_228 = arith.constant 6 : index
    %c0_229 = arith.constant 0 : index
    %c0_230 = arith.constant 0 : index
    %515 = vector.load %arg10[%c6_228, %c0_229, %c0_230] : memref<8x32x32xbf16, #tpu.memory_space<vmem>>, vector<1x32x32xbf16>
    %516 = vector.shape_cast %515 : vector<1x32x32xbf16> to vector<32x32xbf16>
    %cst_231 = arith.constant dense<0.000000e+00> : vector<2x32xf32>
    %517 = tpu.matmul %514, %516, %cst_231 {dimension_numbers = #tpu.dot_dimension_numbers<[1], [0], [0], [1], [0, 0, 1, 1], [], []>} : vector<2x32xbf16>, vector<32x32xbf16>, vector<2x32xf32> -> vector<2x32xf32>
    %c6_232 = arith.constant 6 : index
    %c0_233 = arith.constant 0 : index
    %c0_234 = arith.constant 0 : index
    %518 = vector.load %arg11[%c6_232, %c0_233, %c0_234] : memref<8x1x32xf32, #tpu.memory_space<vmem>>, vector<1x1x32xf32>
    %519 = vector.shape_cast %518 : vector<1x1x32xf32> to vector<1x32xf32>
    %520 = vector.broadcast %519 : vector<1x32xf32> to vector<2x32xf32>
    %521 = arith.addf %517, %520 : vector<2x32xf32>
    %522 = vector.extract_strided_slice %251 {offsets = [18, 0], sizes = [2, 32], strides = [1, 1]} : vector<20x32xf32> to vector<2x32xf32>
    %523 = arith.truncf %522 : vector<2x32xf32> to vector<2x32xbf16>
    %c7 = arith.constant 7 : index
    %c0_235 = arith.constant 0 : index
    %c0_236 = arith.constant 0 : index
    %524 = vector.load %arg8[%c7, %c0_235, %c0_236] : memref<8x32x32xbf16, #tpu.memory_space<vmem>>, vector<1x32x32xbf16>
    %525 = vector.shape_cast %524 : vector<1x32x32xbf16> to vector<32x32xbf16>
    %cst_237 = arith.constant dense<0.000000e+00> : vector<2x32xf32>
    %526 = tpu.matmul %523, %525, %cst_237 {dimension_numbers = #tpu.dot_dimension_numbers<[1], [0], [0], [1], [0, 0, 1, 1], [], []>} : vector<2x32xbf16>, vector<32x32xbf16>, vector<2x32xf32> -> vector<2x32xf32>
    %c7_238 = arith.constant 7 : index
    %c0_239 = arith.constant 0 : index
    %c0_240 = arith.constant 0 : index
    %527 = vector.load %arg9[%c7_238, %c0_239, %c0_240] : memref<8x1x32xf32, #tpu.memory_space<vmem>>, vector<1x1x32xf32>
    %528 = vector.shape_cast %527 : vector<1x1x32xf32> to vector<1x32xf32>
    %529 = vector.broadcast %528 : vector<1x32xf32> to vector<2x32xf32>
    %530 = arith.addf %526, %529 : vector<2x32xf32>
    %531 = arith.mulf %530, %530 : vector<2x32xf32>
    %532 = arith.mulf %530, %531 : vector<2x32xf32>
    %cst_241 = arith.constant 4.471500e-02 : f32
    %533 = vector.broadcast %cst_241 : f32 to vector<2x32xf32>
    %534 = arith.mulf %533, %532 : vector<2x32xf32>
    %535 = arith.addf %530, %534 : vector<2x32xf32>
    %cst_242 = arith.constant 0.797884583 : f32
    %536 = vector.broadcast %cst_242 : f32 to vector<2x32xf32>
    %537 = arith.mulf %536, %535 : vector<2x32xf32>
    %538 = math.tanh %537 : vector<2x32xf32>
    %cst_243 = arith.constant 1.000000e+00 : f32
    %539 = vector.broadcast %cst_243 : f32 to vector<2x32xf32>
    %540 = arith.addf %539, %538 : vector<2x32xf32>
    %cst_244 = arith.constant 5.000000e-01 : f32
    %541 = vector.broadcast %cst_244 : f32 to vector<2x32xf32>
    %542 = arith.mulf %541, %540 : vector<2x32xf32>
    %543 = arith.mulf %530, %542 : vector<2x32xf32>
    %544 = arith.truncf %543 : vector<2x32xf32> to vector<2x32xbf16>
    %c7_245 = arith.constant 7 : index
    %c0_246 = arith.constant 0 : index
    %c0_247 = arith.constant 0 : index
    %545 = vector.load %arg10[%c7_245, %c0_246, %c0_247] : memref<8x32x32xbf16, #tpu.memory_space<vmem>>, vector<1x32x32xbf16>
    %546 = vector.shape_cast %545 : vector<1x32x32xbf16> to vector<32x32xbf16>
    %cst_248 = arith.constant dense<0.000000e+00> : vector<2x32xf32>
    %547 = tpu.matmul %544, %546, %cst_248 {dimension_numbers = #tpu.dot_dimension_numbers<[1], [0], [0], [1], [0, 0, 1, 1], [], []>} : vector<2x32xbf16>, vector<32x32xbf16>, vector<2x32xf32> -> vector<2x32xf32>
    %c7_249 = arith.constant 7 : index
    %c0_250 = arith.constant 0 : index
    %c0_251 = arith.constant 0 : index
    %548 = vector.load %arg11[%c7_249, %c0_250, %c0_251] : memref<8x1x32xf32, #tpu.memory_space<vmem>>, vector<1x1x32xf32>
    %549 = vector.shape_cast %548 : vector<1x1x32xf32> to vector<1x32xf32>
    %550 = vector.broadcast %549 : vector<1x32xf32> to vector<2x32xf32>
    %551 = arith.addf %547, %550 : vector<2x32xf32>
    %552 = tpu.concatenate %281, %311, %341, %371, %401, %431, %461, %491, %521, %551 in 0 : vector<2x32xf32>, vector<2x32xf32>, vector<2x32xf32>, vector<2x32xf32>, vector<2x32xf32>, vector<2x32xf32>, vector<2x32xf32>, vector<2x32xf32>, vector<2x32xf32>, vector<2x32xf32> -> vector<20x32xf32>
    %553 = arith.truncf %552 : vector<20x32xf32> to vector<20x32xbf16>
    %554 = vector.shape_cast %234 : vector<1x64x20xbf16> to vector<64x20xbf16>
    %cst_252 = arith.constant dense<0.000000e+00> : vector<64x32xf32>
    %555 = tpu.matmul %554, %553, %cst_252 {dimension_numbers = #tpu.dot_dimension_numbers<[1], [0], [0], [1], [0, 0, 1, 1], [], []>} : vector<64x20xbf16>, vector<20x32xbf16>, vector<64x32xf32> -> vector<64x32xf32>
    %c0_253 = arith.constant 0 : index
    %c0_254 = arith.constant 0 : index
    %c0_255 = arith.constant 0 : index
    %556 = vector.load %arg12[%c0_253, %c0_254, %c0_255] : memref<1x64x32xf32, #tpu.memory_space<vmem>>, vector<1x64x32xf32>
    %557 = vector.shape_cast %556 : vector<1x64x32xf32> to vector<64x32xf32>
    %558 = vector.shape_cast %555 : vector<64x32xf32> to vector<1x64x32xf32>
    tpu.vector_store %arg12[%c0_253, %c0_254, %c0_255], %558 {strides = array<i32>} : memref<1x64x32xf32, #tpu.memory_space<vmem>>, vector<1x64x32xf32>,
    return
  }
  func.func @transform_0(%arg0: i32) -> (i32, i32, i32) {
    %c0_i32 = arith.constant 0 : i32
    %c0_i32_0 = arith.constant 0 : i32
    %c0_i32_1 = arith.constant 0 : i32
    return %arg0, %c0_i32, %c0_i32_0 : i32, i32, i32
  }
  func.func @transform_1(%arg0: i32) -> (i32, i32) {
    %c0_i32 = arith.constant 0 : i32
    %c0_i32_0 = arith.constant 0 : i32
    %c0_i32_1 = arith.constant 0 : i32
    return %c0_i32, %c0_i32_0 : i32, i32
  }
  func.func @transform_2(%arg0: i32) -> (i32, i32) {
    %c0_i32 = arith.constant 0 : i32
    %c0_i32_0 = arith.constant 0 : i32
    %c0_i32_1 = arith.constant 0 : i32
    return %c0_i32, %c0_i32_0 : i32, i32
  }
  func.func @transform_3(%arg0: i32) -> (i32, i32, i32) {
    %c0_i32 = arith.constant 0 : i32
    %c0_i32_0 = arith.constant 0 : i32
    %c0_i32_1 = arith.constant 0 : i32
    %c0_i32_2 = arith.constant 0 : i32
    return %c0_i32, %c0_i32_0, %c0_i32_1 : i32, i32, i32
  }
  func.func @transform_4(%arg0: i32) -> (i32, i32, i32) {
    %c0_i32 = arith.constant 0 : i32
    %c0_i32_0 = arith.constant 0 : i32
    %c0_i32_1 = arith.constant 0 : i32
    %c0_i32_2 = arith.constant 0 : i32
    return %c0_i32, %c0_i32_0, %c0_i32_1 : i32, i32, i32
  }
  func.func @transform_5(%arg0: i32) -> (i32, i32, i32) {
    %c0_i32 = arith.constant 0 : i32
    %c0_i32_0 = arith.constant 0 : i32
    %c0_i32_1 = arith.constant 0 : i32
    %c0_i32_2 = arith.constant 0 : i32
    return %c0_i32, %c0_i32_0, %c0_i32_1 : i32, i32, i32
  }
  func.func @transform_6(%arg0: i32) -> (i32, i32, i32) {
    %c0_i32 = arith.constant 0 : i32
    %c0_i32_0 = arith.constant 0 : i32
    %c0_i32_1 = arith.constant 0 : i32
    %c0_i32_2 = arith.constant 0 : i32
    return %c0_i32, %c0_i32_0, %c0_i32_1 : i32, i32, i32
  }
  func.func @transform_7(%arg0: i32) -> (i32, i32, i32) {
    %c0_i32 = arith.constant 0 : i32
    %c0_i32_0 = arith.constant 0 : i32
    %c0_i32_1 = arith.constant 0 : i32
    %c0_i32_2 = arith.constant 0 : i32
    return %c0_i32, %c0_i32_0, %c0_i32_1 : i32, i32, i32
  }
  func.func @transform_8(%arg0: i32) -> (i32, i32, i32) {
    %c0_i32 = arith.constant 0 : i32
    %c0_i32_0 = arith.constant 0 : i32
    %c0_i32_1 = arith.constant 0 : i32
    %c0_i32_2 = arith.constant 0 : i32
    return %c0_i32, %c0_i32_0, %c0_i32_1 : i32, i32, i32
  }
  func.func @transform_9(%arg0: i32) -> (i32, i32, i32) {
    %c0_i32 = arith.constant 0 : i32
    %c0_i32_0 = arith.constant 0 : i32
    %c0_i32_1 = arith.constant 0 : i32
    %c0_i32_2 = arith.constant 0 : i32
    return %c0_i32, %c0_i32_0, %c0_i32_1 : i32, i32, i32
  }
  func.func @transform_10(%arg0: i32) -> (i32, i32, i32) {
    %c0_i32 = arith.constant 0 : i32
    %c0_i32_0 = arith.constant 0 : i32
    %c0_i32_1 = arith.constant 0 : i32
    %c0_i32_2 = arith.constant 0 : i32
    return %c0_i32, %c0_i32_0, %c0_i32_1 : i32, i32, i32
  }
  func.func @transform_11(%arg0: i32) -> (i32, i32, i32) {
    %c0_i32 = arith.constant 0 : i32
    %c0_i32_0 = arith.constant 0 : i32
    %c0_i32_1 = arith.constant 0 : i32
    return %arg0, %c0_i32, %c0_i32_0 : i32, i32, i32
  }
}

module attributes {stable_mosaic.version = 11 : i64} {
  func.func @_fused_moe_kernel(%arg0: i32, %arg1: memref<1x64x32xf32, #tpu.memory_space<vmem>>, %arg2: memref<20x32xbf16, #tpu.memory_space<vmem>>, %arg3: memref<32x20xbf16, #tpu.memory_space<vmem>>, %arg4: memref<2x32x128xbf16, #tpu.memory_space<vmem>>, %arg5: memref<2x1x128xf32, #tpu.memory_space<vmem>>, %arg6: memref<2x128x32xbf16, #tpu.memory_space<vmem>>, %arg7: memref<2x1x32xf32, #tpu.memory_space<vmem>>, %arg8: memref<8x32x32xbf16, #tpu.memory_space<vmem>>, %arg9: memref<8x1x32xf32, #tpu.memory_space<vmem>>, %arg10: memref<8x32x32xbf16, #tpu.memory_space<vmem>>, %arg11: memref<8x1x32xf32, #tpu.memory_space<vmem>>, %arg12: memref<1x64x32xf32, #tpu.memory_space<vmem>>) attributes {dimension_semantics = [#tpu.dimension_semantics<parallel>], iteration_bounds = array<i64: 2>, scalar_prefetch = 0 : i64, scratch_operands = 0 : i64, tpu.core_type = #tpu.core_type<tc>, window_params = [{transform_indices = @transform_0, window_bounds = array<i64: 1, 64, 32>}, {pipeline_mode = #tpu.pipeline_mode<synchronous>, transform_indices = @transform_1, window_bounds = array<i64: 20, 32>}, {pipeline_mode = #tpu.pipeline_mode<synchronous>, transform_indices = @transform_2, window_bounds = array<i64: 32, 20>}, {pipeline_mode = #tpu.pipeline_mode<synchronous>, transform_indices = @transform_3, window_bounds = array<i64: 2, 32, 128>}, {pipeline_mode = #tpu.pipeline_mode<synchronous>, transform_indices = @transform_4, window_bounds = array<i64: 2, 1, 128>}, {pipeline_mode = #tpu.pipeline_mode<synchronous>, transform_indices = @transform_5, window_bounds = array<i64: 2, 128, 32>}, {pipeline_mode = #tpu.pipeline_mode<synchronous>, transform_indices = @transform_6, window_bounds = array<i64: 2, 1, 32>}, {pipeline_mode = #tpu.pipeline_mode<synchronous>, transform_indices = @transform_7, window_bounds = array<i64: 8, 32, 32>}, {pipeline_mode = #tpu.pipeline_mode<synchronous>, transform_indices = @transform_8, window_bounds = array<i64: 8, 1, 32>}, {pipeline_mode = #tpu.pipeline_mode<synchronous>, transform_indices = @transform_9, window_bounds = array<i64: 8, 32, 32>}, {pipeline_mode = #tpu.pipeline_mode<synchronous>, transform_indices = @transform_10, window_bounds = array<i64: 8, 1, 32>}, {transform_indices = @transform_11, window_bounds = array<i64: 1, 64, 32>}]} {
    %c0 = arith.constant 0 : index
    %c0_0 = arith.constant 0 : index
    %c0_1 = arith.constant 0 : index
    %0 = vector.load %arg1[%c0, %c0_0, %c0_1] : memref<1x64x32xf32, #tpu.memory_space<vmem>>, vector<1x64x32xf32>
    %1 = arith.mulf %0, %0 : vector<1x64x32xf32>
    %cst = arith.constant dense<0.000000e+00> : vector<1x64xf32>
    %2 = vector.multi_reduction <add>, %1, %cst [2] : vector<1x64x32xf32> to vector<1x64xf32>
    %3 = vector.shape_cast %2 : vector<1x64xf32> to vector<1x64x1xf32>
    %4 = math.sqrt %3 : vector<1x64x1xf32>
    %cst_2 = arith.constant 9.99999997E-7 : f32
    %5 = vector.broadcast %cst_2 : f32 to vector<1x64x1xf32>
    %6 = arith.addf %4, %5 : vector<1x64x1xf32>
    %7 = tpu.reciprocal %6 : vector<1x64x1xf32> -> vector<1x64x1xf32>
    %8 = vector.broadcast %7 : vector<1x64x1xf32> to vector<1x64x32xf32>
    %9 = arith.mulf %0, %8 : vector<1x64x32xf32>
    %10 = arith.truncf %9 : vector<1x64x32xf32> to vector<1x64x32xbf16>
    %11 = arith.truncf %0 : vector<1x64x32xf32> to vector<1x64x32xbf16>
    %12 = vector.shape_cast %10 : vector<1x64x32xbf16> to vector<64x32xbf16>
    %c0_3 = arith.constant 0 : index
    %c0_4 = arith.constant 0 : index
    %13 = vector.load %arg3[%c0_3, %c0_4] : memref<32x20xbf16, #tpu.memory_space<vmem>>, vector<32x20xbf16>
    %cst_5 = arith.constant dense<0.000000e+00> : vector<64x20xf32>
    %14 = tpu.matmul %12, %13, %cst_5 {dimension_numbers = #tpu.dot_dimension_numbers<[1], [0], [0], [1], [0, 0, 1, 1], [], []>} : vector<64x32xbf16>, vector<32x20xbf16>, vector<64x20xf32> -> vector<64x20xf32>
    %15 = vector.shape_cast %14 : vector<64x20xf32> to vector<1x64x20xf32>
    %cst_6 = arith.constant dense<0xFF800000> : vector<1x64xf32>
    %16 = vector.multi_reduction <maximumf>, %15, %cst_6 [2] : vector<1x64x20xf32> to vector<1x64xf32>
    %17 = vector.shape_cast %16 : vector<1x64xf32> to vector<1x64x1xf32>
    %18 = vector.broadcast %17 : vector<1x64x1xf32> to vector<1x64x20xf32>
    %19 = arith.subf %15, %18 : vector<1x64x20xf32>
    %cst_7 = arith.constant 5.000000e-01 : f32
    %20 = vector.broadcast %cst_7 : f32 to vector<1x64x20xf32>
    %21 = arith.mulf %19, %20 : vector<1x64x20xf32>
    %cst_8 = arith.constant -1.000000e+00 : f32
    %22 = vector.broadcast %cst_8 : f32 to vector<1x64x1xf32>
    %cst_9 = arith.constant 0.000000e+00 : f32
    %23 = vector.broadcast %cst_9 : f32 to vector<1x64x1xf32>
    %c0_i32 = arith.constant 0 : i32
    %24 = arith.addf %22, %23 : vector<1x64x1xf32>
    %cst_10 = arith.constant 5.000000e-01 : f32
    %25 = vector.broadcast %cst_10 : f32 to vector<1x64x1xf32>
    %26 = arith.mulf %25, %24 : vector<1x64x1xf32>
    %27 = vector.broadcast %26 : vector<1x64x1xf32> to vector<1x64x20xf32>
    %28 = arith.subf %21, %27 : vector<1x64x20xf32>
    %cst_11 = arith.constant 0.000000e+00 : f32
    %29 = vector.broadcast %cst_11 : f32 to vector<1x64x20xf32>
    %30 = arith.maximumf %28, %29 : vector<1x64x20xf32>
    %31 = arith.mulf %30, %30 : vector<1x64x20xf32>
    %cst_12 = arith.constant dense<0.000000e+00> : vector<1x64xf32>
    %32 = vector.multi_reduction <add>, %31, %cst_12 [2] : vector<1x64x20xf32> to vector<1x64xf32>
    %33 = vector.shape_cast %32 : vector<1x64xf32> to vector<1x64x1xf32>
    %cst_13 = arith.constant 1.000000e+00 : f32
    %34 = vector.broadcast %cst_13 : f32 to vector<1x64x1xf32>
    %35 = arith.cmpf oge, %33, %34 : vector<1x64x1xf32>
    %36 = arith.select %35, %26, %22 : vector<1x64x1xi1>, vector<1x64x1xf32>
    %37 = arith.select %35, %23, %26 : vector<1x64x1xi1>, vector<1x64x1xf32>
    %c1_i32 = arith.constant 1 : i32
    %38 = arith.addf %36, %37 : vector<1x64x1xf32>
    %cst_14 = arith.constant 5.000000e-01 : f32
    %39 = vector.broadcast %cst_14 : f32 to vector<1x64x1xf32>
    %40 = arith.mulf %39, %38 : vector<1x64x1xf32>
    %41 = vector.broadcast %40 : vector<1x64x1xf32> to vector<1x64x20xf32>
    %42 = arith.subf %21, %41 : vector<1x64x20xf32>
    %cst_15 = arith.constant 0.000000e+00 : f32
    %43 = vector.broadcast %cst_15 : f32 to vector<1x64x20xf32>
    %44 = arith.maximumf %42, %43 : vector<1x64x20xf32>
    %45 = arith.mulf %44, %44 : vector<1x64x20xf32>
    %cst_16 = arith.constant dense<0.000000e+00> : vector<1x64xf32>
    %46 = vector.multi_reduction <add>, %45, %cst_16 [2] : vector<1x64x20xf32> to vector<1x64xf32>
    %47 = vector.shape_cast %46 : vector<1x64xf32> to vector<1x64x1xf32>
    %cst_17 = arith.constant 1.000000e+00 : f32
    %48 = vector.broadcast %cst_17 : f32 to vector<1x64x1xf32>
    %49 = arith.cmpf oge, %47, %48 : vector<1x64x1xf32>
    %50 = arith.select %49, %40, %36 : vector<1x64x1xi1>, vector<1x64x1xf32>
    %51 = arith.select %49, %37, %40 : vector<1x64x1xi1>, vector<1x64x1xf32>
    %c2_i32 = arith.constant 2 : i32
    %52 = arith.addf %50, %51 : vector<1x64x1xf32>
    %cst_18 = arith.constant 5.000000e-01 : f32
    %53 = vector.broadcast %cst_18 : f32 to vector<1x64x1xf32>
    %54 = arith.mulf %53, %52 : vector<1x64x1xf32>
    %55 = vector.broadcast %54 : vector<1x64x1xf32> to vector<1x64x20xf32>
    %56 = arith.subf %21, %55 : vector<1x64x20xf32>
    %cst_19 = arith.constant 0.000000e+00 : f32
    %57 = vector.broadcast %cst_19 : f32 to vector<1x64x20xf32>
    %58 = arith.maximumf %56, %57 : vector<1x64x20xf32>
    %59 = arith.mulf %58, %58 : vector<1x64x20xf32>
    %cst_20 = arith.constant dense<0.000000e+00> : vector<1x64xf32>
    %60 = vector.multi_reduction <add>, %59, %cst_20 [2] : vector<1x64x20xf32> to vector<1x64xf32>
    %61 = vector.shape_cast %60 : vector<1x64xf32> to vector<1x64x1xf32>
    %cst_21 = arith.constant 1.000000e+00 : f32
    %62 = vector.broadcast %cst_21 : f32 to vector<1x64x1xf32>
    %63 = arith.cmpf oge, %61, %62 : vector<1x64x1xf32>
    %64 = arith.select %63, %54, %50 : vector<1x64x1xi1>, vector<1x64x1xf32>
    %65 = arith.select %63, %51, %54 : vector<1x64x1xi1>, vector<1x64x1xf32>
    %c3_i32 = arith.constant 3 : i32
    %66 = arith.addf %64, %65 : vector<1x64x1xf32>
    %cst_22 = arith.constant 5.000000e-01 : f32
    %67 = vector.broadcast %cst_22 : f32 to vector<1x64x1xf32>
    %68 = arith.mulf %67, %66 : vector<1x64x1xf32>
    %69 = vector.broadcast %68 : vector<1x64x1xf32> to vector<1x64x20xf32>
    %70 = arith.subf %21, %69 : vector<1x64x20xf32>
    %cst_23 = arith.constant 0.000000e+00 : f32
    %71 = vector.broadcast %cst_23 : f32 to vector<1x64x20xf32>
    %72 = arith.maximumf %70, %71 : vector<1x64x20xf32>
    %73 = arith.mulf %72, %72 : vector<1x64x20xf32>
    %cst_24 = arith.constant dense<0.000000e+00> : vector<1x64xf32>
    %74 = vector.multi_reduction <add>, %73, %cst_24 [2] : vector<1x64x20xf32> to vector<1x64xf32>
    %75 = vector.shape_cast %74 : vector<1x64xf32> to vector<1x64x1xf32>
    %cst_25 = arith.constant 1.000000e+00 : f32
    %76 = vector.broadcast %cst_25 : f32 to vector<1x64x1xf32>
    %77 = arith.cmpf oge, %75, %76 : vector<1x64x1xf32>
    %78 = arith.select %77, %68, %64 : vector<1x64x1xi1>, vector<1x64x1xf32>
    %79 = arith.select %77, %65, %68 : vector<1x64x1xi1>, vector<1x64x1xf32>
    %c4_i32 = arith.constant 4 : i32
    %80 = arith.addf %78, %79 : vector<1x64x1xf32>
    %cst_26 = arith.constant 5.000000e-01 : f32
    %81 = vector.broadcast %cst_26 : f32 to vector<1x64x1xf32>
    %82 = arith.mulf %81, %80 : vector<1x64x1xf32>
    %83 = vector.broadcast %82 : vector<1x64x1xf32> to vector<1x64x20xf32>
    %84 = arith.subf %21, %83 : vector<1x64x20xf32>
    %cst_27 = arith.constant 0.000000e+00 : f32
    %85 = vector.broadcast %cst_27 : f32 to vector<1x64x20xf32>
    %86 = arith.maximumf %84, %85 : vector<1x64x20xf32>
    %87 = arith.mulf %86, %86 : vector<1x64x20xf32>
    %cst_28 = arith.constant dense<0.000000e+00> : vector<1x64xf32>
    %88 = vector.multi_reduction <add>, %87, %cst_28 [2] : vector<1x64x20xf32> to vector<1x64xf32>
    %89 = vector.shape_cast %88 : vector<1x64xf32> to vector<1x64x1xf32>
    %cst_29 = arith.constant 1.000000e+00 : f32
    %90 = vector.broadcast %cst_29 : f32 to vector<1x64x1xf32>
    %91 = arith.cmpf oge, %89, %90 : vector<1x64x1xf32>
    %92 = arith.select %91, %82, %78 : vector<1x64x1xi1>, vector<1x64x1xf32>
    %93 = arith.select %91, %79, %82 : vector<1x64x1xi1>, vector<1x64x1xf32>
    %c5_i32 = arith.constant 5 : i32
    %94 = arith.addf %92, %93 : vector<1x64x1xf32>
    %cst_30 = arith.constant 5.000000e-01 : f32
    %95 = vector.broadcast %cst_30 : f32 to vector<1x64x1xf32>
    %96 = arith.mulf %95, %94 : vector<1x64x1xf32>
    %97 = vector.broadcast %96 : vector<1x64x1xf32> to vector<1x64x20xf32>
    %98 = arith.subf %21, %97 : vector<1x64x20xf32>
    %cst_31 = arith.constant 0.000000e+00 : f32
    %99 = vector.broadcast %cst_31 : f32 to vector<1x64x20xf32>
    %100 = arith.maximumf %98, %99 : vector<1x64x20xf32>
    %101 = arith.mulf %100, %100 : vector<1x64x20xf32>
    %cst_32 = arith.constant dense<0.000000e+00> : vector<1x64xf32>
    %102 = vector.multi_reduction <add>, %101, %cst_32 [2] : vector<1x64x20xf32> to vector<1x64xf32>
    %103 = vector.shape_cast %102 : vector<1x64xf32> to vector<1x64x1xf32>
    %cst_33 = arith.constant 1.000000e+00 : f32
    %104 = vector.broadcast %cst_33 : f32 to vector<1x64x1xf32>
    %105 = arith.cmpf oge, %103, %104 : vector<1x64x1xf32>
    %106 = arith.select %105, %96, %92 : vector<1x64x1xi1>, vector<1x64x1xf32>
    %107 = arith.select %105, %93, %96 : vector<1x64x1xi1>, vector<1x64x1xf32>
    %c6_i32 = arith.constant 6 : i32
    %108 = arith.addf %106, %107 : vector<1x64x1xf32>
    %cst_34 = arith.constant 5.000000e-01 : f32
    %109 = vector.broadcast %cst_34 : f32 to vector<1x64x1xf32>
    %110 = arith.mulf %109, %108 : vector<1x64x1xf32>
    %111 = vector.broadcast %110 : vector<1x64x1xf32> to vector<1x64x20xf32>
    %112 = arith.subf %21, %111 : vector<1x64x20xf32>
    %cst_35 = arith.constant 0.000000e+00 : f32
    %113 = vector.broadcast %cst_35 : f32 to vector<1x64x20xf32>
    %114 = arith.maximumf %112, %113 : vector<1x64x20xf32>
    %115 = arith.mulf %114, %114 : vector<1x64x20xf32>
    %cst_36 = arith.constant dense<0.000000e+00> : vector<1x64xf32>
    %116 = vector.multi_reduction <add>, %115, %cst_36 [2] : vector<1x64x20xf32> to vector<1x64xf32>
    %117 = vector.shape_cast %116 : vector<1x64xf32> to vector<1x64x1xf32>
    %cst_37 = arith.constant 1.000000e+00 : f32
    %118 = vector.broadcast %cst_37 : f32 to vector<1x64x1xf32>
    %119 = arith.cmpf oge, %117, %118 : vector<1x64x1xf32>
    %120 = arith.select %119, %110, %106 : vector<1x64x1xi1>, vector<1x64x1xf32>
    %121 = arith.select %119, %107, %110 : vector<1x64x1xi1>, vector<1x64x1xf32>
    %c7_i32 = arith.constant 7 : i32
    %122 = arith.addf %120, %121 : vector<1x64x1xf32>
    %cst_38 = arith.constant 5.000000e-01 : f32
    %123 = vector.broadcast %cst_38 : f32 to vector<1x64x1xf32>
    %124 = arith.mulf %123, %122 : vector<1x64x1xf32>
    %125 = vector.broadcast %124 : vector<1x64x1xf32> to vector<1x64x20xf32>
    %126 = arith.subf %21, %125 : vector<1x64x20xf32>
    %cst_39 = arith.constant 0.000000e+00 : f32
    %127 = vector.broadcast %cst_39 : f32 to vector<1x64x20xf32>
    %128 = arith.maximumf %126, %127 : vector<1x64x20xf32>
    %129 = arith.mulf %128, %128 : vector<1x64x20xf32>
    %cst_40 = arith.constant dense<0.000000e+00> : vector<1x64xf32>
    %130 = vector.multi_reduction <add>, %129, %cst_40 [2] : vector<1x64x20xf32> to vector<1x64xf32>
    %131 = vector.shape_cast %130 : vector<1x64xf32> to vector<1x64x1xf32>
    %cst_41 = arith.constant 1.000000e+00 : f32
    %132 = vector.broadcast %cst_41 : f32 to vector<1x64x1xf32>
    %133 = arith.cmpf oge, %131, %132 : vector<1x64x1xf32>
    %134 = arith.select %133, %124, %120 : vector<1x64x1xi1>, vector<1x64x1xf32>
    %135 = arith.select %133, %121, %124 : vector<1x64x1xi1>, vector<1x64x1xf32>
    %c8_i32 = arith.constant 8 : i32
    %136 = arith.addf %134, %135 : vector<1x64x1xf32>
    %cst_42 = arith.constant 5.000000e-01 : f32
    %137 = vector.broadcast %cst_42 : f32 to vector<1x64x1xf32>
    %138 = arith.mulf %137, %136 : vector<1x64x1xf32>
    %139 = vector.broadcast %138 : vector<1x64x1xf32> to vector<1x64x20xf32>
    %140 = arith.subf %21, %139 : vector<1x64x20xf32>
    %cst_43 = arith.constant 0.000000e+00 : f32
    %141 = vector.broadcast %cst_43 : f32 to vector<1x64x20xf32>
    %142 = arith.maximumf %140, %141 : vector<1x64x20xf32>
    %143 = arith.mulf %142, %142 : vector<1x64x20xf32>
    %cst_44 = arith.constant dense<0.000000e+00> : vector<1x64xf32>
    %144 = vector.multi_reduction <add>, %143, %cst_44 [2] : vector<1x64x20xf32> to vector<1x64xf32>
    %145 = vector.shape_cast %144 : vector<1x64xf32> to vector<1x64x1xf32>
    %cst_45 = arith.constant 1.000000e+00 : f32
    %146 = vector.broadcast %cst_45 : f32 to vector<1x64x1xf32>
    %147 = arith.cmpf oge, %145, %146 : vector<1x64x1xf32>
    %148 = arith.select %147, %138, %134 : vector<1x64x1xi1>, vector<1x64x1xf32>
    %149 = arith.select %147, %135, %138 : vector<1x64x1xi1>, vector<1x64x1xf32>
    %c9_i32 = arith.constant 9 : i32
    %150 = arith.addf %148, %149 : vector<1x64x1xf32>
    %cst_46 = arith.constant 5.000000e-01 : f32
    %151 = vector.broadcast %cst_46 : f32 to vector<1x64x1xf32>
    %152 = arith.mulf %151, %150 : vector<1x64x1xf32>
    %153 = vector.broadcast %152 : vector<1x64x1xf32> to vector<1x64x20xf32>
    %154 = arith.subf %21, %153 : vector<1x64x20xf32>
    %cst_47 = arith.constant 0.000000e+00 : f32
    %155 = vector.broadcast %cst_47 : f32 to vector<1x64x20xf32>
    %156 = arith.maximumf %154, %155 : vector<1x64x20xf32>
    %157 = arith.mulf %156, %156 : vector<1x64x20xf32>
    %cst_48 = arith.constant dense<0.000000e+00> : vector<1x64xf32>
    %158 = vector.multi_reduction <add>, %157, %cst_48 [2] : vector<1x64x20xf32> to vector<1x64xf32>
    %159 = vector.shape_cast %158 : vector<1x64xf32> to vector<1x64x1xf32>
    %cst_49 = arith.constant 1.000000e+00 : f32
    %160 = vector.broadcast %cst_49 : f32 to vector<1x64x1xf32>
    %161 = arith.cmpf oge, %159, %160 : vector<1x64x1xf32>
    %162 = arith.select %161, %152, %148 : vector<1x64x1xi1>, vector<1x64x1xf32>
    %163 = arith.select %161, %149, %152 : vector<1x64x1xi1>, vector<1x64x1xf32>
    %c10_i32 = arith.constant 10 : i32
    %164 = arith.addf %162, %163 : vector<1x64x1xf32>
    %cst_50 = arith.constant 5.000000e-01 : f32
    %165 = vector.broadcast %cst_50 : f32 to vector<1x64x1xf32>
    %166 = arith.mulf %165, %164 : vector<1x64x1xf32>
    %167 = vector.broadcast %166 : vector<1x64x1xf32> to vector<1x64x20xf32>
    %168 = arith.subf %21, %167 : vector<1x64x20xf32>
    %cst_51 = arith.constant 0.000000e+00 : f32
    %169 = vector.broadcast %cst_51 : f32 to vector<1x64x20xf32>
    %170 = arith.maximumf %168, %169 : vector<1x64x20xf32>
    %171 = arith.mulf %170, %170 : vector<1x64x20xf32>
    %cst_52 = arith.constant dense<0.000000e+00> : vector<1x64xf32>
    %172 = vector.multi_reduction <add>, %171, %cst_52 [2] : vector<1x64x20xf32> to vector<1x64xf32>
    %173 = vector.shape_cast %172 : vector<1x64xf32> to vector<1x64x1xf32>
    %cst_53 = arith.constant 1.000000e+00 : f32
    %174 = vector.broadcast %cst_53 : f32 to vector<1x64x1xf32>
    %175 = arith.cmpf oge, %173, %174 : vector<1x64x1xf32>
    %176 = arith.select %175, %166, %162 : vector<1x64x1xi1>, vector<1x64x1xf32>
    %177 = arith.select %175, %163, %166 : vector<1x64x1xi1>, vector<1x64x1xf32>
    %c11_i32 = arith.constant 11 : i32
    %178 = arith.addf %176, %177 : vector<1x64x1xf32>
    %cst_54 = arith.constant 5.000000e-01 : f32
    %179 = vector.broadcast %cst_54 : f32 to vector<1x64x1xf32>
    %180 = arith.mulf %179, %178 : vector<1x64x1xf32>
    %181 = vector.broadcast %180 : vector<1x64x1xf32> to vector<1x64x20xf32>
    %182 = arith.subf %21, %181 : vector<1x64x20xf32>
    %cst_55 = arith.constant 0.000000e+00 : f32
    %183 = vector.broadcast %cst_55 : f32 to vector<1x64x20xf32>
    %184 = arith.maximumf %182, %183 : vector<1x64x20xf32>
    %185 = arith.mulf %184, %184 : vector<1x64x20xf32>
    %cst_56 = arith.constant dense<0.000000e+00> : vector<1x64xf32>
    %186 = vector.multi_reduction <add>, %185, %cst_56 [2] : vector<1x64x20xf32> to vector<1x64xf32>
    %187 = vector.shape_cast %186 : vector<1x64xf32> to vector<1x64x1xf32>
    %cst_57 = arith.constant 1.000000e+00 : f32
    %188 = vector.broadcast %cst_57 : f32 to vector<1x64x1xf32>
    %189 = arith.cmpf oge, %187, %188 : vector<1x64x1xf32>
    %190 = arith.select %189, %180, %176 : vector<1x64x1xi1>, vector<1x64x1xf32>
    %191 = arith.select %189, %177, %180 : vector<1x64x1xi1>, vector<1x64x1xf32>
    %192 = arith.addf %190, %191 : vector<1x64x1xf32>
    %cst_58 = arith.constant 5.000000e-01 : f32
    %193 = vector.broadcast %cst_58 : f32 to vector<1x64x1xf32>
    %194 = arith.mulf %193, %192 : vector<1x64x1xf32>
    %195 = vector.broadcast %194 : vector<1x64x1xf32> to vector<1x64x20xf32>
    %196 = arith.subf %21, %195 : vector<1x64x20xf32>
    %cst_59 = arith.constant 0.000000e+00 : f32
    %197 = vector.broadcast %cst_59 : f32 to vector<1x64x20xf32>
    %198 = arith.maximumf %196, %197 : vector<1x64x20xf32>
    %199 = arith.mulf %198, %198 : vector<1x64x20xf32>
    %cst_60 = arith.constant dense<0.000000e+00> : vector<1x64xf32>
    %200 = vector.multi_reduction <add>, %199, %cst_60 [2] : vector<1x64x20xf32> to vector<1x64xf32>
    %201 = vector.shape_cast %200 : vector<1x64xf32> to vector<1x64x1xf32>
    %cst_61 = arith.constant 1.000000e+00 : f32
    %202 = vector.broadcast %cst_61 : f32 to vector<1x64x1xf32>
    %203 = arith.subf %201, %202 : vector<1x64x1xf32>
    %cst_62 = arith.constant dense<0.000000e+00> : vector<1x64xf32>
    %204 = vector.multi_reduction <add>, %198, %cst_62 [2] : vector<1x64x20xf32> to vector<1x64xf32>
    %205 = vector.shape_cast %204 : vector<1x64xf32> to vector<1x64x1xf32>
    %cst_63 = arith.constant 2.000000e+00 : f32
    %206 = vector.broadcast %cst_63 : f32 to vector<1x64x1xf32>
    %207 = arith.mulf %206, %205 : vector<1x64x1xf32>
    %cst_64 = arith.constant 1.000000e-30 : f32
    %208 = vector.broadcast %cst_64 : f32 to vector<1x64x1xf32>
    %209 = arith.maximumf %207, %208 : vector<1x64x1xf32>
    %210 = arith.divf %203, %209 : vector<1x64x1xf32>
    %211 = arith.addf %194, %210 : vector<1x64x1xf32>
    %212 = vector.broadcast %211 : vector<1x64x1xf32> to vector<1x64x20xf32>
    %213 = arith.subf %21, %212 : vector<1x64x20xf32>
    %cst_65 = arith.constant 0.000000e+00 : f32
    %214 = vector.broadcast %cst_65 : f32 to vector<1x64x20xf32>
    %215 = arith.maximumf %213, %214 : vector<1x64x20xf32>
    %216 = arith.mulf %215, %215 : vector<1x64x20xf32>
    %cst_66 = arith.constant dense<0.000000e+00> : vector<1x64xf32>
    %217 = vector.multi_reduction <add>, %216, %cst_66 [2] : vector<1x64x20xf32> to vector<1x64xf32>
    %218 = vector.shape_cast %217 : vector<1x64xf32> to vector<1x64x1xf32>
    %cst_67 = arith.constant 1.000000e+00 : f32
    %219 = vector.broadcast %cst_67 : f32 to vector<1x64x1xf32>
    %220 = arith.subf %218, %219 : vector<1x64x1xf32>
    %cst_68 = arith.constant dense<0.000000e+00> : vector<1x64xf32>
    %221 = vector.multi_reduction <add>, %215, %cst_68 [2] : vector<1x64x20xf32> to vector<1x64xf32>
    %222 = vector.shape_cast %221 : vector<1x64xf32> to vector<1x64x1xf32>
    %cst_69 = arith.constant 2.000000e+00 : f32
    %223 = vector.broadcast %cst_69 : f32 to vector<1x64x1xf32>
    %224 = arith.mulf %223, %222 : vector<1x64x1xf32>
    %cst_70 = arith.constant 1.000000e-30 : f32
    %225 = vector.broadcast %cst_70 : f32 to vector<1x64x1xf32>
    %226 = arith.maximumf %224, %225 : vector<1x64x1xf32>
    %227 = arith.divf %220, %226 : vector<1x64x1xf32>
    %228 = arith.addf %211, %227 : vector<1x64x1xf32>
    %229 = vector.broadcast %228 : vector<1x64x1xf32> to vector<1x64x20xf32>
    %230 = arith.subf %21, %229 : vector<1x64x20xf32>
    %cst_71 = arith.constant 0.000000e+00 : f32
    %231 = vector.broadcast %cst_71 : f32 to vector<1x64x20xf32>
    %232 = arith.maximumf %230, %231 : vector<1x64x20xf32>
    %233 = arith.mulf %232, %232 : vector<1x64x20xf32>
    %234 = arith.truncf %233 : vector<1x64x20xf32> to vector<1x64x20xbf16>
    %c0_72 = arith.constant 0 : index
    %c0_73 = arith.constant 0 : index
    %235 = vector.load %arg2[%c0_72, %c0_73] : memref<20x32xbf16, #tpu.memory_space<vmem>>, vector<20x32xbf16>
    %236 = vector.shape_cast %10 : vector<1x64x32xbf16> to vector<64x32xbf16>
    %cst_74 = arith.constant dense<0.000000e+00> : vector<20x64xf32>
    %237 = tpu.matmul %235, %236, %cst_74 {dimension_numbers = #tpu.dot_dimension_numbers<[1], [1], [0], [0], [0, 0, 1, 0], [], []>} : vector<20x32xbf16>, vector<64x32xbf16>, vector<20x64xf32> -> vector<20x64xf32>
    %cst_75 = arith.constant dense<0xFF800000> : vector<20xf32>
    %238 = vector.multi_reduction <maximumf>, %237, %cst_75 [1] : vector<20x64xf32> to vector<20xf32>
    %239 = vector.shape_cast %238 : vector<20xf32> to vector<20x1xf32>
    %240 = vector.broadcast %239 : vector<20x1xf32> to vector<20x64xf32>
    %241 = arith.subf %237, %240 : vector<20x64xf32>
    %242 = math.exp %241 : vector<20x64xf32>
    %cst_76 = arith.constant dense<0.000000e+00> : vector<20xf32>
    %243 = vector.multi_reduction <add>, %242, %cst_76 [1] : vector<20x64xf32> to vector<20xf32>
    %244 = vector.shape_cast %243 : vector<20xf32> to vector<20x1xf32>
    %cst_77 = arith.constant 1.000000e+00 : f32
    %245 = vector.broadcast %cst_77 : f32 to vector<20x1xf32>
    %246 = arith.divf %245, %244 : vector<20x1xf32>
    %247 = vector.broadcast %246 : vector<20x1xf32> to vector<20x64xf32>
    %248 = arith.mulf %242, %247 : vector<20x64xf32>
    %249 = arith.truncf %248 : vector<20x64xf32> to vector<20x64xbf16>
    %250 = vector.shape_cast %11 : vector<1x64x32xbf16> to vector<64x32xbf16>
    %cst_78 = arith.constant dense<0.000000e+00> : vector<20x32xf32>
    %251 = tpu.matmul %249, %250, %cst_78 {dimension_numbers = #tpu.dot_dimension_numbers<[1], [0], [0], [1], [0, 0, 1, 1], [], []>} : vector<20x64xbf16>, vector<64x32xbf16>, vector<20x32xf32> -> vector<20x32xf32>
    %252 = vector.extract_strided_slice %251 {offsets = [0, 0], sizes = [2, 32], strides = [1, 1]} : vector<20x32xf32> to vector<2x32xf32>
    %253 = arith.truncf %252 : vector<2x32xf32> to vector<2x32xbf16>
    %c0_79 = arith.constant 0 : index
    %c0_80 = arith.constant 0 : index
    %c0_81 = arith.constant 0 : index
    %254 = vector.load %arg4[%c0_79, %c0_80, %c0_81] : memref<2x32x128xbf16, #tpu.memory_space<vmem>>, vector<1x32x128xbf16>
    %255 = vector.shape_cast %254 : vector<1x32x128xbf16> to vector<32x128xbf16>
    %cst_82 = arith.constant dense<0.000000e+00> : vector<2x128xf32>
    %256 = tpu.matmul %253, %255, %cst_82 {dimension_numbers = #tpu.dot_dimension_numbers<[1], [0], [0], [1], [0, 0, 1, 1], [], []>} : vector<2x32xbf16>, vector<32x128xbf16>, vector<2x128xf32> -> vector<2x128xf32>
    %c0_83 = arith.constant 0 : index
    %c0_84 = arith.constant 0 : index
    %c0_85 = arith.constant 0 : index
    %257 = vector.load %arg5[%c0_83, %c0_84, %c0_85] : memref<2x1x128xf32, #tpu.memory_space<vmem>>, vector<1x1x128xf32>
    %258 = vector.shape_cast %257 : vector<1x1x128xf32> to vector<1x128xf32>
    %259 = vector.broadcast %258 : vector<1x128xf32> to vector<2x128xf32>
    %260 = arith.addf %256, %259 : vector<2x128xf32>
    %261 = arith.mulf %260, %260 : vector<2x128xf32>
    %262 = arith.mulf %260, %261 : vector<2x128xf32>
    %cst_86 = arith.constant 4.471500e-02 : f32
    %263 = vector.broadcast %cst_86 : f32 to vector<2x128xf32>
    %264 = arith.mulf %263, %262 : vector<2x128xf32>
    %265 = arith.addf %260, %264 : vector<2x128xf32>
    %cst_87 = arith.constant 0.797884583 : f32
    %266 = vector.broadcast %cst_87 : f32 to vector<2x128xf32>
    %267 = arith.mulf %266, %265 : vector<2x128xf32>
    %268 = math.tanh %267 : vector<2x128xf32>
    %cst_88 = arith.constant 1.000000e+00 : f32
    %269 = vector.broadcast %cst_88 : f32 to vector<2x128xf32>
    %270 = arith.addf %269, %268 : vector<2x128xf32>
    %cst_89 = arith.constant 5.000000e-01 : f32
    %271 = vector.broadcast %cst_89 : f32 to vector<2x128xf32>
    %272 = arith.mulf %271, %270 : vector<2x128xf32>
    %273 = arith.mulf %260, %272 : vector<2x128xf32>
    %274 = arith.truncf %273 : vector<2x128xf32> to vector<2x128xbf16>
    %c0_90 = arith.constant 0 : index
    %c0_91 = arith.constant 0 : index
    %c0_92 = arith.constant 0 : index
    %275 = vector.load %arg6[%c0_90, %c0_91, %c0_92] : memref<2x128x32xbf16, #tpu.memory_space<vmem>>, vector<1x128x32xbf16>
    %276 = vector.shape_cast %275 : vector<1x128x32xbf16> to vector<128x32xbf16>
    %cst_93 = arith.constant dense<0.000000e+00> : vector<2x32xf32>
    %277 = tpu.matmul %274, %276, %cst_93 {dimension_numbers = #tpu.dot_dimension_numbers<[1], [0], [0], [1], [0, 0, 1, 1], [], []>} : vector<2x128xbf16>, vector<128x32xbf16>, vector<2x32xf32> -> vector<2x32xf32>
    %c0_94 = arith.constant 0 : index
    %c0_95 = arith.constant 0 : index
    %c0_96 = arith.constant 0 : index
    %278 = vector.load %arg7[%c0_94, %c0_95, %c0_96] : memref<2x1x32xf32, #tpu.memory_space<vmem>>, vector<1x1x32xf32>
    %279 = vector.shape_cast %278 : vector<1x1x32xf32> to vector<1x32xf32>
    %280 = vector.broadcast %279 : vector<1x32xf32> to vector<2x32xf32>
    %281 = arith.addf %277, %280 : vector<2x32xf32>
    %282 = vector.extract_strided_slice %251 {offsets = [2, 0], sizes = [2, 32], strides = [1, 1]} : vector<20x32xf32> to vector<2x32xf32>
    %283 = arith.truncf %282 : vector<2x32xf32> to vector<2x32xbf16>
    %c1 = arith.constant 1 : index
    %c0_97 = arith.constant 0 : index
    %c0_98 = arith.constant 0 : index
    %284 = vector.load %arg4[%c1, %c0_97, %c0_98] : memref<2x32x128xbf16, #tpu.memory_space<vmem>>, vector<1x32x128xbf16>
    %285 = vector.shape_cast %284 : vector<1x32x128xbf16> to vector<32x128xbf16>
    %cst_99 = arith.constant dense<0.000000e+00> : vector<2x128xf32>
    %286 = tpu.matmul %283, %285, %cst_99 {dimension_numbers = #tpu.dot_dimension_numbers<[1], [0], [0], [1], [0, 0, 1, 1], [], []>} : vector<2x32xbf16>, vector<32x128xbf16>, vector<2x128xf32> -> vector<2x128xf32>
    %c1_100 = arith.constant 1 : index
    %c0_101 = arith.constant 0 : index
    %c0_102 = arith.constant 0 : index
    %287 = vector.load %arg5[%c1_100, %c0_101, %c0_102] : memref<2x1x128xf32, #tpu.memory_space<vmem>>, vector<1x1x128xf32>
    %288 = vector.shape_cast %287 : vector<1x1x128xf32> to vector<1x128xf32>
    %289 = vector.broadcast %288 : vector<1x128xf32> to vector<2x128xf32>
    %290 = arith.addf %286, %289 : vector<2x128xf32>
    %291 = arith.mulf %290, %290 : vector<2x128xf32>
    %292 = arith.mulf %290, %291 : vector<2x128xf32>
    %cst_103 = arith.constant 4.471500e-02 : f32
    %293 = vector.broadcast %cst_103 : f32 to vector<2x128xf32>
    %294 = arith.mulf %293, %292 : vector<2x128xf32>
    %295 = arith.addf %290, %294 : vector<2x128xf32>
    %cst_104 = arith.constant 0.797884583 : f32
    %296 = vector.broadcast %cst_104 : f32 to vector<2x128xf32>
    %297 = arith.mulf %296, %295 : vector<2x128xf32>
    %298 = math.tanh %297 : vector<2x128xf32>
    %cst_105 = arith.constant 1.000000e+00 : f32
    %299 = vector.broadcast %cst_105 : f32 to vector<2x128xf32>
    %300 = arith.addf %299, %298 : vector<2x128xf32>
    %cst_106 = arith.constant 5.000000e-01 : f32
    %301 = vector.broadcast %cst_106 : f32 to vector<2x128xf32>
    %302 = arith.mulf %301, %300 : vector<2x128xf32>
    %303 = arith.mulf %290, %302 : vector<2x128xf32>
    %304 = arith.truncf %303 : vector<2x128xf32> to vector<2x128xbf16>
    %c1_107 = arith.constant 1 : index
    %c0_108 = arith.constant 0 : index
    %c0_109 = arith.constant 0 : index
    %305 = vector.load %arg6[%c1_107, %c0_108, %c0_109] : memref<2x128x32xbf16, #tpu.memory_space<vmem>>, vector<1x128x32xbf16>
    %306 = vector.shape_cast %305 : vector<1x128x32xbf16> to vector<128x32xbf16>
    %cst_110 = arith.constant dense<0.000000e+00> : vector<2x32xf32>
    %307 = tpu.matmul %304, %306, %cst_110 {dimension_numbers = #tpu.dot_dimension_numbers<[1], [0], [0], [1], [0, 0, 1, 1], [], []>} : vector<2x128xbf16>, vector<128x32xbf16>, vector<2x32xf32> -> vector<2x32xf32>
    %c1_111 = arith.constant 1 : index
    %c0_112 = arith.constant 0 : index
    %c0_113 = arith.constant 0 : index
    %308 = vector.load %arg7[%c1_111, %c0_112, %c0_113] : memref<2x1x32xf32, #tpu.memory_space<vmem>>, vector<1x1x32xf32>
    %309 = vector.shape_cast %308 : vector<1x1x32xf32> to vector<1x32xf32>
    %310 = vector.broadcast %309 : vector<1x32xf32> to vector<2x32xf32>
    %311 = arith.addf %307, %310 : vector<2x32xf32>
    %312 = vector.extract_strided_slice %251 {offsets = [4, 0], sizes = [2, 32], strides = [1, 1]} : vector<20x32xf32> to vector<2x32xf32>
    %313 = arith.truncf %312 : vector<2x32xf32> to vector<2x32xbf16>
    %c0_114 = arith.constant 0 : index
    %c0_115 = arith.constant 0 : index
    %c0_116 = arith.constant 0 : index
    %314 = vector.load %arg8[%c0_114, %c0_115, %c0_116] : memref<8x32x32xbf16, #tpu.memory_space<vmem>>, vector<1x32x32xbf16>
    %315 = vector.shape_cast %314 : vector<1x32x32xbf16> to vector<32x32xbf16>
    %cst_117 = arith.constant dense<0.000000e+00> : vector<2x32xf32>
    %316 = tpu.matmul %313, %315, %cst_117 {dimension_numbers = #tpu.dot_dimension_numbers<[1], [0], [0], [1], [0, 0, 1, 1], [], []>} : vector<2x32xbf16>, vector<32x32xbf16>, vector<2x32xf32> -> vector<2x32xf32>
    %c0_118 = arith.constant 0 : index
    %c0_119 = arith.constant 0 : index
    %c0_120 = arith.constant 0 : index
    %317 = vector.load %arg9[%c0_118, %c0_119, %c0_120] : memref<8x1x32xf32, #tpu.memory_space<vmem>>, vector<1x1x32xf32>
    %318 = vector.shape_cast %317 : vector<1x1x32xf32> to vector<1x32xf32>
    %319 = vector.broadcast %318 : vector<1x32xf32> to vector<2x32xf32>
    %320 = arith.addf %316, %319 : vector<2x32xf32>
    %321 = arith.mulf %320, %320 : vector<2x32xf32>
    %322 = arith.mulf %320, %321 : vector<2x32xf32>
    %cst_121 = arith.constant 4.471500e-02 : f32
    %323 = vector.broadcast %cst_121 : f32 to vector<2x32xf32>
    %324 = arith.mulf %323, %322 : vector<2x32xf32>
    %325 = arith.addf %320, %324 : vector<2x32xf32>
    %cst_122 = arith.constant 0.797884583 : f32
    %326 = vector.broadcast %cst_122 : f32 to vector<2x32xf32>
    %327 = arith.mulf %326, %325 : vector<2x32xf32>
    %328 = math.tanh %327 : vector<2x32xf32>
    %cst_123 = arith.constant 1.000000e+00 : f32
    %329 = vector.broadcast %cst_123 : f32 to vector<2x32xf32>
    %330 = arith.addf %329, %328 : vector<2x32xf32>
    %cst_124 = arith.constant 5.000000e-01 : f32
    %331 = vector.broadcast %cst_124 : f32 to vector<2x32xf32>
    %332 = arith.mulf %331, %330 : vector<2x32xf32>
    %333 = arith.mulf %320, %332 : vector<2x32xf32>
    %334 = arith.truncf %333 : vector<2x32xf32> to vector<2x32xbf16>
    %c0_125 = arith.constant 0 : index
    %c0_126 = arith.constant 0 : index
    %c0_127 = arith.constant 0 : index
    %335 = vector.load %arg10[%c0_125, %c0_126, %c0_127] : memref<8x32x32xbf16, #tpu.memory_space<vmem>>, vector<1x32x32xbf16>
    %336 = vector.shape_cast %335 : vector<1x32x32xbf16> to vector<32x32xbf16>
    %cst_128 = arith.constant dense<0.000000e+00> : vector<2x32xf32>
    %337 = tpu.matmul %334, %336, %cst_128 {dimension_numbers = #tpu.dot_dimension_numbers<[1], [0], [0], [1], [0, 0, 1, 1], [], []>} : vector<2x32xbf16>, vector<32x32xbf16>, vector<2x32xf32> -> vector<2x32xf32>
    %c0_129 = arith.constant 0 : index
    %c0_130 = arith.constant 0 : index
    %c0_131 = arith.constant 0 : index
    %338 = vector.load %arg11[%c0_129, %c0_130, %c0_131] : memref<8x1x32xf32, #tpu.memory_space<vmem>>, vector<1x1x32xf32>
    %339 = vector.shape_cast %338 : vector<1x1x32xf32> to vector<1x32xf32>
    %340 = vector.broadcast %339 : vector<1x32xf32> to vector<2x32xf32>
    %341 = arith.addf %337, %340 : vector<2x32xf32>
    %342 = vector.extract_strided_slice %251 {offsets = [6, 0], sizes = [2, 32], strides = [1, 1]} : vector<20x32xf32> to vector<2x32xf32>
    %343 = arith.truncf %342 : vector<2x32xf32> to vector<2x32xbf16>
    %c1_132 = arith.constant 1 : index
    %c0_133 = arith.constant 0 : index
    %c0_134 = arith.constant 0 : index
    %344 = vector.load %arg8[%c1_132, %c0_133, %c0_134] : memref<8x32x32xbf16, #tpu.memory_space<vmem>>, vector<1x32x32xbf16>
    %345 = vector.shape_cast %344 : vector<1x32x32xbf16> to vector<32x32xbf16>
    %cst_135 = arith.constant dense<0.000000e+00> : vector<2x32xf32>
    %346 = tpu.matmul %343, %345, %cst_135 {dimension_numbers = #tpu.dot_dimension_numbers<[1], [0], [0], [1], [0, 0, 1, 1], [], []>} : vector<2x32xbf16>, vector<32x32xbf16>, vector<2x32xf32> -> vector<2x32xf32>
    %c1_136 = arith.constant 1 : index
    %c0_137 = arith.constant 0 : index
    %c0_138 = arith.constant 0 : index
    %347 = vector.load %arg9[%c1_136, %c0_137, %c0_138] : memref<8x1x32xf32, #tpu.memory_space<vmem>>, vector<1x1x32xf32>
    %348 = vector.shape_cast %347 : vector<1x1x32xf32> to vector<1x32xf32>
    %349 = vector.broadcast %348 : vector<1x32xf32> to vector<2x32xf32>
    %350 = arith.addf %346, %349 : vector<2x32xf32>
    %351 = arith.mulf %350, %350 : vector<2x32xf32>
    %352 = arith.mulf %350, %351 : vector<2x32xf32>
    %cst_139 = arith.constant 4.471500e-02 : f32
    %353 = vector.broadcast %cst_139 : f32 to vector<2x32xf32>
    %354 = arith.mulf %353, %352 : vector<2x32xf32>
    %355 = arith.addf %350, %354 : vector<2x32xf32>
    %cst_140 = arith.constant 0.797884583 : f32
    %356 = vector.broadcast %cst_140 : f32 to vector<2x32xf32>
    %357 = arith.mulf %356, %355 : vector<2x32xf32>
    %358 = math.tanh %357 : vector<2x32xf32>
    %cst_141 = arith.constant 1.000000e+00 : f32
    %359 = vector.broadcast %cst_141 : f32 to vector<2x32xf32>
    %360 = arith.addf %359, %358 : vector<2x32xf32>
    %cst_142 = arith.constant 5.000000e-01 : f32
    %361 = vector.broadcast %cst_142 : f32 to vector<2x32xf32>
    %362 = arith.mulf %361, %360 : vector<2x32xf32>
    %363 = arith.mulf %350, %362 : vector<2x32xf32>
    %364 = arith.truncf %363 : vector<2x32xf32> to vector<2x32xbf16>
    %c1_143 = arith.constant 1 : index
    %c0_144 = arith.constant 0 : index
    %c0_145 = arith.constant 0 : index
    %365 = vector.load %arg10[%c1_143, %c0_144, %c0_145] : memref<8x32x32xbf16, #tpu.memory_space<vmem>>, vector<1x32x32xbf16>
    %366 = vector.shape_cast %365 : vector<1x32x32xbf16> to vector<32x32xbf16>
    %cst_146 = arith.constant dense<0.000000e+00> : vector<2x32xf32>
    %367 = tpu.matmul %364, %366, %cst_146 {dimension_numbers = #tpu.dot_dimension_numbers<[1], [0], [0], [1], [0, 0, 1, 1], [], []>} : vector<2x32xbf16>, vector<32x32xbf16>, vector<2x32xf32> -> vector<2x32xf32>
    %c1_147 = arith.constant 1 : index
    %c0_148 = arith.constant 0 : index
    %c0_149 = arith.constant 0 : index
    %368 = vector.load %arg11[%c1_147, %c0_148, %c0_149] : memref<8x1x32xf32, #tpu.memory_space<vmem>>, vector<1x1x32xf32>
    %369 = vector.shape_cast %368 : vector<1x1x32xf32> to vector<1x32xf32>
    %370 = vector.broadcast %369 : vector<1x32xf32> to vector<2x32xf32>
    %371 = arith.addf %367, %370 : vector<2x32xf32>
    %372 = vector.extract_strided_slice %251 {offsets = [8, 0], sizes = [2, 32], strides = [1, 1]} : vector<20x32xf32> to vector<2x32xf32>
    %373 = arith.truncf %372 : vector<2x32xf32> to vector<2x32xbf16>
    %c2 = arith.constant 2 : index
    %c0_150 = arith.constant 0 : index
    %c0_151 = arith.constant 0 : index
    %374 = vector.load %arg8[%c2, %c0_150, %c0_151] : memref<8x32x32xbf16, #tpu.memory_space<vmem>>, vector<1x32x32xbf16>
    %375 = vector.shape_cast %374 : vector<1x32x32xbf16> to vector<32x32xbf16>
    %cst_152 = arith.constant dense<0.000000e+00> : vector<2x32xf32>
    %376 = tpu.matmul %373, %375, %cst_152 {dimension_numbers = #tpu.dot_dimension_numbers<[1], [0], [0], [1], [0, 0, 1, 1], [], []>} : vector<2x32xbf16>, vector<32x32xbf16>, vector<2x32xf32> -> vector<2x32xf32>
    %c2_153 = arith.constant 2 : index
    %c0_154 = arith.constant 0 : index
    %c0_155 = arith.constant 0 : index
    %377 = vector.load %arg9[%c2_153, %c0_154, %c0_155] : memref<8x1x32xf32, #tpu.memory_space<vmem>>, vector<1x1x32xf32>
    %378 = vector.shape_cast %377 : vector<1x1x32xf32> to vector<1x32xf32>
    %379 = vector.broadcast %378 : vector<1x32xf32> to vector<2x32xf32>
    %380 = arith.addf %376, %379 : vector<2x32xf32>
    %381 = arith.mulf %380, %380 : vector<2x32xf32>
    %382 = arith.mulf %380, %381 : vector<2x32xf32>
    %cst_156 = arith.constant 4.471500e-02 : f32
    %383 = vector.broadcast %cst_156 : f32 to vector<2x32xf32>
    %384 = arith.mulf %383, %382 : vector<2x32xf32>
    %385 = arith.addf %380, %384 : vector<2x32xf32>
    %cst_157 = arith.constant 0.797884583 : f32
    %386 = vector.broadcast %cst_157 : f32 to vector<2x32xf32>
    %387 = arith.mulf %386, %385 : vector<2x32xf32>
    %388 = math.tanh %387 : vector<2x32xf32>
    %cst_158 = arith.constant 1.000000e+00 : f32
    %389 = vector.broadcast %cst_158 : f32 to vector<2x32xf32>
    %390 = arith.addf %389, %388 : vector<2x32xf32>
    %cst_159 = arith.constant 5.000000e-01 : f32
    %391 = vector.broadcast %cst_159 : f32 to vector<2x32xf32>
    %392 = arith.mulf %391, %390 : vector<2x32xf32>
    %393 = arith.mulf %380, %392 : vector<2x32xf32>
    %394 = arith.truncf %393 : vector<2x32xf32> to vector<2x32xbf16>
    %c2_160 = arith.constant 2 : index
    %c0_161 = arith.constant 0 : index
    %c0_162 = arith.constant 0 : index
    %395 = vector.load %arg10[%c2_160, %c0_161, %c0_162] : memref<8x32x32xbf16, #tpu.memory_space<vmem>>, vector<1x32x32xbf16>
    %396 = vector.shape_cast %395 : vector<1x32x32xbf16> to vector<32x32xbf16>
    %cst_163 = arith.constant dense<0.000000e+00> : vector<2x32xf32>
    %397 = tpu.matmul %394, %396, %cst_163 {dimension_numbers = #tpu.dot_dimension_numbers<[1], [0], [0], [1], [0, 0, 1, 1], [], []>} : vector<2x32xbf16>, vector<32x32xbf16>, vector<2x32xf32> -> vector<2x32xf32>
    %c2_164 = arith.constant 2 : index
    %c0_165 = arith.constant 0 : index
    %c0_166 = arith.constant 0 : index
    %398 = vector.load %arg11[%c2_164, %c0_165, %c0_166] : memref<8x1x32xf32, #tpu.memory_space<vmem>>, vector<1x1x32xf32>
    %399 = vector.shape_cast %398 : vector<1x1x32xf32> to vector<1x32xf32>
    %400 = vector.broadcast %399 : vector<1x32xf32> to vector<2x32xf32>
    %401 = arith.addf %397, %400 : vector<2x32xf32>
    %402 = vector.extract_strided_slice %251 {offsets = [10, 0], sizes = [2, 32], strides = [1, 1]} : vector<20x32xf32> to vector<2x32xf32>
    %403 = arith.truncf %402 : vector<2x32xf32> to vector<2x32xbf16>
    %c3 = arith.constant 3 : index
    %c0_167 = arith.constant 0 : index
    %c0_168 = arith.constant 0 : index
    %404 = vector.load %arg8[%c3, %c0_167, %c0_168] : memref<8x32x32xbf16, #tpu.memory_space<vmem>>, vector<1x32x32xbf16>
    %405 = vector.shape_cast %404 : vector<1x32x32xbf16> to vector<32x32xbf16>
    %cst_169 = arith.constant dense<0.000000e+00> : vector<2x32xf32>
    %406 = tpu.matmul %403, %405, %cst_169 {dimension_numbers = #tpu.dot_dimension_numbers<[1], [0], [0], [1], [0, 0, 1, 1], [], []>} : vector<2x32xbf16>, vector<32x32xbf16>, vector<2x32xf32> -> vector<2x32xf32>
    %c3_170 = arith.constant 3 : index
    %c0_171 = arith.constant 0 : index
    %c0_172 = arith.constant 0 : index
    %407 = vector.load %arg9[%c3_170, %c0_171, %c0_172] : memref<8x1x32xf32, #tpu.memory_space<vmem>>, vector<1x1x32xf32>
    %408 = vector.shape_cast %407 : vector<1x1x32xf32> to vector<1x32xf32>
    %409 = vector.broadcast %408 : vector<1x32xf32> to vector<2x32xf32>
    %410 = arith.addf %406, %409 : vector<2x32xf32>
    %411 = arith.mulf %410, %410 : vector<2x32xf32>
    %412 = arith.mulf %410, %411 : vector<2x32xf32>
    %cst_173 = arith.constant 4.471500e-02 : f32
    %413 = vector.broadcast %cst_173 : f32 to vector<2x32xf32>
    %414 = arith.mulf %413, %412 : vector<2x32xf32>
    %415 = arith.addf %410, %414 : vector<2x32xf32>
    %cst_174 = arith.constant 0.797884583 : f32
    %416 = vector.broadcast %cst_174 : f32 to vector<2x32xf32>
    %417 = arith.mulf %416, %415 : vector<2x32xf32>
    %418 = math.tanh %417 : vector<2x32xf32>
    %cst_175 = arith.constant 1.000000e+00 : f32
    %419 = vector.broadcast %cst_175 : f32 to vector<2x32xf32>
    %420 = arith.addf %419, %418 : vector<2x32xf32>
    %cst_176 = arith.constant 5.000000e-01 : f32
    %421 = vector.broadcast %cst_176 : f32 to vector<2x32xf32>
    %422 = arith.mulf %421, %420 : vector<2x32xf32>
    %423 = arith.mulf %410, %422 : vector<2x32xf32>
    %424 = arith.truncf %423 : vector<2x32xf32> to vector<2x32xbf16>
    %c3_177 = arith.constant 3 : index
    %c0_178 = arith.constant 0 : index
    %c0_179 = arith.constant 0 : index
    %425 = vector.load %arg10[%c3_177, %c0_178, %c0_179] : memref<8x32x32xbf16, #tpu.memory_space<vmem>>, vector<1x32x32xbf16>
    %426 = vector.shape_cast %425 : vector<1x32x32xbf16> to vector<32x32xbf16>
    %cst_180 = arith.constant dense<0.000000e+00> : vector<2x32xf32>
    %427 = tpu.matmul %424, %426, %cst_180 {dimension_numbers = #tpu.dot_dimension_numbers<[1], [0], [0], [1], [0, 0, 1, 1], [], []>} : vector<2x32xbf16>, vector<32x32xbf16>, vector<2x32xf32> -> vector<2x32xf32>
    %c3_181 = arith.constant 3 : index
    %c0_182 = arith.constant 0 : index
    %c0_183 = arith.constant 0 : index
    %428 = vector.load %arg11[%c3_181, %c0_182, %c0_183] : memref<8x1x32xf32, #tpu.memory_space<vmem>>, vector<1x1x32xf32>
    %429 = vector.shape_cast %428 : vector<1x1x32xf32> to vector<1x32xf32>
    %430 = vector.broadcast %429 : vector<1x32xf32> to vector<2x32xf32>
    %431 = arith.addf %427, %430 : vector<2x32xf32>
    %432 = vector.extract_strided_slice %251 {offsets = [12, 0], sizes = [2, 32], strides = [1, 1]} : vector<20x32xf32> to vector<2x32xf32>
    %433 = arith.truncf %432 : vector<2x32xf32> to vector<2x32xbf16>
    %c4 = arith.constant 4 : index
    %c0_184 = arith.constant 0 : index
    %c0_185 = arith.constant 0 : index
    %434 = vector.load %arg8[%c4, %c0_184, %c0_185] : memref<8x32x32xbf16, #tpu.memory_space<vmem>>, vector<1x32x32xbf16>
    %435 = vector.shape_cast %434 : vector<1x32x32xbf16> to vector<32x32xbf16>
    %cst_186 = arith.constant dense<0.000000e+00> : vector<2x32xf32>
    %436 = tpu.matmul %433, %435, %cst_186 {dimension_numbers = #tpu.dot_dimension_numbers<[1], [0], [0], [1], [0, 0, 1, 1], [], []>} : vector<2x32xbf16>, vector<32x32xbf16>, vector<2x32xf32> -> vector<2x32xf32>
    %c4_187 = arith.constant 4 : index
    %c0_188 = arith.constant 0 : index
    %c0_189 = arith.constant 0 : index
    %437 = vector.load %arg9[%c4_187, %c0_188, %c0_189] : memref<8x1x32xf32, #tpu.memory_space<vmem>>, vector<1x1x32xf32>
    %438 = vector.shape_cast %437 : vector<1x1x32xf32> to vector<1x32xf32>
    %439 = vector.broadcast %438 : vector<1x32xf32> to vector<2x32xf32>
    %440 = arith.addf %436, %439 : vector<2x32xf32>
    %441 = arith.mulf %440, %440 : vector<2x32xf32>
    %442 = arith.mulf %440, %441 : vector<2x32xf32>
    %cst_190 = arith.constant 4.471500e-02 : f32
    %443 = vector.broadcast %cst_190 : f32 to vector<2x32xf32>
    %444 = arith.mulf %443, %442 : vector<2x32xf32>
    %445 = arith.addf %440, %444 : vector<2x32xf32>
    %cst_191 = arith.constant 0.797884583 : f32
    %446 = vector.broadcast %cst_191 : f32 to vector<2x32xf32>
    %447 = arith.mulf %446, %445 : vector<2x32xf32>
    %448 = math.tanh %447 : vector<2x32xf32>
    %cst_192 = arith.constant 1.000000e+00 : f32
    %449 = vector.broadcast %cst_192 : f32 to vector<2x32xf32>
    %450 = arith.addf %449, %448 : vector<2x32xf32>
    %cst_193 = arith.constant 5.000000e-01 : f32
    %451 = vector.broadcast %cst_193 : f32 to vector<2x32xf32>
    %452 = arith.mulf %451, %450 : vector<2x32xf32>
    %453 = arith.mulf %440, %452 : vector<2x32xf32>
    %454 = arith.truncf %453 : vector<2x32xf32> to vector<2x32xbf16>
    %c4_194 = arith.constant 4 : index
    %c0_195 = arith.constant 0 : index
    %c0_196 = arith.constant 0 : index
    %455 = vector.load %arg10[%c4_194, %c0_195, %c0_196] : memref<8x32x32xbf16, #tpu.memory_space<vmem>>, vector<1x32x32xbf16>
    %456 = vector.shape_cast %455 : vector<1x32x32xbf16> to vector<32x32xbf16>
    %cst_197 = arith.constant dense<0.000000e+00> : vector<2x32xf32>
    %457 = tpu.matmul %454, %456, %cst_197 {dimension_numbers = #tpu.dot_dimension_numbers<[1], [0], [0], [1], [0, 0, 1, 1], [], []>} : vector<2x32xbf16>, vector<32x32xbf16>, vector<2x32xf32> -> vector<2x32xf32>
    %c4_198 = arith.constant 4 : index
    %c0_199 = arith.constant 0 : index
    %c0_200 = arith.constant 0 : index
    %458 = vector.load %arg11[%c4_198, %c0_199, %c0_200] : memref<8x1x32xf32, #tpu.memory_space<vmem>>, vector<1x1x32xf32>
    %459 = vector.shape_cast %458 : vector<1x1x32xf32> to vector<1x32xf32>
    %460 = vector.broadcast %459 : vector<1x32xf32> to vector<2x32xf32>
    %461 = arith.addf %457, %460 : vector<2x32xf32>
    %462 = vector.extract_strided_slice %251 {offsets = [14, 0], sizes = [2, 32], strides = [1, 1]} : vector<20x32xf32> to vector<2x32xf32>
    %463 = arith.truncf %462 : vector<2x32xf32> to vector<2x32xbf16>
    %c5 = arith.constant 5 : index
    %c0_201 = arith.constant 0 : index
    %c0_202 = arith.constant 0 : index
    %464 = vector.load %arg8[%c5, %c0_201, %c0_202] : memref<8x32x32xbf16, #tpu.memory_space<vmem>>, vector<1x32x32xbf16>
    %465 = vector.shape_cast %464 : vector<1x32x32xbf16> to vector<32x32xbf16>
    %cst_203 = arith.constant dense<0.000000e+00> : vector<2x32xf32>
    %466 = tpu.matmul %463, %465, %cst_203 {dimension_numbers = #tpu.dot_dimension_numbers<[1], [0], [0], [1], [0, 0, 1, 1], [], []>} : vector<2x32xbf16>, vector<32x32xbf16>, vector<2x32xf32> -> vector<2x32xf32>
    %c5_204 = arith.constant 5 : index
    %c0_205 = arith.constant 0 : index
    %c0_206 = arith.constant 0 : index
    %467 = vector.load %arg9[%c5_204, %c0_205, %c0_206] : memref<8x1x32xf32, #tpu.memory_space<vmem>>, vector<1x1x32xf32>
    %468 = vector.shape_cast %467 : vector<1x1x32xf32> to vector<1x32xf32>
    %469 = vector.broadcast %468 : vector<1x32xf32> to vector<2x32xf32>
    %470 = arith.addf %466, %469 : vector<2x32xf32>
    %471 = arith.mulf %470, %470 : vector<2x32xf32>
    %472 = arith.mulf %470, %471 : vector<2x32xf32>
    %cst_207 = arith.constant 4.471500e-02 : f32
    %473 = vector.broadcast %cst_207 : f32 to vector<2x32xf32>
    %474 = arith.mulf %473, %472 : vector<2x32xf32>
    %475 = arith.addf %470, %474 : vector<2x32xf32>
    %cst_208 = arith.constant 0.797884583 : f32
    %476 = vector.broadcast %cst_208 : f32 to vector<2x32xf32>
    %477 = arith.mulf %476, %475 : vector<2x32xf32>
    %478 = math.tanh %477 : vector<2x32xf32>
    %cst_209 = arith.constant 1.000000e+00 : f32
    %479 = vector.broadcast %cst_209 : f32 to vector<2x32xf32>
    %480 = arith.addf %479, %478 : vector<2x32xf32>
    %cst_210 = arith.constant 5.000000e-01 : f32
    %481 = vector.broadcast %cst_210 : f32 to vector<2x32xf32>
    %482 = arith.mulf %481, %480 : vector<2x32xf32>
    %483 = arith.mulf %470, %482 : vector<2x32xf32>
    %484 = arith.truncf %483 : vector<2x32xf32> to vector<2x32xbf16>
    %c5_211 = arith.constant 5 : index
    %c0_212 = arith.constant 0 : index
    %c0_213 = arith.constant 0 : index
    %485 = vector.load %arg10[%c5_211, %c0_212, %c0_213] : memref<8x32x32xbf16, #tpu.memory_space<vmem>>, vector<1x32x32xbf16>
    %486 = vector.shape_cast %485 : vector<1x32x32xbf16> to vector<32x32xbf16>
    %cst_214 = arith.constant dense<0.000000e+00> : vector<2x32xf32>
    %487 = tpu.matmul %484, %486, %cst_214 {dimension_numbers = #tpu.dot_dimension_numbers<[1], [0], [0], [1], [0, 0, 1, 1], [], []>} : vector<2x32xbf16>, vector<32x32xbf16>, vector<2x32xf32> -> vector<2x32xf32>
    %c5_215 = arith.constant 5 : index
    %c0_216 = arith.constant 0 : index
    %c0_217 = arith.constant 0 : index
    %488 = vector.load %arg11[%c5_215, %c0_216, %c0_217] : memref<8x1x32xf32, #tpu.memory_space<vmem>>, vector<1x1x32xf32>
    %489 = vector.shape_cast %488 : vector<1x1x32xf32> to vector<1x32xf32>
    %490 = vector.broadcast %489 : vector<1x32xf32> to vector<2x32xf32>
    %491 = arith.addf %487, %490 : vector<2x32xf32>
    %492 = vector.extract_strided_slice %251 {offsets = [16, 0], sizes = [2, 32], strides = [1, 1]} : vector<20x32xf32> to vector<2x32xf32>
    %493 = arith.truncf %492 : vector<2x32xf32> to vector<2x32xbf16>
    %c6 = arith.constant 6 : index
    %c0_218 = arith.constant 0 : index
    %c0_219 = arith.constant 0 : index
    %494 = vector.load %arg8[%c6, %c0_218, %c0_219] : memref<8x32x32xbf16, #tpu.memory_space<vmem>>, vector<1x32x32xbf16>
    %495 = vector.shape_cast %494 : vector<1x32x32xbf16> to vector<32x32xbf16>
    %cst_220 = arith.constant dense<0.000000e+00> : vector<2x32xf32>
    %496 = tpu.matmul %493, %495, %cst_220 {dimension_numbers = #tpu.dot_dimension_numbers<[1], [0], [0], [1], [0, 0, 1, 1], [], []>} : vector<2x32xbf16>, vector<32x32xbf16>, vector<2x32xf32> -> vector<2x32xf32>
    %c6_221 = arith.constant 6 : index
    %c0_222 = arith.constant 0 : index
    %c0_223 = arith.constant 0 : index
    %497 = vector.load %arg9[%c6_221, %c0_222, %c0_223] : memref<8x1x32xf32, #tpu.memory_space<vmem>>, vector<1x1x32xf32>
    %498 = vector.shape_cast %497 : vector<1x1x32xf32> to vector<1x32xf32>
    %499 = vector.broadcast %498 : vector<1x32xf32> to vector<2x32xf32>
    %500 = arith.addf %496, %499 : vector<2x32xf32>
    %501 = arith.mulf %500, %500 : vector<2x32xf32>
    %502 = arith.mulf %500, %501 : vector<2x32xf32>
    %cst_224 = arith.constant 4.471500e-02 : f32
    %503 = vector.broadcast %cst_224 : f32 to vector<2x32xf32>
    %504 = arith.mulf %503, %502 : vector<2x32xf32>
    %505 = arith.addf %500, %504 : vector<2x32xf32>
    %cst_225 = arith.constant 0.797884583 : f32
    %506 = vector.broadcast %cst_225 : f32 to vector<2x32xf32>
    %507 = arith.mulf %506, %505 : vector<2x32xf32>
    %508 = math.tanh %507 : vector<2x32xf32>
    %cst_226 = arith.constant 1.000000e+00 : f32
    %509 = vector.broadcast %cst_226 : f32 to vector<2x32xf32>
    %510 = arith.addf %509, %508 : vector<2x32xf32>
    %cst_227 = arith.constant 5.000000e-01 : f32
    %511 = vector.broadcast %cst_227 : f32 to vector<2x32xf32>
    %512 = arith.mulf %511, %510 : vector<2x32xf32>
    %513 = arith.mulf %500, %512 : vector<2x32xf32>
    %514 = arith.truncf %513 : vector<2x32xf32> to vector<2x32xbf16>
    %c6_228 = arith.constant 6 : index
    %c0_229 = arith.constant 0 : index
    %c0_230 = arith.constant 0 : index
    %515 = vector.load %arg10[%c6_228, %c0_229, %c0_230] : memref<8x32x32xbf16, #tpu.memory_space<vmem>>, vector<1x32x32xbf16>
    %516 = vector.shape_cast %515 : vector<1x32x32xbf16> to vector<32x32xbf16>
    %cst_231 = arith.constant dense<0.000000e+00> : vector<2x32xf32>
    %517 = tpu.matmul %514, %516, %cst_231 {dimension_numbers = #tpu.dot_dimension_numbers<[1], [0], [0], [1], [0, 0, 1, 1], [], []>} : vector<2x32xbf16>, vector<32x32xbf16>, vector<2x32xf32> -> vector<2x32xf32>
    %c6_232 = arith.constant 6 : index
    %c0_233 = arith.constant 0 : index
    %c0_234 = arith.constant 0 : index
    %518 = vector.load %arg11[%c6_232, %c0_233, %c0_234] : memref<8x1x32xf32, #tpu.memory_space<vmem>>, vector<1x1x32xf32>
    %519 = vector.shape_cast %518 : vector<1x1x32xf32> to vector<1x32xf32>
    %520 = vector.broadcast %519 : vector<1x32xf32> to vector<2x32xf32>
    %521 = arith.addf %517, %520 : vector<2x32xf32>
    %522 = vector.extract_strided_slice %251 {offsets = [18, 0], sizes = [2, 32], strides = [1, 1]} : vector<20x32xf32> to vector<2x32xf32>
    %523 = arith.truncf %522 : vector<2x32xf32> to vector<2x32xbf16>
    %c7 = arith.constant 7 : index
    %c0_235 = arith.constant 0 : index
    %c0_236 = arith.constant 0 : index
    %524 = vector.load %arg8[%c7, %c0_235, %c0_236] : memref<8x32x32xbf16, #tpu.memory_space<vmem>>, vector<1x32x32xbf16>
    %525 = vector.shape_cast %524 : vector<1x32x32xbf16> to vector<32x32xbf16>
    %cst_237 = arith.constant dense<0.000000e+00> : vector<2x32xf32>
    %526 = tpu.matmul %523, %525, %cst_237 {dimension_numbers = #tpu.dot_dimension_numbers<[1], [0], [0], [1], [0, 0, 1, 1], [], []>} : vector<2x32xbf16>, vector<32x32xbf16>, vector<2x32xf32> -> vector<2x32xf32>
    %c7_238 = arith.constant 7 : index
    %c0_239 = arith.constant 0 : index
    %c0_240 = arith.constant 0 : index
    %527 = vector.load %arg9[%c7_238, %c0_239, %c0_240] : memref<8x1x32xf32, #tpu.memory_space<vmem>>, vector<1x1x32xf32>
    %528 = vector.shape_cast %527 : vector<1x1x32xf32> to vector<1x32xf32>
    %529 = vector.broadcast %528 : vector<1x32xf32> to vector<2x32xf32>
    %530 = arith.addf %526, %529 : vector<2x32xf32>
    %531 = arith.mulf %530, %530 : vector<2x32xf32>
    %532 = arith.mulf %530, %531 : vector<2x32xf32>
    %cst_241 = arith.constant 4.471500e-02 : f32
    %533 = vector.broadcast %cst_241 : f32 to vector<2x32xf32>
    %534 = arith.mulf %533, %532 : vector<2x32xf32>
    %535 = arith.addf %530, %534 : vector<2x32xf32>
    %cst_242 = arith.constant 0.797884583 : f32
    %536 = vector.broadcast %cst_242 : f32 to vector<2x32xf32>
    %537 = arith.mulf %536, %535 : vector<2x32xf32>
    %538 = math.tanh %537 : vector<2x32xf32>
    %cst_243 = arith.constant 1.000000e+00 : f32
    %539 = vector.broadcast %cst_243 : f32 to vector<2x32xf32>
    %540 = arith.addf %539, %538 : vector<2x32xf32>
    %cst_244 = arith.constant 5.000000e-01 : f32
    %541 = vector.broadcast %cst_244 : f32 to vector<2x32xf32>
    %542 = arith.mulf %541, %540 : vector<2x32xf32>
    %543 = arith.mulf %530, %542 : vector<2x32xf32>
    %544 = arith.truncf %543 : vector<2x32xf32> to vector<2x32xbf16>
    %c7_245 = arith.constant 7 : index
    %c0_246 = arith.constant 0 : index
    %c0_247 = arith.constant 0 : index
    %545 = vector.load %arg10[%c7_245, %c0_246, %c0_247] : memref<8x32x32xbf16, #tpu.memory_space<vmem>>, vector<1x32x32xbf16>
    %546 = vector.shape_cast %545 : vector<1x32x32xbf16> to vector<32x32xbf16>
    %cst_248 = arith.constant dense<0.000000e+00> : vector<2x32xf32>
    %547 = tpu.matmul %544, %546, %cst_248 {dimension_numbers = #tpu.dot_dimension_numbers<[1], [0], [0], [1], [0, 0, 1, 1], [], []>} : vector<2x32xbf16>, vector<32x32xbf16>, vector<2x32xf32> -> vector<2x32xf32>
    %c7_249 = arith.constant 7 : index
    %c0_250 = arith.constant 0 : index
    %c0_251 = arith.constant 0 : index
    %548 = vector.load %arg11[%c7_249, %c0_250, %c0_251] : memref<8x1x32xf32, #tpu.memory_space<vmem>>, vector<1x1x32xf32>
    %549 = vector.shape_cast %548 : vector<1x1x32xf32> to vector<1x32xf32>
    %550 = vector.broadcast %549 : vector<1x32xf32> to vector<2x32xf32>
    %551 = arith.addf %547, %550 : vector<2x32xf32>
    %552 = tpu.concatenate %281, %311, %341, %371, %401, %431, %461, %491, %521, %551 in 0 : vector<2x32xf32>, vector<2x32xf32>, vector<2x32xf32>, vector<2x32xf32>, vector<2x32xf32>, vector<2x32xf32>, vector<2x32xf32>, vector<2x32xf32>, vector<2x32xf32>, vector<2x32xf32> -> vector<20x32xf32>
    %553 = arith.truncf %552 : vector<20x32xf32> to vector<20x32xbf16>
    %554 = vector.shape_cast %234 : vector<1x64x20xbf16> to vector<64x20xbf16>
    %cst_252 = arith.constant dense<0.000000e+00> : vector<64x32xf32>
    %555 = tpu.matmul %554, %553, %cst_252 {dimension_numbers = #tpu.dot_dimension_numbers<[1], [0], [0], [1], [0, 0, 1, 1], [], []>} : vector<64x20xbf16>, vector<20x32xbf16>, vector<64x32xf32> -> vector<64x32xf32>
    %c0_253 = arith.constant 0 : index
    %c0_254 = arith.constant 0 : index
    %c0_255 = arith.constant 0 : index
    %556 = vector.load %arg12[%c0_253, %c0_254, %c0_255] : memref<1x64x32xf32, #tpu.memory_space<vmem>>, vector<1x64x32xf32>
    %557 = vector.shape_cast %556 : vector<1x64x32xf32> to vector<64x32xf32>
    %558 = vector.shape_cast %555 : vector<64x32xf32> to vector<1x64x32xf32>
    tpu.vector_store %arg12[%c0_253, %c0_254, %c0_255], %558 {strides = array<i32>} : memref<1x64x32xf32, #tpu.memory_space<vmem>>, vector<1x64x32xf32>,
    return
  }
  func.func @transform_0(%arg0: i32) -> (i32, i32, i32) {
    %c0_i32 = arith.constant 0 : i32
    %c0_i32_0 = arith.constant 0 : i32
    %c0_i32_1 = arith.constant 0 : i32
    return %arg0, %c0_i32, %c0_i32_0 : i32, i32, i32
  }
  func.func @transform_1(%arg0: i32) -> (i32, i32) {
    %c0_i32 = arith.constant 0 : i32
    %c0_i32_0 = arith.constant 0 : i32
    %c0_i32_1 = arith.constant 0 : i32
    return %c0_i32, %c0_i32_0 : i32, i32
  }
  func.func @transform_2(%arg0: i32) -> (i32, i32) {
    %c0_i32 = arith.constant 0 : i32
    %c0_i32_0 = arith.constant 0 : i32
    %c0_i32_1 = arith.constant 0 : i32
    return %c0_i32, %c0_i32_0 : i32, i32
  }
  func.func @transform_3(%arg0: i32) -> (i32, i32, i32) {
    %c0_i32 = arith.constant 0 : i32
    %c0_i32_0 = arith.constant 0 : i32
    %c0_i32_1 = arith.constant 0 : i32
    %c0_i32_2 = arith.constant 0 : i32
    return %c0_i32, %c0_i32_0, %c0_i32_1 : i32, i32, i32
  }
  func.func @transform_4(%arg0: i32) -> (i32, i32, i32) {
    %c0_i32 = arith.constant 0 : i32
    %c0_i32_0 = arith.constant 0 : i32
    %c0_i32_1 = arith.constant 0 : i32
    %c0_i32_2 = arith.constant 0 : i32
    return %c0_i32, %c0_i32_0, %c0_i32_1 : i32, i32, i32
  }
  func.func @transform_5(%arg0: i32) -> (i32, i32, i32) {
    %c0_i32 = arith.constant 0 : i32
    %c0_i32_0 = arith.constant 0 : i32
    %c0_i32_1 = arith.constant 0 : i32
    %c0_i32_2 = arith.constant 0 : i32
    return %c0_i32, %c0_i32_0, %c0_i32_1 : i32, i32, i32
  }
  func.func @transform_6(%arg0: i32) -> (i32, i32, i32) {
    %c0_i32 = arith.constant 0 : i32
    %c0_i32_0 = arith.constant 0 : i32
    %c0_i32_1 = arith.constant 0 : i32
    %c0_i32_2 = arith.constant 0 : i32
    return %c0_i32, %c0_i32_0, %c0_i32_1 : i32, i32, i32
  }
  func.func @transform_7(%arg0: i32) -> (i32, i32, i32) {
    %c0_i32 = arith.constant 0 : i32
    %c0_i32_0 = arith.constant 0 : i32
    %c0_i32_1 = arith.constant 0 : i32
    %c0_i32_2 = arith.constant 0 : i32
    return %c0_i32, %c0_i32_0, %c0_i32_1 : i32, i32, i32
  }
  func.func @transform_8(%arg0: i32) -> (i32, i32, i32) {
    %c0_i32 = arith.constant 0 : i32
    %c0_i32_0 = arith.constant 0 : i32
    %c0_i32_1 = arith.constant 0 : i32
    %c0_i32_2 = arith.constant 0 : i32
    return %c0_i32, %c0_i32_0, %c0_i32_1 : i32, i32, i32
  }
  func.func @transform_9(%arg0: i32) -> (i32, i32, i32) {
    %c0_i32 = arith.constant 0 : i32
    %c0_i32_0 = arith.constant 0 : i32
    %c0_i32_1 = arith.constant 0 : i32
    %c0_i32_2 = arith.constant 0 : i32
    return %c0_i32, %c0_i32_0, %c0_i32_1 : i32, i32, i32
  }
  func.func @transform_10(%arg0: i32) -> (i32, i32, i32) {
    %c0_i32 = arith.constant 0 : i32
    %c0_i32_0 = arith.constant 0 : i32
    %c0_i32_1 = arith.constant 0 : i32
    %c0_i32_2 = arith.constant 0 : i32
    return %c0_i32, %c0_i32_0, %c0_i32_1 : i32, i32, i32
  }
  func.func @transform_11(%arg0: i32) -> (i32, i32, i32) {
    %c0_i32 = arith.constant 0 : i32
    %c0_i32_0 = arith.constant 0 : i32
    %c0_i32_1 = arith.constant 0 : i32
    return %arg0, %c0_i32, %c0_i32_0 : i32, i32, i32
  }
}

</mosaic_0001>

<bundles_post_ra>
// kernel: tpu_custom_call.1
= control target key start
LH: loop header
LB: loop body
LE: loop exit
PB: predicated region body
PF: predicated region fallthrough
CT: control target
= control target key end

     0   :  { %s4677_s17 = smov 0   ;;  %s6751_s0 = inlined_call_operand.vmem [shape: f32[2,64,32], index: 0, kind: input, shape index: {}]   ;;  %s6752_s1 = inlined_call_operand.vmem [shape: bf16[20,32], index: 1, kind: input, shape index: {}]   ;;  %s6753_s2 = inlined_call_operand.vmem [shape: bf16[32,20], index: 2, kind: input, shape index: {}]   ;;  %s6754_s3 = inlined_call_operand.vmem [shape: bf16[2,32,128], index: 3, kind: input, shape index: {}]   ;;  %s6755_s4 = inlined_call_operand.vmem [shape: f32[2,1,128], index: 4, kind: input, shape index: {}]   ;;  %s6756_s5 = inlined_call_operand.vmem [shape: bf16[2,128,32], index: 5, kind: input, shape index: {}]   ;;  %s6757_s6 = inlined_call_operand.vmem [shape: f32[2,1,32], index: 6, kind: input, shape index: {}]   ;;  %s6758_s7 = inlined_call_operand.vmem [shape: bf16[8,32,32], index: 7, kind: input, shape index: {}]   ;;  %s6759_s8 = inlined_call_operand.vmem [shape: f32[8,1,32], index: 8, kind: input, shape index: {}]   ;;  %s6760_s9 = inlined_call_operand.vmem [shape: bf16[8,32,32], index: 9, kind: input, shape index: {}]   ;;  %s6761_s10 = inlined_call_operand.vmem [shape: f32[8,1,32], index: 10, kind: input, shape index: {}]   ;;  %s6762_s11 = inlined_call_operand.vmem [shape: f32[2,64,32], index: 11, kind: output, shape index: {}]  }
   0x1 LB: > { %s3865_s18 = sadd.s32 4294967295, %s4611_s17   ;;  %p3869_p0 = scmp.ge.s32.totalorder %s4611_s17, 1  ;;  %s4611_s17 = sphi %s4677_s17, %s21_s17  }
   0x2   : > { %p337_p1 = scmp.lt.s32.totalorder %s4611_s17, 3 }
   0x4   : > { %p338_p2 = pnand %p3869_p0, %p337_p1 }
   0x5   : > { %p377_p3 = scmp.lt.s32.totalorder (!%p338_p2), %s3865_s18, 1 }
   0x6   : > { %341 = sbr.rel (%p338_p2) target bundleno = 2930 (0xb72), region = 64 }
   0xb   : > { %s6764_s18 = smov (!%p377_p3, %s3865_s18), 1  ;;  %vm404_vm0 = vcmask 261120   ;;  %v4445_v24 = vld [vmem:[%s6753_s2 + $0x8] sm:$0xff]   ;;  %v4446_v25 = vld [vmem:[%s6753_s2] sm:$0xff]  }
   0xc   : > { %s4098_s19 = sshll.u32 %s6764_s18, 6  ;;  %4196 = vmatprep.subr.bf16.mxu0 %v4445_v24  ;;  %v4447_v26 = vld [vmem:[%s6752_s1] sm:$0xff]  }
   0xd   : > { %s4693_s22 = scalar_lea.vmem %s6751_s0, %s4098_s19  ;;  %4197 = vmatpush3.bf16.msra.mxu0 %v4445_v24  ;;  %4216 = vmatprep.mubr.msk.bf16.mxu1 %vm404_vm0, %v4447_v26  ;;  %s386_s14 = scalar_lea.vmem %s6762_s11, %s4098_s19 }
   0xe   : > { %v4696_v0 = vld [vmem:[%s4693_s22 + $0x10] sm:$0xff]  ;;  %v4699_v1 = vld [vmem:[%s4693_s22] sm:$0xff]  ;;  %v4702_v2 = vld [vmem:[%s4693_s22 + $0x18] sm:$0xff]  ;;  %4198 = vmatprep.subr.bf16.mxu0 %v4446_v25 }
   0xf   : > { %v398_v3 = vmul.f32 %v4696_v0, %v4696_v0  ;;  %v396_v4 = vmul.f32 %v4699_v1, %v4699_v1  ;;  %v399_v5 = vmul.f32 %v4702_v2, %v4702_v2  ;;  %v4711_v6 = vld [vmem:[%s4693_s22 + $0x8] sm:$0xff]  ;;  %v4717_v8 = vld [vmem:[%s4693_s22 + $0x20] sm:$0xff]  ;;  %v4726_v12 = vld [vmem:[%s4693_s22 + $0x38] sm:$0xff] }
  0x10   : > { %v4714_v7 = vld [vmem:[%s4693_s22 + $0x28] sm:$0xff]  ;;  %v397_v9 = vmul.f32 %v4711_v6, %v4711_v6  ;;  %v400_v11 = vmul.f32 %v4717_v8, %v4717_v8  ;;  %v4729_v13 = vld [vmem:[%s4693_s22 + $0x30] sm:$0xff]  ;;  %v403_v16 = vmul.f32 %v4726_v12, %v4726_v12 }
  0x11   : > { %v401_v10 = vmul.f32 %v4714_v7, %v4714_v7  ;;  %v411_v14 = vsel %vm404_vm0, %v398_v3, 0.0  ;;  %v405_v15 = vsel %vm404_vm0, %v396_v4, 0.0  ;;  %v414_v17 = vsel %vm404_vm0, %v399_v5, 0.0  ;;  %4199 = vmatpush3.bf16.msra.mxu0 %v4446_v25 }
  0x12   : > { %412 = vadd.xlane.f32.xlu1 %v411_v14  ;;  %406 = vadd.xlane.f32.xlu0 %v405_v15  ;;  %v408_v18 = vsel %vm404_vm0, %v397_v9, 0.0  ;;  %v402_v19 = vmul.f32 %v4729_v13, %v4729_v13  ;;  %v417_v21 = vsel %vm404_vm0, %v400_v11, 0.0  ;;  %v426_v22 = vsel %vm404_vm0, %v403_v16, 0.0 }
  0x13   : > { %v420_v20 = vsel %vm404_vm0, %v401_v10, 0.0 }
  0x14   : > { %v423_v23 = vsel %vm404_vm0, %v402_v19, 0.0 }
  0x16   : > { %415 = vadd.xlane.f32.xlu1 %v414_v17  ;;  %409 = vadd.xlane.f32.xlu0 %v408_v18 }
  0x1a   : > { %421 = vadd.xlane.f32.xlu1 %v420_v20  ;;  %418 = vadd.xlane.f32.xlu0 %v417_v21 }
  0x1e   : > { %427 = vadd.xlane.f32.xlu1 %v426_v22  ;;  %424 = vadd.xlane.f32.xlu0 %v423_v23 }
  0x9b   : > { %v413_v27 = vpop.xlane.xlu1 %412  ;;  %v407_v28 = vpop.xlane.xlu0 %406 }
  0x9c   : > { %4501 = vrsqrt.f32 %v413_v27  ;;  %vm445_vm1 = vcmp.eq.f32.partialorder %v413_v27, inf  ;;  %v448_v38 = vand.u32 2147483648, %v413_v27  ;;  %vm447_vm2 = vcmp.eq.f32.partialorder %v413_v27, 0.0 }
  0x9d   : > { %4503 = vrsqrt.f32 %v407_v28  ;;  %vm431_vm3 = vcmp.eq.f32.partialorder %v407_v28, inf  ;;  %v434_v41 = vand.u32 2147483648, %v407_v28  ;;  %vm433_vm4 = vcmp.eq.f32.partialorder %v407_v28, 0.0 }
  0x9f   : > { %v416_v29 = vpop.xlane.xlu1 %415  ;;  %v410_v30 = vpop.xlane.xlu0 %409 }
  0xa0   : > { %4505 = vrsqrt.f32 %v416_v29  ;;  %vm452_vm5 = vcmp.eq.f32.partialorder %v416_v29, inf  ;;  %vm454_vm6 = vcmp.eq.f32.partialorder %v416_v29, 0.0  ;;  %v455_v50 = vand.u32 2147483648, %v416_v29 }
  0xa1   : > { %4507 = vrsqrt.f32 %v410_v30  ;;  %vm438_vm7 = vcmp.eq.f32.partialorder %v410_v30, inf  ;;  %vm440_vm8 = vcmp.eq.f32.partialorder %v410_v30, 0.0  ;;  %v441_v53 = vand.u32 2147483648, %v410_v30 }
  0xa3   : > { %v422_v31 = vpop.xlane.xlu1 %421  ;;  %v419_v32 = vpop.xlane.xlu0 %418 }
  0xa4   : > { %4509 = vrsqrt.f32 %v422_v31  ;;  %vm466_vm9 = vcmp.eq.f32.partialorder %v422_v31, inf  ;;  %vm468_vm10 = vcmp.eq.f32.partialorder %v422_v31, 0.0  ;;  %v469_v62 = vand.u32 2147483648, %v422_v31 }
  0xa5   : > { %4511 = vrsqrt.f32 %v419_v32  ;;  %vm459_vm11 = vcmp.eq.f32.partialorder %v419_v32, inf  ;;  %v462_v4 = vand.u32 2147483648, %v419_v32  ;;  %vm461_vm12 = vcmp.eq.f32.partialorder %v419_v32, 0.0 }
  0xa7   : > { %v4753_v33 = vpop.xlane.xlu1 %427  ;;  %v4755_v34 = vpop.xlane.xlu0 %424 }
  0xa8   : > { %4513 = vrsqrt.f32 %v4753_v33  ;;  %vm480_vm13 = vcmp.eq.f32.partialorder %v4753_v33, inf  ;;  %vm482_vm14 = vcmp.eq.f32.partialorder %v4753_v33, 0.0  ;;  %v483_v18 = vand.u32 2147483648, %v4753_v33 }
  0xa9   : > { %v4502_v35 = vpop.eup %4501  ;;  %4515 = vrsqrt.f32 %v4755_v34  ;;  %vm473_vm15 = vcmp.eq.f32.partialorder %v4755_v34, inf  ;;  %v476_v21 = vand.u32 2147483648, %v4755_v34 }
  0xaa   : > { %v4504_v36 = vpop.eup %4503  ;;  %v444_v37 = vmul.f32 %v4502_v35, %v413_v27 }
  0xab   : > { %v430_v39 = vmul.f32 %v4504_v36, %v407_v28 }
  0xac   : > { %v446_v40 = vsel %vm445_vm1, %v413_v27, %v444_v37  ;;  %vm475_vm1 = vcmp.eq.f32.partialorder %v4755_v34, 0.0 }
  0xad   : > { %v4506_v42 = vpop.eup %4505  ;;  %v449_v43 = vsel %vm447_vm2, %v448_v38, %v446_v40  ;;  %v432_v44 = vsel %vm431_vm3, %v407_v28, %v430_v39  ;;  %vm610_vm2 = vcmask 162816   ;;  %vm2040_vm3 = vcmask 523264  }
  0xae   : > { %v4508_v45 = vpop.eup %4507  ;;  %v487_v46 = vadd.f32 1e-06, %v449_v43  ;;  %v435_v47 = vsel %vm433_vm4, %v434_v41, %v432_v44  ;;  %v451_v48 = vmul.f32 %v4506_v42, %v416_v29  ;;  %v4448_v43 = vld [vmem:[%s6752_s1 + $0x8] ss:$0 sps:$4 sm:$0x33]  }
  0xaf   : > { %v485_v49 = vadd.f32 1e-06, %v435_v47  ;;  %v437_v51 = vmul.f32 %v4508_v45, %v410_v30 }
  0xb0   : > { %v453_v52 = vsel %vm452_vm5, %v416_v29, %v451_v48  ;;  %4517 = vrcp.f32 %v487_v46 }
  0xb1   : > { %v4510_v54 = vpop.eup %4509  ;;  %v456_v55 = vsel %vm454_vm6, %v455_v50, %v453_v52  ;;  %v439_v56 = vsel %vm438_vm7, %v410_v30, %v437_v51  ;;  %4519 = vrcp.f32 %v485_v49 }
  0xb2   : > { %v4512_v57 = vpop.eup %4511  ;;  %v488_v58 = vadd.f32 1e-06, %v456_v55  ;;  %v442_v59 = vsel %vm440_vm8, %v441_v53, %v439_v56  ;;  %v465_v60 = vmul.f32 %v4510_v54, %v422_v31 }
  0xb3   : > { %v486_v61 = vadd.f32 1e-06, %v442_v59  ;;  %v458_v63 = vmul.f32 %v4512_v57, %v419_v32 }
  0xb4   : > { %4521 = vrcp.f32 %v488_v58  ;;  %v467_v3 = vsel %vm466_vm9, %v422_v31, %v465_v60 }
  0xb5   : > { %v4514_v5 = vpop.eup %4513  ;;  %4523 = vrcp.f32 %v486_v61  ;;  %v470_v9 = vsel %vm468_vm10, %v469_v62, %v467_v3  ;;  %v460_v10 = vsel %vm459_vm11, %v419_v32, %v458_v63 }
  0xb6   : > { %v4516_v11 = vpop.eup %4515  ;;  %v490_v14 = vadd.f32 1e-06, %v470_v9  ;;  %v463_v15 = vsel %vm461_vm12, %v462_v4, %v460_v10  ;;  %v479_v16 = vmul.f32 %v4514_v5, %v4753_v33  ;;  %vm2047_vm12 = vcmask 519168  }
  0xb7   : > { %v489_v17 = vadd.f32 1e-06, %v463_v15  ;;  %v472_v19 = vmul.f32 %v4516_v11, %v4755_v34 }
  0xb8   : > { %4525 = vrcp.f32 %v490_v14  ;;  %v481_v20 = vsel %vm480_vm13, %v4753_v33, %v479_v16 }
  0xb9   : > { %4527 = vrcp.f32 %v489_v17  ;;  %v484_v22 = vsel %vm482_vm14, %v483_v18, %v481_v20  ;;  %v474_v23 = vsel %vm473_vm15, %v4755_v34, %v472_v19 }
  0xba   : > { %v492_v24 = vadd.f32 1e-06, %v484_v22  ;;  %v477_v25 = vsel %vm475_vm1, %v476_v21, %v474_v23 }
  0xbb   : > { %v491_v26 = vadd.f32 1e-06, %v477_v25 }
  0xbc   : > { %4529 = vrcp.f32 %v492_v24 }
  0xbd   : > { %4531 = vrcp.f32 %v491_v26  ;;  %v4518_v27 = vpop.eup %4517 }
  0xbe   : > { %v4520_v28 = vpop.eup %4519  ;;  %v503_v31 = vmul.f32 %v4518_v27, %v4696_v0 }
  0xbf   : > { %v501_v33 = vmul.f32 %v4520_v28, %v4699_v1 }
  0xc1   : > { %v4522_v29 = vpop.eup %4521 }
  0xc2   : > { %v4524_v30 = vpop.eup %4523  ;;  %v504_v32 = vmul.f32 %v4522_v29, %v4702_v2 }
  0xc3   : > { %v502_v35 = vmul.f32 %v4524_v30, %v4711_v6 }
  0xc4   : > { %v510_v36 = vpack.c.bf16 %v504_v32, %v503_v31 }
  0xc5   : > { %v4526_v37 = vpop.eup %4525  ;;  %v509_v34 = vpack.c.bf16 %v502_v35, %v501_v33 }
  0xc6   : > { %v4528_v38 = vpop.eup %4527  ;;  %v506_v39 = vmul.f32 %v4526_v37, %v4714_v7 }
  0xc7   : > { %4200 = vmatprep.mubr.msk.bf16.mxu0 %vm404_vm0, %v509_v34  ;;  %v505_v40 = vmul.f32 %v4528_v38, %v4717_v8 }
  0xc8   : > { %4201 = vmatmul.mubr.msk.bf16.vlgmr.msra.gmra.mxu0 %vm404_vm0, %v510_v36 }
  0xc9   : > { %v4530_v41 = vpop.eup %4529  ;;  %v511_v0 = vpack.c.bf16 %v506_v39, %v505_v40 }
  0xca   : > { %v4532_v42 = vpop.eup %4531  ;;  %v508_v2 = vmul.f32 %v4530_v41, %v4726_v12  ;;  %v537_v12 = vsel %vm404_vm0, %v510_v36, 0 }
  0xcb   : > { %4204 = vmatprep.mubr.msk.bf16.mxu0 %vm404_vm0, %v511_v0  ;;  %v507_v1 = vmul.f32 %v4532_v42, %v4729_v13  ;;  %v540_v8 = vsel %vm404_vm0, %v511_v0, 0  ;;  %v534_v13 = vsel %vm404_vm0, %v509_v34, 0 }
  0xcd   : > { %v512_v6 = vpack.c.bf16 %v508_v2, %v507_v1 }
  0xcf   : > { %4428 = vmatprep.subr.msk.bf16.mxu1 %vm404_vm0, %v512_v6  ;;  %v543_v7 = vsel %vm404_vm0, %v512_v6, 0 }
  0xd0   : > { %4205 = vmatmul.mubr.msk.bf16.gmra.mxu0 %vm404_vm0, %v512_v6  ;;  %4209 = vmatpush3.bf16.xpose.msra.mxu1 %v543_v7 }
  0xd1   : > { %4429 = vmatprep.subr.msk.bf16.mxu1 %vm404_vm0, %v511_v0 }
  0xd8   : > { %4211 = vmatpush3.bf16.xpose.msra.mxu1 %v540_v8 }
  0xd9   : > { %4430 = vmatprep.subr.msk.bf16.mxu1 %vm404_vm0, %v510_v36 }
  0xe0   : > { %4213 = vmatpush3.bf16.xpose.msra.mxu1 %v537_v12 }
  0xe1   : > { %4431 = vmatprep.subr.msk.bf16.mxu1 %vm404_vm0, %v509_v34 }
  0xe8   : > { %4215 = vmatpush3.bf16.xpose.msra.mxu1 %v534_v13 }
  0xef   : > { %4217 = vmatmul.mubr.msk.bf16.vlgmr.msra.gmra.mxu1 %vm404_vm0, %v4448_v43 }
 0x188   : > { %v4202_v44 = vpop.f32.mrf.mxu0 }
 0x189   : > { %v617_v49 = vsel %vm610_vm2, %v4202_v44, -inf }
 0x18a   : > { %v579_v45 = vpop.f32.mrf.mxu0 }
 0x18b   : > { %v611_v46 = vsel %vm610_vm2, %v579_v45, -inf }
 0x18c   : > { %612 = vmax.xlane.f32.xlu0 %v611_v46  ;;  %v4203_v47 = vpop.f32.mrf.mxu0 }
 0x18d   : > { %v620_v53 = vsel %vm610_vm2, %v4203_v47, -inf }
 0x18e   : > { %v582_v48 = vpop.f32.mrf.mxu0 }
 0x18f   : > { %v614_v50 = vsel %vm610_vm2, %v582_v48, -inf }
 0x190   : > { %618 = vmax.xlane.f32.xlu0 %v617_v49  ;;  %615 = vmax.xlane.f32.xlu1 %v614_v50  ;;  %v4206_v51 = vpop.f32.mrf.mxu0 }
 0x191   : > { %v629_v57 = vsel %vm610_vm2, %v4206_v51, -inf }
 0x192   : > { %v595_v52 = vpop.f32.mrf.mxu0 }
 0x193   : > { %v623_v54 = vsel %vm610_vm2, %v595_v52, -inf }
 0x194   : > { %621 = vmax.xlane.f32.xlu1 %v620_v53  ;;  %624 = vmax.xlane.f32.xlu0 %v623_v54  ;;  %v4207_v55 = vpop.f32.mrf.mxu0 }
 0x195   : > { %v632_v59 = vsel %vm610_vm2, %v4207_v55, -inf }
 0x196   : > { %v598_v56 = vpop.f32.mrf.mxu0 }
 0x197   : > { %v626_v58 = vsel %vm610_vm2, %v598_v56, -inf }
 0x198   : > { %630 = vmax.xlane.f32.xlu0 %v629_v57  ;;  %627 = vmax.xlane.f32.xlu1 %v626_v58  ;;  %v4613_v57 = vmov -1.0  }
 0x19c   : > { %633 = vmax.xlane.f32.xlu1 %v632_v59  ;;  %v4614_v59 = vmov -0.5  }
 0x1af   : > { %v4802_v60 = vpop.f32.mrf.mxu1 }
 0x1b1   : > { %v4804_v61 = vpop.f32.mrf.mxu1 }
 0x1b2   : > { %v2041_v54 = vsel %vm2040_vm3, %v4804_v61, -inf }
 0x1b3   : > { %v4219_v62 = vpop.f32.mrf.mxu1 }
 0x215   : > { %v613_v63 = vpop.xlane.xlu0 %612 }
 0x216   : > { %v635_v3 = vsub.f32 %v579_v45, %v613_v63 }
 0x218   : > { %v4806_v4 = vmul.f32 0.5, %v635_v3 }
 0x219   : > { %v616_v5 = vpop.xlane.xlu1 %615  ;;  %v619_v9 = vpop.xlane.xlu0 %618 }
 0x21a   : > { %v636_v10 = vsub.f32 %v582_v48, %v616_v5  ;;  %v637_v11 = vsub.f32 %v4202_v44, %v619_v9  ;;  %v3880_v14 = vadd.f32 0.5, %v4806_v4 }
 0x21c   : > { %v4809_v15 = vmul.f32 0.5, %v636_v10  ;;  %v4811_v16 = vmul.f32 0.5, %v637_v11  ;;  %v659_v17 = vmax.f32 %v3880_v14, 0.0 }
 0x21d   : > { %v622_v18 = vpop.xlane.xlu1 %621  ;;  %v625_v19 = vpop.xlane.xlu0 %624 }
 0x21e   : > { %v638_v20 = vsub.f32 %v4203_v47, %v622_v18  ;;  %v639_v21 = vsub.f32 %v595_v52, %v625_v19  ;;  %v667_v22 = vmul.f32 %v659_v17, %v659_v17  ;;  %v3881_v23 = vadd.f32 0.5, %v4809_v15 }
 0x21f   : > { %v3882_v24 = vadd.f32 0.5, %v4811_v16 }
 0x220   : > { %v4815_v25 = vmul.f32 0.5, %v638_v20  ;;  %v4817_v26 = vmul.f32 0.5, %v639_v21  ;;  %v675_v27 = vsel %vm610_vm2, %v667_v22, 0.0  ;;  %v660_v28 = vmax.f32 %v3881_v23, 0.0 }
 0x221   : > { %v628_v29 = vpop.xlane.xlu1 %627  ;;  %676 = vadd.xlane.f32.xlu0 %v675_v27  ;;  %v631_v30 = vpop.xlane.xlu0 %630  ;;  %v661_v31 = vmax.f32 %v3882_v24, 0.0 }
 0x222   : > { %v640_v32 = vsub.f32 %v598_v56, %v628_v29  ;;  %v641_v33 = vsub.f32 %v4206_v51, %v631_v30  ;;  %v668_v35 = vmul.f32 %v660_v28, %v660_v28  ;;  %v3883_v36 = vadd.f32 0.5, %v4815_v25 }
 0x223   : > { %v669_v37 = vmul.f32 %v661_v31, %v661_v31  ;;  %v3884_v34 = vadd.f32 0.5, %v4817_v26 }
 0x224   : > { %v4822_v38 = vmul.f32 0.5, %v640_v32  ;;  %v4824_v39 = vmul.f32 0.5, %v641_v33  ;;  %v678_v40 = vsel %vm610_vm2, %v668_v35, 0.0  ;;  %v662_v41 = vmax.f32 %v3883_v36, 0.0 }
 0x225   : > { %679 = vadd.xlane.f32.xlu1 %v678_v40  ;;  %v634_v0 = vpop.xlane.xlu1 %633  ;;  %v681_v42 = vsel %vm610_vm2, %v669_v37, 0.0  ;;  %v663_v2 = vmax.f32 %v3884_v34, 0.0 }
 0x226   : > { %v642_v1 = vsub.f32 %v4207_v55, %v634_v0  ;;  %682 = vadd.xlane.f32.xlu0 %v681_v42  ;;  %v670_v6 = vmul.f32 %v662_v41, %v662_v41  ;;  %v3885_v7 = vadd.f32 0.5, %v4822_v38  ;;  %v3886_v8 = vadd.f32 0.5, %v4824_v39 }
 0x227   : > { %v671_v12 = vmul.f32 %v663_v2, %v663_v2 }
 0x228   : > { %v4830_v13 = vmul.f32 0.5, %v642_v1  ;;  %v684_v43 = vsel %vm610_vm2, %v670_v6, 0.0  ;;  %v664_v44 = vmax.f32 %v3885_v7, 0.0  ;;  %v665_v45 = vmax.f32 %v3886_v8, 0.0 }
 0x229   : > { %685 = vadd.xlane.f32.xlu1 %v684_v43  ;;  %v687_v46 = vsel %vm610_vm2, %v671_v12, 0.0 }
 0x22a   : > { %688 = vadd.xlane.f32.xlu0 %v687_v46  ;;  %v672_v47 = vmul.f32 %v664_v44, %v664_v44  ;;  %v673_v48 = vmul.f32 %v665_v45, %v665_v45  ;;  %v3887_v49 = vadd.f32 0.5, %v4830_v13 }
 0x22c   : > { %v690_v50 = vsel %vm610_vm2, %v672_v47, 0.0  ;;  %v693_v51 = vsel %vm610_vm2, %v673_v48, 0.0  ;;  %v666_v52 = vmax.f32 %v3887_v49, 0.0 }
 0x22d   : > { %691 = vadd.xlane.f32.xlu1 %v690_v50 }
 0x22e   : > { %694 = vadd.xlane.f32.xlu0 %v693_v51  ;;  %v674_v53 = vmul.f32 %v666_v52, %v666_v52 }
 0x230   : > { %v696_v55 = vsel %vm610_vm2, %v674_v53, 0.0 }
 0x231   : > { %697 = vadd.xlane.f32.xlu1 %v696_v55 }
 0x232   : > { %2042 = vmax.xlane.f32.xlu0 %v2041_v54 }
 0x2aa   : > { %v677_v56 = vpop.xlane.xlu0 %676 }
 0x2ab   : > { %vm699_vm4 = vcmp.ge.f32.partialorder %v677_v56, 1.0 }
 0x2ac   : > { %v4840_v58 = vsel %vm699_vm4, -0.5, %v4613_v57  ;;  %v4842_v62 = vsel %vm699_vm4, 0.0, %v4614_v59 }
 0x2ad   : > { %v723_v63 = vadd.f32 %v4842_v62, %v4840_v58 }
 0x2ae   : > { %v680_v3 = vpop.xlane.xlu1 %679 }
 0x2af   : > { %v4846_v5 = vmul.f32 0.5, %v723_v63  ;;  %vm700_vm5 = vcmp.ge.f32.partialorder %v680_v3, 1.0  ;;  %v683_v9 = vpop.xlane.xlu0 %682 }
 0x2b0   : > { %v4848_v10 = vsel %vm700_vm5, -0.5, %v4613_v57  ;;  %v4850_v11 = vsel %vm700_vm5, 0.0, %v4614_v59  ;;  %vm701_vm6 = vcmp.ge.f32.partialorder %v683_v9, 1.0 }
 0x2b1   : > { %v724_v14 = vadd.f32 %v4850_v11, %v4848_v10  ;;  %v4854_v17 = vsel %vm701_vm6, -0.5, %v4613_v57  ;;  %v4856_v18 = vsel %vm701_vm6, 0.0, %v4614_v59  ;;  %v739_v23 = vsub.f32 %v4806_v4, %v4846_v5 }
 0x2b2   : > { %v725_v19 = vadd.f32 %v4856_v18, %v4854_v17  ;;  %v686_v20 = vpop.xlane.xlu1 %685 }
 0x2b3   : > { %v4860_v21 = vmul.f32 0.5, %v724_v14  ;;  %vm702_vm7 = vcmp.ge.f32.partialorder %v686_v20, 1.0  ;;  %v689_v22 = vpop.xlane.xlu0 %688  ;;  %v747_v34 = vmax.f32 %v739_v23, 0.0 }
 0x2b4   : > { %v4864_v24 = vmul.f32 0.5, %v725_v19  ;;  %v4866_v27 = vsel %vm702_vm7, -0.5, %v4613_v57  ;;  %v4868_v28 = vsel %vm702_vm7, 0.0, %v4614_v59  ;;  %vm703_vm8 = vcmp.ge.f32.partialorder %v689_v22, 1.0 }
 0x2b5   : > { %v726_v29 = vadd.f32 %v4868_v28, %v4866_v27  ;;  %v4872_v30 = vsel %vm703_vm8, -0.5, %v4613_v57  ;;  %v4874_v31 = vsel %vm703_vm8, 0.0, %v4614_v59  ;;  %v740_v40 = vsub.f32 %v4809_v15, %v4860_v21 }
 0x2b6   : > { %v727_v32 = vadd.f32 %v4874_v31, %v4872_v30  ;;  %v692_v33 = vpop.xlane.xlu1 %691  ;;  %v741_v35 = vsub.f32 %v4811_v16, %v4864_v24  ;;  %v755_v45 = vmul.f32 %v747_v34, %v747_v34 }
 0x2b7   : > { %v4880_v36 = vmul.f32 0.5, %v726_v29  ;;  %vm704_vm9 = vcmp.ge.f32.partialorder %v692_v33, 1.0  ;;  %v695_v37 = vpop.xlane.xlu0 %694  ;;  %v748_v46 = vmax.f32 %v740_v40, 0.0 }
 0x2b8   : > { %v4884_v41 = vmul.f32 0.5, %v727_v32  ;;  %v4886_v0 = vsel %vm704_vm9, -0.5, %v4613_v57  ;;  %v4888_v42 = vsel %vm704_vm9, 0.0, %v4614_v59  ;;  %vm705_vm10 = vcmp.ge.f32.partialorder %v695_v37, 1.0 }
 0x2b9   : > { %v728_v2 = vadd.f32 %v4888_v42, %v4886_v0  ;;  %v4892_v1 = vsel %vm705_vm10, -0.5, %v4613_v57  ;;  %v4894_v6 = vsel %vm705_vm10, 0.0, %v4614_v59  ;;  %v749_v7 = vmax.f32 %v741_v35, 0.0  ;;  %v4925_v35 = vpop.f32.mrf.mxu1 }
 0x2ba   : > { %v729_v8 = vadd.f32 %v4894_v6, %v4892_v1  ;;  %v698_v12 = vpop.xlane.xlu1 %697  ;;  %v742_v43 = vsub.f32 %v4815_v25, %v4880_v36  ;;  %v743_v50 = vsub.f32 %v4817_v26, %v4884_v41  ;;  %v2044_v37 = vsel %vm2040_vm3, %v4925_v35, -inf }
 0x2bb   : > { %vm706_vm11 = vcmp.ge.f32.partialorder %v698_v12, 1.0  ;;  %v757_v44 = vmul.f32 %v749_v7, %v749_v7  ;;  %v4908_v51 = vmul.f32 0.5, %v728_v2 }
 0x2bc   : > { %v4900_v47 = vmul.f32 0.5, %v729_v8  ;;  %v4902_v48 = vsel %vm706_vm11, -0.5, %v4613_v57  ;;  %v4904_v49 = vsel %vm706_vm11, 0.0, %v4614_v59  ;;  %v750_v54 = vmax.f32 %v742_v43, 0.0 }
 0x2bd   : > { %v730_v52 = vadd.f32 %v4904_v49, %v4902_v48  ;;  %v769_v53 = vsel %vm610_vm2, %v757_v44, 0.0  ;;  %v763_v57 = vsel %vm610_vm2, %v755_v45, 0.0  ;;  %v756_v59 = vmul.f32 %v748_v46, %v748_v46  ;;  %v2043_v44 = vpop.xlane.xlu0 %2042 }
 0x2be   : > { %770 = vadd.xlane.f32.xlu0 %v769_v53  ;;  %v745_v55 = vsub.f32 %v4824_v39, %v4900_v47  ;;  %v758_v56 = vmul.f32 %v750_v54, %v750_v54  ;;  %v751_v14 = vmax.f32 %v743_v50, 0.0  ;;  %v744_v19 = vsub.f32 %v4822_v38, %v4908_v51 }
 0x2bf   : > { %v4916_v3 = vmul.f32 0.5, %v730_v52  ;;  %v766_v23 = vsel %vm610_vm2, %v756_v59, 0.0  ;;  %v2048_v8 = vsel %vm2047_vm12, %v4802_v60, -inf }
 0x2c0   : > { %v753_v63 = vmax.f32 %v745_v55, 0.0  ;;  %v772_v9 = vsel %vm610_vm2, %v758_v56, 0.0  ;;  %v759_v29 = vmul.f32 %v751_v14, %v751_v14  ;;  %v752_v32 = vmax.f32 %v744_v19, 0.0 }
 0x2c1   : > { %773 = vadd.xlane.f32.xlu1 %v772_v9  ;;  %v746_v33 = vsub.f32 %v4830_v13, %v4916_v3 }
 0x2c2   : > { %764 = vadd.xlane.f32.xlu0 %v763_v57  ;;  %v761_v20 = vmul.f32 %v753_v63, %v753_v63  ;;  %v775_v34 = vsel %vm610_vm2, %v759_v29, 0.0  ;;  %v760_v40 = vmul.f32 %v752_v32, %v752_v32 }
 0x2c3   : > { %v754_v2 = vmax.f32 %v746_v33, 0.0 }
 0x2c4   : > { %v781_v22 = vsel %vm610_vm2, %v761_v20, 0.0  ;;  %v778_v7 = vsel %vm610_vm2, %v760_v40, 0.0 }
 0x2c5   : > { %767 = vadd.xlane.f32.xlu1 %v766_v23  ;;  %v762_v12 = vmul.f32 %v754_v2, %v754_v2 }
 0x2c6   : > { %782 = vadd.xlane.f32.xlu0 %v781_v22 }
 0x2c7   : > { %v784_v43 = vsel %vm610_vm2, %v762_v12, 0.0 }
 0x2c9   : > { %2045 = vmax.xlane.f32.xlu1 %v2044_v37 }
 0x2ca   : > { %776 = vadd.xlane.f32.xlu0 %v775_v34 }
 0x2cd   : > { %779 = vadd.xlane.f32.xlu1 %v778_v7 }
 0x2ce   : > { %2049 = vmax.xlane.f32.xlu0 %v2048_v8 }
 0x2d1   : > { %785 = vadd.xlane.f32.xlu1 %v784_v43 }
 0x347   : > { %v771_v45 = vpop.xlane.xlu0 %770 }
 0x348   : > { %vm789_vm13 = vcmp.ge.f32.partialorder %v771_v45, 1.0 }
 0x349   : > { %v4936_v46 = vsel %vm789_vm13, %v4864_v24, %v4854_v17  ;;  %v4940_v50 = vsel %vm789_vm13, %v4856_v18, %v4864_v24 }
 0x34a   : > { %v813_v52 = vadd.f32 %v4940_v50, %v4936_v46  ;;  %v774_v53 = vpop.xlane.xlu1 %773 }
 0x34b   : > { %v765_v54 = vpop.xlane.xlu0 %764  ;;  %vm790_vm14 = vcmp.ge.f32.partialorder %v774_v53, 1.0 }
 0x34c   : > { %v4944_v55 = vmul.f32 0.5, %v813_v52  ;;  %vm787_vm15 = vcmp.ge.f32.partialorder %v765_v54, 1.0  ;;  %v4948_v56 = vsel %vm790_vm14, %v4880_v36, %v4866_v27  ;;  %v4952_v17 = vsel %vm790_vm14, %v4868_v28, %v4880_v36 }
 0x34d   : > { %v4956_v18 = vsel %vm787_vm15, %v4846_v5, %v4840_v58  ;;  %v4960_v24 = vsel %vm787_vm15, %v4842_v62, %v4846_v5  ;;  %v814_v57 = vadd.f32 %v4952_v17, %v4948_v56  ;;  %v2051_v28 = vsub.f32 %v4804_v61, %v2043_v44 }
 0x34e   : > { %v811_v59 = vadd.f32 %v4960_v24, %v4956_v18  ;;  %v829_v27 = vsub.f32 %v4811_v16, %v4944_v55  ;;  %v768_v36 = vpop.xlane.xlu1 %767 }
 0x34f   : > { %v783_v63 = vpop.xlane.xlu0 %782  ;;  %v4969_v9 = vmul.f32 0.5, %v814_v57  ;;  %vm788_vm1 = vcmp.ge.f32.partialorder %v768_v36, 1.0 }
 0x350   : > { %v4971_v58 = vmul.f32 0.5, %v811_v59  ;;  %vm793_vm4 = vcmp.ge.f32.partialorder %v783_v63, 1.0  ;;  %v4975_v62 = vsel %vm788_vm1, %v4860_v21, %v4848_v10  ;;  %v4979_v5 = vsel %vm788_vm1, %v4850_v11, %v4860_v21 }
 0x351   : > { %v4983_v14 = vsel %vm793_vm4, %v4900_v47, %v4892_v1  ;;  %v4987_v61 = vsel %vm793_vm4, %v4894_v6, %v4900_v47  ;;  %v812_v19 = vadd.f32 %v4979_v5, %v4975_v62  ;;  %v837_v10 = vmax.f32 %v829_v27, 0.0 }
 0x352   : > { %v817_v20 = vadd.f32 %v4987_v61, %v4983_v14  ;;  %v827_v22 = vsub.f32 %v4806_v4, %v4971_v58  ;;  %v2054_v11 = vmul.f32 1.442695, %v2051_v28  ;;  %v2046_v21 = vpop.xlane.xlu1 %2045  ;;  %v830_v1 = vsub.f32 %v4815_v25, %v4969_v9 }
 0x353   : > { %v777_v23 = vpop.xlane.xlu0 %776  ;;  %v4997_v29 = vmul.f32 0.5, %v812_v19  ;;  %v2052_v47 = vsub.f32 %v4925_v35, %v2046_v21  ;;  %v845_v37 = vmul.f32 %v837_v10, %v837_v10 }
 0x354   : > { %v4999_v6 = vmul.f32 0.5, %v817_v20  ;;  %vm791_vm5 = vcmp.ge.f32.partialorder %v777_v23, 1.0  ;;  %v835_v34 = vmax.f32 %v827_v22, 0.0  ;;  %4533 = vpow2.f32 %v2054_v11 }
 0x355   : > { %v5004_v32 = vsel %vm791_vm5, %v4884_v41, %v4872_v30  ;;  %v5008_v33 = vsel %vm791_vm5, %v4874_v31, %v4884_v41  ;;  %v828_v2 = vsub.f32 %v4809_v15, %v4997_v29  ;;  %v2056_v7 = vmul.f32 1.442695, %v2052_v47 }
 0x356   : > { %v815_v40 = vadd.f32 %v5008_v33, %v5004_v32  ;;  %v833_v35 = vsub.f32 %v4824_v39, %v4999_v6  ;;  %v857_v30 = vsel %vm610_vm2, %v845_v37, 0.0  ;;  %v780_v8 = vpop.xlane.xlu1 %779  ;;  %v843_v43 = vmul.f32 %v835_v34, %v835_v34 }
 0x357   : > { %v2050_v12 = vpop.xlane.xlu0 %2049  ;;  %858 = vadd.xlane.f32.xlu1 %v857_v30  ;;  %vm792_vm6 = vcmp.ge.f32.partialorder %v780_v8, 1.0  ;;  %v838_v44 = vmax.f32 %v830_v1, 0.0  ;;  %v836_v54 = vmax.f32 %v828_v2, 0.0  ;;  %4535 = vpow2.f32 %v2056_v7 }
 0x358   : > { %v5017_v31 = vmul.f32 0.5, %v815_v40  ;;  %v2053_v41 = vsub.f32 %v4802_v60, %v2050_v12  ;;  %v5022_v45 = vsel %vm792_vm6, %v4908_v51, %v4886_v0  ;;  %v5026_v52 = vsel %vm792_vm6, %v4888_v42, %v4908_v51 }
 0x359   : > { %v851_v53 = vsel %vm610_vm2, %v843_v43, 0.0  ;;  %v816_v57 = vadd.f32 %v5026_v52, %v5022_v45  ;;  %v841_v27 = vmax.f32 %v833_v35, 0.0  ;;  %v844_v60 = vmul.f32 %v836_v54, %v836_v54 }
 0x35a   : > { %v2058_v59 = vmul.f32 1.442695, %v2053_v41  ;;  %v786_v28 = vpop.xlane.xlu1 %785  ;;  %v831_v36 = vsub.f32 %v4817_v26, %v5017_v31  ;;  %v846_v20 = vmul.f32 %v838_v44, %v838_v44  ;;  %v4597_v44 = vld [vmem:[%s4693_s22 + $0x38] sm:$0xff] }
 0x35b   : > { %v5033_v0 = vmul.f32 0.5, %v816_v57  ;;  %852 = vadd.xlane.f32.xlu1 %v851_v53  ;;  %vm794_vm7 = vcmp.ge.f32.partialorder %v786_v28, 1.0  ;;  %v849_v42 = vmul.f32 %v841_v27, %v841_v27  ;;  %v854_v19 = vsel %vm610_vm2, %v844_v60, 0.0  ;;  %v4598_v53 = vld [vmem:[%s4693_s22 + $0x30] sm:$0xff]  ;;  %v4599_v57 = vld [vmem:[%s4693_s22 + $0x28] sm:$0xff]  ;;  %v4602_v60 = vld [vmem:[%s4693_s22 + $0x18] sm:$0xff] }
 0x35c   : > { %4537 = vpow2.f32 %v2058_v59  ;;  %v5037_v51 = vsel %vm794_vm7, %v4916_v3, %v4902_v48  ;;  %v5041_v63 = vsel %vm794_vm7, %v4904_v49, %v4916_v3  ;;  %855 = vadd.xlane.f32.xlu0 %v854_v19  ;;  %v839_v11 = vmax.f32 %v831_v36, 0.0  ;;  %v4600_v59 = vld [vmem:[%s4693_s22 + $0x20] sm:$0xff]  ;;  %v4601_v28 = vld [vmem:[%s4693_s22 + $0x10] sm:$0xff]  ;;  %v4604_v19 = vld [vmem:[%s4693_s22 + $0x8] sm:$0xff] }
 0x35d   : > { %v818_v10 = vadd.f32 %v5041_v63, %v5037_v51  ;;  %v869_v22 = vsel %vm610_vm2, %v849_v42, 0.0  ;;  %v832_v21 = vsub.f32 %v4822_v38, %v5033_v0  ;;  %v860_v49 = vsel %vm610_vm2, %v846_v20, 0.0  ;;  %v4603_v42 = vld [vmem:[%s4693_s22] sm:$0xff] }
 0x35e   : > { %v847_v48 = vmul.f32 %v839_v11, %v839_v11  ;;  %v516_v54 = vpack.c.bf16 %v4597_v44, %v4598_v53  ;;  %v515_v27 = vpack.c.bf16 %v4599_v57, %v4600_v59  ;;  %v514_v36 = vpack.c.bf16 %v4602_v60, %v4601_v28 }
 0x35f   : > { %v5049_v23 = vmul.f32 0.5, %v818_v10  ;;  %870 = vadd.xlane.f32.xlu1 %v869_v22  ;;  %v840_v1 = vmax.f32 %v832_v21, 0.0  ;;  %v513_v20 = vpack.c.bf16 %v4604_v19, %v4603_v42 }
 0x360   : > { %861 = vadd.xlane.f32.xlu0 %v860_v49  ;;  %v863_v3 = vsel %vm610_vm2, %v847_v48, 0.0  ;;  %4220 = vmatprep.subr.bf16.mxu0 %v516_v54 }
 0x361   : > { %v848_v47 = vmul.f32 %v840_v1, %v840_v1  ;;  %v834_v37 = vsub.f32 %v4830_v13, %v5049_v23  ;;  %v5055_v34 = vpop.eup %4533  ;;  %4221 = vmatpush3.bf16.msra.mxu0 %v516_v54 }
 0x362   : > { %v2060_v7 = vsel %vm2040_vm3, %v5055_v34, 0.0  ;;  %4222 = vmatprep.subr.bf16.mxu0 %v515_v27 }
 0x363   : > { %864 = vadd.xlane.f32.xlu1 %v863_v3  ;;  %v866_v40 = vsel %vm610_vm2, %v848_v47, 0.0  ;;  %v842_v2 = vmax.f32 %v834_v37, 0.0 }
 0x364   : > { %867 = vadd.xlane.f32.xlu0 %v866_v40  ;;  %v5060_v30 = vpop.eup %4535 }
 0x365   : > { %v850_v35 = vmul.f32 %v842_v2, %v842_v2  ;;  %v2063_v41 = vsel %vm2040_vm3, %v5060_v30, 0.0  ;;  %4223 = vmatpush3.bf16.msra.mxu0 %v515_v27 }
 0x366   : > { %4224 = vmatprep.subr.bf16.mxu0 %v514_v36 }
 0x367   : > { %2061 = vadd.xlane.f32.xlu1 %v2060_v7  ;;  %v872_v8 = vsel %vm610_vm2, %v850_v35, 0.0 }
 0x368   : > { %873 = vadd.xlane.f32.xlu0 %v872_v8 }
 0x369   : > { %v5063_v12 = vpop.eup %4537  ;;  %4225 = vmatpush3.bf16.msra.mxu0 %v514_v36 }
 0x36a   : > { %v2066_v43 = vsel %vm2047_vm12, %v5063_v12, 0.0  ;;  %4226 = vmatprep.subr.bf16.mxu0 %v513_v20 }
 0x36b   : > { %2067 = vadd.xlane.f32.xlu1 %v2066_v43 }
 0x36c   : > { %2064 = vadd.xlane.f32.xlu0 %v2063_v41 }
 0x36d   : > { %4227 = vmatpush3.bf16.msra.mxu0 %v513_v20 }
 0x3e0   : > { %v859_v10 = vpop.xlane.xlu1 %858 }
 0x3e1   : > { %vm877_vm8 = vcmp.ge.f32.partialorder %v859_v10, 1.0 }
 0x3e2   : > { %v5079_v22 = vsel %vm877_vm8, %v4944_v55, %v4936_v46  ;;  %v5083_v11 = vsel %vm877_vm8, %v4940_v50, %v4944_v55 }
 0x3e3   : > { %v901_v21 = vadd.f32 %v5083_v11, %v5079_v22 }
 0x3e4   : > { %v853_v48 = vpop.xlane.xlu1 %852 }
 0x3e5   : > { %v5087_v1 = vmul.f32 0.5, %v901_v21  ;;  %vm875_vm9 = vcmp.ge.f32.partialorder %v853_v48, 1.0  ;;  %v856_v46 = vpop.xlane.xlu0 %855 }
 0x3e6   : > { %v5091_v49 = vsel %vm875_vm9, %v4971_v58, %v4956_v18  ;;  %v5095_v3 = vsel %vm875_vm9, %v4960_v24, %v4971_v58  ;;  %vm876_vm10 = vcmp.ge.f32.partialorder %v856_v46, 1.0 }
 0x3e7   : > { %v899_v50 = vadd.f32 %v5095_v3, %v5091_v49  ;;  %v917_v55 = vsub.f32 %v4811_v16, %v5087_v1  ;;  %v5103_v37 = vsel %vm876_vm10, %v4997_v29, %v4975_v62  ;;  %v5107_v18 = vsel %vm876_vm10, %v4979_v5, %v4997_v29 }
 0x3e8   : > { %v871_v47 = vpop.xlane.xlu1 %870  ;;  %v900_v24 = vadd.f32 %v5107_v18, %v5103_v37 }
 0x3e9   : > { %v5109_v40 = vmul.f32 0.5, %v899_v50  ;;  %vm881_vm11 = vcmp.ge.f32.partialorder %v871_v47, 1.0  ;;  %v862_v62 = vpop.xlane.xlu0 %861  ;;  %v925_v35 = vmax.f32 %v917_v55, 0.0 }
 0x3ea   : > { %v5115_v58 = vsel %vm881_vm11, %v4999_v6, %v4983_v14  ;;  %v5119_v2 = vsel %vm881_vm11, %v4987_v61, %v4999_v6  ;;  %v5123_v29 = vmul.f32 0.5, %v900_v24  ;;  %vm878_vm12 = vcmp.ge.f32.partialorder %v862_v62, 1.0 }
 0x3eb   : > { %v905_v5 = vadd.f32 %v5119_v2, %v5115_v58  ;;  %v915_v7 = vsub.f32 %v4806_v4, %v5109_v40  ;;  %v5129_v14 = vsel %vm878_vm12, %v4969_v9, %v4948_v56  ;;  %v5133_v61 = vsel %vm878_vm12, %v4952_v17, %v4969_v9 }
 0x3ec   : > { %v865_v8 = vpop.xlane.xlu1 %864  ;;  %v902_v43 = vadd.f32 %v5133_v61, %v5129_v14  ;;  %v933_v54 = vmul.f32 %v925_v35, %v925_v35  ;;  %v916_v17 = vsub.f32 %v4809_v15, %v5123_v29 }
 0x3ed   : > { %v5135_v6 = vmul.f32 0.5, %v905_v5  ;;  %vm879_vm13 = vcmp.ge.f32.partialorder %v865_v8, 1.0  ;;  %v923_v41 = vmax.f32 %v915_v7, 0.0  ;;  %v868_v56 = vpop.xlane.xlu0 %867 }
 0x3ee   : > { %v5141_v44 = vsel %vm879_vm13, %v5017_v31, %v5004_v32  ;;  %v5145_v53 = vsel %vm879_vm13, %v5008_v33, %v5017_v31  ;;  %v5151_v57 = vmul.f32 0.5, %v902_v43  ;;  %vm880_vm14 = vcmp.ge.f32.partialorder %v868_v56, 1.0 }
 0x3ef   : > { %v903_v9 = vadd.f32 %v5145_v53, %v5141_v44  ;;  %v931_v59 = vmul.f32 %v923_v41, %v923_v41  ;;  %v5155_v32 = vsel %vm880_vm14, %v5033_v0, %v5022_v45  ;;  %v5159_v33 = vsel %vm880_vm14, %v5026_v52, %v5033_v0 }
 0x3f0   : > { %v2062_v27 = vpop.xlane.xlu1 %2061  ;;  %v924_v31 = vmax.f32 %v916_v17, 0.0  ;;  %v904_v60 = vadd.f32 %v5159_v33, %v5155_v32  ;;  %v921_v42 = vsub.f32 %v4824_v39, %v5135_v6  ;;  %v945_v45 = vsel %vm610_vm2, %v933_v54, 0.0 }
 0x3f1   : > { %v5161_v28 = vmul.f32 0.5, %v903_v9  ;;  %v939_v36 = vsel %vm610_vm2, %v931_v59, 0.0  ;;  %v874_v19 = vpop.xlane.xlu0 %873  ;;  %v918_v52 = vsub.f32 %v4815_v25, %v5151_v57  ;;  %4539 = vrcp.f32 %v2062_v27 }
 0x3f2   : > { %940 = vadd.xlane.f32.xlu0 %v939_v36  ;;  %v932_v20 = vmul.f32 %v924_v31, %v924_v31  ;;  %v5171_v0 = vmul.f32 0.5, %v904_v60  ;;  %vm882_vm15 = vcmp.ge.f32.partialorder %v874_v19, 1.0  ;;  %v929_v62 = vmax.f32 %v921_v42, 0.0 }
 0x3f3   : > { %v919_v10 = vsub.f32 %v4817_v26, %v5161_v28  ;;  %v5177_v21 = vsel %vm882_vm15, %v5049_v23, %v5037_v51  ;;  %v5181_v48 = vsel %vm882_vm15, %v5041_v63, %v5049_v23  ;;  %v926_v55 = vmax.f32 %v918_v52, 0.0 }
 0x3f4   : > { %v2068_v46 = vpop.xlane.xlu1 %2067  ;;  %v942_v50 = vsel %vm610_vm2, %v932_v20, 0.0  ;;  %v906_v47 = vadd.f32 %v5181_v48, %v5177_v21  ;;  %v920_v51 = vsub.f32 %v4822_v38, %v5171_v0  ;;  %v937_v41 = vmul.f32 %v929_v62, %v929_v62 }
 0x3f5   : > { %4541 = vrcp.f32 %v2068_v46  ;;  %943 = vadd.xlane.f32.xlu1 %v942_v50  ;;  %v927_v24 = vmax.f32 %v919_v10, 0.0  ;;  %v2065_v35 = vpop.xlane.xlu0 %2064  ;;  %v934_v5 = vmul.f32 %v926_v55, %v926_v55  ;;  %v4449_v46 = vld [vmem:[%s6754_s3 + $0x8] sm:$0xff]   ;;  %v4615_v50 = vmov 0.0  }
 0x3f6   : > { %946 = vadd.xlane.f32.xlu0 %v945_v45  ;;  %v5188_v7 = vmul.f32 0.5, %v906_v47  ;;  %4543 = vrcp.f32 %v2065_v35  ;;  %v928_v8 = vmax.f32 %v920_v51, 0.0  ;;  %v957_v59 = vsel %vm610_vm2, %v937_v41, 0.0  ;;  %4232 = vmatprep.subr.bf16.mxu0 %v4615_v50 }
 0x3f7   : > { %v935_v63 = vmul.f32 %v927_v24, %v927_v24  ;;  %v948_v23 = vsel %vm610_vm2, %v934_v5, 0.0  ;;  %4260 = vmatprep.subr.bf16.mxu1 %v4615_v50 }
 0x3f8   : > { %v922_v56 = vsub.f32 %v4830_v13, %v5188_v7  ;;  %v936_v54 = vmul.f32 %v928_v8, %v928_v8 }
 0x3f9   : > { %v951_v43 = vsel %vm610_vm2, %v935_v63, 0.0  ;;  %949 = vadd.xlane.f32.xlu1 %v948_v23 }
 0x3fa   : > { %952 = vadd.xlane.f32.xlu0 %v951_v43  ;;  %v930_v17 = vmax.f32 %v922_v56, 0.0  ;;  %v954_v9 = vsel %vm610_vm2, %v936_v54, 0.0 }
 0x3fc   : > { %v938_v27 = vmul.f32 %v930_v17, %v930_v17 }
 0x3fd   : > { %955 = vadd.xlane.f32.xlu1 %v954_v9 }
 0x3fe   : > { %958 = vadd.xlane.f32.xlu0 %v957_v59  ;;  %v960_v31 = vsel %vm610_vm2, %v938_v27, 0.0  ;;  %v4540_v60 = vpop.eup %4539 }
 0x3ff   : > { %v2075_v45 = vmul.f32 %v4540_v60, %v5055_v34  ;;  %v4450_v34 = vld [vmem:[%s6754_s3 + $0x18] sm:$0xff]  }
 0x400   : > { %4261 = vmatpush3.bf16.msra.mxu1 %v4450_v34 }
 0x401   : > { %961 = vadd.xlane.f32.xlu1 %v960_v31  ;;  %4262 = vmatprep.subr.bf16.mxu1 %v4615_v50 }
 0x402   : > { %v4542_v36 = vpop.eup %4541 }
 0x403   : > { %v4544_v42 = vpop.eup %4543  ;;  %v2077_v19 = vmul.f32 %v4542_v36, %v5063_v12  ;;  %v4452_v12 = vld [vmem:[%s6754_s3 + $0x10] sm:$0xff]  }
 0x404   : > { %v2076_v20 = vmul.f32 %v4544_v42, %v5060_v30  ;;  %v4451_v30 = vld [vmem:[%s6754_s3] sm:$0xff]   ;;  %4263 = vmatpush3.bf16.msra.mxu1 %v4452_v12 }
 0x405   : > { %v2079_v10 = vpack.c.bf16 %v2077_v19, %v2077_v19  ;;  %4268 = vmatprep.subr.bf16.mxu1 %v4615_v50 }
 0x406   : > { %v2078_v52 = vpack.c.bf16 %v2076_v20, %v2075_v45 }
 0x408   : > { %4228 = vmatprep.mubr.msk.bf16.mxu0 %vm2040_vm3, %v2078_v52 }
 0x409   : > { %4229 = vmatmul.mubr.msk.bf16.vlgmr.msra.gmra.mxu0 %vm2040_vm3, %v2079_v10  ;;  %vm4616_vm3 = vmmov 0  }
 0x40a   : > { %4233 = vmatpush3.bf16.msra.mxu0 %v4449_v46  ;;  %4236 = vmatprep.mubr.msk.bf16.mxu0 %vm4616_vm3, %v4615_v50 }
 0x40b   : > { %4234 = vmatprep.subr.bf16.mxu0 %v4615_v50  ;;  %4264 = vmatprep.mubr.msk.bf16.mxu1 %vm4616_vm3, %v4615_v50 }
 0x40e   : > { %4235 = vmatpush3.bf16.msra.mxu0 %v4451_v30 }
 0x40f   : > { %4240 = vmatprep.subr.bf16.mxu0 %v4615_v50 }
 0x47b   : > { %v941_v55 = vpop.xlane.xlu0 %940 }
 0x47c   : > { %vm963_vm1 = vcmp.ge.f32.partialorder %v941_v55, 1.0 }
 0x47d   : > { %v5226_v47 = vsel %vm963_vm1, %v5109_v40, %v5091_v49  ;;  %v5230_v24 = vsel %vm963_vm1, %v5095_v3, %v5109_v40 }
 0x47e   : > { %v987_v62 = vadd.f32 %v5230_v24, %v5226_v47  ;;  %v944_v35 = vpop.xlane.xlu1 %943 }
 0x47f   : > { %vm964_vm4 = vcmp.ge.f32.partialorder %v944_v35, 1.0  ;;  %v947_v5 = vpop.xlane.xlu0 %946 }
 0x480   : > { %v5234_v51 = vmul.f32 0.5, %v987_v62  ;;  %v5238_v63 = vsel %vm964_vm4, %v5123_v29, %v5103_v37  ;;  %v5242_v49 = vsel %vm964_vm4, %v5107_v18, %v5123_v29  ;;  %vm965_vm5 = vcmp.ge.f32.partialorder %v947_v5, 1.0 }
 0x481   : > { %v988_v3 = vadd.f32 %v5242_v49, %v5238_v63  ;;  %v5248_v40 = vsel %vm965_vm5, %v5087_v1, %v5079_v22  ;;  %v5252_v23 = vsel %vm965_vm5, %v5083_v11, %v5087_v1 }
 0x482   : > { %v989_v37 = vadd.f32 %v5252_v23, %v5248_v40  ;;  %v950_v8 = vpop.xlane.xlu1 %949  ;;  %v1003_v18 = vsub.f32 %v4806_v4, %v5234_v51 }
 0x483   : > { %v5258_v29 = vmul.f32 0.5, %v988_v3  ;;  %vm966_vm6 = vcmp.ge.f32.partialorder %v950_v8, 1.0  ;;  %v953_v43 = vpop.xlane.xlu0 %952 }
 0x484   : > { %v5260_v41 = vmul.f32 0.5, %v989_v37  ;;  %v5264_v22 = vsel %vm966_vm6, %v5151_v57, %v5129_v14  ;;  %v5268_v11 = vsel %vm966_vm6, %v5133_v61, %v5151_v57  ;;  %vm967_vm7 = vcmp.ge.f32.partialorder %v953_v43, 1.0 }
 0x485   : > { %v990_v1 = vadd.f32 %v5268_v11, %v5264_v22  ;;  %v5274_v56 = vsel %vm967_vm7, %v5161_v28, %v5141_v44  ;;  %v5278_v54 = vsel %vm967_vm7, %v5145_v53, %v5161_v28  ;;  %v1011_v17 = vmax.f32 %v1003_v18, 0.0 }
 0x486   : > { %v991_v14 = vadd.f32 %v5278_v54, %v5274_v56  ;;  %v956_v9 = vpop.xlane.xlu1 %955  ;;  %v1004_v61 = vsub.f32 %v4809_v15, %v5258_v29  ;;  %v1005_v57 = vsub.f32 %v4811_v16, %v5260_v41 }
 0x487   : > { %v5286_v59 = vmul.f32 0.5, %v990_v1  ;;  %vm968_vm8 = vcmp.ge.f32.partialorder %v956_v9, 1.0  ;;  %v959_v44 = vpop.xlane.xlu0 %958  ;;  %v1019_v27 = vmul.f32 %v1011_v17, %v1011_v17 }
 0x488   : > { %v5288_v31 = vmul.f32 0.5, %v991_v14  ;;  %v5292_v53 = vsel %vm968_vm8, %v5171_v0, %v5155_v32  ;;  %v5296_v28 = vsel %vm968_vm8, %v5159_v33, %v5171_v0  ;;  %vm969_vm9 = vcmp.ge.f32.partialorder %v959_v44, 1.0 }
 0x489   : > { %v992_v60 = vadd.f32 %v5296_v28, %v5292_v53  ;;  %v5302_v36 = vsel %vm969_vm9, %v5135_v6, %v5115_v58  ;;  %v5306_v42 = vsel %vm969_vm9, %v5119_v2, %v5135_v6  ;;  %v1027_v19 = vsel %vm610_vm2, %v1019_v27, 0.0 }
 0x48a   : > { %v993_v32 = vadd.f32 %v5306_v42, %v5302_v36  ;;  %1028 = vadd.xlane.f32.xlu0 %v1027_v19  ;;  %v962_v33 = vpop.xlane.xlu1 %961  ;;  %v1012_v0 = vmax.f32 %v1004_v61, 0.0  ;;  %v1013_v45 = vmax.f32 %v1005_v57, 0.0  ;;  %v1006_v20 = vsub.f32 %v4815_v25, %v5286_v59 }
 0x48b   : > { %v5313_v52 = vmul.f32 0.5, %v992_v60  ;;  %vm970_vm10 = vcmp.ge.f32.partialorder %v962_v33, 1.0  ;;  %v1007_v58 = vsub.f32 %v4817_v26, %v5288_v31 }
 0x48c   : > { %v5317_v2 = vmul.f32 0.5, %v993_v32  ;;  %v5321_v6 = vsel %vm970_vm10, %v5188_v7, %v5177_v21  ;;  %v5325_v10 = vsel %vm970_vm10, %v5181_v48, %v5188_v7  ;;  %v1020_v46 = vmul.f32 %v1012_v0, %v1012_v0 }
 0x48d   : > { %v994_v34 = vadd.f32 %v5325_v10, %v5321_v6  ;;  %v1021_v30 = vmul.f32 %v1013_v45, %v1013_v45  ;;  %v1014_v12 = vmax.f32 %v1006_v20, 0.0  ;;  %v1015_v55 = vmax.f32 %v1007_v58, 0.0 }
 0x48e   : > { %v1030_v62 = vsel %vm610_vm2, %v1020_v46, 0.0  ;;  %v1008_v35 = vsub.f32 %v4822_v38, %v5313_v52  ;;  %v1009_v21 = vsub.f32 %v4824_v39, %v5317_v2 }
 0x48f   : > { %v5334_v5 = vmul.f32 0.5, %v994_v34  ;;  %1031 = vadd.xlane.f32.xlu1 %v1030_v62  ;;  %v1033_v48 = vsel %vm610_vm2, %v1021_v30, 0.0  ;;  %v1022_v7 = vmul.f32 %v1014_v12, %v1014_v12  ;;  %v1023_v3 = vmul.f32 %v1015_v55, %v1015_v55  ;;  %v4453_v12 = vld [vmem:[%s6756_s5 + $0x38] sm:$0xff]  }
 0x490   : > { %1034 = vadd.xlane.f32.xlu0 %v1033_v48  ;;  %v1016_v37 = vmax.f32 %v1008_v35, 0.0  ;;  %v1017_v8 = vmax.f32 %v1009_v21, 0.0  ;;  %v4454_v62 = vld [vmem:[%s6756_s5 + $0x78] sm:$0xff]  }
 0x491   : > { %v1036_v18 = vsel %vm610_vm2, %v1022_v7, 0.0  ;;  %v1039_v43 = vsel %vm610_vm2, %v1023_v3, 0.0  ;;  %v1010_v1 = vsub.f32 %v4830_v13, %v5334_v5  ;;  %v4455_v7 = vld [vmem:[%s6756_s5 + $0x30] sm:$0xff]  }
 0x492   : > { %v1024_v17 = vmul.f32 %v1016_v37, %v1016_v37  ;;  %v1025_v14 = vmul.f32 %v1017_v8, %v1017_v8  ;;  %v4456_v8 = vld [vmem:[%s6756_s5 + $0x70] sm:$0xff]  }
 0x493   : > { %1037 = vadd.xlane.f32.xlu1 %v1036_v18  ;;  %v1018_v9 = vmax.f32 %v1010_v1, 0.0  ;;  %v4457_v18 = vld [vmem:[%s6756_s5 + $0x28] sm:$0xff]  }
 0x494   : > { %1040 = vadd.xlane.f32.xlu0 %v1039_v43  ;;  %v1042_v61 = vsel %vm610_vm2, %v1024_v17, 0.0  ;;  %v1045_v57 = vsel %vm610_vm2, %v1025_v14, 0.0 }
 0x495   : > { %v1026_v44 = vmul.f32 %v1018_v9, %v1018_v9 }
 0x497   : > { %1043 = vadd.xlane.f32.xlu1 %v1042_v61  ;;  %v1048_v27 = vsel %vm610_vm2, %v1026_v44, 0.0 }
 0x498   : > { %1046 = vadd.xlane.f32.xlu0 %v1045_v57 }
 0x49b   : > { %1049 = vadd.xlane.f32.xlu1 %v1048_v27 }
 0x4c9   : > { %v5344_v60 = vpop.f32.mrf.mxu0 }
 0x4cb   : > { %v2120_v19 = vpop.f32.mrf.mxu0 }
 0x4cc   : > { %v5346_v32 = vpack.c.bf16 %v2120_v19, %v2120_v19  ;;  %v4459_v19 = vld [vmem:[%s6756_s5 + $0x20] sm:$0xff]  }
 0x4cd   : > { %v4231_v33 = vpop.f32.mrf.mxu0 }
 0x4ce   : > { %v2336_v0 = vrot.slane %v5346_v32, 1  ;;  %4237 = vmatmul.mubr.msk.bf16.vlgmr.msra.gmra.mxu0 %vm404_vm0, %v5346_v32 }
 0x4cf   : > { %4256 = vmatprep.mubr.msk.bf16.mxu0 %vm4616_vm3, %v4615_v50  ;;  %4241 = vmatpush3.bf16.msra.mxu0 %v4453_v12 }
 0x4d0   : > { %4265 = vmatmul.mubr.msk.bf16.vlgmr.msra.gmra.mxu1 %vm404_vm0, %v2336_v0  ;;  %4242 = vmatprep.subr.bf16.mxu0 %v4615_v50 }
 0x4d1   : > { %4284 = vmatprep.mubr.msk.bf16.mxu1 %vm4616_vm3, %v4615_v50  ;;  %4269 = vmatpush3.bf16.msra.mxu1 %v4454_v62 }
 0x4d2   : > { %4270 = vmatprep.subr.bf16.mxu1 %v4615_v50 }
 0x4d3   : > { %4243 = vmatpush3.bf16.msra.mxu0 %v4455_v7 }
 0x4d4   : > { %4244 = vmatprep.subr.bf16.mxu0 %v4615_v50 }
 0x4d5   : > { %4271 = vmatpush3.bf16.msra.mxu1 %v4456_v8  ;;  %v4462_v8 = vld [vmem:[%s6756_s5 + $0x58] sm:$0xff]  }
 0x4d6   : > { %4272 = vmatprep.subr.bf16.mxu1 %v4615_v50 }
 0x4d7   : > { %4245 = vmatpush3.bf16.msra.mxu0 %v4457_v18 }
 0x4d8   : > { %4246 = vmatprep.subr.bf16.mxu0 %v4615_v50 }
 0x4db   : > { %4247 = vmatpush3.bf16.msra.mxu0 %v4459_v19 }
 0x4dc   : > { %4248 = vmatprep.subr.bf16.mxu0 %v4615_v50 }
 0x513   : > { %v1029_v45 = vpop.xlane.xlu0 %1028 }
 0x514   : > { %vm1051_vm11 = vcmp.ge.f32.partialorder %v1029_v45, 1.0 }
 0x515   : > { %v5358_v20 = vsel %vm1051_vm11, %v5234_v51, %v5226_v47  ;;  %v5362_v58 = vsel %vm1051_vm11, %v5230_v24, %v5234_v51 }
 0x516   : > { %v1075_v46 = vadd.f32 %v5362_v58, %v5358_v20 }
 0x518   : > { %v5366_v34 = vmul.f32 0.5, %v1075_v46  ;;  %v1032_v30 = vpop.xlane.xlu1 %1031 }
 0x519   : > { %vm1052_vm12 = vcmp.ge.f32.partialorder %v1032_v30, 1.0  ;;  %v1035_v55 = vpop.xlane.xlu0 %1034 }
 0x51a   : > { %v5373_v47 = vsel %vm1052_vm12, %v5258_v29, %v5238_v63  ;;  %v5377_v24 = vsel %vm1052_vm12, %v5242_v49, %v5258_v29  ;;  %vm1053_vm13 = vcmp.ge.f32.partialorder %v1035_v55, 1.0  ;;  %v1091_v51 = vsub.f32 %v4806_v4, %v5366_v34 }
 0x51b   : > { %v1076_v35 = vadd.f32 %v5377_v24, %v5373_v47  ;;  %v5388_v63 = vsel %vm1053_vm13, %v5260_v41, %v5248_v40  ;;  %v5392_v49 = vsel %vm1053_vm13, %v5252_v23, %v5260_v41 }
 0x51c   : > { %v1077_v29 = vadd.f32 %v5392_v49, %v5388_v63  ;;  %v1038_v21 = vpop.xlane.xlu1 %1037  ;;  %v1099_v48 = vmax.f32 %v1091_v51, 0.0 }
 0x51d   : > { %v5400_v3 = vmul.f32 0.5, %v1076_v35  ;;  %vm1054_vm14 = vcmp.ge.f32.partialorder %v1038_v21, 1.0  ;;  %v1041_v40 = vpop.xlane.xlu0 %1040 }
 0x51e   : > { %v5403_v23 = vmul.f32 0.5, %v1077_v29  ;;  %v5407_v41 = vsel %vm1054_vm14, %v5286_v59, %v5264_v22  ;;  %v5411_v37 = vsel %vm1054_vm14, %v5268_v11, %v5286_v59  ;;  %vm1055_vm15 = vcmp.ge.f32.partialorder %v1041_v40, 1.0  ;;  %v4461_v29 = vld [vmem:[%s6756_s5 + $0x18] sm:$0xff]  }
 0x51f   : > { %v1078_v43 = vadd.f32 %v5411_v37, %v5407_v41  ;;  %v5423_v22 = vsel %vm1055_vm15, %v5288_v31, %v5274_v56  ;;  %v5427_v11 = vsel %vm1055_vm15, %v5278_v54, %v5288_v31  ;;  %v1107_v59 = vmul.f32 %v1099_v48, %v1099_v48  ;;  %v4458_v56 = vld [vmem:[%s6756_s5 + $0x68] sm:$0xff]   ;;  %4249 = vmatpush3.bf16.msra.mxu0 %v4461_v29  ;;  %v5540_v29 = vpop.f32.mrf.mxu0 }
 0x520   : > { %v1079_v1 = vadd.f32 %v5427_v11, %v5423_v22  ;;  %v1044_v17 = vpop.xlane.xlu1 %1043  ;;  %v1092_v14 = vsub.f32 %v4809_v15, %v5400_v3  ;;  %v1093_v9 = vsub.f32 %v4811_v16, %v5403_v23  ;;  %4273 = vmatpush3.bf16.msra.mxu1 %v4458_v56  ;;  %4250 = vmatprep.subr.bf16.mxu0 %v4615_v50 }
 0x521   : > { %v5439_v54 = vmul.f32 0.5, %v1078_v43  ;;  %vm1056_vm1 = vcmp.ge.f32.partialorder %v1044_v17, 1.0  ;;  %v1047_v31 = vpop.xlane.xlu0 %1046  ;;  %v1115_v61 = vsel %vm610_vm2, %v1107_v59, 0.0  ;;  %4274 = vmatprep.subr.bf16.mxu1 %v4615_v50 }
 0x522   : > { %v5443_v57 = vmul.f32 0.5, %v1079_v1  ;;  %v5447_v44 = vsel %vm1056_vm1, %v5313_v52, %v5292_v53  ;;  %v5451_v27 = vsel %vm1056_vm1, %v5296_v28, %v5313_v52  ;;  %vm1057_vm4 = vcmp.ge.f32.partialorder %v1047_v31, 1.0  ;;  %1116 = vadd.xlane.f32.xlu0 %v1115_v61 }
 0x523   : > { %v1080_v33 = vadd.f32 %v5451_v27, %v5447_v44  ;;  %v5460_v0 = vsel %vm1057_vm4, %v5317_v2, %v5302_v36  ;;  %v5464_v53 = vsel %vm1057_vm4, %v5306_v42, %v5317_v2  ;;  %v1100_v28 = vmax.f32 %v1092_v14, 0.0  ;;  %v4460_v36 = vld [vmem:[%s6756_s5 + $0x60] sm:$0xff]   ;;  %v4463_v14 = vld [vmem:[%s6756_s5 + $0x10] sm:$0xff]  }
 0x524   : > { %v1081_v52 = vadd.f32 %v5464_v53, %v5460_v0  ;;  %v1050_v45 = vpop.xlane.xlu1 %1049  ;;  %v1101_v46 = vmax.f32 %v1093_v9, 0.0  ;;  %v1094_v30 = vsub.f32 %v4815_v25, %v5439_v54  ;;  %v1095_v12 = vsub.f32 %v4817_v26, %v5443_v57  ;;  %4275 = vmatpush3.bf16.msra.mxu1 %v4460_v36  ;;  %4251 = vmatpush3.bf16.msra.mxu0 %v4463_v14  ;;  %v4466_v36 = vld [vmem:[%s6756_s5 + $0x48] sm:$0xff]  }
 0x525   : > { %v5476_v42 = vmul.f32 0.5, %v1080_v33  ;;  %vm1058_vm5 = vcmp.ge.f32.partialorder %v1050_v45, 1.0  ;;  %v1108_v2 = vmul.f32 %v1100_v28, %v1100_v28  ;;  %4276 = vmatprep.subr.bf16.mxu1 %v4615_v50  ;;  %v4464_v45 = vld [vmem:[%s6756_s5 + $0x50] sm:$0xff]   ;;  %4252 = vmatprep.subr.bf16.mxu0 %v4615_v50 }
 0x526   : > { %v5479_v55 = vmul.f32 0.5, %v1081_v52  ;;  %v5483_v51 = vsel %vm1058_vm5, %v5334_v5, %v5321_v6  ;;  %v5487_v62 = vsel %vm1058_vm5, %v5325_v10, %v5334_v5  ;;  %v1109_v35 = vmul.f32 %v1101_v46, %v1101_v46 }
 0x527   : > { %v1082_v21 = vadd.f32 %v5487_v62, %v5483_v51  ;;  %v1118_v48 = vsel %vm610_vm2, %v1108_v2, 0.0  ;;  %v1102_v7 = vmax.f32 %v1094_v30, 0.0  ;;  %v1103_v40 = vmax.f32 %v1095_v12, 0.0  ;;  %v4465_v30 = vld [vmem:[%s6756_s5 + $0x8] sm:$0xff]   ;;  %v4467_v2 = vld [vmem:[%s6756_s5] sm:$0xff]  }
 0x528   : > { %1119 = vadd.xlane.f32.xlu1 %v1118_v48  ;;  %v1121_v6 = vsel %vm610_vm2, %v1109_v35, 0.0  ;;  %v1096_v10 = vsub.f32 %v4822_v38, %v5476_v42  ;;  %v1097_v5 = vsub.f32 %v4824_v39, %v5479_v55  ;;  %4277 = vmatpush3.bf16.msra.mxu1 %v4462_v8  ;;  %v4468_v35 = vld [vmem:[%s6756_s5 + $0x40] sm:$0xff]  }
 0x529   : > { %v5504_v18 = vmul.f32 0.5, %v1082_v21  ;;  %1122 = vadd.xlane.f32.xlu0 %v1121_v6  ;;  %v1110_v43 = vmul.f32 %v1102_v7, %v1102_v7  ;;  %v1111_v59 = vmul.f32 %v1103_v40, %v1103_v40  ;;  %4278 = vmatprep.subr.bf16.mxu1 %v4615_v50  ;;  %v3910_v21 = vld [vmem:[%s6755_s4] ss:$0 sm:$0xff]  ;;  %v3928_v7 = vld [vmem:[%s6755_s4 + $0x1] ss:$0 sm:$0xff] }
 0x52a   : > { %v1104_v1 = vmax.f32 %v1096_v10, 0.0  ;;  %v1105_v17 = vmax.f32 %v1097_v5, 0.0  ;;  %4253 = vmatpush3.bf16.msra.mxu0 %v4465_v30 }
 0x52b   : > { %v1124_v9 = vsel %vm610_vm2, %v1110_v43, 0.0  ;;  %v1127_v56 = vsel %vm610_vm2, %v1111_v59, 0.0  ;;  %v1098_v31 = vsub.f32 %v4830_v13, %v5504_v18  ;;  %4254 = vmatprep.subr.bf16.mxu0 %v4615_v50 }
 0x52c   : > { %1125 = vadd.xlane.f32.xlu1 %v1124_v9  ;;  %v1112_v61 = vmul.f32 %v1104_v1, %v1104_v1  ;;  %v1113_v19 = vmul.f32 %v1105_v17, %v1105_v17  ;;  %4279 = vmatpush3.bf16.msra.mxu1 %v4464_v45 }
 0x52d   : > { %1128 = vadd.xlane.f32.xlu0 %v1127_v56  ;;  %v1106_v33 = vmax.f32 %v1098_v31, 0.0  ;;  %4280 = vmatprep.subr.bf16.mxu1 %v4615_v50 }
 0x52e   : > { %v1130_v28 = vsel %vm610_vm2, %v1112_v61, 0.0  ;;  %v1133_v52 = vsel %vm610_vm2, %v1113_v19, 0.0  ;;  %4255 = vmatpush3.bf16.msra.mxu0 %v4467_v2 }
 0x52f   : > { %v1114_v46 = vmul.f32 %v1106_v33, %v1106_v33  ;;  %4288 = vmatprep.subr.bf16.mxu0 %v4615_v50 }
 0x530   : > { %1131 = vadd.xlane.f32.xlu1 %v1130_v28  ;;  %4281 = vmatpush3.bf16.msra.mxu1 %v4466_v36 }
 0x531   : > { %1134 = vadd.xlane.f32.xlu0 %v1133_v52  ;;  %v1136_v12 = vsel %vm610_vm2, %v1114_v46, 0.0  ;;  %4282 = vmatprep.subr.bf16.mxu1 %v4615_v50 }
 0x534   : > { %1137 = vadd.xlane.f32.xlu1 %v1136_v12  ;;  %4283 = vmatpush3.bf16.msra.mxu1 %v4468_v35 }
 0x535   : > { %4304 = vmatprep.subr.bf16.mxu1 %v4615_v50 }
 0x58e   : > { %v2195_v48 = vpop.f32.mrf.mxu0 }
 0x58f   : > { %v2196_v40 = vadd.f32 %v3910_v21, %v2195_v48 }
 0x590   : > { %v4238_v6 = vpop.f32.mrf.mxu0  ;;  %v2386_v10 = vpop.f32.mrf.mxu1 }
 0x591   : > { %v2201_v5 = vmul.f32 %v2196_v40, %v2196_v40  ;;  %v2387_v8 = vadd.f32 %v3928_v7, %v2386_v10 }
 0x592   : > { %v2198_v43 = vpop.f32.mrf.mxu0  ;;  %v4266_v59 = vpop.f32.mrf.mxu1 }
 0x593   : > { %v2202_v1 = vmul.f32 %v2201_v5, %v2196_v40  ;;  %v2392_v17 = vmul.f32 %v2387_v8, %v2387_v8  ;;  %v4469_v5 = vld [vmem:[%s6758_s7 + $0x8] sm:$0xff]  }
 0x594   : > { %v4239_v14 = vpop.f32.mrf.mxu0  ;;  %v2389_v9 = vpop.f32.mrf.mxu1 }
 0x595   : > { %v2203_v56 = vmul.f32 0.044715, %v2202_v1  ;;  %v2393_v31 = vmul.f32 %v2392_v17, %v2387_v8 }
 0x596   : > { %v4267_v61 = vpop.f32.mrf.mxu1 }
 0x597   : > { %v2204_v19 = vadd.f32 %v2203_v56, %v2196_v40  ;;  %v2394_v33 = vmul.f32 0.044715, %v2393_v31 }
 0x599   : > { %v2205_v28 = vmul.f32 0.7978846, %v2204_v19  ;;  %v2395_v52 = vadd.f32 %v2394_v33, %v2387_v8  ;;  %v4472_v19 = vld [vmem:[%s6758_s7 + $0x10] sm:$0xff]  }
 0x59b   : > { %4545 = vtanh.f32 %v2205_v28  ;;  %v2396_v45 = vmul.f32 0.7978846, %v2395_v52 }
 0x59d   : > { %4547 = vtanh.f32 %v2396_v45 }
 0x5a8   : > { %v4546_v46 = vpop.eup %4545 }
 0x5a9   : > { %v2207_v30 = vadd.f32 1.0, %v4546_v46 }
 0x5aa   : > { %v4548_v12 = vpop.eup %4547 }
 0x5ab   : > { %v1117_v36 = vpop.xlane.xlu0 %1116  ;;  %v2208_v2 = vmul.f32 0.5, %v2207_v30  ;;  %v2398_v35 = vadd.f32 1.0, %v4548_v12 }
 0x5ac   : > { %vm1139_vm6 = vcmp.ge.f32.partialorder %v1117_v36, 1.0 }
 0x5ad   : > { %v5550_v21 = vsel %vm1139_vm6, %v5366_v34, %v5358_v20  ;;  %v5554_v48 = vsel %vm1139_vm6, %v5362_v58, %v5366_v34  ;;  %v2209_v6 = vmul.f32 %v2208_v2, %v2196_v40  ;;  %v2399_v10 = vmul.f32 0.5, %v2398_v35  ;;  %v4470_v20 = vld [vmem:[%s6758_s7 + $0x18] sm:$0xff]  }
 0x5ae   : > { %v1163_v7 = vadd.f32 %v5554_v48, %v5550_v21 }
 0x5af   : > { %v2210_v59 = vpack.c.bf16 %v2209_v6, %v2209_v6  ;;  %v2400_v1 = vmul.f32 %v2399_v10, %v2387_v8  ;;  %v4471_v8 = vld [vmem:[%s6758_s7] sm:$0xff]  }
 0x5b0   : > { %v5561_v43 = vmul.f32 0.5, %v1163_v7 }
 0x5b1   : > { %v1120_v17 = vpop.xlane.xlu1 %1119  ;;  %4257 = vmatmul.mubr.bf16.vlgmr.msra.gmra.mxu0 %v2210_v59  ;;  %v2401_v34 = vpack.c.bf16 %v2400_v1, %v2400_v1 }
 0x5b2   : > { %vm1140_vm7 = vcmp.ge.f32.partialorder %v1120_v17, 1.0  ;;  %v1123_v58 = vpop.xlane.xlu0 %1122  ;;  %v1179_v40 = vsub.f32 %v4806_v4, %v5561_v43  ;;  %4289 = vmatpush3.bf16.msra.mxu0 %v4469_v5  ;;  %4292 = vmatprep.mubr.msk.bf16.mxu0 %vm4616_vm3, %v4615_v50 }
 0x5b3   : > { %v5570_v14 = vsel %vm1140_vm7, %v5400_v3, %v5373_v47  ;;  %v5574_v9 = vsel %vm1140_vm7, %v5377_v24, %v5400_v3  ;;  %vm1141_vm8 = vcmp.ge.f32.partialorder %v1123_v58, 1.0  ;;  %4285 = vmatmul.mubr.bf16.vlgmr.msra.gmra.mxu1 %v2401_v34  ;;  %4290 = vmatprep.subr.bf16.mxu0 %v4615_v50 }
 0x5b4   : > { %v1164_v56 = vadd.f32 %v5574_v9, %v5570_v14  ;;  %v5585_v47 = vsel %vm1141_vm8, %v5403_v23, %v5388_v63  ;;  %v5589_v24 = vsel %vm1141_vm8, %v5392_v49, %v5403_v23  ;;  %v1187_v3 = vmax.f32 %v1179_v40, 0.0  ;;  %4305 = vmatpush3.bf16.msra.mxu1 %v4470_v20  ;;  %4308 = vmatprep.mubr.msk.bf16.mxu1 %vm4616_vm3, %v4615_v50 }
 0x5b5   : > { %v1165_v31 = vadd.f32 %v5589_v24, %v5585_v47  ;;  %v1126_v61 = vpop.xlane.xlu1 %1125  ;;  %v2526_v63 = vrot.slane %v5346_v32, 2  ;;  %4306 = vmatprep.subr.bf16.mxu1 %v4615_v50 }
 0x5b6   : > { %v5600_v49 = vmul.f32 0.5, %v1164_v56  ;;  %vm1142_vm9 = vcmp.ge.f32.partialorder %v1126_v61, 1.0  ;;  %v1129_v23 = vpop.xlane.xlu0 %1128  ;;  %v1195_v33 = vmul.f32 %v1187_v3, %v1187_v3  ;;  %4291 = vmatpush3.bf16.msra.mxu0 %v4471_v8 }
 0x5b7   : > { %v5603_v28 = vmul.f32 0.5, %v1165_v31  ;;  %v5607_v52 = vsel %vm1142_vm9, %v5439_v54, %v5407_v41  ;;  %v5611_v45 = vsel %vm1142_vm9, %v5411_v37, %v5439_v54  ;;  %vm1143_vm10 = vcmp.ge.f32.partialorder %v1129_v23, 1.0  ;;  %4296 = vmatprep.subr.bf16.mxu0 %v4615_v50 }
 0x5b8   : > { %v1166_v46 = vadd.f32 %v5611_v45, %v5607_v52  ;;  %v5617_v30 = vsel %vm1143_vm10, %v5443_v57, %v5423_v22  ;;  %v5621_v12 = vsel %vm1143_vm10, %v5427_v11, %v5443_v57  ;;  %v1203_v41 = vsel %vm610_vm2, %v1195_v33, 0.0  ;;  %4307 = vmatpush3.bf16.msra.mxu1 %v4472_v19  ;;  %v4473_v11 = vld [vmem:[%s6758_s7 + $0x28] sm:$0xff]  }
 0x5b9   : > { %v1167_v37 = vadd.f32 %v5621_v12, %v5617_v30  ;;  %v1132_v54 = vpop.xlane.xlu1 %1131  ;;  %1204 = vadd.xlane.f32.xlu0 %v1203_v41  ;;  %v1180_v36 = vsub.f32 %v4809_v15, %v5600_v49  ;;  %v1181_v22 = vsub.f32 %v4811_v16, %v5603_v28  ;;  %v2671_v57 = vrot.slane %v5346_v32, 3  ;;  %4293 = vmatmul.mubr.msk.bf16.vlgmr.msra.gmra.mxu0 %vm404_vm0, %v2526_v63 }
 0x5ba   : > { %v5635_v2 = vmul.f32 0.5, %v1166_v46  ;;  %vm1144_vm11 = vcmp.ge.f32.partialorder %v1132_v54, 1.0  ;;  %v1135_v35 = vpop.xlane.xlu0 %1134  ;;  %4320 = vmatprep.subr.bf16.mxu1 %v4615_v50  ;;  %4300 = vmatprep.mubr.msk.bf16.mxu0 %vm4616_vm3, %v4615_v50  ;;  %vm3710_vm9 = vcmask 1041408  }
 0x5bb   : > { %v5639_v7 = vmul.f32 0.5, %v1167_v37  ;;  %v5643_v6 = vsel %vm1144_vm11, %v5476_v42, %v5447_v44  ;;  %v5647_v10 = vsel %vm1144_vm11, %v5451_v27, %v5476_v42  ;;  %vm1145_vm12 = vcmp.ge.f32.partialorder %v1135_v35, 1.0  ;;  %4309 = vmatmul.mubr.msk.bf16.vlgmr.msra.gmra.mxu1 %vm404_vm0, %v2671_v57  ;;  %v4476_v57 = vld [vmem:[%s6758_s7 + $0x30] sm:$0xff]  }
 0x5bc   : > { %v1168_v32 = vadd.f32 %v5647_v10, %v5643_v6  ;;  %v5655_v5 = vsel %vm1145_vm12, %v5479_v55, %v5460_v0  ;;  %v5659_v59 = vsel %vm1145_vm12, %v5464_v53, %v5479_v55  ;;  %v1188_v44 = vmax.f32 %v1180_v36, 0.0  ;;  %4321 = vmatpush3.bf16.msra.mxu1 %v4473_v11  ;;  %v4474_v53 = vld [vmem:[%s6758_s7 + $0x20] sm:$0xff]   ;;  %4324 = vmatprep.mubr.msk.bf16.mxu1 %vm4616_vm3, %v4615_v50 }
 0x5bd   : > { %v1169_v27 = vadd.f32 %v5659_v59, %v5655_v5  ;;  %v1138_v42 = vpop.xlane.xlu1 %1137  ;;  %v1189_v1 = vmax.f32 %v1181_v22, 0.0  ;;  %v1182_v17 = vsub.f32 %v4815_v25, %v5635_v2  ;;  %v1183_v0 = vsub.f32 %v4817_v26, %v5639_v7  ;;  %4322 = vmatprep.subr.bf16.mxu1 %v4615_v50 }
 0x5be   : > { %v5673_v55 = vmul.f32 0.5, %v1168_v32  ;;  %vm1146_vm13 = vcmp.ge.f32.partialorder %v1138_v42, 1.0  ;;  %v1196_v20 = vmul.f32 %v1188_v44, %v1188_v44  ;;  %v4477_v42 = vld [vmem:[%s6758_s7 + $0x48] sm:$0xff]  }
 0x5bf   : > { %v5676_v58 = vmul.f32 0.5, %v1169_v27  ;;  %v5680_v34 = vsel %vm1146_vm13, %v5504_v18, %v5483_v51  ;;  %v5684_v40 = vsel %vm1146_vm13, %v5487_v62, %v5504_v18  ;;  %v1197_v8 = vmul.f32 %v1189_v1, %v1189_v1  ;;  %v4475_v62 = vld [vmem:[%s6758_s7 + $0x38] sm:$0xff]  }
 0x5c0   : > { %v1170_v56 = vadd.f32 %v5684_v40, %v5680_v34  ;;  %v1206_v3 = vsel %vm610_vm2, %v1196_v20, 0.0  ;;  %v1190_v31 = vmax.f32 %v1182_v17, 0.0  ;;  %v1191_v61 = vmax.f32 %v1183_v0, 0.0  ;;  %4323 = vmatpush3.bf16.msra.mxu1 %v4474_v53  ;;  %v4478_v0 = vld [vmem:[%s6758_s7 + $0x40] sm:$0xff]   ;;  %v4479_v53 = vld [vmem:[%s6758_s7 + $0x58] sm:$0xff]  }
 0x5c1   : > { %1207 = vadd.xlane.f32.xlu1 %v1206_v3  ;;  %v1209_v19 = vsel %vm610_vm2, %v1197_v8, 0.0  ;;  %v1184_v63 = vsub.f32 %v4822_v38, %v5673_v55  ;;  %v1185_v51 = vsub.f32 %v4824_v39, %v5676_v58  ;;  %v2805_v18 = vpack.c.bf16 %v5540_v29, %v5540_v29  ;;  %4336 = vmatprep.subr.bf16.mxu1 %v4615_v50  ;;  %v4480_v8 = vld [vmem:[%s6758_s7 + $0x50] sm:$0xff]  }
 0x5c2   : > { %v5699_v23 = vmul.f32 0.5, %v1170_v56  ;;  %1210 = vadd.xlane.f32.xlu0 %v1209_v19  ;;  %v1198_v33 = vmul.f32 %v1190_v31, %v1190_v31  ;;  %v1199_v46 = vmul.f32 %v1191_v61, %v1191_v61  ;;  %v4481_v56 = vld [vmem:[%s6758_s7 + $0x68] sm:$0xff]   ;;  %v4482_v31 = vld [vmem:[%s6758_s7 + $0x60] sm:$0xff]   ;;  %v4483_v61 = vld [vmem:[%s6758_s7 + $0x78] sm:$0xff]   ;;  %v3394_v19 = vpack.c.bf16 %v5344_v60, %v5344_v60 }
 0x5c3   : > { %v1192_v41 = vmax.f32 %v1184_v63, 0.0  ;;  %v1193_v37 = vmax.f32 %v1185_v51, 0.0  ;;  %4325 = vmatmul.mubr.msk.bf16.vlgmr.msra.gmra.mxu1 %vm404_vm0, %v2805_v18  ;;  %v2966_v1 = vrot.slane %v2805_v18, 1  ;;  %v3113_v20 = vrot.slane %v2805_v18, 2  ;;  %v4484_v63 = vld [vmem:[%s6758_s7 + $0x70] sm:$0xff]   ;;  %v4485_v60 = vld [vmem:[%s6760_s9 + $0x8] sm:$0xff]  }
 0x5c4   : > { %v1212_v54 = vsel %vm610_vm2, %v1198_v33, 0.0  ;;  %v1215_v36 = vsel %vm610_vm2, %v1199_v46, 0.0  ;;  %v1186_v22 = vsub.f32 %v4830_v13, %v5699_v23  ;;  %4337 = vmatpush3.bf16.msra.mxu1 %v4475_v62  ;;  %4340 = vmatprep.mubr.msk.bf16.mxu1 %vm4616_vm3, %v4615_v50  ;;  %v3260_v3 = vrot.slane %v2805_v18, 3  ;;  %v4486_v62 = vld [vmem:[%s6760_s9] sm:$0xff]  }
 0x5c5   : > { %1213 = vadd.xlane.f32.xlu1 %v1212_v54  ;;  %v1200_v29 = vmul.f32 %v1192_v41, %v1192_v41  ;;  %v1201_v11 = vmul.f32 %v1193_v37, %v1193_v37  ;;  %4338 = vmatprep.subr.bf16.mxu1 %v4615_v50  ;;  %v3555_v51 = vrot.slane %v3394_v19, 1 }
 0x5c6   : > { %1216 = vadd.xlane.f32.xlu0 %v1215_v36  ;;  %v1194_v35 = vmax.f32 %v1186_v22, 0.0  ;;  %4297 = vmatpush3.bf16.msra.mxu0 %v4485_v60 }
 0x5c7   : > { %v1218_v32 = vsel %vm610_vm2, %v1200_v29, 0.0  ;;  %v1221_v44 = vsel %vm610_vm2, %v1201_v11, 0.0  ;;  %4298 = vmatprep.subr.bf16.mxu0 %v4615_v50 }
 0x5c8   : > { %v1202_v27 = vmul.f32 %v1194_v35, %v1194_v35  ;;  %4339 = vmatpush3.bf16.msra.mxu1 %v4476_v57 }
 0x5c9   : > { %1219 = vadd.xlane.f32.xlu1 %v1218_v32  ;;  %4352 = vmatprep.subr.bf16.mxu1 %v4615_v50 }
 0x5ca   : > { %1222 = vadd.xlane.f32.xlu0 %v1221_v44  ;;  %v1224_v17 = vsel %vm610_vm2, %v1202_v27, 0.0  ;;  %4299 = vmatpush3.bf16.msra.mxu0 %v4486_v62 }
 0x5cb   : > { %4341 = vmatmul.mubr.msk.bf16.vlgmr.msra.gmra.mxu1 %vm404_vm0, %v2966_v1  ;;  %4312 = vmatprep.subr.bf16.mxu0 %v4615_v50 }
 0x5cc   : > { %4353 = vmatpush3.bf16.msra.mxu1 %v4477_v42  ;;  %4356 = vmatprep.mubr.msk.bf16.mxu1 %vm4616_vm3, %v4615_v50 }
 0x5cd   : > { %1225 = vadd.xlane.f32.xlu1 %v1224_v17  ;;  %4354 = vmatprep.subr.bf16.mxu1 %v4615_v50 }
 0x5d0   : > { %4355 = vmatpush3.bf16.msra.mxu1 %v4478_v0 }
 0x5d1   : > { %4368 = vmatprep.subr.bf16.mxu1 %v4615_v50 }
 0x5d3   : > { %4357 = vmatmul.mubr.msk.bf16.vlgmr.msra.gmra.mxu1 %vm404_vm0, %v3113_v20 }
 0x5d4   : > { %4369 = vmatpush3.bf16.msra.mxu1 %v4479_v53  ;;  %4372 = vmatprep.mubr.msk.bf16.mxu1 %vm4616_vm3, %v4615_v50 }
 0x5d5   : > { %4370 = vmatprep.subr.bf16.mxu1 %v4615_v50 }
 0x5d8   : > { %4371 = vmatpush3.bf16.msra.mxu1 %v4480_v8 }
 0x5d9   : > { %4384 = vmatprep.subr.bf16.mxu1 %v4615_v50 }
 0x5db   : > { %4373 = vmatmul.mubr.msk.bf16.vlgmr.msra.gmra.mxu1 %vm404_vm0, %v3260_v3 }
 0x5dc   : > { %4385 = vmatpush3.bf16.msra.mxu1 %v4481_v56  ;;  %4388 = vmatprep.mubr.msk.bf16.mxu1 %vm4616_vm3, %v4615_v50 }
 0x5dd   : > { %4386 = vmatprep.subr.bf16.mxu1 %v4615_v50 }
 0x5e0   : > { %4387 = vmatpush3.bf16.msra.mxu1 %v4482_v31 }
 0x5e1   : > { %4400 = vmatprep.subr.bf16.mxu1 %v4615_v50 }
 0x5e3   : > { %4389 = vmatmul.mubr.msk.bf16.vlgmr.msra.gmra.mxu1 %vm404_vm0, %v3394_v19 }
 0x5e4   : > { %4401 = vmatpush3.bf16.msra.mxu1 %v4483_v61  ;;  %4404 = vmatprep.mubr.msk.bf16.mxu1 %vm4616_vm3, %v4615_v50 }
 0x5e5   : > { %4402 = vmatprep.subr.bf16.mxu1 %v4615_v50 }
 0x5e8   : > { %4403 = vmatpush3.bf16.msra.mxu1 %v4484_v63 }
 0x5eb   : > { %4405 = vmatmul.mubr.msk.bf16.vlgmr.msra.gmra.mxu1 %vm404_vm0, %v3555_v51 }
 0x642   : > { %v1205_v18 = vpop.xlane.xlu0 %1204 }
 0x643   : > { %vm1227_vm14 = vcmp.ge.f32.partialorder %v1205_v18, 1.0 }
 0x644   : > { %v5773_v33 = vsel %vm1227_vm14, %v5561_v43, %v5550_v21  ;;  %v5777_v46 = vsel %vm1227_vm14, %v5554_v48, %v5561_v43 }
 0x645   : > { %v1251_v41 = vadd.f32 %v5777_v46, %v5773_v33 }
 0x647   : > { %v5781_v37 = vmul.f32 0.5, %v1251_v41 }
 0x649   : > { %v1267_v54 = vsub.f32 %v4806_v4, %v5781_v37 }
 0x64a   : > { %v1208_v36 = vpop.xlane.xlu1 %1207 }
 0x64b   : > { %vm1228_vm15 = vcmp.ge.f32.partialorder %v1208_v36, 1.0  ;;  %v1211_v22 = vpop.xlane.xlu0 %1210  ;;  %v1275_v29 = vmax.f32 %v1267_v54, 0.0 }
 0x64c   : > { %v5787_v21 = vsel %vm1228_vm15, %v5600_v49, %v5570_v14  ;;  %v5791_v48 = vsel %vm1228_vm15, %v5574_v9, %v5600_v49  ;;  %vm1229_vm1 = vcmp.ge.f32.partialorder %v1211_v22, 1.0 }
 0x64d   : > { %v1252_v43 = vadd.f32 %v5791_v48, %v5787_v21  ;;  %v5797_v11 = vsel %vm1229_vm1, %v5603_v28, %v5585_v47  ;;  %v5801_v57 = vsel %vm1229_vm1, %v5589_v24, %v5603_v28  ;;  %v1283_v35 = vmul.f32 %v1275_v29, %v1275_v29 }
 0x64e   : > { %v1253_v14 = vadd.f32 %v5801_v57, %v5797_v11  ;;  %v1214_v32 = vpop.xlane.xlu1 %1213 }
 0x64f   : > { %v5805_v44 = vmul.f32 0.5, %v1252_v43  ;;  %vm1230_vm4 = vcmp.ge.f32.partialorder %v1214_v32, 1.0  ;;  %v1217_v9 = vpop.xlane.xlu0 %1216  ;;  %v1291_v49 = vsel %vm610_vm2, %v1283_v35, 0.0 }
 0x650   : > { %v5808_v27 = vmul.f32 0.5, %v1253_v14  ;;  %v5812_v47 = vsel %vm1230_vm4, %v5635_v2, %v5607_v52  ;;  %v5816_v24 = vsel %vm1230_vm4, %v5611_v45, %v5635_v2  ;;  %vm1231_vm5 = vcmp.ge.f32.partialorder %v1217_v9, 1.0  ;;  %1292 = vadd.xlane.f32.xlu0 %v1291_v49 }
 0x651   : > { %v1254_v28 = vadd.f32 %v5816_v24, %v5812_v47  ;;  %v5822_v42 = vsel %vm1231_vm5, %v5639_v7, %v5617_v30  ;;  %v5826_v1 = vsel %vm1231_vm5, %v5621_v12, %v5639_v7  ;;  %v1268_v52 = vsub.f32 %v4809_v15, %v5805_v44 }
 0x652   : > { %v1255_v45 = vadd.f32 %v5826_v1, %v5822_v42  ;;  %v1220_v2 = vpop.xlane.xlu1 %1219  ;;  %v1269_v17 = vsub.f32 %v4811_v16, %v5808_v27 }
 0x653   : > { %v5834_v0 = vmul.f32 0.5, %v1254_v28  ;;  %vm1232_vm6 = vcmp.ge.f32.partialorder %v1220_v2, 1.0  ;;  %v1223_v53 = vpop.xlane.xlu0 %1222  ;;  %v1276_v30 = vmax.f32 %v1268_v52, 0.0 }
 0x654   : > { %v5836_v20 = vmul.f32 0.5, %v1255_v45  ;;  %v5840_v12 = vsel %vm1232_vm6, %v5673_v55, %v5643_v6  ;;  %v5844_v7 = vsel %vm1232_vm6, %v5647_v10, %v5673_v55  ;;  %vm1233_vm7 = vcmp.ge.f32.partialorder %v1223_v53, 1.0 }
 0x655   : > { %v1256_v8 = vadd.f32 %v5844_v7, %v5840_v12  ;;  %v5850_v56 = vsel %vm1233_vm7, %v5676_v58, %v5655_v5  ;;  %v5854_v3 = vsel %vm1233_vm7, %v5659_v59, %v5676_v58  ;;  %v1284_v31 = vmul.f32 %v1276_v30, %v1276_v30  ;;  %v3949_v30 = vld [vmem:[%s6757_s6 + $0x1] ss:$0 sm:$0xff] }
 0x656   : > { %v1257_v6 = vadd.f32 %v5854_v3, %v5850_v56  ;;  %v1226_v61 = vpop.xlane.xlu1 %1225  ;;  %v1277_v19 = vmax.f32 %v1269_v17, 0.0  ;;  %v1270_v10 = vsub.f32 %v4815_v25, %v5834_v0  ;;  %v1271_v55 = vsub.f32 %v4817_v26, %v5836_v20 }
 0x657   : > { %v5862_v63 = vmul.f32 0.5, %v1256_v8  ;;  %vm1234_vm8 = vcmp.ge.f32.partialorder %v1226_v61, 1.0  ;;  %v1294_v5 = vsel %vm610_vm2, %v1284_v31, 0.0  ;;  %v3914_v8 = vld [vmem:[%s6757_s6] ss:$0 sm:$0xff] }
 0x658   : > { %v5865_v51 = vmul.f32 0.5, %v1257_v6  ;;  %v5869_v59 = vsel %vm1234_vm8, %v5699_v23, %v5680_v34  ;;  %v5873_v58 = vsel %vm1234_vm8, %v5684_v40, %v5699_v23  ;;  %1295 = vadd.xlane.f32.xlu1 %v1294_v5  ;;  %v1285_v60 = vmul.f32 %v1277_v19, %v1277_v19 }
 0x659   : > { %v1258_v62 = vadd.f32 %v5873_v58, %v5869_v59  ;;  %v1278_v18 = vmax.f32 %v1270_v10, 0.0  ;;  %v1279_v41 = vmax.f32 %v1271_v55, 0.0  ;;  %v1272_v54 = vsub.f32 %v4822_v38, %v5862_v63 }
 0x65a   : > { %v1297_v36 = vsel %vm610_vm2, %v1285_v60, 0.0  ;;  %v1273_v34 = vsub.f32 %v4824_v39, %v5865_v51 }
 0x65b   : > { %v5882_v22 = vmul.f32 0.5, %v1258_v62  ;;  %1298 = vadd.xlane.f32.xlu0 %v1297_v36  ;;  %v1286_v40 = vmul.f32 %v1278_v18, %v1278_v18  ;;  %v1287_v23 = vmul.f32 %v1279_v41, %v1279_v41  ;;  %v1280_v29 = vmax.f32 %v1272_v54, 0.0  ;;  %v3958_v18 = vld [vmem:[%s6759_s8] ss:$0 sm:$0xff] }
 0x65c   : > { %v1281_v43 = vmax.f32 %v1273_v34, 0.0  ;;  %v3971_v34 = vld [vmem:[%s6759_s8 + $0x1] ss:$0 sm:$0xff] }
 0x65d   : > { %v1300_v35 = vsel %vm610_vm2, %v1286_v40, 0.0  ;;  %v1303_v14 = vsel %vm610_vm2, %v1287_v23, 0.0  ;;  %v1288_v32 = vmul.f32 %v1280_v29, %v1280_v29  ;;  %v1274_v9 = vsub.f32 %v4830_v13, %v5882_v22 }
 0x65e   : > { %1301 = vadd.xlane.f32.xlu1 %v1300_v35  ;;  %v1289_v49 = vmul.f32 %v1281_v43, %v1281_v43 }
 0x65f   : > { %1304 = vadd.xlane.f32.xlu0 %v1303_v14  ;;  %v1306_v28 = vsel %vm610_vm2, %v1288_v32, 0.0  ;;  %v1282_v52 = vmax.f32 %v1274_v9, 0.0 }
 0x660   : > { %v1309_v45 = vsel %vm610_vm2, %v1289_v49, 0.0 }
 0x661   : > { %v1290_v2 = vmul.f32 %v1282_v52, %v1282_v52 }
 0x662   : > { %1307 = vadd.xlane.f32.xlu1 %v1306_v28 }
 0x663   : > { %1310 = vadd.xlane.f32.xlu0 %v1309_v45  ;;  %v1312_v17 = vsel %vm610_vm2, %v1290_v2, 0.0 }
 0x666   : > { %1313 = vadd.xlane.f32.xlu1 %v1312_v17 }
 0x671   : > { %v2316_v53 = vpop.f32.mrf.mxu0 }
 0x672   : > { %v2317_v55 = vadd.f32 %v3914_v8, %v2316_v53  ;;  %v3989_v53 = vld [vmem:[%s6759_s8 + $0x2] ss:$0 sm:$0xff] }
 0x673   : > { %v4258_v31 = vpop.f32.mrf.mxu0  ;;  %v2509_v6 = vpop.f32.mrf.mxu1 }
 0x674   : > { %v2510_v61 = vadd.f32 %v3949_v30, %v2509_v6 }
 0x675   : > { %v2319_v19 = vpop.f32.mrf.mxu0  ;;  %v4286_v10 = vpop.f32.mrf.mxu1 }
 0x676   : > { %v3690_v5 = vrot.slane %v2510_v61, 6 }
 0x677   : > { %v4259_v60 = vpop.f32.mrf.mxu0  ;;  %v2512_v62 = vpop.f32.mrf.mxu1 }
 0x678   : > { %v5901_v41 = vsel %vm3710_vm9, %v2317_v55, %v3690_v5 }
 0x679   : > { %v4287_v54 = vpop.f32.mrf.mxu1  ;;  %v2576_v36 = vpop.f32.mrf.mxu0 }
 0x67a   : > { %v2577_v40 = vadd.f32 %v3958_v18, %v2576_v36  ;;  %v4007_v54 = vld [vmem:[%s6759_s8 + $0x3] ss:$0 sm:$0xff] }
 0x67b   : > { %v4294_v23 = vpop.f32.mrf.mxu0  ;;  %v2721_v29 = vpop.f32.mrf.mxu1 }
 0x67c   : > { %v2582_v43 = vmul.f32 %v2577_v40, %v2577_v40  ;;  %v5906_v35 = vadd.f32 %v3971_v34, %v2721_v29 }
 0x67d   : > { %v2579_v14 = vpop.f32.mrf.mxu0  ;;  %v4310_v32 = vpop.f32.mrf.mxu1 }
 0x67e   : > { %v2583_v9 = vmul.f32 %v2582_v43, %v2577_v40  ;;  %v2727_v49 = vmul.f32 %v5906_v35, %v5906_v35 }
 0x67f   : > { %v4295_v28 = vpop.f32.mrf.mxu0  ;;  %v2724_v52 = vpop.f32.mrf.mxu1 }
 0x680   : > { %v2584_v45 = vmul.f32 0.044715, %v2583_v9  ;;  %v2728_v2 = vmul.f32 %v2727_v49, %v5906_v35  ;;  %v4025_v52 = vld [vmem:[%s6759_s8 + $0x4] ss:$0 sm:$0xff] }
 0x681   : > { %v4311_v17 = vpop.f32.mrf.mxu1 }
 0x682   : > { %v2585_v30 = vadd.f32 %v2584_v45, %v2577_v40  ;;  %v2729_v8 = vmul.f32 0.044715, %v2728_v2 }
 0x683   : > { %v2868_v31 = vpop.f32.mrf.mxu1 }
 0x684   : > { %v2586_v6 = vmul.f32 0.7978846, %v2585_v30  ;;  %v2730_v61 = vadd.f32 %v2729_v8, %v5906_v35  ;;  %v5915_v19 = vadd.f32 %v3989_v53, %v2868_v31 }
 0x685   : > { %v4326_v10 = vpop.f32.mrf.mxu1 }
 0x686   : > { %4549 = vtanh.f32 %v2586_v6  ;;  %v2731_v55 = vmul.f32 0.7978846, %v2730_v61  ;;  %v2874_v5 = vmul.f32 %v5915_v19, %v5915_v19 }
 0x687   : > { %v2871_v60 = vpop.f32.mrf.mxu1 }
 0x688   : > { %4551 = vtanh.f32 %v2731_v55  ;;  %v2875_v62 = vmul.f32 %v2874_v5, %v5915_v19 }
 0x689   : > { %v4327_v18 = vpop.f32.mrf.mxu1 }
 0x68a   : > { %v2876_v36 = vmul.f32 0.044715, %v2875_v62 }
 0x68b   : > { %v3016_v34 = vpop.f32.mrf.mxu1 }
 0x68c   : > { %v2877_v23 = vadd.f32 %v2876_v36, %v5915_v19  ;;  %v5924_v29 = vadd.f32 %v4007_v54, %v3016_v34  ;;  %v4043_v36 = vld [vmem:[%s6759_s8 + $0x5] ss:$0 sm:$0xff]  ;;  %v4487_v34 = vld [vmem:[%s6760_s9 + $0x18] sm:$0xff]  }
 0x68d   : > { %v4342_v43 = vpop.f32.mrf.mxu1 }
 0x68e   : > { %v2878_v14 = vmul.f32 0.7978846, %v2877_v23  ;;  %v3022_v32 = vmul.f32 %v5924_v29, %v5924_v29 }
 0x68f   : > { %v3019_v9 = vpop.f32.mrf.mxu1 }
 0x690   : > { %4553 = vtanh.f32 %v2878_v14  ;;  %v3023_v49 = vmul.f32 %v3022_v32, %v5924_v29 }
 0x691   : > { %v4343_v28 = vpop.f32.mrf.mxu1 }
 0x692   : > { %v3024_v45 = vmul.f32 0.044715, %v3023_v49 }
 0x693   : > { %v4550_v2 = vpop.eup %4549  ;;  %v3163_v17 = vpop.f32.mrf.mxu1 }
 0x694   : > { %v2588_v53 = vadd.f32 1.0, %v4550_v2  ;;  %v3025_v30 = vadd.f32 %v3024_v45, %v5924_v29  ;;  %v5933_v8 = vadd.f32 %v4025_v52, %v3163_v17  ;;  %v4488_v52 = vld [vmem:[%s6760_s9 + $0x10] sm:$0xff]  }
 0x695   : > { %v4552_v31 = vpop.eup %4551  ;;  %v4358_v6 = vpop.f32.mrf.mxu1 }
 0x696   : > { %v2589_v61 = vmul.f32 0.5, %v2588_v53  ;;  %v2733_v10 = vadd.f32 1.0, %v4552_v31  ;;  %v3026_v55 = vmul.f32 0.7978846, %v3025_v30  ;;  %v3169_v5 = vmul.f32 %v5933_v8, %v5933_v8 }
 0x697   : > { %v3166_v60 = vpop.f32.mrf.mxu1 }
 0x698   : > { %v2590_v62 = vmul.f32 %v2589_v61, %v2577_v40  ;;  %4555 = vtanh.f32 %v3026_v55  ;;  %v3170_v18 = vmul.f32 %v3169_v5, %v5933_v8  ;;  %v2734_v43 = vmul.f32 0.5, %v2733_v10  ;;  %v4061_v61 = vld [vmem:[%s6759_s8 + $0x6] ss:$0 sm:$0xff] }
 0x699   : > { %v4359_v54 = vpop.f32.mrf.mxu1 }
 0x69a   : > { %v2591_v23 = vpack.c.bf16 %v2590_v62, %v2590_v62  ;;  %v3171_v14 = vmul.f32 0.044715, %v3170_v18  ;;  %v2735_v45 = vmul.f32 %v2734_v43, %v5906_v35  ;;  %v4489_v35 = vld [vmem:[%s6760_s9 + $0x28] sm:$0xff]  }
 0x69b   : > { %v3310_v32 = vpop.f32.mrf.mxu1 }
 0x69c   : > { %v3172_v9 = vadd.f32 %v3171_v14, %v5933_v8  ;;  %v5945_v49 = vadd.f32 %v4043_v36, %v3310_v32  ;;  %4301 = vmatmul.mubr.msk.bf16.vlgmr.msra.gmra.mxu0 %vm404_vm0, %v2591_v23  ;;  %v2736_v10 = vpack.c.bf16 %v2735_v45, %v2735_v45 }
 0x69d   : > { %v4554_v40 = vpop.eup %4553  ;;  %4313 = vmatpush3.bf16.msra.mxu0 %v4487_v34  ;;  %v4374_v28 = vpop.f32.mrf.mxu1  ;;  %4316 = vmatprep.mubr.msk.bf16.mxu0 %vm4616_vm3, %v4615_v50  ;;  %v4490_v34 = vld [vmem:[%s6760_s9 + $0x20] sm:$0xff]  }
 0x69e   : > { %v2880_v2 = vadd.f32 1.0, %v4554_v40  ;;  %v3173_v17 = vmul.f32 0.7978846, %v3172_v9  ;;  %v3316_v53 = vmul.f32 %v5945_v49, %v5945_v49  ;;  %4314 = vmatprep.subr.bf16.mxu0 %v4615_v50 }
 0x69f   : > { %v3313_v30 = vpop.f32.mrf.mxu1 }
 0x6a0   : > { %4557 = vtanh.f32 %v3173_v17  ;;  %v3317_v31 = vmul.f32 %v3316_v53, %v5945_v49  ;;  %v2881_v55 = vmul.f32 0.5, %v2880_v2 }
 0x6a1   : > { %4315 = vmatpush3.bf16.msra.mxu0 %v4488_v52  ;;  %v4375_v6 = vpop.f32.mrf.mxu1  ;;  %v4079_v52 = vld [vmem:[%s6759_s8 + $0x7] ss:$0 sm:$0xff] }
 0x6a2   : > { %v3318_v5 = vmul.f32 0.044715, %v3317_v31  ;;  %4328 = vmatprep.subr.bf16.mxu0 %v4615_v50  ;;  %v2882_v23 = vmul.f32 %v2881_v55, %v5915_v19  ;;  %v4491_v19 = vld [vmem:[%s6760_s9 + $0x38] sm:$0xff]  }
 0x6a3   : > { %v3457_v60 = vpop.f32.mrf.mxu1 }
 0x6a4   : > { %v3319_v62 = vadd.f32 %v3318_v5, %v5945_v49  ;;  %v5966_v18 = vadd.f32 %v4061_v61, %v3457_v60  ;;  %4317 = vmatmul.mubr.msk.bf16.vlgmr.msra.gmra.mxu0 %vm404_vm0, %v2736_v10  ;;  %v2883_v45 = vpack.c.bf16 %v2882_v23, %v2882_v23 }
 0x6a5   : > { %v4556_v54 = vpop.eup %4555  ;;  %4329 = vmatpush3.bf16.msra.mxu0 %v4489_v35  ;;  %v4390_v36 = vpop.f32.mrf.mxu1  ;;  %4332 = vmatprep.mubr.msk.bf16.mxu0 %vm4616_vm3, %v4615_v50  ;;  %v4492_v35 = vld [vmem:[%s6760_s9 + $0x30] sm:$0xff]  }
 0x6a6   : > { %v3028_v43 = vadd.f32 1.0, %v4556_v54  ;;  %v3320_v14 = vmul.f32 0.7978846, %v3319_v62  ;;  %v3463_v32 = vmul.f32 %v5966_v18, %v5966_v18  ;;  %4330 = vmatprep.subr.bf16.mxu0 %v4615_v50 }
 0x6a7   : > { %v3460_v9 = vpop.f32.mrf.mxu1 }
 0x6a8   : > { %4559 = vtanh.f32 %v3320_v14  ;;  %v3464_v40 = vmul.f32 %v3463_v32, %v5966_v18  ;;  %v3029_v2 = vmul.f32 0.5, %v3028_v43  ;;  %v4494_v9 = vld [vmem:[%s6760_s9 + $0x40] sm:$0xff]  }
 0x6a9   : > { %4331 = vmatpush3.bf16.msra.mxu0 %v4490_v34  ;;  %v4391_v28 = vpop.f32.mrf.mxu1  ;;  %v4493_v34 = vld [vmem:[%s6760_s9 + $0x48] sm:$0xff]  }
 0x6aa   : > { %v3465_v17 = vmul.f32 0.044715, %v3464_v40  ;;  %4344 = vmatprep.subr.bf16.mxu0 %v4615_v50  ;;  %v3030_v10 = vmul.f32 %v3029_v2, %v5924_v29 }
 0x6ab   : > { %v3605_v53 = vpop.f32.mrf.mxu1 }
 0x6ac   : > { %v3466_v30 = vadd.f32 %v3465_v17, %v5966_v18  ;;  %v5987_v31 = vadd.f32 %v4079_v52, %v3605_v53  ;;  %4333 = vmatmul.mubr.msk.bf16.vlgmr.msra.gmra.mxu0 %vm404_vm0, %v2883_v45  ;;  %v3031_v23 = vpack.c.bf16 %v3030_v10, %v3030_v10 }
 0x6ad   : > { %v4558_v6 = vpop.eup %4557  ;;  %4345 = vmatpush3.bf16.msra.mxu0 %v4491_v19  ;;  %v4406_v61 = vpop.f32.mrf.mxu1  ;;  %4348 = vmatprep.mubr.msk.bf16.mxu0 %vm4616_vm3, %v4615_v50  ;;  %v4495_v19 = vld [vmem:[%s6760_s9 + $0x58] sm:$0xff]  }
 0x6ae   : > { %v3175_v55 = vadd.f32 1.0, %v4558_v6  ;;  %v3467_v5 = vmul.f32 0.7978846, %v3466_v30  ;;  %v3611_v60 = vmul.f32 %v5987_v31, %v5987_v31  ;;  %4346 = vmatprep.subr.bf16.mxu0 %v4615_v50  ;;  %v4497_v6 = vld [vmem:[%s6760_s9 + $0x68] sm:$0xff]  }
 0x6af   : > { %v3608_v62 = vpop.f32.mrf.mxu1 }
 0x6b0   : > { %4561 = vtanh.f32 %v3467_v5  ;;  %v3612_v54 = vmul.f32 %v3611_v60, %v5987_v31  ;;  %v3176_v43 = vmul.f32 0.5, %v3175_v55  ;;  %v4499_v60 = vld [vmem:[%s6760_s9 + $0x78] sm:$0xff]  }
 0x6b1   : > { %4347 = vmatpush3.bf16.msra.mxu0 %v4492_v35  ;;  %v4407_v36 = vpop.f32.mrf.mxu1 }
 0x6b2   : > { %v3613_v29 = vmul.f32 0.044715, %v3612_v54  ;;  %4360 = vmatprep.subr.bf16.mxu0 %v4615_v50  ;;  %v3177_v40 = vmul.f32 %v3176_v43, %v5933_v8  ;;  %v4496_v8 = vld [vmem:[%s6760_s9 + $0x50] sm:$0xff]  }
 0x6b3   : > { %v4500_v36 = vld [vmem:[%s6760_s9 + $0x70] sm:$0xff]  }
 0x6b4   : > { %v3614_v14 = vadd.f32 %v3613_v29, %v5987_v31  ;;  %4349 = vmatmul.mubr.msk.bf16.vlgmr.msra.gmra.mxu0 %vm404_vm0, %v3031_v23  ;;  %v3178_v45 = vpack.c.bf16 %v3177_v40, %v3177_v40 }
 0x6b5   : > { %v4560_v32 = vpop.eup %4559  ;;  %4361 = vmatpush3.bf16.msra.mxu0 %v4493_v34  ;;  %4364 = vmatprep.mubr.msk.bf16.mxu0 %vm4616_vm3, %v4615_v50 }
 0x6b6   : > { %v3322_v28 = vadd.f32 1.0, %v4560_v32  ;;  %v3615_v52 = vmul.f32 0.7978846, %v3614_v14  ;;  %4362 = vmatprep.subr.bf16.mxu0 %v4615_v50 }
 0x6b8   : > { %4563 = vtanh.f32 %v3615_v52  ;;  %v3323_v2 = vmul.f32 0.5, %v3322_v28 }
 0x6b9   : > { %4363 = vmatpush3.bf16.msra.mxu0 %v4494_v9 }
 0x6ba   : > { %4376 = vmatprep.subr.bf16.mxu0 %v4615_v50  ;;  %v3324_v53 = vmul.f32 %v3323_v2, %v5945_v49  ;;  %v4498_v49 = vld [vmem:[%s6760_s9 + $0x60] sm:$0xff]  }
 0x6bc   : > { %4365 = vmatmul.mubr.msk.bf16.vlgmr.msra.gmra.mxu0 %vm404_vm0, %v3178_v45  ;;  %v3325_v61 = vpack.c.bf16 %v3324_v53, %v3324_v53 }
 0x6bd   : > { %v4562_v17 = vpop.eup %4561  ;;  %4377 = vmatpush3.bf16.msra.mxu0 %v4495_v19  ;;  %4380 = vmatprep.mubr.msk.bf16.mxu0 %vm4616_vm3, %v4615_v50 }
 0x6be   : > { %v3469_v30 = vadd.f32 1.0, %v4562_v17  ;;  %4378 = vmatprep.subr.bf16.mxu0 %v4615_v50 }
 0x6c0   : > { %v3470_v35 = vmul.f32 0.5, %v3469_v30 }
 0x6c1   : > { %4379 = vmatpush3.bf16.msra.mxu0 %v4496_v8 }
 0x6c2   : > { %4392 = vmatprep.subr.bf16.mxu0 %v4615_v50  ;;  %v3471_v55 = vmul.f32 %v3470_v35, %v5966_v18 }
 0x6c4   : > { %4381 = vmatmul.mubr.msk.bf16.vlgmr.msra.gmra.mxu0 %vm404_vm0, %v3325_v61  ;;  %v3472_v62 = vpack.c.bf16 %v3471_v55, %v3471_v55 }
 0x6c5   : > { %v4564_v10 = vpop.eup %4563  ;;  %4393 = vmatpush3.bf16.msra.mxu0 %v4497_v6  ;;  %4396 = vmatprep.mubr.msk.bf16.mxu0 %vm4616_vm3, %v4615_v50 }
 0x6c6   : > { %v3617_v5 = vadd.f32 1.0, %v4564_v10  ;;  %4394 = vmatprep.subr.bf16.mxu0 %v4615_v50 }
 0x6c8   : > { %v3618_v54 = vmul.f32 0.5, %v3617_v5 }
 0x6c9   : > { %4395 = vmatpush3.bf16.msra.mxu0 %v4498_v49 }
 0x6ca   : > { %4408 = vmatprep.subr.bf16.mxu0 %v4615_v50  ;;  %v3619_v18 = vmul.f32 %v3618_v54, %v5987_v31 }
 0x6cc   : > { %4397 = vmatmul.mubr.msk.bf16.vlgmr.msra.gmra.mxu0 %vm404_vm0, %v3472_v62  ;;  %v3620_v34 = vpack.c.bf16 %v3619_v18, %v3619_v18 }
 0x6cd   : > { %4409 = vmatpush3.bf16.msra.mxu0 %v4499_v60  ;;  %4412 = vmatprep.mubr.msk.bf16.mxu0 %vm4616_vm3, %v4615_v50 }
 0x6ce   : > { %4410 = vmatprep.subr.bf16.mxu0 %v4615_v50 }
 0x6d1   : > { %4411 = vmatpush3.bf16.msra.mxu0 %v4500_v36 }
 0x6d4   : > { %4413 = vmatmul.mubr.msk.bf16.vlgmr.msra.gmra.mxu0 %vm404_vm0, %v3620_v34 }
 0x6d9   : > { %v1293_v23 = vpop.xlane.xlu0 %1292 }
 0x6da   : > { %vm1315_vm10 = vcmp.ge.f32.partialorder %v1293_v23, 1.0 }
 0x6db   : > { %v6052_v43 = vsel %vm1315_vm10, %v5781_v37, %v5773_v33  ;;  %v6056_v29 = vsel %vm1315_vm10, %v5777_v46, %v5781_v37 }
 0x6dc   : > { %v1339_v14 = vadd.f32 %v6056_v29, %v6052_v43 }
 0x6de   : > { %v6060_v31 = vmul.f32 0.5, %v1339_v14 }
 0x6e0   : > { %v1355_v50 = vsub.f32 %v4806_v4, %v6060_v31 }
 0x6e1   : > { %v1296_v32 = vpop.xlane.xlu1 %1295 }
 0x6e2   : > { %vm1316_vm3 = vcmp.ge.f32.partialorder %v1296_v32, 1.0  ;;  %v1363_v9 = vmax.f32 %v1355_v50, 0.0 }
 0x6e3   : > { %v6066_v40 = vsel %vm1316_vm3, %v5805_v44, %v5787_v21  ;;  %v6070_v33 = vsel %vm1316_vm3, %v5791_v48, %v5805_v44 }
 0x6e4   : > { %v1340_v46 = vadd.f32 %v6070_v33, %v6066_v40  ;;  %v1299_v37 = vpop.xlane.xlu0 %1298  ;;  %v1371_v28 = vmul.f32 %v1363_v9, %v1363_v9 }
 0x6e5   : > { %vm1317_vm11 = vcmp.ge.f32.partialorder %v1299_v37, 1.0 }
 0x6e6   : > { %v6074_v52 = vmul.f32 0.5, %v1340_v46  ;;  %v6078_v19 = vsel %vm1317_vm11, %v5808_v27, %v5797_v11  ;;  %v6082_v21 = vsel %vm1317_vm11, %v5801_v57, %v5808_v27  ;;  %v1379_v45 = vsel %vm610_vm2, %v1371_v28, 0.0 }
 0x6e7   : > { %v1341_v48 = vadd.f32 %v6082_v21, %v6078_v19  ;;  %v1302_v44 = vpop.xlane.xlu1 %1301  ;;  %1380 = vadd.xlane.f32.xlu0 %v1379_v45 }
 0x6e8   : > { %vm1318_vm12 = vcmp.ge.f32.partialorder %v1302_v44, 1.0  ;;  %v1305_v2 = vpop.xlane.xlu0 %1304  ;;  %v1356_v17 = vsub.f32 %v4809_v15, %v6074_v52 }
 0x6e9   : > { %v6089_v8 = vmul.f32 0.5, %v1341_v48  ;;  %v6093_v11 = vsel %vm1318_vm12, %v5834_v0, %v5812_v47  ;;  %v6097_v57 = vsel %vm1318_vm12, %v5816_v24, %v5834_v0  ;;  %vm1319_vm13 = vcmp.ge.f32.partialorder %v1305_v2, 1.0 }
 0x6ea   : > { %v1342_v27 = vadd.f32 %v6097_v57, %v6093_v11  ;;  %v6103_v53 = vsel %vm1319_vm13, %v5836_v20, %v5822_v42  ;;  %v6107_v30 = vsel %vm1319_vm13, %v5826_v1, %v5836_v20  ;;  %v1364_v6 = vmax.f32 %v1356_v17, 0.0 }
 0x6eb   : > { %v1343_v47 = vadd.f32 %v6107_v30, %v6103_v53  ;;  %v1308_v61 = vpop.xlane.xlu1 %1307  ;;  %v1357_v24 = vsub.f32 %v4811_v16, %v6089_v8  ;;  %vm3712_vm12 = vcmask 1043456   ;;  %vm3714_vm13 = vcmask 1045504  }
 0x6ec   : > { %v6113_v0 = vmul.f32 0.5, %v1342_v27  ;;  %vm1320_vm14 = vcmp.ge.f32.partialorder %v1308_v61, 1.0  ;;  %v1311_v35 = vpop.xlane.xlu0 %1310  ;;  %v1372_v10 = vmul.f32 %v1364_v6, %v1364_v6 }
 0x6ed   : > { %v6115_v49 = vmul.f32 0.5, %v1343_v47  ;;  %v6119_v42 = vsel %vm1320_vm14, %v5862_v63, %v5840_v12  ;;  %v6123_v1 = vsel %vm1320_vm14, %v5844_v7, %v5862_v63  ;;  %vm1321_vm15 = vcmp.ge.f32.partialorder %v1311_v35, 1.0 }
 0x6ee   : > { %v1344_v20 = vadd.f32 %v6123_v1, %v6119_v42  ;;  %v6129_v55 = vsel %vm1321_vm15, %v5865_v51, %v5850_v56  ;;  %v6133_v5 = vsel %vm1321_vm15, %v5854_v3, %v5865_v51  ;;  %v1382_v60 = vsel %vm610_vm2, %v1372_v10, 0.0 }
 0x6ef   : > { %v1345_v12 = vadd.f32 %v6133_v5, %v6129_v55  ;;  %v1314_v62 = vpop.xlane.xlu1 %1313  ;;  %1383 = vadd.xlane.f32.xlu1 %v1382_v60  ;;  %v1365_v7 = vmax.f32 %v1357_v24, 0.0  ;;  %v1358_v63 = vsub.f32 %v4815_v25, %v6113_v0  ;;  %v1359_v54 = vsub.f32 %v4817_v26, %v6115_v49 }
 0x6f0   : > { %v6142_v56 = vmul.f32 0.5, %v1344_v20  ;;  %vm1322_vm1 = vcmp.ge.f32.partialorder %v1314_v62, 1.0 }
 0x6f1   : > { %v6144_v36 = vmul.f32 0.5, %v1345_v12  ;;  %v6148_v3 = vsel %vm1322_vm1, %v5882_v22, %v5869_v59  ;;  %v6152_v51 = vsel %vm1322_vm1, %v5873_v58, %v5882_v22  ;;  %v1373_v18 = vmul.f32 %v1365_v7, %v1365_v7 }
 0x6f2   : > { %v1346_v34 = vadd.f32 %v6152_v51, %v6148_v3  ;;  %v1366_v23 = vmax.f32 %v1358_v63, 0.0  ;;  %v1367_v14 = vmax.f32 %v1359_v54, 0.0  ;;  %v1360_v50 = vsub.f32 %v4822_v38, %v6142_v56 }
 0x6f3   : > { %v1385_v32 = vsel %vm610_vm2, %v1373_v18, 0.0  ;;  %v1361_v9 = vsub.f32 %v4824_v39, %v6144_v36 }
 0x6f4   : > { %v6161_v59 = vmul.f32 0.5, %v1346_v34  ;;  %1386 = vadd.xlane.f32.xlu0 %v1385_v32  ;;  %v1374_v46 = vmul.f32 %v1366_v23, %v1366_v23  ;;  %v1375_v58 = vmul.f32 %v1367_v14, %v1367_v14  ;;  %v1368_v22 = vmax.f32 %v1360_v50, 0.0 }
 0x6f5   : > { %v1369_v37 = vmax.f32 %v1361_v9, 0.0 }
 0x6f6   : > { %v1388_v28 = vsel %vm610_vm2, %v1374_v46, 0.0  ;;  %v1391_v45 = vsel %vm610_vm2, %v1375_v58, 0.0  ;;  %v1376_v48 = vmul.f32 %v1368_v22, %v1368_v22  ;;  %v1362_v44 = vsub.f32 %v4830_v13, %v6161_v59 }
 0x6f7   : > { %1389 = vadd.xlane.f32.xlu1 %v1388_v28  ;;  %v1377_v2 = vmul.f32 %v1369_v37, %v1369_v37 }
 0x6f8   : > { %1392 = vadd.xlane.f32.xlu0 %v1391_v45  ;;  %v1394_v17 = vsel %vm610_vm2, %v1376_v48, 0.0  ;;  %v1370_v27 = vmax.f32 %v1362_v44, 0.0 }
 0x6f9   : > { %v1397_v6 = vsel %vm610_vm2, %v1377_v2, 0.0 }
 0x6fa   : > { %v1378_v47 = vmul.f32 %v1370_v27, %v1370_v27 }
 0x6fb   : > { %1395 = vadd.xlane.f32.xlu1 %v1394_v17 }
 0x6fc   : > { %1398 = vadd.xlane.f32.xlu0 %v1397_v6  ;;  %v1400_v61 = vsel %vm610_vm2, %v1378_v47, 0.0 }
 0x6ff   : > { %1401 = vadd.xlane.f32.xlu1 %v1400_v61 }
 0x75c   : > { %v6170_v24 = vpop.f32.mrf.mxu0 }
 0x75e   : > { %v4302_v35 = vpop.f32.mrf.mxu0 }
 0x760   : > { %v2655_v10 = vpop.f32.mrf.mxu0 }
 0x762   : > { %v4303_v20 = vpop.f32.mrf.mxu0 }
 0x764   : > { %v6172_v60 = vpop.f32.mrf.mxu0 }
 0x766   : > { %v4318_v12 = vpop.f32.mrf.mxu0 }
 0x768   : > { %v2802_v62 = vpop.f32.mrf.mxu0 }
 0x76a   : > { %v4319_v7 = vpop.f32.mrf.mxu0 }
 0x76c   : > { %v6174_v63 = vpop.f32.mrf.mxu0 }
 0x76e   : > { %v4334_v54 = vpop.f32.mrf.mxu0 }
 0x770   : > { %v1381_v18 = vpop.xlane.xlu0 %1380  ;;  %v2949_v34 = vpop.f32.mrf.mxu0 }
 0x771   : > { %vm1403_vm4 = vcmp.ge.f32.partialorder %v1381_v18, 1.0 }
 0x772   : > { %v6178_v23 = vsel %vm1403_vm4, %v6060_v31, %v6052_v43  ;;  %v6182_v14 = vsel %vm1403_vm4, %v6056_v29, %v6060_v31  ;;  %v4335_v32 = vpop.f32.mrf.mxu0 }
 0x773   : > { %v1427_v50 = vadd.f32 %v6182_v14, %v6178_v23 }
 0x774   : > { %v6188_v46 = vpop.f32.mrf.mxu0 }
 0x775   : > { %v6186_v9 = vmul.f32 0.5, %v1427_v50 }
 0x776   : > { %v4350_v58 = vpop.f32.mrf.mxu0 }
 0x777   : > { %v1443_v22 = vsub.f32 %v4806_v4, %v6186_v9 }
 0x778   : > { %v1384_v37 = vpop.xlane.xlu1 %1383  ;;  %v3097_v43 = vpop.f32.mrf.mxu0 }
 0x779   : > { %vm1404_vm5 = vcmp.ge.f32.partialorder %v1384_v37, 1.0  ;;  %v1451_v28 = vmax.f32 %v1443_v22, 0.0 }
 0x77a   : > { %v6194_v29 = vsel %vm1404_vm5, %v6074_v52, %v6066_v40  ;;  %v6198_v31 = vsel %vm1404_vm5, %v6070_v33, %v6074_v52  ;;  %v4351_v44 = vpop.f32.mrf.mxu0 }
 0x77b   : > { %v1428_v45 = vadd.f32 %v6198_v31, %v6194_v29  ;;  %v1459_v48 = vmul.f32 %v1451_v28, %v1451_v28 }
 0x77c   : > { %v6205_v6 = vpop.f32.mrf.mxu0 }
 0x77d   : > { %v6202_v2 = vmul.f32 0.5, %v1428_v45  ;;  %v1387_v17 = vpop.xlane.xlu0 %1386  ;;  %v1467_v27 = vsel %vm610_vm2, %v1459_v48, 0.0 }
 0x77e   : > { %vm1405_vm6 = vcmp.ge.f32.partialorder %v1387_v17, 1.0  ;;  %1468 = vadd.xlane.f32.xlu0 %v1467_v27  ;;  %v4366_v47 = vpop.f32.mrf.mxu0 }
 0x77f   : > { %v6209_v40 = vsel %vm1405_vm6, %v6089_v8, %v6078_v19  ;;  %v6213_v33 = vsel %vm1405_vm6, %v6082_v21, %v6089_v8  ;;  %v1444_v52 = vsub.f32 %v4809_v15, %v6202_v2 }
 0x780   : > { %v1429_v61 = vadd.f32 %v6213_v33, %v6209_v40  ;;  %v1390_v35 = vpop.xlane.xlu1 %1389  ;;  %v3244_v12 = vpop.f32.mrf.mxu0 }
 0x781   : > { %vm1406_vm7 = vcmp.ge.f32.partialorder %v1390_v35, 1.0  ;;  %v1393_v10 = vpop.xlane.xlu0 %1392  ;;  %v1452_v20 = vmax.f32 %v1444_v52, 0.0 }
 0x782   : > { %v6219_v62 = vmul.f32 0.5, %v1429_v61  ;;  %v6223_v19 = vsel %vm1406_vm7, %v6113_v0, %v6093_v11  ;;  %v6227_v21 = vsel %vm1406_vm7, %v6097_v57, %v6113_v0  ;;  %vm1407_vm8 = vcmp.ge.f32.partialorder %v1393_v10, 1.0  ;;  %v4367_v18 = vpop.f32.mrf.mxu0 }
 0x783   : > { %v1430_v8 = vadd.f32 %v6227_v21, %v6223_v19  ;;  %v6233_v7 = vsel %vm1407_vm8, %v6115_v49, %v6103_v53  ;;  %v6237_v54 = vsel %vm1407_vm8, %v6107_v30, %v6115_v49  ;;  %v1460_v50 = vmul.f32 %v1452_v20, %v1452_v20 }
 0x784   : > { %v1431_v11 = vadd.f32 %v6237_v54, %v6233_v7  ;;  %v1396_v34 = vpop.xlane.xlu1 %1395  ;;  %v1445_v57 = vsub.f32 %v4811_v16, %v6219_v62  ;;  %v3388_v58 = vpop.f32.mrf.mxu0 }
 0x785   : > { %v6243_v0 = vmul.f32 0.5, %v1430_v8  ;;  %vm1408_vm10 = vcmp.ge.f32.partialorder %v1396_v34, 1.0  ;;  %v1399_v32 = vpop.xlane.xlu0 %1398  ;;  %v1470_v28 = vsel %vm610_vm2, %v1460_v50, 0.0  ;;  %v4034_v34 = vld [vmem:[%s6761_s10 + $0x4] ss:$0 sm:$0xff] }
 0x786   : > { %v6245_v53 = vmul.f32 0.5, %v1431_v11  ;;  %v6249_v30 = vsel %vm1408_vm10, %v6142_v56, %v6119_v42  ;;  %v6253_v49 = vsel %vm1408_vm10, %v6123_v1, %v6142_v56  ;;  %vm1409_vm3 = vcmp.ge.f32.partialorder %v1399_v32, 1.0  ;;  %v4382_v42 = vpop.f32.mrf.mxu0  ;;  %1471 = vadd.xlane.f32.xlu1 %v1470_v28  ;;  %v4052_v28 = vld [vmem:[%s6761_s10 + $0x5] ss:$0 sm:$0xff] }
 0x787   : > { %v1432_v22 = vadd.f32 %v6253_v49, %v6249_v30  ;;  %v6259_v37 = vsel %vm1409_vm3, %v6144_v36, %v6129_v55  ;;  %v6263_v43 = vsel %vm1409_vm3, %v6133_v5, %v6144_v36  ;;  %v1453_v56 = vmax.f32 %v1445_v57, 0.0 }
 0x788   : > { %v1433_v45 = vadd.f32 %v6263_v43, %v6259_v37  ;;  %v1402_v1 = vpop.xlane.xlu1 %1401  ;;  %v1446_v48 = vsub.f32 %v4815_v25, %v6243_v0  ;;  %v1447_v55 = vsub.f32 %v4817_v26, %v6245_v53  ;;  %v3391_v5 = vpop.f32.mrf.mxu0 }
 0x789   : > { %v6272_v44 = vmul.f32 0.5, %v1432_v22  ;;  %vm1410_vm11 = vcmp.ge.f32.partialorder %v1402_v1, 1.0  ;;  %v1461_v52 = vmul.f32 %v1453_v56, %v1453_v56  ;;  %v3962_v1 = vld [vmem:[%s6761_s10] ss:$0 sm:$0xff]  ;;  %v3980_v5 = vld [vmem:[%s6761_s10 + $0x1] ss:$0 sm:$0xff] }
 0x78a   : > { %v6274_v36 = vmul.f32 0.5, %v1433_v45  ;;  %v6278_v17 = vsel %vm1410_vm11, %v6161_v59, %v6148_v3  ;;  %v6282_v27 = vsel %vm1410_vm11, %v6152_v51, %v6161_v59  ;;  %v1454_v61 = vmax.f32 %v1446_v48, 0.0  ;;  %v4383_v10 = vpop.f32.mrf.mxu0  ;;  %v4016_v51 = vld [vmem:[%s6761_s10 + $0x3] ss:$0 sm:$0xff] }
 0x78b   : > { %v1434_v47 = vadd.f32 %v6282_v27, %v6278_v17  ;;  %v1455_v35 = vmax.f32 %v1447_v55, 0.0  ;;  %v1473_v20 = vsel %vm610_vm2, %v1461_v52, 0.0  ;;  %v1448_v12 = vsub.f32 %v4822_v38, %v6272_v44 }
 0x78c   : > { %v1449_v3 = vsub.f32 %v4824_v39, %v6274_v36  ;;  %1474 = vadd.xlane.f32.xlu0 %v1473_v20  ;;  %v1462_v8 = vmul.f32 %v1454_v61, %v1454_v61  ;;  %v3535_v11 = vpop.f32.mrf.mxu0  ;;  %v3095_v56 = vadd.f32 %v4016_v51, %v6188_v46  ;;  %v3242_v52 = vadd.f32 %v4034_v34, %v6205_v6  ;;  %v3998_v46 = vld [vmem:[%s6761_s10 + $0x2] ss:$0 sm:$0xff]  ;;  %v4088_v6 = vld [vmem:[%s6761_s10 + $0x7] ss:$0 sm:$0xff] }
 0x78d   : > { %v6294_v59 = vmul.f32 0.5, %v1434_v47  ;;  %v1463_v18 = vmul.f32 %v1455_v35, %v1455_v35  ;;  %v1456_v50 = vmax.f32 %v1448_v12, 0.0  ;;  %v3389_v35 = vadd.f32 %v4052_v28, %v3388_v58 }
 0x78e   : > { %v1457_v57 = vmax.f32 %v1449_v3, 0.0  ;;  %v1476_v32 = vsel %vm610_vm2, %v1462_v8, 0.0  ;;  %v4398_v45 = vpop.f32.mrf.mxu0  ;;  %v2653_v12 = vadd.f32 %v3962_v1, %v6170_v24  ;;  %v2800_v8 = vadd.f32 %v3980_v5, %v6172_v60  ;;  %v4070_v24 = vld [vmem:[%s6761_s10 + $0x6] ss:$0 sm:$0xff] }
 0x78f   : > { %v1479_v22 = vsel %vm610_vm2, %v1463_v18, 0.0  ;;  %v1450_v42 = vsub.f32 %v4830_v13, %v6294_v59  ;;  %1477 = vadd.xlane.f32.xlu1 %v1476_v32  ;;  %v1464_v48 = vmul.f32 %v1456_v50, %v1456_v50  ;;  %v3699_v18 = vrot.slane %v3095_v56, 6 }
 0x790   : > { %v1465_v55 = vmul.f32 %v1457_v57, %v1457_v57  ;;  %1480 = vadd.xlane.f32.xlu0 %v1479_v22  ;;  %v3538_v61 = vpop.f32.mrf.mxu0  ;;  %v3702_v58 = vrot.slane %v3242_v52, 4  ;;  %v2947_v57 = vadd.f32 %v3998_v46, %v6174_v63  ;;  %v3705_v32 = vrot.slane %v3389_v35, 2 }
 0x791   : > { %v1458_v47 = vmax.f32 %v1450_v42, 0.0  ;;  %v1482_v10 = vsel %vm610_vm2, %v1464_v48, 0.0  ;;  %v3693_v28 = vrot.slane %v2653_v12, 4  ;;  %v3696_v45 = vrot.slane %v2800_v8, 2 }
 0x792   : > { %v1485_v20 = vsel %vm610_vm2, %v1465_v55, 0.0  ;;  %v4399_v51 = vpop.f32.mrf.mxu0  ;;  %v3716_v60 = vsel %vm3710_vm9, %v2947_v57, %v3699_v18  ;;  %v3536_v1 = vadd.f32 %v4070_v24, %v3535_v11 }
 0x793   : > { %v1466_v3 = vmul.f32 %v1458_v47, %v1458_v47  ;;  %1483 = vadd.xlane.f32.xlu1 %v1482_v10  ;;  %v3717_v48 = vsel %vm3712_vm12, %v3716_v60, %v3702_v58  ;;  %v3713_v47 = vsel %vm3712_vm12, %v5901_v41, %v3693_v28 }
 0x794   : > { %1486 = vadd.xlane.f32.xlu0 %v1485_v20  ;;  %v3683_v50 = vpop.f32.mrf.mxu0  ;;  %v3718_v52 = vsel %vm3714_vm13, %v3717_v48, %v3705_v32  ;;  %v3715_v35 = vsel %vm3714_vm13, %v3713_v47, %v3696_v45 }
 0x795   : > { %v1488_v34 = vsel %vm610_vm2, %v1466_v3, 0.0  ;;  %v3684_v22 = vadd.f32 %v4088_v6, %v3683_v50  ;;  %v3720_v20 = vpack.c.bf16 %v3718_v52, %v3715_v35 }
 0x796   : > { %v4414_v42 = vpop.f32.mrf.mxu0 }
 0x797   : > { %1489 = vadd.xlane.f32.xlu1 %v1488_v34  ;;  %v3708_v56 = vrot.slane %v3684_v22, 6 }
 0x798   : > { %v3686_v55 = vpop.f32.mrf.mxu0 }
 0x799   : > { %v3719_v5 = vsel %vm3710_vm9, %v3536_v1, %v3708_v56 }
 0x79a   : > { %v3721_v63 = vpack.c.bf16 %v3719_v5, %v3719_v5  ;;  %v4415_v61 = vpop.f32.mrf.mxu0 }
 0x79c   : > { %4432 = vmatprep.subr.msk.bf16.mxu1 %vm3710_vm9, %v3721_v63  ;;  %v3735_v10 = vsel %vm3710_vm9, %v3721_v63, 0 }
 0x79d   : > { %4417 = vmatpush3.bf16.msra.mxu1 %v3735_v10 }
 0x79e   : > { %4418 = vmatprep.subr.bf16.mxu1 %v3720_v20 }
 0x7a1   : > { %4419 = vmatpush3.bf16.msra.mxu1 %v3720_v20 }
 0x807   : > { %v1469_v11 = vpop.xlane.xlu0 %1468 }
 0x808   : > { %vm1491_vm14 = vcmp.ge.f32.partialorder %v1469_v11, 1.0 }
 0x809   : > { %v6336_v12 = vsel %vm1491_vm14, %v6186_v9, %v6178_v23  ;;  %v6340_v41 = vsel %vm1491_vm14, %v6182_v14, %v6186_v9 }
 0x80a   : > { %v1515_v46 = vadd.f32 %v6340_v41, %v6336_v12 }
 0x80c   : > { %v6344_v3 = vmul.f32 0.5, %v1515_v46 }
 0x80e   : > { %v1531_v51 = vsub.f32 %v4806_v4, %v6344_v3 }
 0x80f   : > { %v1472_v8 = vpop.xlane.xlu1 %1471 }
 0x810   : > { %v1539_v6 = vmax.f32 %v1531_v51, 0.0  ;;  %vm1492_vm9 = vcmp.ge.f32.partialorder %v1472_v8, 1.0 }
 0x811   : > { %v6350_v23 = vsel %vm1492_vm9, %v6202_v2, %v6194_v29  ;;  %v6354_v14 = vsel %vm1492_vm9, %v6198_v31, %v6202_v2 }
 0x812   : > { %v1547_v18 = vmul.f32 %v1539_v6, %v1539_v6  ;;  %v1516_v9 = vadd.f32 %v6354_v14, %v6350_v23 }
 0x814   : > { %v1555_v58 = vsel %vm610_vm2, %v1547_v18, 0.0  ;;  %v6359_v34 = vmul.f32 0.5, %v1516_v9 }
 0x815   : > { %1556 = vadd.xlane.f32.xlu0 %v1555_v58  ;;  %v1475_v24 = vpop.xlane.xlu0 %1474 }
 0x816   : > { %vm1493_vm15 = vcmp.ge.f32.partialorder %v1475_v24, 1.0  ;;  %v1532_v31 = vsub.f32 %v4809_v15, %v6359_v34 }
 0x817   : > { %v6363_v50 = vsel %vm1493_vm15, %v6219_v62, %v6209_v40  ;;  %v6367_v29 = vsel %vm1493_vm15, %v6213_v33, %v6219_v62 }
 0x818   : > { %v1517_v2 = vadd.f32 %v6367_v29, %v6363_v50  ;;  %v1478_v57 = vpop.xlane.xlu1 %1477  ;;  %v1540_v22 = vmax.f32 %v1532_v31, 0.0 }
 0x819   : > { %vm1494_vm1 = vcmp.ge.f32.partialorder %v1478_v57, 1.0  ;;  %v1481_v32 = vpop.xlane.xlu0 %1480 }
 0x81a   : > { %v6373_v28 = vmul.f32 0.5, %v1517_v2  ;;  %v6377_v40 = vsel %vm1494_vm1, %v6243_v0, %v6223_v19  ;;  %v6381_v33 = vsel %vm1494_vm1, %v6227_v21, %v6243_v0  ;;  %vm1495_vm4 = vcmp.ge.f32.partialorder %v1481_v32, 1.0 }
 0x81b   : > { %v1518_v62 = vadd.f32 %v6381_v33, %v6377_v40  ;;  %v6387_v42 = vsel %vm1495_vm4, %v6245_v53, %v6233_v7  ;;  %v6391_v45 = vsel %vm1495_vm4, %v6237_v54, %v6245_v53  ;;  %v1548_v60 = vmul.f32 %v1540_v22, %v1540_v22 }
 0x81c   : > { %v1519_v19 = vadd.f32 %v6391_v45, %v6387_v42  ;;  %v1484_v1 = vpop.xlane.xlu1 %1483  ;;  %v1533_v21 = vsub.f32 %v4811_v16, %v6373_v28 }
 0x81d   : > { %v6397_v0 = vmul.f32 0.5, %v1518_v62  ;;  %vm1496_vm5 = vcmp.ge.f32.partialorder %v1484_v1, 1.0  ;;  %v1487_v56 = vpop.xlane.xlu0 %1486  ;;  %v1558_v48 = vsel %vm610_vm2, %v1548_v60, 0.0 }
 0x81e   : > { %v6400_v7 = vmul.f32 0.5, %v1519_v19  ;;  %v6404_v54 = vsel %vm1496_vm5, %v6272_v44, %v6249_v30  ;;  %v6408_v53 = vsel %vm1496_vm5, %v6253_v49, %v6272_v44  ;;  %vm1497_vm6 = vcmp.ge.f32.partialorder %v1487_v56, 1.0  ;;  %1559 = vadd.xlane.f32.xlu1 %v1558_v48 }
 0x81f   : > { %v1520_v55 = vadd.f32 %v6408_v53, %v6404_v54  ;;  %v6414_v5 = vsel %vm1497_vm6, %v6274_v36, %v6259_v37  ;;  %v6418_v52 = vsel %vm1497_vm6, %v6263_v43, %v6274_v36  ;;  %v1541_v47 = vmax.f32 %v1533_v21, 0.0 }
 0x820   : > { %v1521_v30 = vadd.f32 %v6418_v52, %v6414_v5  ;;  %v1490_v63 = vpop.xlane.xlu1 %1489  ;;  %v1534_v49 = vsub.f32 %v4815_v25, %v6397_v0  ;;  %v1535_v44 = vsub.f32 %v4817_v26, %v6400_v7 }
 0x821   : > { %v6426_v61 = vmul.f32 0.5, %v1520_v55  ;;  %vm1498_vm7 = vcmp.ge.f32.partialorder %v1490_v63, 1.0  ;;  %v1549_v37 = vmul.f32 %v1541_v47, %v1541_v47 }
 0x822   : > { %v6428_v35 = vmul.f32 0.5, %v1521_v30  ;;  %v6432_v43 = vsel %vm1498_vm7, %v6294_v59, %v6278_v17  ;;  %v6436_v36 = vsel %vm1498_vm7, %v6282_v27, %v6294_v59  ;;  %v1542_v10 = vmax.f32 %v1534_v49, 0.0 }
 0x823   : > { %v1522_v20 = vadd.f32 %v6436_v36, %v6432_v43  ;;  %v1561_v11 = vsel %vm610_vm2, %v1549_v37, 0.0  ;;  %v1543_v46 = vmax.f32 %v1535_v44, 0.0  ;;  %v1536_v51 = vsub.f32 %v4822_v38, %v6426_v61 }
 0x824   : > { %1562 = vadd.xlane.f32.xlu0 %v1561_v11  ;;  %v1550_v6 = vmul.f32 %v1542_v10, %v1542_v10  ;;  %v1537_v17 = vsub.f32 %v4824_v39, %v6428_v35 }
 0x825   : > { %v6445_v8 = vmul.f32 0.5, %v1522_v20  ;;  %v1551_v18 = vmul.f32 %v1543_v46, %v1543_v46  ;;  %v1544_v27 = vmax.f32 %v1536_v51, 0.0 }
 0x826   : > { %v1564_v59 = vsel %vm610_vm2, %v1550_v6, 0.0  ;;  %v1545_v9 = vmax.f32 %v1537_v17, 0.0 }
 0x827   : > { %1565 = vadd.xlane.f32.xlu1 %v1564_v59  ;;  %v1567_v58 = vsel %vm610_vm2, %v1551_v18, 0.0  ;;  %v1552_v24 = vmul.f32 %v1544_v27, %v1544_v27  ;;  %v1538_v31 = vsub.f32 %v4830_v13, %v6445_v8 }
 0x828   : > { %1568 = vadd.xlane.f32.xlu0 %v1567_v58  ;;  %v1553_v2 = vmul.f32 %v1545_v9, %v1545_v9 }
 0x829   : > { %v1570_v57 = vsel %vm610_vm2, %v1552_v24, 0.0  ;;  %v1546_v32 = vmax.f32 %v1538_v31, 0.0 }
 0x82a   : > { %v1573_v22 = vsel %vm610_vm2, %v1553_v2, 0.0 }
 0x82b   : > { %1571 = vadd.xlane.f32.xlu1 %v1570_v57  ;;  %v1554_v62 = vmul.f32 %v1546_v32, %v1546_v32 }
 0x82c   : > { %1574 = vadd.xlane.f32.xlu0 %v1573_v22 }
 0x82d   : > { %v1576_v60 = vsel %vm610_vm2, %v1554_v62, 0.0 }
 0x82f   : > { %1577 = vadd.xlane.f32.xlu1 %v1576_v60 }
 0x89e   : > { %v1557_v19 = vpop.xlane.xlu0 %1556 }
 0x89f   : > { %vm1579_vm8 = vcmp.ge.f32.partialorder %v1557_v19, 1.0 }
 0x8a0   : > { %v6456_v1 = vsel %vm1579_vm8, %v6344_v3, %v6336_v12  ;;  %v6460_v21 = vsel %vm1579_vm8, %v6340_v41, %v6344_v3 }
 0x8a1   : > { %v1603_v56 = vadd.f32 %v6460_v21, %v6456_v1 }
 0x8a3   : > { %v6464_v48 = vmul.f32 0.5, %v1603_v56 }
 0x8a5   : > { %v1619_v55 = vsub.f32 %v4806_v4, %v6464_v48 }
 0x8a7   : > { %v1627_v47 = vmax.f32 %v1619_v55, 0.0  ;;  %v1560_v30 = vpop.xlane.xlu1 %1559 }
 0x8a8   : > { %vm1580_vm10 = vcmp.ge.f32.partialorder %v1560_v30, 1.0 }
 0x8a9   : > { %v1635_v63 = vmul.f32 %v1627_v47, %v1627_v47  ;;  %v6470_v12 = vsel %vm1580_vm10, %v6359_v34, %v6350_v23  ;;  %v6474_v41 = vsel %vm1580_vm10, %v6354_v14, %v6359_v34 }
 0x8aa   : > { %v1604_v3 = vadd.f32 %v6474_v41, %v6470_v12 }
 0x8ab   : > { %v1643_v49 = vsel %vm610_vm2, %v1635_v63, 0.0 }
 0x8ac   : > { %1644 = vadd.xlane.f32.xlu0 %v1643_v49  ;;  %v6479_v44 = vmul.f32 0.5, %v1604_v3 }
 0x8ad   : > { %v1563_v37 = vpop.xlane.xlu0 %1562 }
 0x8ae   : > { %vm1581_vm3 = vcmp.ge.f32.partialorder %v1563_v37, 1.0  ;;  %v1620_v10 = vsub.f32 %v4809_v15, %v6479_v44 }
 0x8af   : > { %v6485_v23 = vsel %vm1581_vm3, %v6373_v28, %v6363_v50  ;;  %v6489_v14 = vsel %vm1581_vm3, %v6367_v29, %v6373_v28 }
 0x8b0   : > { %v1605_v34 = vadd.f32 %v6489_v14, %v6485_v23  ;;  %v1566_v20 = vpop.xlane.xlu1 %1565  ;;  %v1628_v11 = vmax.f32 %v1620_v10, 0.0 }
 0x8b1   : > { %vm1582_vm11 = vcmp.ge.f32.partialorder %v1566_v20, 1.0  ;;  %v1569_v46 = vpop.xlane.xlu0 %1568 }
 0x8b2   : > { %v6493_v51 = vmul.f32 0.5, %v1605_v34  ;;  %v6497_v6 = vsel %vm1582_vm11, %v6397_v0, %v6377_v40  ;;  %v6501_v50 = vsel %vm1582_vm11, %v6381_v33, %v6397_v0  ;;  %vm1583_vm12 = vcmp.ge.f32.partialorder %v1569_v46, 1.0 }
 0x8b3   : > { %v1606_v29 = vadd.f32 %v6501_v50, %v6497_v6  ;;  %v6507_v28 = vsel %vm1583_vm12, %v6400_v7, %v6387_v42  ;;  %v6511_v17 = vsel %vm1583_vm12, %v6391_v45, %v6400_v7  ;;  %v1636_v18 = vmul.f32 %v1628_v11, %v1628_v11 }
 0x8b4   : > { %v1607_v40 = vadd.f32 %v6511_v17, %v6507_v28  ;;  %v1572_v27 = vpop.xlane.xlu1 %1571  ;;  %v1621_v33 = vsub.f32 %v4811_v16, %v6493_v51 }
 0x8b5   : > { %v6517_v0 = vmul.f32 0.5, %v1606_v29  ;;  %vm1584_vm13 = vcmp.ge.f32.partialorder %v1572_v27, 1.0  ;;  %v1575_v59 = vpop.xlane.xlu0 %1574  ;;  %v1646_v9 = vsel %vm610_vm2, %v1636_v18, 0.0 }
 0x8b6   : > { %v6520_v42 = vmul.f32 0.5, %v1607_v40  ;;  %v6524_v45 = vsel %vm1584_vm13, %v6426_v61, %v6404_v54  ;;  %v6528_v7 = vsel %vm1584_vm13, %v6408_v53, %v6426_v61  ;;  %vm1585_vm14 = vcmp.ge.f32.partialorder %v1575_v59, 1.0  ;;  %1647 = vadd.xlane.f32.xlu1 %v1646_v9 }
 0x8b7   : > { %v1608_v58 = vadd.f32 %v6528_v7, %v6524_v45  ;;  %v6534_v24 = vsel %vm1585_vm14, %v6428_v35, %v6414_v5  ;;  %v6538_v31 = vsel %vm1585_vm14, %v6418_v52, %v6428_v35  ;;  %v1629_v2 = vmax.f32 %v1621_v33, 0.0 }
 0x8b8   : > { %v1609_v54 = vadd.f32 %v6538_v31, %v6534_v24  ;;  %v1578_v57 = vpop.xlane.xlu1 %1577  ;;  %v1622_v53 = vsub.f32 %v4815_v25, %v6517_v0  ;;  %v1623_v61 = vsub.f32 %v4817_v26, %v6520_v42 }
 0x8b9   : > { %v6546_v32 = vmul.f32 0.5, %v1608_v58  ;;  %vm1586_vm9 = vcmp.ge.f32.partialorder %v1578_v57, 1.0  ;;  %v1637_v5 = vmul.f32 %v1629_v2, %v1629_v2 }
 0x8ba   : > { %v6548_v22 = vmul.f32 0.5, %v1609_v54  ;;  %v6552_v52 = vsel %vm1586_vm9, %v6445_v8, %v6432_v43  ;;  %v6556_v35 = vsel %vm1586_vm9, %v6436_v36, %v6445_v8  ;;  %v1630_v62 = vmax.f32 %v1622_v53, 0.0 }
 0x8bb   : > { %v1610_v60 = vadd.f32 %v6556_v35, %v6552_v52  ;;  %v1649_v19 = vsel %vm610_vm2, %v1637_v5, 0.0  ;;  %v1631_v56 = vmax.f32 %v1623_v61, 0.0  ;;  %v1624_v55 = vsub.f32 %v4822_v38, %v6546_v32 }
 0x8bc   : > { %1650 = vadd.xlane.f32.xlu0 %v1649_v19  ;;  %v1638_v47 = vmul.f32 %v1630_v62, %v1630_v62  ;;  %v1625_v43 = vsub.f32 %v4824_v39, %v6548_v22 }
 0x8bd   : > { %v6565_v30 = vmul.f32 0.5, %v1610_v60  ;;  %v1639_v63 = vmul.f32 %v1631_v56, %v1631_v56  ;;  %v1632_v36 = vmax.f32 %v1624_v55, 0.0 }
 0x8be   : > { %v1652_v8 = vsel %vm610_vm2, %v1638_v47, 0.0  ;;  %v1633_v3 = vmax.f32 %v1625_v43, 0.0 }
 0x8bf   : > { %1653 = vadd.xlane.f32.xlu1 %v1652_v8  ;;  %v1655_v49 = vsel %vm610_vm2, %v1639_v63, 0.0  ;;  %v1640_v37 = vmul.f32 %v1632_v36, %v1632_v36  ;;  %v1626_v10 = vsub.f32 %v4830_v13, %v6565_v30 }
 0x8c0   : > { %1656 = vadd.xlane.f32.xlu0 %v1655_v49  ;;  %v1641_v34 = vmul.f32 %v1633_v3, %v1633_v3 }
 0x8c1   : > { %v1658_v20 = vsel %vm610_vm2, %v1640_v37, 0.0  ;;  %v1634_v11 = vmax.f32 %v1626_v10, 0.0 }
 0x8c2   : > { %v1661_v46 = vsel %vm610_vm2, %v1641_v34, 0.0 }
 0x8c3   : > { %1659 = vadd.xlane.f32.xlu1 %v1658_v20  ;;  %v1642_v29 = vmul.f32 %v1634_v11, %v1634_v11 }
 0x8c4   : > { %1662 = vadd.xlane.f32.xlu0 %v1661_v46 }
 0x8c5   : > { %v1664_v18 = vsel %vm610_vm2, %v1642_v29, 0.0 }
 0x8c7   : > { %1665 = vadd.xlane.f32.xlu1 %v1664_v18 }
 0x935   : > { %v1645_v40 = vpop.xlane.xlu0 %1644 }
 0x936   : > { %vm1667_vm15 = vcmp.ge.f32.partialorder %v1645_v40, 1.0 }
 0x937   : > { %v1675_v27 = vsel %vm1667_vm15, %v6464_v48, %v6456_v1  ;;  %v1683_v33 = vsel %vm1667_vm15, %v6460_v21, %v6464_v48 }
 0x938   : > { %v1691_v59 = vadd.f32 %v1683_v33, %v1675_v27 }
 0x93a   : > { %v6578_v9 = vmul.f32 0.5, %v1691_v59 }
 0x93c   : > { %v1707_v58 = vsub.f32 %v4806_v4, %v6578_v9 }
 0x93e   : > { %v6582_v2 = vmax.f32 %v1707_v58, 0.0 }
 0x93f   : > { %v1648_v54 = vpop.xlane.xlu1 %1647 }
 0x940   : > { %v1763_v57 = vsel %vm610_vm2, %v6582_v2, 0.0  ;;  %vm1668_vm1 = vcmp.ge.f32.partialorder %v1648_v54, 1.0 }
 0x941   : > { %1764 = vadd.xlane.f32.xlu0 %v1763_v57  ;;  %v1676_v1 = vsel %vm1668_vm1, %v6479_v44, %v6470_v12  ;;  %v1684_v21 = vsel %vm1668_vm1, %v6474_v41, %v6479_v44 }
 0x942   : > { %v1692_v48 = vadd.f32 %v1684_v21, %v1676_v1  ;;  %v1723_v1 = vmul.f32 %v6582_v2, %v6582_v2 }
 0x944   : > { %v6590_v53 = vmul.f32 0.5, %v1692_v48 }
 0x945   : > { %v1651_v61 = vpop.xlane.xlu0 %1650 }
 0x946   : > { %vm1669_vm4 = vcmp.ge.f32.partialorder %v1651_v61, 1.0  ;;  %v1708_v5 = vsub.f32 %v4809_v15, %v6590_v53  ;;  %v1731_v61 = vsel %vm610_vm2, %v1723_v1, 0.0 }
 0x947   : > { %v1677_v62 = vsel %vm1669_vm4, %v6493_v51, %v6485_v23  ;;  %v1685_v60 = vsel %vm1669_vm4, %v6489_v14, %v6493_v51 }
 0x948   : > { %v1693_v19 = vadd.f32 %v1685_v60, %v1677_v62  ;;  %v1654_v56 = vpop.xlane.xlu1 %1653  ;;  %v1716_v12 = vmax.f32 %v1708_v5, 0.0 }
 0x949   : > { %vm1670_vm5 = vcmp.ge.f32.partialorder %v1654_v56, 1.0  ;;  %v1657_v55 = vpop.xlane.xlu0 %1656 }
 0x94a   : > { %v6598_v41 = vmul.f32 0.5, %v1693_v19  ;;  %v1678_v44 = vsel %vm1670_vm5, %v6517_v0, %v6497_v6  ;;  %v1686_v47 = vsel %vm1670_vm5, %v6501_v50, %v6517_v0  ;;  %vm1671_vm6 = vcmp.ge.f32.partialorder %v1657_v55, 1.0 }
 0x94b   : > { %v1694_v43 = vadd.f32 %v1686_v47, %v1678_v44  ;;  %v1679_v23 = vsel %vm1671_vm6, %v6520_v42, %v6507_v28  ;;  %v1687_v14 = vsel %vm1671_vm6, %v6511_v17, %v6520_v42  ;;  %v1766_v51 = vsel %vm610_vm2, %v1716_v12, 0.0 }
 0x94c   : > { %v1695_v63 = vadd.f32 %v1687_v14, %v1679_v23  ;;  %v1660_v36 = vpop.xlane.xlu1 %1659  ;;  %1767 = vadd.xlane.f32.xlu1 %v1766_v51  ;;  %v1709_v8 = vsub.f32 %v4811_v16, %v6598_v41  ;;  %v1724_v48 = vmul.f32 %v1716_v12, %v1716_v12 }
 0x94d   : > { %v6611_v6 = vmul.f32 0.5, %v1694_v43  ;;  %vm1672_vm7 = vcmp.ge.f32.partialorder %v1660_v36, 1.0  ;;  %v1663_v50 = vpop.xlane.xlu0 %1662 }
 0x94e   : > { %v6613_v0 = vmul.f32 0.5, %v1695_v63  ;;  %v1680_v28 = vsel %vm1672_vm7, %v6546_v32, %v6524_v45  ;;  %v1688_v17 = vsel %vm1672_vm7, %v6528_v7, %v6546_v32  ;;  %vm1673_vm8 = vcmp.ge.f32.partialorder %v1663_v50, 1.0 }
 0x94f   : > { %v1696_v42 = vadd.f32 %v1688_v17, %v1680_v28  ;;  %v1681_v3 = vsel %vm1673_vm8, %v6548_v22, %v6534_v24  ;;  %v1689_v49 = vsel %vm1673_vm8, %v6538_v31, %v6548_v22  ;;  %v1717_v37 = vmax.f32 %v1709_v8, 0.0 }
 0x950   : > { %v1697_v10 = vadd.f32 %v1689_v49, %v1681_v3  ;;  %v1666_v34 = vpop.xlane.xlu1 %1665  ;;  %v1710_v20 = vsub.f32 %v4815_v25, %v6611_v6  ;;  %v1711_v45 = vsub.f32 %v4817_v26, %v6613_v0  ;;  %v1734_v62 = vsel %vm610_vm2, %v1724_v48, 0.0 }
 0x951   : > { %v6627_v11 = vmul.f32 0.5, %v1696_v42  ;;  %vm1674_vm10 = vcmp.ge.f32.partialorder %v1666_v34, 1.0  ;;  %v1769_v7 = vsel %vm610_vm2, %v1717_v37, 0.0  ;;  %v1725_v5 = vmul.f32 %v1717_v37, %v1717_v37 }
 0x952   : > { %v6630_v32 = vmul.f32 0.5, %v1697_v10  ;;  %v1682_v24 = vsel %vm1674_vm10, %v6565_v30, %v6552_v52  ;;  %v1690_v31 = vsel %vm1674_vm10, %v6556_v35, %v6565_v30  ;;  %1770 = vadd.xlane.f32.xlu0 %v1769_v7  ;;  %v1718_v22 = vmax.f32 %v1710_v20, 0.0 }
 0x953   : > { %v1698_v46 = vadd.f32 %v1690_v31, %v1682_v24  ;;  %v1719_v29 = vmax.f32 %v1711_v45, 0.0  ;;  %v1712_v18 = vsub.f32 %v4822_v38, %v6627_v11  ;;  %v1737_v19 = vsel %vm610_vm2, %v1725_v5, 0.0 }
 0x954   : > { %v1772_v40 = vsel %vm610_vm2, %v1718_v22, 0.0  ;;  %v1713_v27 = vsub.f32 %v4824_v39, %v6630_v32  ;;  %v1726_v60 = vmul.f32 %v1718_v22, %v1718_v22 }
 0x955   : > { %v6641_v33 = vmul.f32 0.5, %v1698_v46  ;;  %1773 = vadd.xlane.f32.xlu1 %v1772_v40  ;;  %v1775_v52 = vsel %vm610_vm2, %v1719_v29, 0.0  ;;  %v1720_v59 = vmax.f32 %v1712_v18, 0.0  ;;  %v1727_v56 = vmul.f32 %v1719_v29, %v1719_v29 }
 0x956   : > { %1776 = vadd.xlane.f32.xlu0 %v1775_v52  ;;  %v1721_v35 = vmax.f32 %v1713_v27, 0.0  ;;  %v1740_v55 = vsel %vm610_vm2, %v1726_v60, 0.0 }
 0x957   : > { %v1778_v30 = vsel %vm610_vm2, %v1720_v59, 0.0  ;;  %v1714_v58 = vsub.f32 %v4830_v13, %v6641_v33  ;;  %v1728_v2 = vmul.f32 %v1720_v59, %v1720_v59  ;;  %v1743_v44 = vsel %vm610_vm2, %v1727_v56, 0.0 }
 0x958   : > { %v1781_v54 = vsel %vm610_vm2, %v1721_v35, 0.0  ;;  %v1729_v12 = vmul.f32 %v1721_v35, %v1721_v35 }
 0x959   : > { %1779 = vadd.xlane.f32.xlu1 %v1778_v30  ;;  %v1722_v57 = vmax.f32 %v1714_v58, 0.0  ;;  %v1746_v47 = vsel %vm610_vm2, %v1728_v2, 0.0 }
 0x95a   : > { %1782 = vadd.xlane.f32.xlu0 %v1781_v54  ;;  %v1749_v23 = vsel %vm610_vm2, %v1729_v12, 0.0 }
 0x95b   : > { %v1784_v21 = vsel %vm610_vm2, %v1722_v57, 0.0  ;;  %v1730_v43 = vmul.f32 %v1722_v57, %v1722_v57 }
 0x95d   : > { %1785 = vadd.xlane.f32.xlu1 %v1784_v21  ;;  %v1752_v14 = vsel %vm610_vm2, %v1730_v43, 0.0 }
 0x95e   : > { %1732 = vadd.xlane.f32.xlu0 %v1731_v61 }
 0x961   : > { %1735 = vadd.xlane.f32.xlu1 %v1734_v62 }
 0x962   : > { %1738 = vadd.xlane.f32.xlu0 %v1737_v19 }
 0x965   : > { %1741 = vadd.xlane.f32.xlu1 %v1740_v55 }
 0x966   : > { %1744 = vadd.xlane.f32.xlu0 %v1743_v44 }
 0x969   : > { %1747 = vadd.xlane.f32.xlu1 %v1746_v47 }
 0x96a   : > { %1750 = vadd.xlane.f32.xlu0 %v1749_v23 }
 0x96d   : > { %1753 = vadd.xlane.f32.xlu1 %v1752_v14 }
 0x9ca   : > { %v1765_v51 = vpop.xlane.xlu0 %1764 }
 0x9cb   : > { %v1787_v63 = vmul.f32 2.0, %v1765_v51 }
 0x9cd   : > { %v1795_v8 = vmax.f32 %v1787_v63, 1e-30 }
 0x9cf   : > { %4565 = vrcp.f32 %v1795_v8 }
 0x9d5   : > { %v1768_v36 = vpop.xlane.xlu1 %1767 }
 0x9d6   : > { %v1788_v50 = vmul.f32 2.0, %v1768_v36 }
 0x9d8   : > { %v1796_v28 = vmax.f32 %v1788_v50, 1e-30 }
 0x9da   : > { %4567 = vrcp.f32 %v1796_v28 }
 0x9db   : > { %v1771_v17 = vpop.xlane.xlu0 %1770 }
 0x9dc   : > { %v1789_v42 = vmul.f32 2.0, %v1771_v17  ;;  %v4566_v40 = vpop.eup %4565 }
 0x9de   : > { %v1797_v3 = vmax.f32 %v1789_v42, 1e-30  ;;  %v1774_v49 = vpop.xlane.xlu1 %1773 }
 0x9df   : > { %v1790_v37 = vmul.f32 2.0, %v1774_v49  ;;  %v1777_v10 = vpop.xlane.xlu0 %1776 }
 0x9e0   : > { %4569 = vrcp.f32 %v1797_v3  ;;  %v1791_v34 = vmul.f32 2.0, %v1777_v10 }
 0x9e1   : > { %v1798_v20 = vmax.f32 %v1790_v37, 1e-30 }
 0x9e2   : > { %v1799_v45 = vmax.f32 %v1791_v34, 1e-30  ;;  %v1780_v7 = vpop.xlane.xlu1 %1779 }
 0x9e3   : > { %4571 = vrcp.f32 %v1798_v20  ;;  %v1792_v24 = vmul.f32 2.0, %v1780_v7  ;;  %v1783_v31 = vpop.xlane.xlu0 %1782 }
 0x9e4   : > { %4573 = vrcp.f32 %v1799_v45  ;;  %v1793_v22 = vmul.f32 2.0, %v1783_v31 }
 0x9e5   : > { %v1800_v46 = vmax.f32 %v1792_v24, 1e-30 }
 0x9e6   : > { %v1801_v29 = vmax.f32 %v1793_v22, 1e-30  ;;  %v1786_v18 = vpop.xlane.xlu1 %1785 }
 0x9e7   : > { %4575 = vrcp.f32 %v1800_v46  ;;  %v1794_v27 = vmul.f32 2.0, %v1786_v18  ;;  %v1733_v52 = vpop.xlane.xlu0 %1732  ;;  %v4568_v30 = vpop.eup %4567 }
 0x9e8   : > { %4577 = vrcp.f32 %v1801_v29  ;;  %v3888_v59 = vadd.f32 -1.0, %v1733_v52 }
 0x9e9   : > { %v1802_v35 = vmax.f32 %v1794_v27, 1e-30 }
 0x9ea   : > { %v1804_v58 = vmul.f32 %v4566_v40, %v3888_v59  ;;  %v1736_v54 = vpop.xlane.xlu1 %1735 }
 0x9eb   : > { %4579 = vrcp.f32 %v1802_v35  ;;  %v3889_v57 = vadd.f32 -1.0, %v1736_v54  ;;  %v1739_v1 = vpop.xlane.xlu0 %1738 }
 0x9ec   : > { %v6660_v21 = vadd.f32 %v1804_v58, %v6578_v9  ;;  %v3890_v48 = vadd.f32 -1.0, %v1739_v1 }
 0x9ed   : > { %v4570_v61 = vpop.eup %4569  ;;  %v1806_v5 = vmul.f32 %v4568_v30, %v3889_v57 }
 0x9ee   : > { %v1808_v62 = vmul.f32 %v4570_v61, %v3890_v48  ;;  %v1742_v60 = vpop.xlane.xlu1 %1741  ;;  %v1827_v19 = vsub.f32 %v4806_v4, %v6660_v21 }
 0x9ef   : > { %v6665_v56 = vadd.f32 %v1806_v5, %v6590_v53  ;;  %v3891_v55 = vadd.f32 -1.0, %v1742_v60  ;;  %v1745_v2 = vpop.xlane.xlu0 %1744 }
 0x9f0   : > { %v4572_v44 = vpop.eup %4571  ;;  %v6668_v12 = vadd.f32 %v1808_v62, %v6598_v41  ;;  %v3892_v47 = vadd.f32 -1.0, %v1745_v2  ;;  %v1835_v9 = vmax.f32 %v1827_v19, 0.0 }
 0x9f1   : > { %v4574_v43 = vpop.eup %4573  ;;  %v1810_v23 = vmul.f32 %v4572_v44, %v3891_v55  ;;  %v1828_v14 = vsub.f32 %v4809_v15, %v6665_v56 }
 0x9f2   : > { %v1812_v51 = vmul.f32 %v4574_v43, %v3892_v47  ;;  %v1748_v63 = vpop.xlane.xlu1 %1747  ;;  %v1883_v36 = vsel %vm610_vm2, %v1835_v9, 0.0  ;;  %v1829_v53 = vsub.f32 %v4811_v16, %v6668_v12  ;;  %v1843_v1 = vmul.f32 %v1835_v9, %v1835_v9 }
 0x9f3   : > { %v6676_v8 = vadd.f32 %v1810_v23, %v6611_v6  ;;  %v3893_v50 = vadd.f32 -1.0, %v1748_v63  ;;  %1884 = vadd.xlane.f32.xlu0 %v1883_v36  ;;  %v1751_v41 = vpop.xlane.xlu0 %1750  ;;  %v1836_v28 = vmax.f32 %v1828_v14, 0.0 }
 0x9f4   : > { %v4576_v17 = vpop.eup %4575  ;;  %v6679_v42 = vadd.f32 %v1812_v51, %v6613_v0  ;;  %v3894_v3 = vadd.f32 -1.0, %v1751_v41  ;;  %v1837_v49 = vmax.f32 %v1829_v53, 0.0 }
 0x9f5   : > { %v4578_v37 = vpop.eup %4577  ;;  %v1814_v10 = vmul.f32 %v4576_v17, %v3893_v50  ;;  %v1886_v34 = vsel %vm610_vm2, %v1836_v28, 0.0  ;;  %v1830_v20 = vsub.f32 %v4815_v25, %v6676_v8  ;;  %v1844_v5 = vmul.f32 %v1836_v28, %v1836_v28 }
 0x9f6   : > { %v1816_v45 = vmul.f32 %v4578_v37, %v3894_v3  ;;  %1887 = vadd.xlane.f32.xlu1 %v1886_v34  ;;  %v1754_v6 = vpop.xlane.xlu1 %1753  ;;  %v1889_v7 = vsel %vm610_vm2, %v1837_v49, 0.0  ;;  %v1831_v24 = vsub.f32 %v4817_v26, %v6679_v42  ;;  %v1845_v62 = vmul.f32 %v1837_v49, %v1837_v49 }
 0x9f7   : > { %v6688_v0 = vadd.f32 %v1814_v10, %v6627_v11  ;;  %v3895_v31 = vadd.f32 -1.0, %v1754_v6  ;;  %1890 = vadd.xlane.f32.xlu0 %v1889_v7  ;;  %v1838_v22 = vmax.f32 %v1830_v20, 0.0  ;;  %v1854_v60 = vsel %vm610_vm2, %v1844_v5, 0.0 }
 0x9f8   : > { %v4580_v46 = vpop.eup %4579  ;;  %v6691_v29 = vadd.f32 %v1816_v45, %v6630_v32  ;;  %v1839_v18 = vmax.f32 %v1831_v24, 0.0  ;;  %v1857_v55 = vsel %vm610_vm2, %v1845_v62, 0.0 }
 0x9f9   : > { %v1818_v40 = vmul.f32 %v4580_v46, %v3895_v31  ;;  %v1892_v27 = vsel %vm610_vm2, %v1838_v22, 0.0  ;;  %v1832_v52 = vsub.f32 %v4822_v38, %v6688_v0  ;;  %v1846_v19 = vmul.f32 %v1838_v22, %v1838_v22 }
 0x9fa   : > { %1893 = vadd.xlane.f32.xlu1 %v1892_v27  ;;  %v1895_v59 = vsel %vm610_vm2, %v1839_v18, 0.0  ;;  %v1833_v11 = vsub.f32 %v4824_v39, %v6691_v29  ;;  %v1847_v2 = vmul.f32 %v1839_v18, %v1839_v18 }
 0x9fb   : > { %v6700_v35 = vadd.f32 %v1818_v40, %v6641_v33  ;;  %1896 = vadd.xlane.f32.xlu0 %v1895_v59  ;;  %v1840_v30 = vmax.f32 %v1832_v52, 0.0  ;;  %v1851_v33 = vsel %vm610_vm2, %v1843_v1, 0.0  ;;  %v1860_v44 = vsel %vm610_vm2, %v1846_v19, 0.0 }
 0x9fc   : > { %v1841_v32 = vmax.f32 %v1833_v11, 0.0  ;;  %v1863_v9 = vsel %vm610_vm2, %v1847_v2, 0.0 }
 0x9fd   : > { %v1898_v58 = vsel %vm610_vm2, %v1840_v30, 0.0  ;;  %v1834_v54 = vsub.f32 %v4830_v13, %v6700_v35  ;;  %v1848_v47 = vmul.f32 %v1840_v30, %v1840_v30 }
 0x9fe   : > { %1899 = vadd.xlane.f32.xlu1 %v1898_v58  ;;  %v1901_v57 = vsel %vm610_vm2, %v1841_v32, 0.0  ;;  %v1849_v43 = vmul.f32 %v1841_v32, %v1841_v32 }
 0x9ff   : > { %1902 = vadd.xlane.f32.xlu0 %v1901_v57  ;;  %v1842_v48 = vmax.f32 %v1834_v54, 0.0  ;;  %v1866_v23 = vsel %vm610_vm2, %v1848_v47, 0.0 }
 0xa00   : > { %v1869_v51 = vsel %vm610_vm2, %v1849_v43, 0.0 }
 0xa01   : > { %v1904_v61 = vsel %vm610_vm2, %v1842_v48, 0.0  ;;  %v1850_v14 = vmul.f32 %v1842_v48, %v1842_v48 }
 0xa02   : > { %1905 = vadd.xlane.f32.xlu1 %v1904_v61 }
 0xa03   : > { %1852 = vadd.xlane.f32.xlu0 %v1851_v33  ;;  %v1872_v63 = vsel %vm610_vm2, %v1850_v14, 0.0 }
 0xa06   : > { %1855 = vadd.xlane.f32.xlu1 %v1854_v60 }
 0xa07   : > { %1858 = vadd.xlane.f32.xlu0 %v1857_v55 }
 0xa0a   : > { %1861 = vadd.xlane.f32.xlu1 %v1860_v44 }
 0xa0b   : > { %1864 = vadd.xlane.f32.xlu0 %v1863_v9 }
 0xa0e   : > { %1867 = vadd.xlane.f32.xlu1 %v1866_v23 }
 0xa0f   : > { %1870 = vadd.xlane.f32.xlu0 %v1869_v51 }
 0xa12   : > { %1873 = vadd.xlane.f32.xlu1 %v1872_v63 }
 0xa7c   : > { %v1885_v36 = vpop.xlane.xlu0 %1884 }
 0xa7d   : > { %v1907_v53 = vmul.f32 2.0, %v1885_v36 }
 0xa7f   : > { %v1915_v50 = vmax.f32 %v1907_v53, 1e-30  ;;  %v1888_v41 = vpop.xlane.xlu1 %1887 }
 0xa80   : > { %v1908_v28 = vmul.f32 2.0, %v1888_v41  ;;  %v1891_v17 = vpop.xlane.xlu0 %1890 }
 0xa81   : > { %4581 = vrcp.f32 %v1915_v50  ;;  %v1909_v3 = vmul.f32 2.0, %v1891_v17 }
 0xa82   : > { %v1916_v49 = vmax.f32 %v1908_v28, 1e-30 }
 0xa83   : > { %v1917_v37 = vmax.f32 %v1909_v3, 1e-30  ;;  %v1894_v10 = vpop.xlane.xlu1 %1893 }
 0xa84   : > { %4583 = vrcp.f32 %v1916_v49  ;;  %v1910_v34 = vmul.f32 2.0, %v1894_v10  ;;  %v1897_v20 = vpop.xlane.xlu0 %1896 }
 0xa85   : > { %4585 = vrcp.f32 %v1917_v37  ;;  %v1911_v45 = vmul.f32 2.0, %v1897_v20 }
 0xa86   : > { %v1918_v6 = vmax.f32 %v1910_v34, 1e-30 }
 0xa87   : > { %v1919_v7 = vmax.f32 %v1911_v45, 1e-30  ;;  %v1900_v24 = vpop.xlane.xlu1 %1899 }
 0xa88   : > { %4587 = vrcp.f32 %v1918_v6  ;;  %v1912_v31 = vmul.f32 2.0, %v1900_v24  ;;  %v1903_v22 = vpop.xlane.xlu0 %1902 }
 0xa89   : > { %4589 = vrcp.f32 %v1919_v7  ;;  %v1913_v46 = vmul.f32 2.0, %v1903_v22 }
 0xa8a   : > { %v1920_v18 = vmax.f32 %v1912_v31, 1e-30 }
 0xa8b   : > { %v1921_v40 = vmax.f32 %v1913_v46, 1e-30  ;;  %v1906_v27 = vpop.xlane.xlu1 %1905 }
 0xa8c   : > { %4591 = vrcp.f32 %v1920_v18  ;;  %v1914_v52 = vmul.f32 2.0, %v1906_v27  ;;  %v1853_v59 = vpop.xlane.xlu0 %1852 }
 0xa8d   : > { %4593 = vrcp.f32 %v1921_v40  ;;  %v3896_v11 = vadd.f32 -1.0, %v1853_v59 }
 0xa8e   : > { %v4582_v30 = vpop.eup %4581  ;;  %v1922_v32 = vmax.f32 %v1914_v52, 1e-30 }
 0xa8f   : > { %v1924_v58 = vmul.f32 %v4582_v30, %v3896_v11  ;;  %v1856_v54 = vpop.xlane.xlu1 %1855 }
 0xa90   : > { %4595 = vrcp.f32 %v1922_v32  ;;  %v3897_v57 = vadd.f32 -1.0, %v1856_v54  ;;  %v1859_v1 = vpop.xlane.xlu0 %1858 }
 0xa91   : > { %v4584_v48 = vpop.eup %4583  ;;  %v1939_v61 = vadd.f32 %v1924_v58, %v6660_v21  ;;  %v3898_v5 = vadd.f32 -1.0, %v1859_v1 }
 0xa92   : > { %v4586_v33 = vpop.eup %4585  ;;  %v1926_v62 = vmul.f32 %v4584_v48, %v3897_v57 }
 0xa93   : > { %v1947_v60 = vsub.f32 %v4806_v4, %v1939_v61  ;;  %v1928_v19 = vmul.f32 %v4586_v33, %v3898_v5  ;;  %v1862_v55 = vpop.xlane.xlu1 %1861 }
 0xa94   : > { %v1940_v2 = vadd.f32 %v1926_v62, %v6665_v56  ;;  %v3899_v44 = vadd.f32 -1.0, %v1862_v55  ;;  %v1865_v47 = vpop.xlane.xlu0 %1864 }
 0xa95   : > { %v4588_v9 = vpop.eup %4587  ;;  %v1941_v43 = vadd.f32 %v1928_v19, %v6668_v12  ;;  %v3900_v23 = vadd.f32 -1.0, %v1865_v47  ;;  %v1955_v51 = vmax.f32 %v1947_v60, 0.0 }
 0xa96   : > { %v4590_v14 = vpop.eup %4589  ;;  %v1948_v63 = vsub.f32 %v4809_v15, %v1940_v2  ;;  %v1930_v21 = vmul.f32 %v4588_v9, %v3899_v44 }
 0xa97   : > { %v1949_v36 = vsub.f32 %v4811_v16, %v1941_v43  ;;  %v1932_v53 = vmul.f32 %v4590_v14, %v3900_v23  ;;  %v1868_v50 = vpop.xlane.xlu1 %1867  ;;  %v1963_v10 = vmul.f32 %v1955_v51, %v1955_v51 }
 0xa98   : > { %v1956_v4 = vmax.f32 %v1948_v63, 0.0  ;;  %v1942_v41 = vadd.f32 %v1930_v21, %v6676_v8  ;;  %v3901_v28 = vadd.f32 -1.0, %v1868_v50  ;;  %v1871_v56 = vpop.xlane.xlu0 %1870 }
 0xa99   : > { %v4592_v17 = vpop.eup %4591  ;;  %v1957_v3 = vmax.f32 %v1949_v36, 0.0  ;;  %v1943_v49 = vadd.f32 %v1932_v53, %v6679_v42  ;;  %v3902_v12 = vadd.f32 -1.0, %v1871_v56 }
 0xa9a   : > { %v4594_v37 = vpop.eup %4593  ;;  %v1964_v34 = vmul.f32 %v1956_v4, %v1956_v4  ;;  %v1950_v15 = vsub.f32 %v4815_v25, %v1942_v41  ;;  %v1934_v20 = vmul.f32 %v4592_v17, %v3901_v28 }
 0xa9b   : > { %v1951_v16 = vsub.f32 %v4817_v26, %v1943_v49  ;;  %v1936_v45 = vmul.f32 %v4594_v37, %v3902_v12  ;;  %v1874_v6 = vpop.xlane.xlu1 %1873  ;;  %v1965_v46 = vmul.f32 %v1957_v3, %v1957_v3 }
 0xa9c   : > { %v1958_v7 = vmax.f32 %v1950_v15, 0.0  ;;  %v1944_v8 = vadd.f32 %v1934_v20, %v6688_v0  ;;  %v3903_v24 = vadd.f32 -1.0, %v1874_v6  ;;  %v1971_v31 = vpack.c.bf16 %v1964_v34, %v1963_v10 }
 0xa9d   : > { %v4596_v22 = vpop.eup %4595  ;;  %v1945_v42 = vadd.f32 %v1936_v45, %v6691_v29  ;;  %v1959_v40 = vmax.f32 %v1951_v16, 0.0 }
 0xa9e   : > { %v1966_v18 = vmul.f32 %v1958_v7, %v1958_v7  ;;  %v1952_v27 = vsub.f32 %v4822_v38, %v1944_v8  ;;  %v1938_v52 = vmul.f32 %v4596_v22, %v3903_v24  ;;  %4420 = vmatprep.mubr.msk.bf16.mxu1 %vm610_vm2, %v1971_v31 }
 0xa9f   : > { %v1953_v25 = vsub.f32 %v4824_v39, %v1945_v42  ;;  %v1967_v11 = vmul.f32 %v1959_v40, %v1959_v40 }
 0xaa0   : > { %v1972_v26 = vpack.c.bf16 %v1966_v18, %v1965_v46  ;;  %v1960_v59 = vmax.f32 %v1952_v27, 0.0  ;;  %v1946_v0 = vadd.f32 %v1938_v52, %v6700_v35 }
 0xaa1   : > { %v1961_v32 = vmax.f32 %v1953_v25, 0.0 }
 0xaa2   : > { %v1968_v30 = vmul.f32 %v1960_v59, %v1960_v59  ;;  %v1954_v58 = vsub.f32 %v4830_v13, %v1946_v0  ;;  %4421 = vmatmul.mubr.msk.bf16.vlgmr.msra.gmra.mxu1 %vm610_vm2, %v1972_v26 }
 0xaa3   : > { %v1969_v38 = vmul.f32 %v1961_v32, %v1961_v32 }
 0xaa4   : > { %v1962_v29 = vmax.f32 %v1954_v58, 0.0  ;;  %v1973_v54 = vpack.c.bf16 %v1968_v30, %v1967_v11 }
 0xaa6   : > { %v1970_v57 = vmul.f32 %v1962_v29, %v1962_v29  ;;  %4424 = vmatprep.mubr.msk.bf16.mxu1 %vm610_vm2, %v1973_v54 }
 0xaa8   : > { %v1974_v1 = vpack.c.bf16 %v1970_v57, %v1969_v38 }
 0xaaa   : > { %4425 = vmatmul.mubr.msk.bf16.gmra.mxu1 %vm610_vm2, %v1974_v1 }
 0xb62   : > { %v4422_v39 = vpop.f32.mrf.mxu1 }
 0xb63   : > { %3804 = vst.msk [vmem:[%s386_s14 + $0x10] sm:$0xff] %vm404_vm0, %v4422_v39 }
 0xb64   : > { %v3771_v13 = vpop.f32.mrf.mxu1 }
 0xb65   : > { %3802 = vst.msk [vmem:[%s386_s14] sm:$0xff] %vm404_vm0, %v3771_v13 }
 0xb66   : > { %v4423_v35 = vpop.f32.mrf.mxu1 }
 0xb67   : > { %3805 = vst.msk [vmem:[%s386_s14 + $0x18] sm:$0xff] %vm404_vm0, %v4423_v35 }
 0xb68   : > { %v3774_v48 = vpop.f32.mrf.mxu1 }
 0xb69   : > { %3803 = vst.msk [vmem:[%s386_s14 + $0x8] sm:$0xff] %vm404_vm0, %v3774_v48 }
 0xb6a   : > { %v4426_v61 = vpop.f32.mrf.mxu1 }
 0xb6b   : > { %3808 = vst.msk [vmem:[%s386_s14 + $0x30] sm:$0xff] %vm404_vm0, %v4426_v61 }
 0xb6c   : > { %v3787_v5 = vpop.f32.mrf.mxu1 }
 0xb6d   : > { %3806 = vst.msk [vmem:[%s386_s14 + $0x20] sm:$0xff] %vm404_vm0, %v3787_v5 }
 0xb6e   : > { %v4427_v33 = vpop.f32.mrf.mxu1 }
 0xb6f   : > { %3809 = vst.msk [vmem:[%s386_s14 + $0x38] sm:$0xff] %vm404_vm0, %v4427_v33 }
 0xb70   : > { %v3790_v62 = vpop.f32.mrf.mxu1 }
 0xb71   : > { %3807 = vst.msk [vmem:[%s386_s14 + $0x28] sm:$0xff] %vm404_vm0, %v3790_v62 }
 0xb72 PF: > { %s21_s17 = sadd.s32 1, %s4611_s17  }
 0xb73   : > { %p18_p4 = scmp.ge.s32.totalorder %s21_s17, 4  }
 0xb75   :  { %20 = sbr.rel (!%p18_p4) target bundleno = 1 (0x1), region = 126 }

// kernel: tpu_custom_call.1
= control target key start
LH: loop header
LB: loop body
LE: loop exit
PB: predicated region body
PF: predicated region fallthrough
CT: control target
= control target key end

     0   :  { %s4677_s17 = smov 0   ;;  %s6751_s0 = inlined_call_operand.vmem [shape: f32[2,64,32], index: 0, kind: input, shape index: {}]   ;;  %s6752_s1 = inlined_call_operand.vmem [shape: bf16[20,32], index: 1, kind: input, shape index: {}]   ;;  %s6753_s2 = inlined_call_operand.vmem [shape: bf16[32,20], index: 2, kind: input, shape index: {}]   ;;  %s6754_s3 = inlined_call_operand.vmem [shape: bf16[2,32,128], index: 3, kind: input, shape index: {}]   ;;  %s6755_s4 = inlined_call_operand.vmem [shape: f32[2,1,128], index: 4, kind: input, shape index: {}]   ;;  %s6756_s5 = inlined_call_operand.vmem [shape: bf16[2,128,32], index: 5, kind: input, shape index: {}]   ;;  %s6757_s6 = inlined_call_operand.vmem [shape: f32[2,1,32], index: 6, kind: input, shape index: {}]   ;;  %s6758_s7 = inlined_call_operand.vmem [shape: bf16[8,32,32], index: 7, kind: input, shape index: {}]   ;;  %s6759_s8 = inlined_call_operand.vmem [shape: f32[8,1,32], index: 8, kind: input, shape index: {}]   ;;  %s6760_s9 = inlined_call_operand.vmem [shape: bf16[8,32,32], index: 9, kind: input, shape index: {}]   ;;  %s6761_s10 = inlined_call_operand.vmem [shape: f32[8,1,32], index: 10, kind: input, shape index: {}]   ;;  %s6762_s11 = inlined_call_operand.vmem [shape: f32[2,64,32], index: 11, kind: output, shape index: {}]  }
   0x1 LB: > { %s3865_s18 = sadd.s32 4294967295, %s4611_s17   ;;  %p3869_p0 = scmp.ge.s32.totalorder %s4611_s17, 1  ;;  %s4611_s17 = sphi %s4677_s17, %s21_s17  }
   0x2   : > { %p337_p1 = scmp.lt.s32.totalorder %s4611_s17, 3 }
   0x4   : > { %p338_p2 = pnand %p3869_p0, %p337_p1 }
   0x5   : > { %p377_p3 = scmp.lt.s32.totalorder (!%p338_p2), %s3865_s18, 1 }
   0x6   : > { %341 = sbr.rel (%p338_p2) target bundleno = 2930 (0xb72), region = 64 }
   0xb   : > { %s6764_s18 = smov (!%p377_p3, %s3865_s18), 1  ;;  %vm404_vm0 = vcmask 261120   ;;  %v4445_v24 = vld [vmem:[%s6753_s2 + $0x8] sm:$0xff]   ;;  %v4446_v25 = vld [vmem:[%s6753_s2] sm:$0xff]  }
   0xc   : > { %s4098_s19 = sshll.u32 %s6764_s18, 6  ;;  %4196 = vmatprep.subr.bf16.mxu0 %v4445_v24  ;;  %v4447_v26 = vld [vmem:[%s6752_s1] sm:$0xff]  }
   0xd   : > { %s4693_s22 = scalar_lea.vmem %s6751_s0, %s4098_s19  ;;  %4197 = vmatpush3.bf16.msra.mxu0 %v4445_v24  ;;  %4216 = vmatprep.mubr.msk.bf16.mxu1 %vm404_vm0, %v4447_v26  ;;  %s386_s14 = scalar_lea.vmem %s6762_s11, %s4098_s19 }
   0xe   : > { %v4696_v0 = vld [vmem:[%s4693_s22 + $0x10] sm:$0xff]  ;;  %v4699_v1 = vld [vmem:[%s4693_s22] sm:$0xff]  ;;  %v4702_v2 = vld [vmem:[%s4693_s22 + $0x18] sm:$0xff]  ;;  %4198 = vmatprep.subr.bf16.mxu0 %v4446_v25 }
   0xf   : > { %v398_v3 = vmul.f32 %v4696_v0, %v4696_v0  ;;  %v396_v4 = vmul.f32 %v4699_v1, %v4699_v1  ;;  %v399_v5 = vmul.f32 %v4702_v2, %v4702_v2  ;;  %v4711_v6 = vld [vmem:[%s4693_s22 + $0x8] sm:$0xff]  ;;  %v4717_v8 = vld [vmem:[%s4693_s22 + $0x20] sm:$0xff]  ;;  %v4726_v12 = vld [vmem:[%s4693_s22 + $0x38] sm:$0xff] }
  0x10   : > { %v4714_v7 = vld [vmem:[%s4693_s22 + $0x28] sm:$0xff]  ;;  %v397_v9 = vmul.f32 %v4711_v6, %v4711_v6  ;;  %v400_v11 = vmul.f32 %v4717_v8, %v4717_v8  ;;  %v4729_v13 = vld [vmem:[%s4693_s22 + $0x30] sm:$0xff]  ;;  %v403_v16 = vmul.f32 %v4726_v12, %v4726_v12 }
  0x11   : > { %v401_v10 = vmul.f32 %v4714_v7, %v4714_v7  ;;  %v411_v14 = vsel %vm404_vm0, %v398_v3, 0.0  ;;  %v405_v15 = vsel %vm404_vm0, %v396_v4, 0.0  ;;  %v414_v17 = vsel %vm404_vm0, %v399_v5, 0.0  ;;  %4199 = vmatpush3.bf16.msra.mxu0 %v4446_v25 }
  0x12   : > { %412 = vadd.xlane.f32.xlu1 %v411_v14  ;;  %406 = vadd.xlane.f32.xlu0 %v405_v15  ;;  %v408_v18 = vsel %vm404_vm0, %v397_v9, 0.0  ;;  %v402_v19 = vmul.f32 %v4729_v13, %v4729_v13  ;;  %v417_v21 = vsel %vm404_vm0, %v400_v11, 0.0  ;;  %v426_v22 = vsel %vm404_vm0, %v403_v16, 0.0 }
  0x13   : > { %v420_v20 = vsel %vm404_vm0, %v401_v10, 0.0 }
  0x14   : > { %v423_v23 = vsel %vm404_vm0, %v402_v19, 0.0 }
  0x16   : > { %415 = vadd.xlane.f32.xlu1 %v414_v17  ;;  %409 = vadd.xlane.f32.xlu0 %v408_v18 }
  0x1a   : > { %421 = vadd.xlane.f32.xlu1 %v420_v20  ;;  %418 = vadd.xlane.f32.xlu0 %v417_v21 }
  0x1e   : > { %427 = vadd.xlane.f32.xlu1 %v426_v22  ;;  %424 = vadd.xlane.f32.xlu0 %v423_v23 }
  0x9b   : > { %v413_v27 = vpop.xlane.xlu1 %412  ;;  %v407_v28 = vpop.xlane.xlu0 %406 }
  0x9c   : > { %4501 = vrsqrt.f32 %v413_v27  ;;  %vm445_vm1 = vcmp.eq.f32.partialorder %v413_v27, inf  ;;  %v448_v38 = vand.u32 2147483648, %v413_v27  ;;  %vm447_vm2 = vcmp.eq.f32.partialorder %v413_v27, 0.0 }
  0x9d   : > { %4503 = vrsqrt.f32 %v407_v28  ;;  %vm431_vm3 = vcmp.eq.f32.partialorder %v407_v28, inf  ;;  %v434_v41 = vand.u32 2147483648, %v407_v28  ;;  %vm433_vm4 = vcmp.eq.f32.partialorder %v407_v28, 0.0 }
  0x9f   : > { %v416_v29 = vpop.xlane.xlu1 %415  ;;  %v410_v30 = vpop.xlane.xlu0 %409 }
  0xa0   : > { %4505 = vrsqrt.f32 %v416_v29  ;;  %vm452_vm5 = vcmp.eq.f32.partialorder %v416_v29, inf  ;;  %vm454_vm6 = vcmp.eq.f32.partialorder %v416_v29, 0.0  ;;  %v455_v50 = vand.u32 2147483648, %v416_v29 }
  0xa1   : > { %4507 = vrsqrt.f32 %v410_v30  ;;  %vm438_vm7 = vcmp.eq.f32.partialorder %v410_v30, inf  ;;  %vm440_vm8 = vcmp.eq.f32.partialorder %v410_v30, 0.0  ;;  %v441_v53 = vand.u32 2147483648, %v410_v30 }
  0xa3   : > { %v422_v31 = vpop.xlane.xlu1 %421  ;;  %v419_v32 = vpop.xlane.xlu0 %418 }
  0xa4   : > { %4509 = vrsqrt.f32 %v422_v31  ;;  %vm466_vm9 = vcmp.eq.f32.partialorder %v422_v31, inf  ;;  %vm468_vm10 = vcmp.eq.f32.partialorder %v422_v31, 0.0  ;;  %v469_v62 = vand.u32 2147483648, %v422_v31 }
  0xa5   : > { %4511 = vrsqrt.f32 %v419_v32  ;;  %vm459_vm11 = vcmp.eq.f32.partialorder %v419_v32, inf  ;;  %v462_v4 = vand.u32 2147483648, %v419_v32  ;;  %vm461_vm12 = vcmp.eq.f32.partialorder %v419_v32, 0.0 }
  0xa7   : > { %v4753_v33 = vpop.xlane.xlu1 %427  ;;  %v4755_v34 = vpop.xlane.xlu0 %424 }
  0xa8   : > { %4513 = vrsqrt.f32 %v4753_v33  ;;  %vm480_vm13 = vcmp.eq.f32.partialorder %v4753_v33, inf  ;;  %vm482_vm14 = vcmp.eq.f32.partialorder %v4753_v33, 0.0  ;;  %v483_v18 = vand.u32 2147483648, %v4753_v33 }
  0xa9   : > { %v4502_v35 = vpop.eup %4501  ;;  %4515 = vrsqrt.f32 %v4755_v34  ;;  %vm473_vm15 = vcmp.eq.f32.partialorder %v4755_v34, inf  ;;  %v476_v21 = vand.u32 2147483648, %v4755_v34 }
  0xaa   : > { %v4504_v36 = vpop.eup %4503  ;;  %v444_v37 = vmul.f32 %v4502_v35, %v413_v27 }
  0xab   : > { %v430_v39 = vmul.f32 %v4504_v36, %v407_v28 }
  0xac   : > { %v446_v40 = vsel %vm445_vm1, %v413_v27, %v444_v37  ;;  %vm475_vm1 = vcmp.eq.f32.partialorder %v4755_v34, 0.0 }
  0xad   : > { %v4506_v42 = vpop.eup %4505  ;;  %v449_v43 = vsel %vm447_vm2, %v448_v38, %v446_v40  ;;  %v432_v44 = vsel %vm431_vm3, %v407_v28, %v430_v39  ;;  %vm610_vm2 = vcmask 162816   ;;  %vm2040_vm3 = vcmask 523264  }
  0xae   : > { %v4508_v45 = vpop.eup %4507  ;;  %v487_v46 = vadd.f32 1e-06, %v449_v43  ;;  %v435_v47 = vsel %vm433_vm4, %v434_v41, %v432_v44  ;;  %v451_v48 = vmul.f32 %v4506_v42, %v416_v29  ;;  %v4448_v43 = vld [vmem:[%s6752_s1 + $0x8] ss:$0 sps:$4 sm:$0x33]  }
  0xaf   : > { %v485_v49 = vadd.f32 1e-06, %v435_v47  ;;  %v437_v51 = vmul.f32 %v4508_v45, %v410_v30 }
  0xb0   : > { %v453_v52 = vsel %vm452_vm5, %v416_v29, %v451_v48  ;;  %4517 = vrcp.f32 %v487_v46 }
  0xb1   : > { %v4510_v54 = vpop.eup %4509  ;;  %v456_v55 = vsel %vm454_vm6, %v455_v50, %v453_v52  ;;  %v439_v56 = vsel %vm438_vm7, %v410_v30, %v437_v51  ;;  %4519 = vrcp.f32 %v485_v49 }
  0xb2   : > { %v4512_v57 = vpop.eup %4511  ;;  %v488_v58 = vadd.f32 1e-06, %v456_v55  ;;  %v442_v59 = vsel %vm440_vm8, %v441_v53, %v439_v56  ;;  %v465_v60 = vmul.f32 %v4510_v54, %v422_v31 }
  0xb3   : > { %v486_v61 = vadd.f32 1e-06, %v442_v59  ;;  %v458_v63 = vmul.f32 %v4512_v57, %v419_v32 }
  0xb4   : > { %4521 = vrcp.f32 %v488_v58  ;;  %v467_v3 = vsel %vm466_vm9, %v422_v31, %v465_v60 }
  0xb5   : > { %v4514_v5 = vpop.eup %4513  ;;  %4523 = vrcp.f32 %v486_v61  ;;  %v470_v9 = vsel %vm468_vm10, %v469_v62, %v467_v3  ;;  %v460_v10 = vsel %vm459_vm11, %v419_v32, %v458_v63 }
  0xb6   : > { %v4516_v11 = vpop.eup %4515  ;;  %v490_v14 = vadd.f32 1e-06, %v470_v9  ;;  %v463_v15 = vsel %vm461_vm12, %v462_v4, %v460_v10  ;;  %v479_v16 = vmul.f32 %v4514_v5, %v4753_v33  ;;  %vm2047_vm12 = vcmask 519168  }
  0xb7   : > { %v489_v17 = vadd.f32 1e-06, %v463_v15  ;;  %v472_v19 = vmul.f32 %v4516_v11, %v4755_v34 }
  0xb8   : > { %4525 = vrcp.f32 %v490_v14  ;;  %v481_v20 = vsel %vm480_vm13, %v4753_v33, %v479_v16 }
  0xb9   : > { %4527 = vrcp.f32 %v489_v17  ;;  %v484_v22 = vsel %vm482_vm14, %v483_v18, %v481_v20  ;;  %v474_v23 = vsel %vm473_vm15, %v4755_v34, %v472_v19 }
  0xba   : > { %v492_v24 = vadd.f32 1e-06, %v484_v22  ;;  %v477_v25 = vsel %vm475_vm1, %v476_v21, %v474_v23 }
  0xbb   : > { %v491_v26 = vadd.f32 1e-06, %v477_v25 }
  0xbc   : > { %4529 = vrcp.f32 %v492_v24 }
  0xbd   : > { %4531 = vrcp.f32 %v491_v26  ;;  %v4518_v27 = vpop.eup %4517 }
  0xbe   : > { %v4520_v28 = vpop.eup %4519  ;;  %v503_v31 = vmul.f32 %v4518_v27, %v4696_v0 }
  0xbf   : > { %v501_v33 = vmul.f32 %v4520_v28, %v4699_v1 }
  0xc1   : > { %v4522_v29 = vpop.eup %4521 }
  0xc2   : > { %v4524_v30 = vpop.eup %4523  ;;  %v504_v32 = vmul.f32 %v4522_v29, %v4702_v2 }
  0xc3   : > { %v502_v35 = vmul.f32 %v4524_v30, %v4711_v6 }
  0xc4   : > { %v510_v36 = vpack.c.bf16 %v504_v32, %v503_v31 }
  0xc5   : > { %v4526_v37 = vpop.eup %4525  ;;  %v509_v34 = vpack.c.bf16 %v502_v35, %v501_v33 }
  0xc6   : > { %v4528_v38 = vpop.eup %4527  ;;  %v506_v39 = vmul.f32 %v4526_v37, %v4714_v7 }
  0xc7   : > { %4200 = vmatprep.mubr.msk.bf16.mxu0 %vm404_vm0, %v509_v34  ;;  %v505_v40 = vmul.f32 %v4528_v38, %v4717_v8 }
  0xc8   : > { %4201 = vmatmul.mubr.msk.bf16.vlgmr.msra.gmra.mxu0 %vm404_vm0, %v510_v36 }
  0xc9   : > { %v4530_v41 = vpop.eup %4529  ;;  %v511_v0 = vpack.c.bf16 %v506_v39, %v505_v40 }
  0xca   : > { %v4532_v42 = vpop.eup %4531  ;;  %v508_v2 = vmul.f32 %v4530_v41, %v4726_v12  ;;  %v537_v12 = vsel %vm404_vm0, %v510_v36, 0 }
  0xcb   : > { %4204 = vmatprep.mubr.msk.bf16.mxu0 %vm404_vm0, %v511_v0  ;;  %v507_v1 = vmul.f32 %v4532_v42, %v4729_v13  ;;  %v540_v8 = vsel %vm404_vm0, %v511_v0, 0  ;;  %v534_v13 = vsel %vm404_vm0, %v509_v34, 0 }
  0xcd   : > { %v512_v6 = vpack.c.bf16 %v508_v2, %v507_v1 }
  0xcf   : > { %4428 = vmatprep.subr.msk.bf16.mxu1 %vm404_vm0, %v512_v6  ;;  %v543_v7 = vsel %vm404_vm0, %v512_v6, 0 }
  0xd0   : > { %4205 = vmatmul.mubr.msk.bf16.gmra.mxu0 %vm404_vm0, %v512_v6  ;;  %4209 = vmatpush3.bf16.xpose.msra.mxu1 %v543_v7 }
  0xd1   : > { %4429 = vmatprep.subr.msk.bf16.mxu1 %vm404_vm0, %v511_v0 }
  0xd8   : > { %4211 = vmatpush3.bf16.xpose.msra.mxu1 %v540_v8 }
  0xd9   : > { %4430 = vmatprep.subr.msk.bf16.mxu1 %vm404_vm0, %v510_v36 }
  0xe0   : > { %4213 = vmatpush3.bf16.xpose.msra.mxu1 %v537_v12 }
  0xe1   : > { %4431 = vmatprep.subr.msk.bf16.mxu1 %vm404_vm0, %v509_v34 }
  0xe8   : > { %4215 = vmatpush3.bf16.xpose.msra.mxu1 %v534_v13 }
  0xef   : > { %4217 = vmatmul.mubr.msk.bf16.vlgmr.msra.gmra.mxu1 %vm404_vm0, %v4448_v43 }
 0x188   : > { %v4202_v44 = vpop.f32.mrf.mxu0 }
 0x189   : > { %v617_v49 = vsel %vm610_vm2, %v4202_v44, -inf }
 0x18a   : > { %v579_v45 = vpop.f32.mrf.mxu0 }
 0x18b   : > { %v611_v46 = vsel %vm610_vm2, %v579_v45, -inf }
 0x18c   : > { %612 = vmax.xlane.f32.xlu0 %v611_v46  ;;  %v4203_v47 = vpop.f32.mrf.mxu0 }
 0x18d   : > { %v620_v53 = vsel %vm610_vm2, %v4203_v47, -inf }
 0x18e   : > { %v582_v48 = vpop.f32.mrf.mxu0 }
 0x18f   : > { %v614_v50 = vsel %vm610_vm2, %v582_v48, -inf }
 0x190   : > { %618 = vmax.xlane.f32.xlu0 %v617_v49  ;;  %615 = vmax.xlane.f32.xlu1 %v614_v50  ;;  %v4206_v51 = vpop.f32.mrf.mxu0 }
 0x191   : > { %v629_v57 = vsel %vm610_vm2, %v4206_v51, -inf }
 0x192   : > { %v595_v52 = vpop.f32.mrf.mxu0 }
 0x193   : > { %v623_v54 = vsel %vm610_vm2, %v595_v52, -inf }
 0x194   : > { %621 = vmax.xlane.f32.xlu1 %v620_v53  ;;  %624 = vmax.xlane.f32.xlu0 %v623_v54  ;;  %v4207_v55 = vpop.f32.mrf.mxu0 }
 0x195   : > { %v632_v59 = vsel %vm610_vm2, %v4207_v55, -inf }
 0x196   : > { %v598_v56 = vpop.f32.mrf.mxu0 }
 0x197   : > { %v626_v58 = vsel %vm610_vm2, %v598_v56, -inf }
 0x198   : > { %630 = vmax.xlane.f32.xlu0 %v629_v57  ;;  %627 = vmax.xlane.f32.xlu1 %v626_v58  ;;  %v4613_v57 = vmov -1.0  }
 0x19c   : > { %633 = vmax.xlane.f32.xlu1 %v632_v59  ;;  %v4614_v59 = vmov -0.5  }
 0x1af   : > { %v4802_v60 = vpop.f32.mrf.mxu1 }
 0x1b1   : > { %v4804_v61 = vpop.f32.mrf.mxu1 }
 0x1b2   : > { %v2041_v54 = vsel %vm2040_vm3, %v4804_v61, -inf }
 0x1b3   : > { %v4219_v62 = vpop.f32.mrf.mxu1 }
 0x215   : > { %v613_v63 = vpop.xlane.xlu0 %612 }
 0x216   : > { %v635_v3 = vsub.f32 %v579_v45, %v613_v63 }
 0x218   : > { %v4806_v4 = vmul.f32 0.5, %v635_v3 }
 0x219   : > { %v616_v5 = vpop.xlane.xlu1 %615  ;;  %v619_v9 = vpop.xlane.xlu0 %618 }
 0x21a   : > { %v636_v10 = vsub.f32 %v582_v48, %v616_v5  ;;  %v637_v11 = vsub.f32 %v4202_v44, %v619_v9  ;;  %v3880_v14 = vadd.f32 0.5, %v4806_v4 }
 0x21c   : > { %v4809_v15 = vmul.f32 0.5, %v636_v10  ;;  %v4811_v16 = vmul.f32 0.5, %v637_v11  ;;  %v659_v17 = vmax.f32 %v3880_v14, 0.0 }
 0x21d   : > { %v622_v18 = vpop.xlane.xlu1 %621  ;;  %v625_v19 = vpop.xlane.xlu0 %624 }
 0x21e   : > { %v638_v20 = vsub.f32 %v4203_v47, %v622_v18  ;;  %v639_v21 = vsub.f32 %v595_v52, %v625_v19  ;;  %v667_v22 = vmul.f32 %v659_v17, %v659_v17  ;;  %v3881_v23 = vadd.f32 0.5, %v4809_v15 }
 0x21f   : > { %v3882_v24 = vadd.f32 0.5, %v4811_v16 }
 0x220   : > { %v4815_v25 = vmul.f32 0.5, %v638_v20  ;;  %v4817_v26 = vmul.f32 0.5, %v639_v21  ;;  %v675_v27 = vsel %vm610_vm2, %v667_v22, 0.0  ;;  %v660_v28 = vmax.f32 %v3881_v23, 0.0 }
 0x221   : > { %v628_v29 = vpop.xlane.xlu1 %627  ;;  %676 = vadd.xlane.f32.xlu0 %v675_v27  ;;  %v631_v30 = vpop.xlane.xlu0 %630  ;;  %v661_v31 = vmax.f32 %v3882_v24, 0.0 }
 0x222   : > { %v640_v32 = vsub.f32 %v598_v56, %v628_v29  ;;  %v641_v33 = vsub.f32 %v4206_v51, %v631_v30  ;;  %v668_v35 = vmul.f32 %v660_v28, %v660_v28  ;;  %v3883_v36 = vadd.f32 0.5, %v4815_v25 }
 0x223   : > { %v669_v37 = vmul.f32 %v661_v31, %v661_v31  ;;  %v3884_v34 = vadd.f32 0.5, %v4817_v26 }
 0x224   : > { %v4822_v38 = vmul.f32 0.5, %v640_v32  ;;  %v4824_v39 = vmul.f32 0.5, %v641_v33  ;;  %v678_v40 = vsel %vm610_vm2, %v668_v35, 0.0  ;;  %v662_v41 = vmax.f32 %v3883_v36, 0.0 }
 0x225   : > { %679 = vadd.xlane.f32.xlu1 %v678_v40  ;;  %v634_v0 = vpop.xlane.xlu1 %633  ;;  %v681_v42 = vsel %vm610_vm2, %v669_v37, 0.0  ;;  %v663_v2 = vmax.f32 %v3884_v34, 0.0 }
 0x226   : > { %v642_v1 = vsub.f32 %v4207_v55, %v634_v0  ;;  %682 = vadd.xlane.f32.xlu0 %v681_v42  ;;  %v670_v6 = vmul.f32 %v662_v41, %v662_v41  ;;  %v3885_v7 = vadd.f32 0.5, %v4822_v38  ;;  %v3886_v8 = vadd.f32 0.5, %v4824_v39 }
 0x227   : > { %v671_v12 = vmul.f32 %v663_v2, %v663_v2 }
 0x228   : > { %v4830_v13 = vmul.f32 0.5, %v642_v1  ;;  %v684_v43 = vsel %vm610_vm2, %v670_v6, 0.0  ;;  %v664_v44 = vmax.f32 %v3885_v7, 0.0  ;;  %v665_v45 = vmax.f32 %v3886_v8, 0.0 }
 0x229   : > { %685 = vadd.xlane.f32.xlu1 %v684_v43  ;;  %v687_v46 = vsel %vm610_vm2, %v671_v12, 0.0 }
 0x22a   : > { %688 = vadd.xlane.f32.xlu0 %v687_v46  ;;  %v672_v47 = vmul.f32 %v664_v44, %v664_v44  ;;  %v673_v48 = vmul.f32 %v665_v45, %v665_v45  ;;  %v3887_v49 = vadd.f32 0.5, %v4830_v13 }
 0x22c   : > { %v690_v50 = vsel %vm610_vm2, %v672_v47, 0.0  ;;  %v693_v51 = vsel %vm610_vm2, %v673_v48, 0.0  ;;  %v666_v52 = vmax.f32 %v3887_v49, 0.0 }
 0x22d   : > { %691 = vadd.xlane.f32.xlu1 %v690_v50 }
 0x22e   : > { %694 = vadd.xlane.f32.xlu0 %v693_v51  ;;  %v674_v53 = vmul.f32 %v666_v52, %v666_v52 }
 0x230   : > { %v696_v55 = vsel %vm610_vm2, %v674_v53, 0.0 }
 0x231   : > { %697 = vadd.xlane.f32.xlu1 %v696_v55 }
 0x232   : > { %2042 = vmax.xlane.f32.xlu0 %v2041_v54 }
 0x2aa   : > { %v677_v56 = vpop.xlane.xlu0 %676 }
 0x2ab   : > { %vm699_vm4 = vcmp.ge.f32.partialorder %v677_v56, 1.0 }
 0x2ac   : > { %v4840_v58 = vsel %vm699_vm4, -0.5, %v4613_v57  ;;  %v4842_v62 = vsel %vm699_vm4, 0.0, %v4614_v59 }
 0x2ad   : > { %v723_v63 = vadd.f32 %v4842_v62, %v4840_v58 }
 0x2ae   : > { %v680_v3 = vpop.xlane.xlu1 %679 }
 0x2af   : > { %v4846_v5 = vmul.f32 0.5, %v723_v63  ;;  %vm700_vm5 = vcmp.ge.f32.partialorder %v680_v3, 1.0  ;;  %v683_v9 = vpop.xlane.xlu0 %682 }
 0x2b0   : > { %v4848_v10 = vsel %vm700_vm5, -0.5, %v4613_v57  ;;  %v4850_v11 = vsel %vm700_vm5, 0.0, %v4614_v59  ;;  %vm701_vm6 = vcmp.ge.f32.partialorder %v683_v9, 1.0 }
 0x2b1   : > { %v724_v14 = vadd.f32 %v4850_v11, %v4848_v10  ;;  %v4854_v17 = vsel %vm701_vm6, -0.5, %v4613_v57  ;;  %v4856_v18 = vsel %vm701_vm6, 0.0, %v4614_v59  ;;  %v739_v23 = vsub.f32 %v4806_v4, %v4846_v5 }
 0x2b2   : > { %v725_v19 = vadd.f32 %v4856_v18, %v4854_v17  ;;  %v686_v20 = vpop.xlane.xlu1 %685 }
 0x2b3   : > { %v4860_v21 = vmul.f32 0.5, %v724_v14  ;;  %vm702_vm7 = vcmp.ge.f32.partialorder %v686_v20, 1.0  ;;  %v689_v22 = vpop.xlane.xlu0 %688  ;;  %v747_v34 = vmax.f32 %v739_v23, 0.0 }
 0x2b4   : > { %v4864_v24 = vmul.f32 0.5, %v725_v19  ;;  %v4866_v27 = vsel %vm702_vm7, -0.5, %v4613_v57  ;;  %v4868_v28 = vsel %vm702_vm7, 0.0, %v4614_v59  ;;  %vm703_vm8 = vcmp.ge.f32.partialorder %v689_v22, 1.0 }
 0x2b5   : > { %v726_v29 = vadd.f32 %v4868_v28, %v4866_v27  ;;  %v4872_v30 = vsel %vm703_vm8, -0.5, %v4613_v57  ;;  %v4874_v31 = vsel %vm703_vm8, 0.0, %v4614_v59  ;;  %v740_v40 = vsub.f32 %v4809_v15, %v4860_v21 }
 0x2b6   : > { %v727_v32 = vadd.f32 %v4874_v31, %v4872_v30  ;;  %v692_v33 = vpop.xlane.xlu1 %691  ;;  %v741_v35 = vsub.f32 %v4811_v16, %v4864_v24  ;;  %v755_v45 = vmul.f32 %v747_v34, %v747_v34 }
 0x2b7   : > { %v4880_v36 = vmul.f32 0.5, %v726_v29  ;;  %vm704_vm9 = vcmp.ge.f32.partialorder %v692_v33, 1.0  ;;  %v695_v37 = vpop.xlane.xlu0 %694  ;;  %v748_v46 = vmax.f32 %v740_v40, 0.0 }
 0x2b8   : > { %v4884_v41 = vmul.f32 0.5, %v727_v32  ;;  %v4886_v0 = vsel %vm704_vm9, -0.5, %v4613_v57  ;;  %v4888_v42 = vsel %vm704_vm9, 0.0, %v4614_v59  ;;  %vm705_vm10 = vcmp.ge.f32.partialorder %v695_v37, 1.0 }
 0x2b9   : > { %v728_v2 = vadd.f32 %v4888_v42, %v4886_v0  ;;  %v4892_v1 = vsel %vm705_vm10, -0.5, %v4613_v57  ;;  %v4894_v6 = vsel %vm705_vm10, 0.0, %v4614_v59  ;;  %v749_v7 = vmax.f32 %v741_v35, 0.0  ;;  %v4925_v35 = vpop.f32.mrf.mxu1 }
 0x2ba   : > { %v729_v8 = vadd.f32 %v4894_v6, %v4892_v1  ;;  %v698_v12 = vpop.xlane.xlu1 %697  ;;  %v742_v43 = vsub.f32 %v4815_v25, %v4880_v36  ;;  %v743_v50 = vsub.f32 %v4817_v26, %v4884_v41  ;;  %v2044_v37 = vsel %vm2040_vm3, %v4925_v35, -inf }
 0x2bb   : > { %vm706_vm11 = vcmp.ge.f32.partialorder %v698_v12, 1.0  ;;  %v757_v44 = vmul.f32 %v749_v7, %v749_v7  ;;  %v4908_v51 = vmul.f32 0.5, %v728_v2 }
 0x2bc   : > { %v4900_v47 = vmul.f32 0.5, %v729_v8  ;;  %v4902_v48 = vsel %vm706_vm11, -0.5, %v4613_v57  ;;  %v4904_v49 = vsel %vm706_vm11, 0.0, %v4614_v59  ;;  %v750_v54 = vmax.f32 %v742_v43, 0.0 }
 0x2bd   : > { %v730_v52 = vadd.f32 %v4904_v49, %v4902_v48  ;;  %v769_v53 = vsel %vm610_vm2, %v757_v44, 0.0  ;;  %v763_v57 = vsel %vm610_vm2, %v755_v45, 0.0  ;;  %v756_v59 = vmul.f32 %v748_v46, %v748_v46  ;;  %v2043_v44 = vpop.xlane.xlu0 %2042 }
 0x2be   : > { %770 = vadd.xlane.f32.xlu0 %v769_v53  ;;  %v745_v55 = vsub.f32 %v4824_v39, %v4900_v47  ;;  %v758_v56 = vmul.f32 %v750_v54, %v750_v54  ;;  %v751_v14 = vmax.f32 %v743_v50, 0.0  ;;  %v744_v19 = vsub.f32 %v4822_v38, %v4908_v51 }
 0x2bf   : > { %v4916_v3 = vmul.f32 0.5, %v730_v52  ;;  %v766_v23 = vsel %vm610_vm2, %v756_v59, 0.0  ;;  %v2048_v8 = vsel %vm2047_vm12, %v4802_v60, -inf }
 0x2c0   : > { %v753_v63 = vmax.f32 %v745_v55, 0.0  ;;  %v772_v9 = vsel %vm610_vm2, %v758_v56, 0.0  ;;  %v759_v29 = vmul.f32 %v751_v14, %v751_v14  ;;  %v752_v32 = vmax.f32 %v744_v19, 0.0 }
 0x2c1   : > { %773 = vadd.xlane.f32.xlu1 %v772_v9  ;;  %v746_v33 = vsub.f32 %v4830_v13, %v4916_v3 }
 0x2c2   : > { %764 = vadd.xlane.f32.xlu0 %v763_v57  ;;  %v761_v20 = vmul.f32 %v753_v63, %v753_v63  ;;  %v775_v34 = vsel %vm610_vm2, %v759_v29, 0.0  ;;  %v760_v40 = vmul.f32 %v752_v32, %v752_v32 }
 0x2c3   : > { %v754_v2 = vmax.f32 %v746_v33, 0.0 }
 0x2c4   : > { %v781_v22 = vsel %vm610_vm2, %v761_v20, 0.0  ;;  %v778_v7 = vsel %vm610_vm2, %v760_v40, 0.0 }
 0x2c5   : > { %767 = vadd.xlane.f32.xlu1 %v766_v23  ;;  %v762_v12 = vmul.f32 %v754_v2, %v754_v2 }
 0x2c6   : > { %782 = vadd.xlane.f32.xlu0 %v781_v22 }
 0x2c7   : > { %v784_v43 = vsel %vm610_vm2, %v762_v12, 0.0 }
 0x2c9   : > { %2045 = vmax.xlane.f32.xlu1 %v2044_v37 }
 0x2ca   : > { %776 = vadd.xlane.f32.xlu0 %v775_v34 }
 0x2cd   : > { %779 = vadd.xlane.f32.xlu1 %v778_v7 }
 0x2ce   : > { %2049 = vmax.xlane.f32.xlu0 %v2048_v8 }
 0x2d1   : > { %785 = vadd.xlane.f32.xlu1 %v784_v43 }
 0x347   : > { %v771_v45 = vpop.xlane.xlu0 %770 }
 0x348   : > { %vm789_vm13 = vcmp.ge.f32.partialorder %v771_v45, 1.0 }
 0x349   : > { %v4936_v46 = vsel %vm789_vm13, %v4864_v24, %v4854_v17  ;;  %v4940_v50 = vsel %vm789_vm13, %v4856_v18, %v4864_v24 }
 0x34a   : > { %v813_v52 = vadd.f32 %v4940_v50, %v4936_v46  ;;  %v774_v53 = vpop.xlane.xlu1 %773 }
 0x34b   : > { %v765_v54 = vpop.xlane.xlu0 %764  ;;  %vm790_vm14 = vcmp.ge.f32.partialorder %v774_v53, 1.0 }
 0x34c   : > { %v4944_v55 = vmul.f32 0.5, %v813_v52  ;;  %vm787_vm15 = vcmp.ge.f32.partialorder %v765_v54, 1.0  ;;  %v4948_v56 = vsel %vm790_vm14, %v4880_v36, %v4866_v27  ;;  %v4952_v17 = vsel %vm790_vm14, %v4868_v28, %v4880_v36 }
 0x34d   : > { %v4956_v18 = vsel %vm787_vm15, %v4846_v5, %v4840_v58  ;;  %v4960_v24 = vsel %vm787_vm15, %v4842_v62, %v4846_v5  ;;  %v814_v57 = vadd.f32 %v4952_v17, %v4948_v56  ;;  %v2051_v28 = vsub.f32 %v4804_v61, %v2043_v44 }
 0x34e   : > { %v811_v59 = vadd.f32 %v4960_v24, %v4956_v18  ;;  %v829_v27 = vsub.f32 %v4811_v16, %v4944_v55  ;;  %v768_v36 = vpop.xlane.xlu1 %767 }
 0x34f   : > { %v783_v63 = vpop.xlane.xlu0 %782  ;;  %v4969_v9 = vmul.f32 0.5, %v814_v57  ;;  %vm788_vm1 = vcmp.ge.f32.partialorder %v768_v36, 1.0 }
 0x350   : > { %v4971_v58 = vmul.f32 0.5, %v811_v59  ;;  %vm793_vm4 = vcmp.ge.f32.partialorder %v783_v63, 1.0  ;;  %v4975_v62 = vsel %vm788_vm1, %v4860_v21, %v4848_v10  ;;  %v4979_v5 = vsel %vm788_vm1, %v4850_v11, %v4860_v21 }
 0x351   : > { %v4983_v14 = vsel %vm793_vm4, %v4900_v47, %v4892_v1  ;;  %v4987_v61 = vsel %vm793_vm4, %v4894_v6, %v4900_v47  ;;  %v812_v19 = vadd.f32 %v4979_v5, %v4975_v62  ;;  %v837_v10 = vmax.f32 %v829_v27, 0.0 }
 0x352   : > { %v817_v20 = vadd.f32 %v4987_v61, %v4983_v14  ;;  %v827_v22 = vsub.f32 %v4806_v4, %v4971_v58  ;;  %v2054_v11 = vmul.f32 1.442695, %v2051_v28  ;;  %v2046_v21 = vpop.xlane.xlu1 %2045  ;;  %v830_v1 = vsub.f32 %v4815_v25, %v4969_v9 }
 0x353   : > { %v777_v23 = vpop.xlane.xlu0 %776  ;;  %v4997_v29 = vmul.f32 0.5, %v812_v19  ;;  %v2052_v47 = vsub.f32 %v4925_v35, %v2046_v21  ;;  %v845_v37 = vmul.f32 %v837_v10, %v837_v10 }
 0x354   : > { %v4999_v6 = vmul.f32 0.5, %v817_v20  ;;  %vm791_vm5 = vcmp.ge.f32.partialorder %v777_v23, 1.0  ;;  %v835_v34 = vmax.f32 %v827_v22, 0.0  ;;  %4533 = vpow2.f32 %v2054_v11 }
 0x355   : > { %v5004_v32 = vsel %vm791_vm5, %v4884_v41, %v4872_v30  ;;  %v5008_v33 = vsel %vm791_vm5, %v4874_v31, %v4884_v41  ;;  %v828_v2 = vsub.f32 %v4809_v15, %v4997_v29  ;;  %v2056_v7 = vmul.f32 1.442695, %v2052_v47 }
 0x356   : > { %v815_v40 = vadd.f32 %v5008_v33, %v5004_v32  ;;  %v833_v35 = vsub.f32 %v4824_v39, %v4999_v6  ;;  %v857_v30 = vsel %vm610_vm2, %v845_v37, 0.0  ;;  %v780_v8 = vpop.xlane.xlu1 %779  ;;  %v843_v43 = vmul.f32 %v835_v34, %v835_v34 }
 0x357   : > { %v2050_v12 = vpop.xlane.xlu0 %2049  ;;  %858 = vadd.xlane.f32.xlu1 %v857_v30  ;;  %vm792_vm6 = vcmp.ge.f32.partialorder %v780_v8, 1.0  ;;  %v838_v44 = vmax.f32 %v830_v1, 0.0  ;;  %v836_v54 = vmax.f32 %v828_v2, 0.0  ;;  %4535 = vpow2.f32 %v2056_v7 }
 0x358   : > { %v5017_v31 = vmul.f32 0.5, %v815_v40  ;;  %v2053_v41 = vsub.f32 %v4802_v60, %v2050_v12  ;;  %v5022_v45 = vsel %vm792_vm6, %v4908_v51, %v4886_v0  ;;  %v5026_v52 = vsel %vm792_vm6, %v4888_v42, %v4908_v51 }
 0x359   : > { %v851_v53 = vsel %vm610_vm2, %v843_v43, 0.0  ;;  %v816_v57 = vadd.f32 %v5026_v52, %v5022_v45  ;;  %v841_v27 = vmax.f32 %v833_v35, 0.0  ;;  %v844_v60 = vmul.f32 %v836_v54, %v836_v54 }
 0x35a   : > { %v2058_v59 = vmul.f32 1.442695, %v2053_v41  ;;  %v786_v28 = vpop.xlane.xlu1 %785  ;;  %v831_v36 = vsub.f32 %v4817_v26, %v5017_v31  ;;  %v846_v20 = vmul.f32 %v838_v44, %v838_v44  ;;  %v4597_v44 = vld [vmem:[%s4693_s22 + $0x38] sm:$0xff] }
 0x35b   : > { %v5033_v0 = vmul.f32 0.5, %v816_v57  ;;  %852 = vadd.xlane.f32.xlu1 %v851_v53  ;;  %vm794_vm7 = vcmp.ge.f32.partialorder %v786_v28, 1.0  ;;  %v849_v42 = vmul.f32 %v841_v27, %v841_v27  ;;  %v854_v19 = vsel %vm610_vm2, %v844_v60, 0.0  ;;  %v4598_v53 = vld [vmem:[%s4693_s22 + $0x30] sm:$0xff]  ;;  %v4599_v57 = vld [vmem:[%s4693_s22 + $0x28] sm:$0xff]  ;;  %v4602_v60 = vld [vmem:[%s4693_s22 + $0x18] sm:$0xff] }
 0x35c   : > { %4537 = vpow2.f32 %v2058_v59  ;;  %v5037_v51 = vsel %vm794_vm7, %v4916_v3, %v4902_v48  ;;  %v5041_v63 = vsel %vm794_vm7, %v4904_v49, %v4916_v3  ;;  %855 = vadd.xlane.f32.xlu0 %v854_v19  ;;  %v839_v11 = vmax.f32 %v831_v36, 0.0  ;;  %v4600_v59 = vld [vmem:[%s4693_s22 + $0x20] sm:$0xff]  ;;  %v4601_v28 = vld [vmem:[%s4693_s22 + $0x10] sm:$0xff]  ;;  %v4604_v19 = vld [vmem:[%s4693_s22 + $0x8] sm:$0xff] }
 0x35d   : > { %v818_v10 = vadd.f32 %v5041_v63, %v5037_v51  ;;  %v869_v22 = vsel %vm610_vm2, %v849_v42, 0.0  ;;  %v832_v21 = vsub.f32 %v4822_v38, %v5033_v0  ;;  %v860_v49 = vsel %vm610_vm2, %v846_v20, 0.0  ;;  %v4603_v42 = vld [vmem:[%s4693_s22] sm:$0xff] }
 0x35e   : > { %v847_v48 = vmul.f32 %v839_v11, %v839_v11  ;;  %v516_v54 = vpack.c.bf16 %v4597_v44, %v4598_v53  ;;  %v515_v27 = vpack.c.bf16 %v4599_v57, %v4600_v59  ;;  %v514_v36 = vpack.c.bf16 %v4602_v60, %v4601_v28 }
 0x35f   : > { %v5049_v23 = vmul.f32 0.5, %v818_v10  ;;  %870 = vadd.xlane.f32.xlu1 %v869_v22  ;;  %v840_v1 = vmax.f32 %v832_v21, 0.0  ;;  %v513_v20 = vpack.c.bf16 %v4604_v19, %v4603_v42 }
 0x360   : > { %861 = vadd.xlane.f32.xlu0 %v860_v49  ;;  %v863_v3 = vsel %vm610_vm2, %v847_v48, 0.0  ;;  %4220 = vmatprep.subr.bf16.mxu0 %v516_v54 }
 0x361   : > { %v848_v47 = vmul.f32 %v840_v1, %v840_v1  ;;  %v834_v37 = vsub.f32 %v4830_v13, %v5049_v23  ;;  %v5055_v34 = vpop.eup %4533  ;;  %4221 = vmatpush3.bf16.msra.mxu0 %v516_v54 }
 0x362   : > { %v2060_v7 = vsel %vm2040_vm3, %v5055_v34, 0.0  ;;  %4222 = vmatprep.subr.bf16.mxu0 %v515_v27 }
 0x363   : > { %864 = vadd.xlane.f32.xlu1 %v863_v3  ;;  %v866_v40 = vsel %vm610_vm2, %v848_v47, 0.0  ;;  %v842_v2 = vmax.f32 %v834_v37, 0.0 }
 0x364   : > { %867 = vadd.xlane.f32.xlu0 %v866_v40  ;;  %v5060_v30 = vpop.eup %4535 }
 0x365   : > { %v850_v35 = vmul.f32 %v842_v2, %v842_v2  ;;  %v2063_v41 = vsel %vm2040_vm3, %v5060_v30, 0.0  ;;  %4223 = vmatpush3.bf16.msra.mxu0 %v515_v27 }
 0x366   : > { %4224 = vmatprep.subr.bf16.mxu0 %v514_v36 }
 0x367   : > { %2061 = vadd.xlane.f32.xlu1 %v2060_v7  ;;  %v872_v8 = vsel %vm610_vm2, %v850_v35, 0.0 }
 0x368   : > { %873 = vadd.xlane.f32.xlu0 %v872_v8 }
 0x369   : > { %v5063_v12 = vpop.eup %4537  ;;  %4225 = vmatpush3.bf16.msra.mxu0 %v514_v36 }
 0x36a   : > { %v2066_v43 = vsel %vm2047_vm12, %v5063_v12, 0.0  ;;  %4226 = vmatprep.subr.bf16.mxu0 %v513_v20 }
 0x36b   : > { %2067 = vadd.xlane.f32.xlu1 %v2066_v43 }
 0x36c   : > { %2064 = vadd.xlane.f32.xlu0 %v2063_v41 }
 0x36d   : > { %4227 = vmatpush3.bf16.msra.mxu0 %v513_v20 }
 0x3e0   : > { %v859_v10 = vpop.xlane.xlu1 %858 }
 0x3e1   : > { %vm877_vm8 = vcmp.ge.f32.partialorder %v859_v10, 1.0 }
 0x3e2   : > { %v5079_v22 = vsel %vm877_vm8, %v4944_v55, %v4936_v46  ;;  %v5083_v11 = vsel %vm877_vm8, %v4940_v50, %v4944_v55 }
 0x3e3   : > { %v901_v21 = vadd.f32 %v5083_v11, %v5079_v22 }
 0x3e4   : > { %v853_v48 = vpop.xlane.xlu1 %852 }
 0x3e5   : > { %v5087_v1 = vmul.f32 0.5, %v901_v21  ;;  %vm875_vm9 = vcmp.ge.f32.partialorder %v853_v48, 1.0  ;;  %v856_v46 = vpop.xlane.xlu0 %855 }
 0x3e6   : > { %v5091_v49 = vsel %vm875_vm9, %v4971_v58, %v4956_v18  ;;  %v5095_v3 = vsel %vm875_vm9, %v4960_v24, %v4971_v58  ;;  %vm876_vm10 = vcmp.ge.f32.partialorder %v856_v46, 1.0 }
 0x3e7   : > { %v899_v50 = vadd.f32 %v5095_v3, %v5091_v49  ;;  %v917_v55 = vsub.f32 %v4811_v16, %v5087_v1  ;;  %v5103_v37 = vsel %vm876_vm10, %v4997_v29, %v4975_v62  ;;  %v5107_v18 = vsel %vm876_vm10, %v4979_v5, %v4997_v29 }
 0x3e8   : > { %v871_v47 = vpop.xlane.xlu1 %870  ;;  %v900_v24 = vadd.f32 %v5107_v18, %v5103_v37 }
 0x3e9   : > { %v5109_v40 = vmul.f32 0.5, %v899_v50  ;;  %vm881_vm11 = vcmp.ge.f32.partialorder %v871_v47, 1.0  ;;  %v862_v62 = vpop.xlane.xlu0 %861  ;;  %v925_v35 = vmax.f32 %v917_v55, 0.0 }
 0x3ea   : > { %v5115_v58 = vsel %vm881_vm11, %v4999_v6, %v4983_v14  ;;  %v5119_v2 = vsel %vm881_vm11, %v4987_v61, %v4999_v6  ;;  %v5123_v29 = vmul.f32 0.5, %v900_v24  ;;  %vm878_vm12 = vcmp.ge.f32.partialorder %v862_v62, 1.0 }
 0x3eb   : > { %v905_v5 = vadd.f32 %v5119_v2, %v5115_v58  ;;  %v915_v7 = vsub.f32 %v4806_v4, %v5109_v40  ;;  %v5129_v14 = vsel %vm878_vm12, %v4969_v9, %v4948_v56  ;;  %v5133_v61 = vsel %vm878_vm12, %v4952_v17, %v4969_v9 }
 0x3ec   : > { %v865_v8 = vpop.xlane.xlu1 %864  ;;  %v902_v43 = vadd.f32 %v5133_v61, %v5129_v14  ;;  %v933_v54 = vmul.f32 %v925_v35, %v925_v35  ;;  %v916_v17 = vsub.f32 %v4809_v15, %v5123_v29 }
 0x3ed   : > { %v5135_v6 = vmul.f32 0.5, %v905_v5  ;;  %vm879_vm13 = vcmp.ge.f32.partialorder %v865_v8, 1.0  ;;  %v923_v41 = vmax.f32 %v915_v7, 0.0  ;;  %v868_v56 = vpop.xlane.xlu0 %867 }
 0x3ee   : > { %v5141_v44 = vsel %vm879_vm13, %v5017_v31, %v5004_v32  ;;  %v5145_v53 = vsel %vm879_vm13, %v5008_v33, %v5017_v31  ;;  %v5151_v57 = vmul.f32 0.5, %v902_v43  ;;  %vm880_vm14 = vcmp.ge.f32.partialorder %v868_v56, 1.0 }
 0x3ef   : > { %v903_v9 = vadd.f32 %v5145_v53, %v5141_v44  ;;  %v931_v59 = vmul.f32 %v923_v41, %v923_v41  ;;  %v5155_v32 = vsel %vm880_vm14, %v5033_v0, %v5022_v45  ;;  %v5159_v33 = vsel %vm880_vm14, %v5026_v52, %v5033_v0 }
 0x3f0   : > { %v2062_v27 = vpop.xlane.xlu1 %2061  ;;  %v924_v31 = vmax.f32 %v916_v17, 0.0  ;;  %v904_v60 = vadd.f32 %v5159_v33, %v5155_v32  ;;  %v921_v42 = vsub.f32 %v4824_v39, %v5135_v6  ;;  %v945_v45 = vsel %vm610_vm2, %v933_v54, 0.0 }
 0x3f1   : > { %v5161_v28 = vmul.f32 0.5, %v903_v9  ;;  %v939_v36 = vsel %vm610_vm2, %v931_v59, 0.0  ;;  %v874_v19 = vpop.xlane.xlu0 %873  ;;  %v918_v52 = vsub.f32 %v4815_v25, %v5151_v57  ;;  %4539 = vrcp.f32 %v2062_v27 }
 0x3f2   : > { %940 = vadd.xlane.f32.xlu0 %v939_v36  ;;  %v932_v20 = vmul.f32 %v924_v31, %v924_v31  ;;  %v5171_v0 = vmul.f32 0.5, %v904_v60  ;;  %vm882_vm15 = vcmp.ge.f32.partialorder %v874_v19, 1.0  ;;  %v929_v62 = vmax.f32 %v921_v42, 0.0 }
 0x3f3   : > { %v919_v10 = vsub.f32 %v4817_v26, %v5161_v28  ;;  %v5177_v21 = vsel %vm882_vm15, %v5049_v23, %v5037_v51  ;;  %v5181_v48 = vsel %vm882_vm15, %v5041_v63, %v5049_v23  ;;  %v926_v55 = vmax.f32 %v918_v52, 0.0 }
 0x3f4   : > { %v2068_v46 = vpop.xlane.xlu1 %2067  ;;  %v942_v50 = vsel %vm610_vm2, %v932_v20, 0.0  ;;  %v906_v47 = vadd.f32 %v5181_v48, %v5177_v21  ;;  %v920_v51 = vsub.f32 %v4822_v38, %v5171_v0  ;;  %v937_v41 = vmul.f32 %v929_v62, %v929_v62 }
 0x3f5   : > { %4541 = vrcp.f32 %v2068_v46  ;;  %943 = vadd.xlane.f32.xlu1 %v942_v50  ;;  %v927_v24 = vmax.f32 %v919_v10, 0.0  ;;  %v2065_v35 = vpop.xlane.xlu0 %2064  ;;  %v934_v5 = vmul.f32 %v926_v55, %v926_v55  ;;  %v4449_v46 = vld [vmem:[%s6754_s3 + $0x8] sm:$0xff]   ;;  %v4615_v50 = vmov 0.0  }
 0x3f6   : > { %946 = vadd.xlane.f32.xlu0 %v945_v45  ;;  %v5188_v7 = vmul.f32 0.5, %v906_v47  ;;  %4543 = vrcp.f32 %v2065_v35  ;;  %v928_v8 = vmax.f32 %v920_v51, 0.0  ;;  %v957_v59 = vsel %vm610_vm2, %v937_v41, 0.0  ;;  %4232 = vmatprep.subr.bf16.mxu0 %v4615_v50 }
 0x3f7   : > { %v935_v63 = vmul.f32 %v927_v24, %v927_v24  ;;  %v948_v23 = vsel %vm610_vm2, %v934_v5, 0.0  ;;  %4260 = vmatprep.subr.bf16.mxu1 %v4615_v50 }
 0x3f8   : > { %v922_v56 = vsub.f32 %v4830_v13, %v5188_v7  ;;  %v936_v54 = vmul.f32 %v928_v8, %v928_v8 }
 0x3f9   : > { %v951_v43 = vsel %vm610_vm2, %v935_v63, 0.0  ;;  %949 = vadd.xlane.f32.xlu1 %v948_v23 }
 0x3fa   : > { %952 = vadd.xlane.f32.xlu0 %v951_v43  ;;  %v930_v17 = vmax.f32 %v922_v56, 0.0  ;;  %v954_v9 = vsel %vm610_vm2, %v936_v54, 0.0 }
 0x3fc   : > { %v938_v27 = vmul.f32 %v930_v17, %v930_v17 }
 0x3fd   : > { %955 = vadd.xlane.f32.xlu1 %v954_v9 }
 0x3fe   : > { %958 = vadd.xlane.f32.xlu0 %v957_v59  ;;  %v960_v31 = vsel %vm610_vm2, %v938_v27, 0.0  ;;  %v4540_v60 = vpop.eup %4539 }
 0x3ff   : > { %v2075_v45 = vmul.f32 %v4540_v60, %v5055_v34  ;;  %v4450_v34 = vld [vmem:[%s6754_s3 + $0x18] sm:$0xff]  }
 0x400   : > { %4261 = vmatpush3.bf16.msra.mxu1 %v4450_v34 }
 0x401   : > { %961 = vadd.xlane.f32.xlu1 %v960_v31  ;;  %4262 = vmatprep.subr.bf16.mxu1 %v4615_v50 }
 0x402   : > { %v4542_v36 = vpop.eup %4541 }
 0x403   : > { %v4544_v42 = vpop.eup %4543  ;;  %v2077_v19 = vmul.f32 %v4542_v36, %v5063_v12  ;;  %v4452_v12 = vld [vmem:[%s6754_s3 + $0x10] sm:$0xff]  }
 0x404   : > { %v2076_v20 = vmul.f32 %v4544_v42, %v5060_v30  ;;  %v4451_v30 = vld [vmem:[%s6754_s3] sm:$0xff]   ;;  %4263 = vmatpush3.bf16.msra.mxu1 %v4452_v12 }
 0x405   : > { %v2079_v10 = vpack.c.bf16 %v2077_v19, %v2077_v19  ;;  %4268 = vmatprep.subr.bf16.mxu1 %v4615_v50 }
 0x406   : > { %v2078_v52 = vpack.c.bf16 %v2076_v20, %v2075_v45 }
 0x408   : > { %4228 = vmatprep.mubr.msk.bf16.mxu0 %vm2040_vm3, %v2078_v52 }
 0x409   : > { %4229 = vmatmul.mubr.msk.bf16.vlgmr.msra.gmra.mxu0 %vm2040_vm3, %v2079_v10  ;;  %vm4616_vm3 = vmmov 0  }
 0x40a   : > { %4233 = vmatpush3.bf16.msra.mxu0 %v4449_v46  ;;  %4236 = vmatprep.mubr.msk.bf16.mxu0 %vm4616_vm3, %v4615_v50 }
 0x40b   : > { %4234 = vmatprep.subr.bf16.mxu0 %v4615_v50  ;;  %4264 = vmatprep.mubr.msk.bf16.mxu1 %vm4616_vm3, %v4615_v50 }
 0x40e   : > { %4235 = vmatpush3.bf16.msra.mxu0 %v4451_v30 }
 0x40f   : > { %4240 = vmatprep.subr.bf16.mxu0 %v4615_v50 }
 0x47b   : > { %v941_v55 = vpop.xlane.xlu0 %940 }
 0x47c   : > { %vm963_vm1 = vcmp.ge.f32.partialorder %v941_v55, 1.0 }
 0x47d   : > { %v5226_v47 = vsel %vm963_vm1, %v5109_v40, %v5091_v49  ;;  %v5230_v24 = vsel %vm963_vm1, %v5095_v3, %v5109_v40 }
 0x47e   : > { %v987_v62 = vadd.f32 %v5230_v24, %v5226_v47  ;;  %v944_v35 = vpop.xlane.xlu1 %943 }
 0x47f   : > { %vm964_vm4 = vcmp.ge.f32.partialorder %v944_v35, 1.0  ;;  %v947_v5 = vpop.xlane.xlu0 %946 }
 0x480   : > { %v5234_v51 = vmul.f32 0.5, %v987_v62  ;;  %v5238_v63 = vsel %vm964_vm4, %v5123_v29, %v5103_v37  ;;  %v5242_v49 = vsel %vm964_vm4, %v5107_v18, %v5123_v29  ;;  %vm965_vm5 = vcmp.ge.f32.partialorder %v947_v5, 1.0 }
 0x481   : > { %v988_v3 = vadd.f32 %v5242_v49, %v5238_v63  ;;  %v5248_v40 = vsel %vm965_vm5, %v5087_v1, %v5079_v22  ;;  %v5252_v23 = vsel %vm965_vm5, %v5083_v11, %v5087_v1 }
 0x482   : > { %v989_v37 = vadd.f32 %v5252_v23, %v5248_v40  ;;  %v950_v8 = vpop.xlane.xlu1 %949  ;;  %v1003_v18 = vsub.f32 %v4806_v4, %v5234_v51 }
 0x483   : > { %v5258_v29 = vmul.f32 0.5, %v988_v3  ;;  %vm966_vm6 = vcmp.ge.f32.partialorder %v950_v8, 1.0  ;;  %v953_v43 = vpop.xlane.xlu0 %952 }
 0x484   : > { %v5260_v41 = vmul.f32 0.5, %v989_v37  ;;  %v5264_v22 = vsel %vm966_vm6, %v5151_v57, %v5129_v14  ;;  %v5268_v11 = vsel %vm966_vm6, %v5133_v61, %v5151_v57  ;;  %vm967_vm7 = vcmp.ge.f32.partialorder %v953_v43, 1.0 }
 0x485   : > { %v990_v1 = vadd.f32 %v5268_v11, %v5264_v22  ;;  %v5274_v56 = vsel %vm967_vm7, %v5161_v28, %v5141_v44  ;;  %v5278_v54 = vsel %vm967_vm7, %v5145_v53, %v5161_v28  ;;  %v1011_v17 = vmax.f32 %v1003_v18, 0.0 }
 0x486   : > { %v991_v14 = vadd.f32 %v5278_v54, %v5274_v56  ;;  %v956_v9 = vpop.xlane.xlu1 %955  ;;  %v1004_v61 = vsub.f32 %v4809_v15, %v5258_v29  ;;  %v1005_v57 = vsub.f32 %v4811_v16, %v5260_v41 }
 0x487   : > { %v5286_v59 = vmul.f32 0.5, %v990_v1  ;;  %vm968_vm8 = vcmp.ge.f32.partialorder %v956_v9, 1.0  ;;  %v959_v44 = vpop.xlane.xlu0 %958  ;;  %v1019_v27 = vmul.f32 %v1011_v17, %v1011_v17 }
 0x488   : > { %v5288_v31 = vmul.f32 0.5, %v991_v14  ;;  %v5292_v53 = vsel %vm968_vm8, %v5171_v0, %v5155_v32  ;;  %v5296_v28 = vsel %vm968_vm8, %v5159_v33, %v5171_v0  ;;  %vm969_vm9 = vcmp.ge.f32.partialorder %v959_v44, 1.0 }
 0x489   : > { %v992_v60 = vadd.f32 %v5296_v28, %v5292_v53  ;;  %v5302_v36 = vsel %vm969_vm9, %v5135_v6, %v5115_v58  ;;  %v5306_v42 = vsel %vm969_vm9, %v5119_v2, %v5135_v6  ;;  %v1027_v19 = vsel %vm610_vm2, %v1019_v27, 0.0 }
 0x48a   : > { %v993_v32 = vadd.f32 %v5306_v42, %v5302_v36  ;;  %1028 = vadd.xlane.f32.xlu0 %v1027_v19  ;;  %v962_v33 = vpop.xlane.xlu1 %961  ;;  %v1012_v0 = vmax.f32 %v1004_v61, 0.0  ;;  %v1013_v45 = vmax.f32 %v1005_v57, 0.0  ;;  %v1006_v20 = vsub.f32 %v4815_v25, %v5286_v59 }
 0x48b   : > { %v5313_v52 = vmul.f32 0.5, %v992_v60  ;;  %vm970_vm10 = vcmp.ge.f32.partialorder %v962_v33, 1.0  ;;  %v1007_v58 = vsub.f32 %v4817_v26, %v5288_v31 }
 0x48c   : > { %v5317_v2 = vmul.f32 0.5, %v993_v32  ;;  %v5321_v6 = vsel %vm970_vm10, %v5188_v7, %v5177_v21  ;;  %v5325_v10 = vsel %vm970_vm10, %v5181_v48, %v5188_v7  ;;  %v1020_v46 = vmul.f32 %v1012_v0, %v1012_v0 }
 0x48d   : > { %v994_v34 = vadd.f32 %v5325_v10, %v5321_v6  ;;  %v1021_v30 = vmul.f32 %v1013_v45, %v1013_v45  ;;  %v1014_v12 = vmax.f32 %v1006_v20, 0.0  ;;  %v1015_v55 = vmax.f32 %v1007_v58, 0.0 }
 0x48e   : > { %v1030_v62 = vsel %vm610_vm2, %v1020_v46, 0.0  ;;  %v1008_v35 = vsub.f32 %v4822_v38, %v5313_v52  ;;  %v1009_v21 = vsub.f32 %v4824_v39, %v5317_v2 }
 0x48f   : > { %v5334_v5 = vmul.f32 0.5, %v994_v34  ;;  %1031 = vadd.xlane.f32.xlu1 %v1030_v62  ;;  %v1033_v48 = vsel %vm610_vm2, %v1021_v30, 0.0  ;;  %v1022_v7 = vmul.f32 %v1014_v12, %v1014_v12  ;;  %v1023_v3 = vmul.f32 %v1015_v55, %v1015_v55  ;;  %v4453_v12 = vld [vmem:[%s6756_s5 + $0x38] sm:$0xff]  }
 0x490   : > { %1034 = vadd.xlane.f32.xlu0 %v1033_v48  ;;  %v1016_v37 = vmax.f32 %v1008_v35, 0.0  ;;  %v1017_v8 = vmax.f32 %v1009_v21, 0.0  ;;  %v4454_v62 = vld [vmem:[%s6756_s5 + $0x78] sm:$0xff]  }
 0x491   : > { %v1036_v18 = vsel %vm610_vm2, %v1022_v7, 0.0  ;;  %v1039_v43 = vsel %vm610_vm2, %v1023_v3, 0.0  ;;  %v1010_v1 = vsub.f32 %v4830_v13, %v5334_v5  ;;  %v4455_v7 = vld [vmem:[%s6756_s5 + $0x30] sm:$0xff]  }
 0x492   : > { %v1024_v17 = vmul.f32 %v1016_v37, %v1016_v37  ;;  %v1025_v14 = vmul.f32 %v1017_v8, %v1017_v8  ;;  %v4456_v8 = vld [vmem:[%s6756_s5 + $0x70] sm:$0xff]  }
 0x493   : > { %1037 = vadd.xlane.f32.xlu1 %v1036_v18  ;;  %v1018_v9 = vmax.f32 %v1010_v1, 0.0  ;;  %v4457_v18 = vld [vmem:[%s6756_s5 + $0x28] sm:$0xff]  }
 0x494   : > { %1040 = vadd.xlane.f32.xlu0 %v1039_v43  ;;  %v1042_v61 = vsel %vm610_vm2, %v1024_v17, 0.0  ;;  %v1045_v57 = vsel %vm610_vm2, %v1025_v14, 0.0 }
 0x495   : > { %v1026_v44 = vmul.f32 %v1018_v9, %v1018_v9 }
 0x497   : > { %1043 = vadd.xlane.f32.xlu1 %v1042_v61  ;;  %v1048_v27 = vsel %vm610_vm2, %v1026_v44, 0.0 }
 0x498   : > { %1046 = vadd.xlane.f32.xlu0 %v1045_v57 }
 0x49b   : > { %1049 = vadd.xlane.f32.xlu1 %v1048_v27 }
 0x4c9   : > { %v5344_v60 = vpop.f32.mrf.mxu0 }
 0x4cb   : > { %v2120_v19 = vpop.f32.mrf.mxu0 }
 0x4cc   : > { %v5346_v32 = vpack.c.bf16 %v2120_v19, %v2120_v19  ;;  %v4459_v19 = vld [vmem:[%s6756_s5 + $0x20] sm:$0xff]  }
 0x4cd   : > { %v4231_v33 = vpop.f32.mrf.mxu0 }
 0x4ce   : > { %v2336_v0 = vrot.slane %v5346_v32, 1  ;;  %4237 = vmatmul.mubr.msk.bf16.vlgmr.msra.gmra.mxu0 %vm404_vm0, %v5346_v32 }
 0x4cf   : > { %4256 = vmatprep.mubr.msk.bf16.mxu0 %vm4616_vm3, %v4615_v50  ;;  %4241 = vmatpush3.bf16.msra.mxu0 %v4453_v12 }
 0x4d0   : > { %4265 = vmatmul.mubr.msk.bf16.vlgmr.msra.gmra.mxu1 %vm404_vm0, %v2336_v0  ;;  %4242 = vmatprep.subr.bf16.mxu0 %v4615_v50 }
 0x4d1   : > { %4284 = vmatprep.mubr.msk.bf16.mxu1 %vm4616_vm3, %v4615_v50  ;;  %4269 = vmatpush3.bf16.msra.mxu1 %v4454_v62 }
 0x4d2   : > { %4270 = vmatprep.subr.bf16.mxu1 %v4615_v50 }
 0x4d3   : > { %4243 = vmatpush3.bf16.msra.mxu0 %v4455_v7 }
 0x4d4   : > { %4244 = vmatprep.subr.bf16.mxu0 %v4615_v50 }
 0x4d5   : > { %4271 = vmatpush3.bf16.msra.mxu1 %v4456_v8  ;;  %v4462_v8 = vld [vmem:[%s6756_s5 + $0x58] sm:$0xff]  }
 0x4d6   : > { %4272 = vmatprep.subr.bf16.mxu1 %v4615_v50 }
 0x4d7   : > { %4245 = vmatpush3.bf16.msra.mxu0 %v4457_v18 }
 0x4d8   : > { %4246 = vmatprep.subr.bf16.mxu0 %v4615_v50 }
 0x4db   : > { %4247 = vmatpush3.bf16.msra.mxu0 %v4459_v19 }
 0x4dc   : > { %4248 = vmatprep.subr.bf16.mxu0 %v4615_v50 }
 0x513   : > { %v1029_v45 = vpop.xlane.xlu0 %1028 }
 0x514   : > { %vm1051_vm11 = vcmp.ge.f32.partialorder %v1029_v45, 1.0 }
 0x515   : > { %v5358_v20 = vsel %vm1051_vm11, %v5234_v51, %v5226_v47  ;;  %v5362_v58 = vsel %vm1051_vm11, %v5230_v24, %v5234_v51 }
 0x516   : > { %v1075_v46 = vadd.f32 %v5362_v58, %v5358_v20 }
 0x518   : > { %v5366_v34 = vmul.f32 0.5, %v1075_v46  ;;  %v1032_v30 = vpop.xlane.xlu1 %1031 }
 0x519   : > { %vm1052_vm12 = vcmp.ge.f32.partialorder %v1032_v30, 1.0  ;;  %v1035_v55 = vpop.xlane.xlu0 %1034 }
 0x51a   : > { %v5373_v47 = vsel %vm1052_vm12, %v5258_v29, %v5238_v63  ;;  %v5377_v24 = vsel %vm1052_vm12, %v5242_v49, %v5258_v29  ;;  %vm1053_vm13 = vcmp.ge.f32.partialorder %v1035_v55, 1.0  ;;  %v1091_v51 = vsub.f32 %v4806_v4, %v5366_v34 }
 0x51b   : > { %v1076_v35 = vadd.f32 %v5377_v24, %v5373_v47  ;;  %v5388_v63 = vsel %vm1053_vm13, %v5260_v41, %v5248_v40  ;;  %v5392_v49 = vsel %vm1053_vm13, %v5252_v23, %v5260_v41 }
 0x51c   : > { %v1077_v29 = vadd.f32 %v5392_v49, %v5388_v63  ;;  %v1038_v21 = vpop.xlane.xlu1 %1037  ;;  %v1099_v48 = vmax.f32 %v1091_v51, 0.0 }
 0x51d   : > { %v5400_v3 = vmul.f32 0.5, %v1076_v35  ;;  %vm1054_vm14 = vcmp.ge.f32.partialorder %v1038_v21, 1.0  ;;  %v1041_v40 = vpop.xlane.xlu0 %1040 }
 0x51e   : > { %v5403_v23 = vmul.f32 0.5, %v1077_v29  ;;  %v5407_v41 = vsel %vm1054_vm14, %v5286_v59, %v5264_v22  ;;  %v5411_v37 = vsel %vm1054_vm14, %v5268_v11, %v5286_v59  ;;  %vm1055_vm15 = vcmp.ge.f32.partialorder %v1041_v40, 1.0  ;;  %v4461_v29 = vld [vmem:[%s6756_s5 + $0x18] sm:$0xff]  }
 0x51f   : > { %v1078_v43 = vadd.f32 %v5411_v37, %v5407_v41  ;;  %v5423_v22 = vsel %vm1055_vm15, %v5288_v31, %v5274_v56  ;;  %v5427_v11 = vsel %vm1055_vm15, %v5278_v54, %v5288_v31  ;;  %v1107_v59 = vmul.f32 %v1099_v48, %v1099_v48  ;;  %v4458_v56 = vld [vmem:[%s6756_s5 + $0x68] sm:$0xff]   ;;  %4249 = vmatpush3.bf16.msra.mxu0 %v4461_v29  ;;  %v5540_v29 = vpop.f32.mrf.mxu0 }
 0x520   : > { %v1079_v1 = vadd.f32 %v5427_v11, %v5423_v22  ;;  %v1044_v17 = vpop.xlane.xlu1 %1043  ;;  %v1092_v14 = vsub.f32 %v4809_v15, %v5400_v3  ;;  %v1093_v9 = vsub.f32 %v4811_v16, %v5403_v23  ;;  %4273 = vmatpush3.bf16.msra.mxu1 %v4458_v56  ;;  %4250 = vmatprep.subr.bf16.mxu0 %v4615_v50 }
 0x521   : > { %v5439_v54 = vmul.f32 0.5, %v1078_v43  ;;  %vm1056_vm1 = vcmp.ge.f32.partialorder %v1044_v17, 1.0  ;;  %v1047_v31 = vpop.xlane.xlu0 %1046  ;;  %v1115_v61 = vsel %vm610_vm2, %v1107_v59, 0.0  ;;  %4274 = vmatprep.subr.bf16.mxu1 %v4615_v50 }
 0x522   : > { %v5443_v57 = vmul.f32 0.5, %v1079_v1  ;;  %v5447_v44 = vsel %vm1056_vm1, %v5313_v52, %v5292_v53  ;;  %v5451_v27 = vsel %vm1056_vm1, %v5296_v28, %v5313_v52  ;;  %vm1057_vm4 = vcmp.ge.f32.partialorder %v1047_v31, 1.0  ;;  %1116 = vadd.xlane.f32.xlu0 %v1115_v61 }
 0x523   : > { %v1080_v33 = vadd.f32 %v5451_v27, %v5447_v44  ;;  %v5460_v0 = vsel %vm1057_vm4, %v5317_v2, %v5302_v36  ;;  %v5464_v53 = vsel %vm1057_vm4, %v5306_v42, %v5317_v2  ;;  %v1100_v28 = vmax.f32 %v1092_v14, 0.0  ;;  %v4460_v36 = vld [vmem:[%s6756_s5 + $0x60] sm:$0xff]   ;;  %v4463_v14 = vld [vmem:[%s6756_s5 + $0x10] sm:$0xff]  }
 0x524   : > { %v1081_v52 = vadd.f32 %v5464_v53, %v5460_v0  ;;  %v1050_v45 = vpop.xlane.xlu1 %1049  ;;  %v1101_v46 = vmax.f32 %v1093_v9, 0.0  ;;  %v1094_v30 = vsub.f32 %v4815_v25, %v5439_v54  ;;  %v1095_v12 = vsub.f32 %v4817_v26, %v5443_v57  ;;  %4275 = vmatpush3.bf16.msra.mxu1 %v4460_v36  ;;  %4251 = vmatpush3.bf16.msra.mxu0 %v4463_v14  ;;  %v4466_v36 = vld [vmem:[%s6756_s5 + $0x48] sm:$0xff]  }
 0x525   : > { %v5476_v42 = vmul.f32 0.5, %v1080_v33  ;;  %vm1058_vm5 = vcmp.ge.f32.partialorder %v1050_v45, 1.0  ;;  %v1108_v2 = vmul.f32 %v1100_v28, %v1100_v28  ;;  %4276 = vmatprep.subr.bf16.mxu1 %v4615_v50  ;;  %v4464_v45 = vld [vmem:[%s6756_s5 + $0x50] sm:$0xff]   ;;  %4252 = vmatprep.subr.bf16.mxu0 %v4615_v50 }
 0x526   : > { %v5479_v55 = vmul.f32 0.5, %v1081_v52  ;;  %v5483_v51 = vsel %vm1058_vm5, %v5334_v5, %v5321_v6  ;;  %v5487_v62 = vsel %vm1058_vm5, %v5325_v10, %v5334_v5  ;;  %v1109_v35 = vmul.f32 %v1101_v46, %v1101_v46 }
 0x527   : > { %v1082_v21 = vadd.f32 %v5487_v62, %v5483_v51  ;;  %v1118_v48 = vsel %vm610_vm2, %v1108_v2, 0.0  ;;  %v1102_v7 = vmax.f32 %v1094_v30, 0.0  ;;  %v1103_v40 = vmax.f32 %v1095_v12, 0.0  ;;  %v4465_v30 = vld [vmem:[%s6756_s5 + $0x8] sm:$0xff]   ;;  %v4467_v2 = vld [vmem:[%s6756_s5] sm:$0xff]  }
 0x528   : > { %1119 = vadd.xlane.f32.xlu1 %v1118_v48  ;;  %v1121_v6 = vsel %vm610_vm2, %v1109_v35, 0.0  ;;  %v1096_v10 = vsub.f32 %v4822_v38, %v5476_v42  ;;  %v1097_v5 = vsub.f32 %v4824_v39, %v5479_v55  ;;  %4277 = vmatpush3.bf16.msra.mxu1 %v4462_v8  ;;  %v4468_v35 = vld [vmem:[%s6756_s5 + $0x40] sm:$0xff]  }
 0x529   : > { %v5504_v18 = vmul.f32 0.5, %v1082_v21  ;;  %1122 = vadd.xlane.f32.xlu0 %v1121_v6  ;;  %v1110_v43 = vmul.f32 %v1102_v7, %v1102_v7  ;;  %v1111_v59 = vmul.f32 %v1103_v40, %v1103_v40  ;;  %4278 = vmatprep.subr.bf16.mxu1 %v4615_v50  ;;  %v3910_v21 = vld [vmem:[%s6755_s4] ss:$0 sm:$0xff]  ;;  %v3928_v7 = vld [vmem:[%s6755_s4 + $0x1] ss:$0 sm:$0xff] }
 0x52a   : > { %v1104_v1 = vmax.f32 %v1096_v10, 0.0  ;;  %v1105_v17 = vmax.f32 %v1097_v5, 0.0  ;;  %4253 = vmatpush3.bf16.msra.mxu0 %v4465_v30 }
 0x52b   : > { %v1124_v9 = vsel %vm610_vm2, %v1110_v43, 0.0  ;;  %v1127_v56 = vsel %vm610_vm2, %v1111_v59, 0.0  ;;  %v1098_v31 = vsub.f32 %v4830_v13, %v5504_v18  ;;  %4254 = vmatprep.subr.bf16.mxu0 %v4615_v50 }
 0x52c   : > { %1125 = vadd.xlane.f32.xlu1 %v1124_v9  ;;  %v1112_v61 = vmul.f32 %v1104_v1, %v1104_v1  ;;  %v1113_v19 = vmul.f32 %v1105_v17, %v1105_v17  ;;  %4279 = vmatpush3.bf16.msra.mxu1 %v4464_v45 }
 0x52d   : > { %1128 = vadd.xlane.f32.xlu0 %v1127_v56  ;;  %v1106_v33 = vmax.f32 %v1098_v31, 0.0  ;;  %4280 = vmatprep.subr.bf16.mxu1 %v4615_v50 }
 0x52e   : > { %v1130_v28 = vsel %vm610_vm2, %v1112_v61, 0.0  ;;  %v1133_v52 = vsel %vm610_vm2, %v1113_v19, 0.0  ;;  %4255 = vmatpush3.bf16.msra.mxu0 %v4467_v2 }
 0x52f   : > { %v1114_v46 = vmul.f32 %v1106_v33, %v1106_v33  ;;  %4288 = vmatprep.subr.bf16.mxu0 %v4615_v50 }
 0x530   : > { %1131 = vadd.xlane.f32.xlu1 %v1130_v28  ;;  %4281 = vmatpush3.bf16.msra.mxu1 %v4466_v36 }
 0x531   : > { %1134 = vadd.xlane.f32.xlu0 %v1133_v52  ;;  %v1136_v12 = vsel %vm610_vm2, %v1114_v46, 0.0  ;;  %4282 = vmatprep.subr.bf16.mxu1 %v4615_v50 }
 0x534   : > { %1137 = vadd.xlane.f32.xlu1 %v1136_v12  ;;  %4283 = vmatpush3.bf16.msra.mxu1 %v4468_v35 }
 0x535   : > { %4304 = vmatprep.subr.bf16.mxu1 %v4615_v50 }
 0x58e   : > { %v2195_v48 = vpop.f32.mrf.mxu0 }
 0x58f   : > { %v2196_v40 = vadd.f32 %v3910_v21, %v2195_v48 }
 0x590   : > { %v4238_v6 = vpop.f32.mrf.mxu0  ;;  %v2386_v10 = vpop.f32.mrf.mxu1 }
 0x591   : > { %v2201_v5 = vmul.f32 %v2196_v40, %v2196_v40  ;;  %v2387_v8 = vadd.f32 %v3928_v7, %v2386_v10 }
 0x592   : > { %v2198_v43 = vpop.f32.mrf.mxu0  ;;  %v4266_v59 = vpop.f32.mrf.mxu1 }
 0x593   : > { %v2202_v1 = vmul.f32 %v2201_v5, %v2196_v40  ;;  %v2392_v17 = vmul.f32 %v2387_v8, %v2387_v8  ;;  %v4469_v5 = vld [vmem:[%s6758_s7 + $0x8] sm:$0xff]  }
 0x594   : > { %v4239_v14 = vpop.f32.mrf.mxu0  ;;  %v2389_v9 = vpop.f32.mrf.mxu1 }
 0x595   : > { %v2203_v56 = vmul.f32 0.044715, %v2202_v1  ;;  %v2393_v31 = vmul.f32 %v2392_v17, %v2387_v8 }
 0x596   : > { %v4267_v61 = vpop.f32.mrf.mxu1 }
 0x597   : > { %v2204_v19 = vadd.f32 %v2203_v56, %v2196_v40  ;;  %v2394_v33 = vmul.f32 0.044715, %v2393_v31 }
 0x599   : > { %v2205_v28 = vmul.f32 0.7978846, %v2204_v19  ;;  %v2395_v52 = vadd.f32 %v2394_v33, %v2387_v8  ;;  %v4472_v19 = vld [vmem:[%s6758_s7 + $0x10] sm:$0xff]  }
 0x59b   : > { %4545 = vtanh.f32 %v2205_v28  ;;  %v2396_v45 = vmul.f32 0.7978846, %v2395_v52 }
 0x59d   : > { %4547 = vtanh.f32 %v2396_v45 }
 0x5a8   : > { %v4546_v46 = vpop.eup %4545 }
 0x5a9   : > { %v2207_v30 = vadd.f32 1.0, %v4546_v46 }
 0x5aa   : > { %v4548_v12 = vpop.eup %4547 }
 0x5ab   : > { %v1117_v36 = vpop.xlane.xlu0 %1116  ;;  %v2208_v2 = vmul.f32 0.5, %v2207_v30  ;;  %v2398_v35 = vadd.f32 1.0, %v4548_v12 }
 0x5ac   : > { %vm1139_vm6 = vcmp.ge.f32.partialorder %v1117_v36, 1.0 }
 0x5ad   : > { %v5550_v21 = vsel %vm1139_vm6, %v5366_v34, %v5358_v20  ;;  %v5554_v48 = vsel %vm1139_vm6, %v5362_v58, %v5366_v34  ;;  %v2209_v6 = vmul.f32 %v2208_v2, %v2196_v40  ;;  %v2399_v10 = vmul.f32 0.5, %v2398_v35  ;;  %v4470_v20 = vld [vmem:[%s6758_s7 + $0x18] sm:$0xff]  }
 0x5ae   : > { %v1163_v7 = vadd.f32 %v5554_v48, %v5550_v21 }
 0x5af   : > { %v2210_v59 = vpack.c.bf16 %v2209_v6, %v2209_v6  ;;  %v2400_v1 = vmul.f32 %v2399_v10, %v2387_v8  ;;  %v4471_v8 = vld [vmem:[%s6758_s7] sm:$0xff]  }
 0x5b0   : > { %v5561_v43 = vmul.f32 0.5, %v1163_v7 }
 0x5b1   : > { %v1120_v17 = vpop.xlane.xlu1 %1119  ;;  %4257 = vmatmul.mubr.bf16.vlgmr.msra.gmra.mxu0 %v2210_v59  ;;  %v2401_v34 = vpack.c.bf16 %v2400_v1, %v2400_v1 }
 0x5b2   : > { %vm1140_vm7 = vcmp.ge.f32.partialorder %v1120_v17, 1.0  ;;  %v1123_v58 = vpop.xlane.xlu0 %1122  ;;  %v1179_v40 = vsub.f32 %v4806_v4, %v5561_v43  ;;  %4289 = vmatpush3.bf16.msra.mxu0 %v4469_v5  ;;  %4292 = vmatprep.mubr.msk.bf16.mxu0 %vm4616_vm3, %v4615_v50 }
 0x5b3   : > { %v5570_v14 = vsel %vm1140_vm7, %v5400_v3, %v5373_v47  ;;  %v5574_v9 = vsel %vm1140_vm7, %v5377_v24, %v5400_v3  ;;  %vm1141_vm8 = vcmp.ge.f32.partialorder %v1123_v58, 1.0  ;;  %4285 = vmatmul.mubr.bf16.vlgmr.msra.gmra.mxu1 %v2401_v34  ;;  %4290 = vmatprep.subr.bf16.mxu0 %v4615_v50 }
 0x5b4   : > { %v1164_v56 = vadd.f32 %v5574_v9, %v5570_v14  ;;  %v5585_v47 = vsel %vm1141_vm8, %v5403_v23, %v5388_v63  ;;  %v5589_v24 = vsel %vm1141_vm8, %v5392_v49, %v5403_v23  ;;  %v1187_v3 = vmax.f32 %v1179_v40, 0.0  ;;  %4305 = vmatpush3.bf16.msra.mxu1 %v4470_v20  ;;  %4308 = vmatprep.mubr.msk.bf16.mxu1 %vm4616_vm3, %v4615_v50 }
 0x5b5   : > { %v1165_v31 = vadd.f32 %v5589_v24, %v5585_v47  ;;  %v1126_v61 = vpop.xlane.xlu1 %1125  ;;  %v2526_v63 = vrot.slane %v5346_v32, 2  ;;  %4306 = vmatprep.subr.bf16.mxu1 %v4615_v50 }
 0x5b6   : > { %v5600_v49 = vmul.f32 0.5, %v1164_v56  ;;  %vm1142_vm9 = vcmp.ge.f32.partialorder %v1126_v61, 1.0  ;;  %v1129_v23 = vpop.xlane.xlu0 %1128  ;;  %v1195_v33 = vmul.f32 %v1187_v3, %v1187_v3  ;;  %4291 = vmatpush3.bf16.msra.mxu0 %v4471_v8 }
 0x5b7   : > { %v5603_v28 = vmul.f32 0.5, %v1165_v31  ;;  %v5607_v52 = vsel %vm1142_vm9, %v5439_v54, %v5407_v41  ;;  %v5611_v45 = vsel %vm1142_vm9, %v5411_v37, %v5439_v54  ;;  %vm1143_vm10 = vcmp.ge.f32.partialorder %v1129_v23, 1.0  ;;  %4296 = vmatprep.subr.bf16.mxu0 %v4615_v50 }
 0x5b8   : > { %v1166_v46 = vadd.f32 %v5611_v45, %v5607_v52  ;;  %v5617_v30 = vsel %vm1143_vm10, %v5443_v57, %v5423_v22  ;;  %v5621_v12 = vsel %vm1143_vm10, %v5427_v11, %v5443_v57  ;;  %v1203_v41 = vsel %vm610_vm2, %v1195_v33, 0.0  ;;  %4307 = vmatpush3.bf16.msra.mxu1 %v4472_v19  ;;  %v4473_v11 = vld [vmem:[%s6758_s7 + $0x28] sm:$0xff]  }
 0x5b9   : > { %v1167_v37 = vadd.f32 %v5621_v12, %v5617_v30  ;;  %v1132_v54 = vpop.xlane.xlu1 %1131  ;;  %1204 = vadd.xlane.f32.xlu0 %v1203_v41  ;;  %v1180_v36 = vsub.f32 %v4809_v15, %v5600_v49  ;;  %v1181_v22 = vsub.f32 %v4811_v16, %v5603_v28  ;;  %v2671_v57 = vrot.slane %v5346_v32, 3  ;;  %4293 = vmatmul.mubr.msk.bf16.vlgmr.msra.gmra.mxu0 %vm404_vm0, %v2526_v63 }
 0x5ba   : > { %v5635_v2 = vmul.f32 0.5, %v1166_v46  ;;  %vm1144_vm11 = vcmp.ge.f32.partialorder %v1132_v54, 1.0  ;;  %v1135_v35 = vpop.xlane.xlu0 %1134  ;;  %4320 = vmatprep.subr.bf16.mxu1 %v4615_v50  ;;  %4300 = vmatprep.mubr.msk.bf16.mxu0 %vm4616_vm3, %v4615_v50  ;;  %vm3710_vm9 = vcmask 1041408  }
 0x5bb   : > { %v5639_v7 = vmul.f32 0.5, %v1167_v37  ;;  %v5643_v6 = vsel %vm1144_vm11, %v5476_v42, %v5447_v44  ;;  %v5647_v10 = vsel %vm1144_vm11, %v5451_v27, %v5476_v42  ;;  %vm1145_vm12 = vcmp.ge.f32.partialorder %v1135_v35, 1.0  ;;  %4309 = vmatmul.mubr.msk.bf16.vlgmr.msra.gmra.mxu1 %vm404_vm0, %v2671_v57  ;;  %v4476_v57 = vld [vmem:[%s6758_s7 + $0x30] sm:$0xff]  }
 0x5bc   : > { %v1168_v32 = vadd.f32 %v5647_v10, %v5643_v6  ;;  %v5655_v5 = vsel %vm1145_vm12, %v5479_v55, %v5460_v0  ;;  %v5659_v59 = vsel %vm1145_vm12, %v5464_v53, %v5479_v55  ;;  %v1188_v44 = vmax.f32 %v1180_v36, 0.0  ;;  %4321 = vmatpush3.bf16.msra.mxu1 %v4473_v11  ;;  %v4474_v53 = vld [vmem:[%s6758_s7 + $0x20] sm:$0xff]   ;;  %4324 = vmatprep.mubr.msk.bf16.mxu1 %vm4616_vm3, %v4615_v50 }
 0x5bd   : > { %v1169_v27 = vadd.f32 %v5659_v59, %v5655_v5  ;;  %v1138_v42 = vpop.xlane.xlu1 %1137  ;;  %v1189_v1 = vmax.f32 %v1181_v22, 0.0  ;;  %v1182_v17 = vsub.f32 %v4815_v25, %v5635_v2  ;;  %v1183_v0 = vsub.f32 %v4817_v26, %v5639_v7  ;;  %4322 = vmatprep.subr.bf16.mxu1 %v4615_v50 }
 0x5be   : > { %v5673_v55 = vmul.f32 0.5, %v1168_v32  ;;  %vm1146_vm13 = vcmp.ge.f32.partialorder %v1138_v42, 1.0  ;;  %v1196_v20 = vmul.f32 %v1188_v44, %v1188_v44  ;;  %v4477_v42 = vld [vmem:[%s6758_s7 + $0x48] sm:$0xff]  }
 0x5bf   : > { %v5676_v58 = vmul.f32 0.5, %v1169_v27  ;;  %v5680_v34 = vsel %vm1146_vm13, %v5504_v18, %v5483_v51  ;;  %v5684_v40 = vsel %vm1146_vm13, %v5487_v62, %v5504_v18  ;;  %v1197_v8 = vmul.f32 %v1189_v1, %v1189_v1  ;;  %v4475_v62 = vld [vmem:[%s6758_s7 + $0x38] sm:$0xff]  }
 0x5c0   : > { %v1170_v56 = vadd.f32 %v5684_v40, %v5680_v34  ;;  %v1206_v3 = vsel %vm610_vm2, %v1196_v20, 0.0  ;;  %v1190_v31 = vmax.f32 %v1182_v17, 0.0  ;;  %v1191_v61 = vmax.f32 %v1183_v0, 0.0  ;;  %4323 = vmatpush3.bf16.msra.mxu1 %v4474_v53  ;;  %v4478_v0 = vld [vmem:[%s6758_s7 + $0x40] sm:$0xff]   ;;  %v4479_v53 = vld [vmem:[%s6758_s7 + $0x58] sm:$0xff]  }
 0x5c1   : > { %1207 = vadd.xlane.f32.xlu1 %v1206_v3  ;;  %v1209_v19 = vsel %vm610_vm2, %v1197_v8, 0.0  ;;  %v1184_v63 = vsub.f32 %v4822_v38, %v5673_v55  ;;  %v1185_v51 = vsub.f32 %v4824_v39, %v5676_v58  ;;  %v2805_v18 = vpack.c.bf16 %v5540_v29, %v5540_v29  ;;  %4336 = vmatprep.subr.bf16.mxu1 %v4615_v50  ;;  %v4480_v8 = vld [vmem:[%s6758_s7 + $0x50] sm:$0xff]  }
 0x5c2   : > { %v5699_v23 = vmul.f32 0.5, %v1170_v56  ;;  %1210 = vadd.xlane.f32.xlu0 %v1209_v19  ;;  %v1198_v33 = vmul.f32 %v1190_v31, %v1190_v31  ;;  %v1199_v46 = vmul.f32 %v1191_v61, %v1191_v61  ;;  %v4481_v56 = vld [vmem:[%s6758_s7 + $0x68] sm:$0xff]   ;;  %v4482_v31 = vld [vmem:[%s6758_s7 + $0x60] sm:$0xff]   ;;  %v4483_v61 = vld [vmem:[%s6758_s7 + $0x78] sm:$0xff]   ;;  %v3394_v19 = vpack.c.bf16 %v5344_v60, %v5344_v60 }
 0x5c3   : > { %v1192_v41 = vmax.f32 %v1184_v63, 0.0  ;;  %v1193_v37 = vmax.f32 %v1185_v51, 0.0  ;;  %4325 = vmatmul.mubr.msk.bf16.vlgmr.msra.gmra.mxu1 %vm404_vm0, %v2805_v18  ;;  %v2966_v1 = vrot.slane %v2805_v18, 1  ;;  %v3113_v20 = vrot.slane %v2805_v18, 2  ;;  %v4484_v63 = vld [vmem:[%s6758_s7 + $0x70] sm:$0xff]   ;;  %v4485_v60 = vld [vmem:[%s6760_s9 + $0x8] sm:$0xff]  }
 0x5c4   : > { %v1212_v54 = vsel %vm610_vm2, %v1198_v33, 0.0  ;;  %v1215_v36 = vsel %vm610_vm2, %v1199_v46, 0.0  ;;  %v1186_v22 = vsub.f32 %v4830_v13, %v5699_v23  ;;  %4337 = vmatpush3.bf16.msra.mxu1 %v4475_v62  ;;  %4340 = vmatprep.mubr.msk.bf16.mxu1 %vm4616_vm3, %v4615_v50  ;;  %v3260_v3 = vrot.slane %v2805_v18, 3  ;;  %v4486_v62 = vld [vmem:[%s6760_s9] sm:$0xff]  }
 0x5c5   : > { %1213 = vadd.xlane.f32.xlu1 %v1212_v54  ;;  %v1200_v29 = vmul.f32 %v1192_v41, %v1192_v41  ;;  %v1201_v11 = vmul.f32 %v1193_v37, %v1193_v37  ;;  %4338 = vmatprep.subr.bf16.mxu1 %v4615_v50  ;;  %v3555_v51 = vrot.slane %v3394_v19, 1 }
 0x5c6   : > { %1216 = vadd.xlane.f32.xlu0 %v1215_v36  ;;  %v1194_v35 = vmax.f32 %v1186_v22, 0.0  ;;  %4297 = vmatpush3.bf16.msra.mxu0 %v4485_v60 }
 0x5c7   : > { %v1218_v32 = vsel %vm610_vm2, %v1200_v29, 0.0  ;;  %v1221_v44 = vsel %vm610_vm2, %v1201_v11, 0.0  ;;  %4298 = vmatprep.subr.bf16.mxu0 %v4615_v50 }
 0x5c8   : > { %v1202_v27 = vmul.f32 %v1194_v35, %v1194_v35  ;;  %4339 = vmatpush3.bf16.msra.mxu1 %v4476_v57 }
 0x5c9   : > { %1219 = vadd.xlane.f32.xlu1 %v1218_v32  ;;  %4352 = vmatprep.subr.bf16.mxu1 %v4615_v50 }
 0x5ca   : > { %1222 = vadd.xlane.f32.xlu0 %v1221_v44  ;;  %v1224_v17 = vsel %vm610_vm2, %v1202_v27, 0.0  ;;  %4299 = vmatpush3.bf16.msra.mxu0 %v4486_v62 }
 0x5cb   : > { %4341 = vmatmul.mubr.msk.bf16.vlgmr.msra.gmra.mxu1 %vm404_vm0, %v2966_v1  ;;  %4312 = vmatprep.subr.bf16.mxu0 %v4615_v50 }
 0x5cc   : > { %4353 = vmatpush3.bf16.msra.mxu1 %v4477_v42  ;;  %4356 = vmatprep.mubr.msk.bf16.mxu1 %vm4616_vm3, %v4615_v50 }
 0x5cd   : > { %1225 = vadd.xlane.f32.xlu1 %v1224_v17  ;;  %4354 = vmatprep.subr.bf16.mxu1 %v4615_v50 }
 0x5d0   : > { %4355 = vmatpush3.bf16.msra.mxu1 %v4478_v0 }
 0x5d1   : > { %4368 = vmatprep.subr.bf16.mxu1 %v4615_v50 }
 0x5d3   : > { %4357 = vmatmul.mubr.msk.bf16.vlgmr.msra.gmra.mxu1 %vm404_vm0, %v3113_v20 }
 0x5d4   : > { %4369 = vmatpush3.bf16.msra.mxu1 %v4479_v53  ;;  %4372 = vmatprep.mubr.msk.bf16.mxu1 %vm4616_vm3, %v4615_v50 }
 0x5d5   : > { %4370 = vmatprep.subr.bf16.mxu1 %v4615_v50 }
 0x5d8   : > { %4371 = vmatpush3.bf16.msra.mxu1 %v4480_v8 }
 0x5d9   : > { %4384 = vmatprep.subr.bf16.mxu1 %v4615_v50 }
 0x5db   : > { %4373 = vmatmul.mubr.msk.bf16.vlgmr.msra.gmra.mxu1 %vm404_vm0, %v3260_v3 }
 0x5dc   : > { %4385 = vmatpush3.bf16.msra.mxu1 %v4481_v56  ;;  %4388 = vmatprep.mubr.msk.bf16.mxu1 %vm4616_vm3, %v4615_v50 }
 0x5dd   : > { %4386 = vmatprep.subr.bf16.mxu1 %v4615_v50 }
 0x5e0   : > { %4387 = vmatpush3.bf16.msra.mxu1 %v4482_v31 }
 0x5e1   : > { %4400 = vmatprep.subr.bf16.mxu1 %v4615_v50 }
 0x5e3   : > { %4389 = vmatmul.mubr.msk.bf16.vlgmr.msra.gmra.mxu1 %vm404_vm0, %v3394_v19 }
 0x5e4   : > { %4401 = vmatpush3.bf16.msra.mxu1 %v4483_v61  ;;  %4404 = vmatprep.mubr.msk.bf16.mxu1 %vm4616_vm3, %v4615_v50 }
 0x5e5   : > { %4402 = vmatprep.subr.bf16.mxu1 %v4615_v50 }
 0x5e8   : > { %4403 = vmatpush3.bf16.msra.mxu1 %v4484_v63 }
 0x5eb   : > { %4405 = vmatmul.mubr.msk.bf16.vlgmr.msra.gmra.mxu1 %vm404_vm0, %v3555_v51 }
 0x642   : > { %v1205_v18 = vpop.xlane.xlu0 %1204 }
 0x643   : > { %vm1227_vm14 = vcmp.ge.f32.partialorder %v1205_v18, 1.0 }
 0x644   : > { %v5773_v33 = vsel %vm1227_vm14, %v5561_v43, %v5550_v21  ;;  %v5777_v46 = vsel %vm1227_vm14, %v5554_v48, %v5561_v43 }
 0x645   : > { %v1251_v41 = vadd.f32 %v5777_v46, %v5773_v33 }
 0x647   : > { %v5781_v37 = vmul.f32 0.5, %v1251_v41 }
 0x649   : > { %v1267_v54 = vsub.f32 %v4806_v4, %v5781_v37 }
 0x64a   : > { %v1208_v36 = vpop.xlane.xlu1 %1207 }
 0x64b   : > { %vm1228_vm15 = vcmp.ge.f32.partialorder %v1208_v36, 1.0  ;;  %v1211_v22 = vpop.xlane.xlu0 %1210  ;;  %v1275_v29 = vmax.f32 %v1267_v54, 0.0 }
 0x64c   : > { %v5787_v21 = vsel %vm1228_vm15, %v5600_v49, %v5570_v14  ;;  %v5791_v48 = vsel %vm1228_vm15, %v5574_v9, %v5600_v49  ;;  %vm1229_vm1 = vcmp.ge.f32.partialorder %v1211_v22, 1.0 }
 0x64d   : > { %v1252_v43 = vadd.f32 %v5791_v48, %v5787_v21  ;;  %v5797_v11 = vsel %vm1229_vm1, %v5603_v28, %v5585_v47  ;;  %v5801_v57 = vsel %vm1229_vm1, %v5589_v24, %v5603_v28  ;;  %v1283_v35 = vmul.f32 %v1275_v29, %v1275_v29 }
 0x64e   : > { %v1253_v14 = vadd.f32 %v5801_v57, %v5797_v11  ;;  %v1214_v32 = vpop.xlane.xlu1 %1213 }
 0x64f   : > { %v5805_v44 = vmul.f32 0.5, %v1252_v43  ;;  %vm1230_vm4 = vcmp.ge.f32.partialorder %v1214_v32, 1.0  ;;  %v1217_v9 = vpop.xlane.xlu0 %1216  ;;  %v1291_v49 = vsel %vm610_vm2, %v1283_v35, 0.0 }
 0x650   : > { %v5808_v27 = vmul.f32 0.5, %v1253_v14  ;;  %v5812_v47 = vsel %vm1230_vm4, %v5635_v2, %v5607_v52  ;;  %v5816_v24 = vsel %vm1230_vm4, %v5611_v45, %v5635_v2  ;;  %vm1231_vm5 = vcmp.ge.f32.partialorder %v1217_v9, 1.0  ;;  %1292 = vadd.xlane.f32.xlu0 %v1291_v49 }
 0x651   : > { %v1254_v28 = vadd.f32 %v5816_v24, %v5812_v47  ;;  %v5822_v42 = vsel %vm1231_vm5, %v5639_v7, %v5617_v30  ;;  %v5826_v1 = vsel %vm1231_vm5, %v5621_v12, %v5639_v7  ;;  %v1268_v52 = vsub.f32 %v4809_v15, %v5805_v44 }
 0x652   : > { %v1255_v45 = vadd.f32 %v5826_v1, %v5822_v42  ;;  %v1220_v2 = vpop.xlane.xlu1 %1219  ;;  %v1269_v17 = vsub.f32 %v4811_v16, %v5808_v27 }
 0x653   : > { %v5834_v0 = vmul.f32 0.5, %v1254_v28  ;;  %vm1232_vm6 = vcmp.ge.f32.partialorder %v1220_v2, 1.0  ;;  %v1223_v53 = vpop.xlane.xlu0 %1222  ;;  %v1276_v30 = vmax.f32 %v1268_v52, 0.0 }
 0x654   : > { %v5836_v20 = vmul.f32 0.5, %v1255_v45  ;;  %v5840_v12 = vsel %vm1232_vm6, %v5673_v55, %v5643_v6  ;;  %v5844_v7 = vsel %vm1232_vm6, %v5647_v10, %v5673_v55  ;;  %vm1233_vm7 = vcmp.ge.f32.partialorder %v1223_v53, 1.0 }
 0x655   : > { %v1256_v8 = vadd.f32 %v5844_v7, %v5840_v12  ;;  %v5850_v56 = vsel %vm1233_vm7, %v5676_v58, %v5655_v5  ;;  %v5854_v3 = vsel %vm1233_vm7, %v5659_v59, %v5676_v58  ;;  %v1284_v31 = vmul.f32 %v1276_v30, %v1276_v30  ;;  %v3949_v30 = vld [vmem:[%s6757_s6 + $0x1] ss:$0 sm:$0xff] }
 0x656   : > { %v1257_v6 = vadd.f32 %v5854_v3, %v5850_v56  ;;  %v1226_v61 = vpop.xlane.xlu1 %1225  ;;  %v1277_v19 = vmax.f32 %v1269_v17, 0.0  ;;  %v1270_v10 = vsub.f32 %v4815_v25, %v5834_v0  ;;  %v1271_v55 = vsub.f32 %v4817_v26, %v5836_v20 }
 0x657   : > { %v5862_v63 = vmul.f32 0.5, %v1256_v8  ;;  %vm1234_vm8 = vcmp.ge.f32.partialorder %v1226_v61, 1.0  ;;  %v1294_v5 = vsel %vm610_vm2, %v1284_v31, 0.0  ;;  %v3914_v8 = vld [vmem:[%s6757_s6] ss:$0 sm:$0xff] }
 0x658   : > { %v5865_v51 = vmul.f32 0.5, %v1257_v6  ;;  %v5869_v59 = vsel %vm1234_vm8, %v5699_v23, %v5680_v34  ;;  %v5873_v58 = vsel %vm1234_vm8, %v5684_v40, %v5699_v23  ;;  %1295 = vadd.xlane.f32.xlu1 %v1294_v5  ;;  %v1285_v60 = vmul.f32 %v1277_v19, %v1277_v19 }
 0x659   : > { %v1258_v62 = vadd.f32 %v5873_v58, %v5869_v59  ;;  %v1278_v18 = vmax.f32 %v1270_v10, 0.0  ;;  %v1279_v41 = vmax.f32 %v1271_v55, 0.0  ;;  %v1272_v54 = vsub.f32 %v4822_v38, %v5862_v63 }
 0x65a   : > { %v1297_v36 = vsel %vm610_vm2, %v1285_v60, 0.0  ;;  %v1273_v34 = vsub.f32 %v4824_v39, %v5865_v51 }
 0x65b   : > { %v5882_v22 = vmul.f32 0.5, %v1258_v62  ;;  %1298 = vadd.xlane.f32.xlu0 %v1297_v36  ;;  %v1286_v40 = vmul.f32 %v1278_v18, %v1278_v18  ;;  %v1287_v23 = vmul.f32 %v1279_v41, %v1279_v41  ;;  %v1280_v29 = vmax.f32 %v1272_v54, 0.0  ;;  %v3958_v18 = vld [vmem:[%s6759_s8] ss:$0 sm:$0xff] }
 0x65c   : > { %v1281_v43 = vmax.f32 %v1273_v34, 0.0  ;;  %v3971_v34 = vld [vmem:[%s6759_s8 + $0x1] ss:$0 sm:$0xff] }
 0x65d   : > { %v1300_v35 = vsel %vm610_vm2, %v1286_v40, 0.0  ;;  %v1303_v14 = vsel %vm610_vm2, %v1287_v23, 0.0  ;;  %v1288_v32 = vmul.f32 %v1280_v29, %v1280_v29  ;;  %v1274_v9 = vsub.f32 %v4830_v13, %v5882_v22 }
 0x65e   : > { %1301 = vadd.xlane.f32.xlu1 %v1300_v35  ;;  %v1289_v49 = vmul.f32 %v1281_v43, %v1281_v43 }
 0x65f   : > { %1304 = vadd.xlane.f32.xlu0 %v1303_v14  ;;  %v1306_v28 = vsel %vm610_vm2, %v1288_v32, 0.0  ;;  %v1282_v52 = vmax.f32 %v1274_v9, 0.0 }
 0x660   : > { %v1309_v45 = vsel %vm610_vm2, %v1289_v49, 0.0 }
 0x661   : > { %v1290_v2 = vmul.f32 %v1282_v52, %v1282_v52 }
 0x662   : > { %1307 = vadd.xlane.f32.xlu1 %v1306_v28 }
 0x663   : > { %1310 = vadd.xlane.f32.xlu0 %v1309_v45  ;;  %v1312_v17 = vsel %vm610_vm2, %v1290_v2, 0.0 }
 0x666   : > { %1313 = vadd.xlane.f32.xlu1 %v1312_v17 }
 0x671   : > { %v2316_v53 = vpop.f32.mrf.mxu0 }
 0x672   : > { %v2317_v55 = vadd.f32 %v3914_v8, %v2316_v53  ;;  %v3989_v53 = vld [vmem:[%s6759_s8 + $0x2] ss:$0 sm:$0xff] }
 0x673   : > { %v4258_v31 = vpop.f32.mrf.mxu0  ;;  %v2509_v6 = vpop.f32.mrf.mxu1 }
 0x674   : > { %v2510_v61 = vadd.f32 %v3949_v30, %v2509_v6 }
 0x675   : > { %v2319_v19 = vpop.f32.mrf.mxu0  ;;  %v4286_v10 = vpop.f32.mrf.mxu1 }
 0x676   : > { %v3690_v5 = vrot.slane %v2510_v61, 6 }
 0x677   : > { %v4259_v60 = vpop.f32.mrf.mxu0  ;;  %v2512_v62 = vpop.f32.mrf.mxu1 }
 0x678   : > { %v5901_v41 = vsel %vm3710_vm9, %v2317_v55, %v3690_v5 }
 0x679   : > { %v4287_v54 = vpop.f32.mrf.mxu1  ;;  %v2576_v36 = vpop.f32.mrf.mxu0 }
 0x67a   : > { %v2577_v40 = vadd.f32 %v3958_v18, %v2576_v36  ;;  %v4007_v54 = vld [vmem:[%s6759_s8 + $0x3] ss:$0 sm:$0xff] }
 0x67b   : > { %v4294_v23 = vpop.f32.mrf.mxu0  ;;  %v2721_v29 = vpop.f32.mrf.mxu1 }
 0x67c   : > { %v2582_v43 = vmul.f32 %v2577_v40, %v2577_v40  ;;  %v5906_v35 = vadd.f32 %v3971_v34, %v2721_v29 }
 0x67d   : > { %v2579_v14 = vpop.f32.mrf.mxu0  ;;  %v4310_v32 = vpop.f32.mrf.mxu1 }
 0x67e   : > { %v2583_v9 = vmul.f32 %v2582_v43, %v2577_v40  ;;  %v2727_v49 = vmul.f32 %v5906_v35, %v5906_v35 }
 0x67f   : > { %v4295_v28 = vpop.f32.mrf.mxu0  ;;  %v2724_v52 = vpop.f32.mrf.mxu1 }
 0x680   : > { %v2584_v45 = vmul.f32 0.044715, %v2583_v9  ;;  %v2728_v2 = vmul.f32 %v2727_v49, %v5906_v35  ;;  %v4025_v52 = vld [vmem:[%s6759_s8 + $0x4] ss:$0 sm:$0xff] }
 0x681   : > { %v4311_v17 = vpop.f32.mrf.mxu1 }
 0x682   : > { %v2585_v30 = vadd.f32 %v2584_v45, %v2577_v40  ;;  %v2729_v8 = vmul.f32 0.044715, %v2728_v2 }
 0x683   : > { %v2868_v31 = vpop.f32.mrf.mxu1 }
 0x684   : > { %v2586_v6 = vmul.f32 0.7978846, %v2585_v30  ;;  %v2730_v61 = vadd.f32 %v2729_v8, %v5906_v35  ;;  %v5915_v19 = vadd.f32 %v3989_v53, %v2868_v31 }
 0x685   : > { %v4326_v10 = vpop.f32.mrf.mxu1 }
 0x686   : > { %4549 = vtanh.f32 %v2586_v6  ;;  %v2731_v55 = vmul.f32 0.7978846, %v2730_v61  ;;  %v2874_v5 = vmul.f32 %v5915_v19, %v5915_v19 }
 0x687   : > { %v2871_v60 = vpop.f32.mrf.mxu1 }
 0x688   : > { %4551 = vtanh.f32 %v2731_v55  ;;  %v2875_v62 = vmul.f32 %v2874_v5, %v5915_v19 }
 0x689   : > { %v4327_v18 = vpop.f32.mrf.mxu1 }
 0x68a   : > { %v2876_v36 = vmul.f32 0.044715, %v2875_v62 }
 0x68b   : > { %v3016_v34 = vpop.f32.mrf.mxu1 }
 0x68c   : > { %v2877_v23 = vadd.f32 %v2876_v36, %v5915_v19  ;;  %v5924_v29 = vadd.f32 %v4007_v54, %v3016_v34  ;;  %v4043_v36 = vld [vmem:[%s6759_s8 + $0x5] ss:$0 sm:$0xff]  ;;  %v4487_v34 = vld [vmem:[%s6760_s9 + $0x18] sm:$0xff]  }
 0x68d   : > { %v4342_v43 = vpop.f32.mrf.mxu1 }
 0x68e   : > { %v2878_v14 = vmul.f32 0.7978846, %v2877_v23  ;;  %v3022_v32 = vmul.f32 %v5924_v29, %v5924_v29 }
 0x68f   : > { %v3019_v9 = vpop.f32.mrf.mxu1 }
 0x690   : > { %4553 = vtanh.f32 %v2878_v14  ;;  %v3023_v49 = vmul.f32 %v3022_v32, %v5924_v29 }
 0x691   : > { %v4343_v28 = vpop.f32.mrf.mxu1 }
 0x692   : > { %v3024_v45 = vmul.f32 0.044715, %v3023_v49 }
 0x693   : > { %v4550_v2 = vpop.eup %4549  ;;  %v3163_v17 = vpop.f32.mrf.mxu1 }
 0x694   : > { %v2588_v53 = vadd.f32 1.0, %v4550_v2  ;;  %v3025_v30 = vadd.f32 %v3024_v45, %v5924_v29  ;;  %v5933_v8 = vadd.f32 %v4025_v52, %v3163_v17  ;;  %v4488_v52 = vld [vmem:[%s6760_s9 + $0x10] sm:$0xff]  }
 0x695   : > { %v4552_v31 = vpop.eup %4551  ;;  %v4358_v6 = vpop.f32.mrf.mxu1 }
 0x696   : > { %v2589_v61 = vmul.f32 0.5, %v2588_v53  ;;  %v2733_v10 = vadd.f32 1.0, %v4552_v31  ;;  %v3026_v55 = vmul.f32 0.7978846, %v3025_v30  ;;  %v3169_v5 = vmul.f32 %v5933_v8, %v5933_v8 }
 0x697   : > { %v3166_v60 = vpop.f32.mrf.mxu1 }
 0x698   : > { %v2590_v62 = vmul.f32 %v2589_v61, %v2577_v40  ;;  %4555 = vtanh.f32 %v3026_v55  ;;  %v3170_v18 = vmul.f32 %v3169_v5, %v5933_v8  ;;  %v2734_v43 = vmul.f32 0.5, %v2733_v10  ;;  %v4061_v61 = vld [vmem:[%s6759_s8 + $0x6] ss:$0 sm:$0xff] }
 0x699   : > { %v4359_v54 = vpop.f32.mrf.mxu1 }
 0x69a   : > { %v2591_v23 = vpack.c.bf16 %v2590_v62, %v2590_v62  ;;  %v3171_v14 = vmul.f32 0.044715, %v3170_v18  ;;  %v2735_v45 = vmul.f32 %v2734_v43, %v5906_v35  ;;  %v4489_v35 = vld [vmem:[%s6760_s9 + $0x28] sm:$0xff]  }
 0x69b   : > { %v3310_v32 = vpop.f32.mrf.mxu1 }
 0x69c   : > { %v3172_v9 = vadd.f32 %v3171_v14, %v5933_v8  ;;  %v5945_v49 = vadd.f32 %v4043_v36, %v3310_v32  ;;  %4301 = vmatmul.mubr.msk.bf16.vlgmr.msra.gmra.mxu0 %vm404_vm0, %v2591_v23  ;;  %v2736_v10 = vpack.c.bf16 %v2735_v45, %v2735_v45 }
 0x69d   : > { %v4554_v40 = vpop.eup %4553  ;;  %4313 = vmatpush3.bf16.msra.mxu0 %v4487_v34  ;;  %v4374_v28 = vpop.f32.mrf.mxu1  ;;  %4316 = vmatprep.mubr.msk.bf16.mxu0 %vm4616_vm3, %v4615_v50  ;;  %v4490_v34 = vld [vmem:[%s6760_s9 + $0x20] sm:$0xff]  }
 0x69e   : > { %v2880_v2 = vadd.f32 1.0, %v4554_v40  ;;  %v3173_v17 = vmul.f32 0.7978846, %v3172_v9  ;;  %v3316_v53 = vmul.f32 %v5945_v49, %v5945_v49  ;;  %4314 = vmatprep.subr.bf16.mxu0 %v4615_v50 }
 0x69f   : > { %v3313_v30 = vpop.f32.mrf.mxu1 }
 0x6a0   : > { %4557 = vtanh.f32 %v3173_v17  ;;  %v3317_v31 = vmul.f32 %v3316_v53, %v5945_v49  ;;  %v2881_v55 = vmul.f32 0.5, %v2880_v2 }
 0x6a1   : > { %4315 = vmatpush3.bf16.msra.mxu0 %v4488_v52  ;;  %v4375_v6 = vpop.f32.mrf.mxu1  ;;  %v4079_v52 = vld [vmem:[%s6759_s8 + $0x7] ss:$0 sm:$0xff] }
 0x6a2   : > { %v3318_v5 = vmul.f32 0.044715, %v3317_v31  ;;  %4328 = vmatprep.subr.bf16.mxu0 %v4615_v50  ;;  %v2882_v23 = vmul.f32 %v2881_v55, %v5915_v19  ;;  %v4491_v19 = vld [vmem:[%s6760_s9 + $0x38] sm:$0xff]  }
 0x6a3   : > { %v3457_v60 = vpop.f32.mrf.mxu1 }
 0x6a4   : > { %v3319_v62 = vadd.f32 %v3318_v5, %v5945_v49  ;;  %v5966_v18 = vadd.f32 %v4061_v61, %v3457_v60  ;;  %4317 = vmatmul.mubr.msk.bf16.vlgmr.msra.gmra.mxu0 %vm404_vm0, %v2736_v10  ;;  %v2883_v45 = vpack.c.bf16 %v2882_v23, %v2882_v23 }
 0x6a5   : > { %v4556_v54 = vpop.eup %4555  ;;  %4329 = vmatpush3.bf16.msra.mxu0 %v4489_v35  ;;  %v4390_v36 = vpop.f32.mrf.mxu1  ;;  %4332 = vmatprep.mubr.msk.bf16.mxu0 %vm4616_vm3, %v4615_v50  ;;  %v4492_v35 = vld [vmem:[%s6760_s9 + $0x30] sm:$0xff]  }
 0x6a6   : > { %v3028_v43 = vadd.f32 1.0, %v4556_v54  ;;  %v3320_v14 = vmul.f32 0.7978846, %v3319_v62  ;;  %v3463_v32 = vmul.f32 %v5966_v18, %v5966_v18  ;;  %4330 = vmatprep.subr.bf16.mxu0 %v4615_v50 }
 0x6a7   : > { %v3460_v9 = vpop.f32.mrf.mxu1 }
 0x6a8   : > { %4559 = vtanh.f32 %v3320_v14  ;;  %v3464_v40 = vmul.f32 %v3463_v32, %v5966_v18  ;;  %v3029_v2 = vmul.f32 0.5, %v3028_v43  ;;  %v4494_v9 = vld [vmem:[%s6760_s9 + $0x40] sm:$0xff]  }
 0x6a9   : > { %4331 = vmatpush3.bf16.msra.mxu0 %v4490_v34  ;;  %v4391_v28 = vpop.f32.mrf.mxu1  ;;  %v4493_v34 = vld [vmem:[%s6760_s9 + $0x48] sm:$0xff]  }
 0x6aa   : > { %v3465_v17 = vmul.f32 0.044715, %v3464_v40  ;;  %4344 = vmatprep.subr.bf16.mxu0 %v4615_v50  ;;  %v3030_v10 = vmul.f32 %v3029_v2, %v5924_v29 }
 0x6ab   : > { %v3605_v53 = vpop.f32.mrf.mxu1 }
 0x6ac   : > { %v3466_v30 = vadd.f32 %v3465_v17, %v5966_v18  ;;  %v5987_v31 = vadd.f32 %v4079_v52, %v3605_v53  ;;  %4333 = vmatmul.mubr.msk.bf16.vlgmr.msra.gmra.mxu0 %vm404_vm0, %v2883_v45  ;;  %v3031_v23 = vpack.c.bf16 %v3030_v10, %v3030_v10 }
 0x6ad   : > { %v4558_v6 = vpop.eup %4557  ;;  %4345 = vmatpush3.bf16.msra.mxu0 %v4491_v19  ;;  %v4406_v61 = vpop.f32.mrf.mxu1  ;;  %4348 = vmatprep.mubr.msk.bf16.mxu0 %vm4616_vm3, %v4615_v50  ;;  %v4495_v19 = vld [vmem:[%s6760_s9 + $0x58] sm:$0xff]  }
 0x6ae   : > { %v3175_v55 = vadd.f32 1.0, %v4558_v6  ;;  %v3467_v5 = vmul.f32 0.7978846, %v3466_v30  ;;  %v3611_v60 = vmul.f32 %v5987_v31, %v5987_v31  ;;  %4346 = vmatprep.subr.bf16.mxu0 %v4615_v50  ;;  %v4497_v6 = vld [vmem:[%s6760_s9 + $0x68] sm:$0xff]  }
 0x6af   : > { %v3608_v62 = vpop.f32.mrf.mxu1 }
 0x6b0   : > { %4561 = vtanh.f32 %v3467_v5  ;;  %v3612_v54 = vmul.f32 %v3611_v60, %v5987_v31  ;;  %v3176_v43 = vmul.f32 0.5, %v3175_v55  ;;  %v4499_v60 = vld [vmem:[%s6760_s9 + $0x78] sm:$0xff]  }
 0x6b1   : > { %4347 = vmatpush3.bf16.msra.mxu0 %v4492_v35  ;;  %v4407_v36 = vpop.f32.mrf.mxu1 }
 0x6b2   : > { %v3613_v29 = vmul.f32 0.044715, %v3612_v54  ;;  %4360 = vmatprep.subr.bf16.mxu0 %v4615_v50  ;;  %v3177_v40 = vmul.f32 %v3176_v43, %v5933_v8  ;;  %v4496_v8 = vld [vmem:[%s6760_s9 + $0x50] sm:$0xff]  }
 0x6b3   : > { %v4500_v36 = vld [vmem:[%s6760_s9 + $0x70] sm:$0xff]  }
 0x6b4   : > { %v3614_v14 = vadd.f32 %v3613_v29, %v5987_v31  ;;  %4349 = vmatmul.mubr.msk.bf16.vlgmr.msra.gmra.mxu0 %vm404_vm0, %v3031_v23  ;;  %v3178_v45 = vpack.c.bf16 %v3177_v40, %v3177_v40 }
 0x6b5   : > { %v4560_v32 = vpop.eup %4559  ;;  %4361 = vmatpush3.bf16.msra.mxu0 %v4493_v34  ;;  %4364 = vmatprep.mubr.msk.bf16.mxu0 %vm4616_vm3, %v4615_v50 }
 0x6b6   : > { %v3322_v28 = vadd.f32 1.0, %v4560_v32  ;;  %v3615_v52 = vmul.f32 0.7978846, %v3614_v14  ;;  %4362 = vmatprep.subr.bf16.mxu0 %v4615_v50 }
 0x6b8   : > { %4563 = vtanh.f32 %v3615_v52  ;;  %v3323_v2 = vmul.f32 0.5, %v3322_v28 }
 0x6b9   : > { %4363 = vmatpush3.bf16.msra.mxu0 %v4494_v9 }
 0x6ba   : > { %4376 = vmatprep.subr.bf16.mxu0 %v4615_v50  ;;  %v3324_v53 = vmul.f32 %v3323_v2, %v5945_v49  ;;  %v4498_v49 = vld [vmem:[%s6760_s9 + $0x60] sm:$0xff]  }
 0x6bc   : > { %4365 = vmatmul.mubr.msk.bf16.vlgmr.msra.gmra.mxu0 %vm404_vm0, %v3178_v45  ;;  %v3325_v61 = vpack.c.bf16 %v3324_v53, %v3324_v53 }
 0x6bd   : > { %v4562_v17 = vpop.eup %4561  ;;  %4377 = vmatpush3.bf16.msra.mxu0 %v4495_v19  ;;  %4380 = vmatprep.mubr.msk.bf16.mxu0 %vm4616_vm3, %v4615_v50 }
 0x6be   : > { %v3469_v30 = vadd.f32 1.0, %v4562_v17  ;;  %4378 = vmatprep.subr.bf16.mxu0 %v4615_v50 }
 0x6c0   : > { %v3470_v35 = vmul.f32 0.5, %v3469_v30 }
 0x6c1   : > { %4379 = vmatpush3.bf16.msra.mxu0 %v4496_v8 }
 0x6c2   : > { %4392 = vmatprep.subr.bf16.mxu0 %v4615_v50  ;;  %v3471_v55 = vmul.f32 %v3470_v35, %v5966_v18 }
 0x6c4   : > { %4381 = vmatmul.mubr.msk.bf16.vlgmr.msra.gmra.mxu0 %vm404_vm0, %v3325_v61  ;;  %v3472_v62 = vpack.c.bf16 %v3471_v55, %v3471_v55 }
 0x6c5   : > { %v4564_v10 = vpop.eup %4563  ;;  %4393 = vmatpush3.bf16.msra.mxu0 %v4497_v6  ;;  %4396 = vmatprep.mubr.msk.bf16.mxu0 %vm4616_vm3, %v4615_v50 }
 0x6c6   : > { %v3617_v5 = vadd.f32 1.0, %v4564_v10  ;;  %4394 = vmatprep.subr.bf16.mxu0 %v4615_v50 }
 0x6c8   : > { %v3618_v54 = vmul.f32 0.5, %v3617_v5 }
 0x6c9   : > { %4395 = vmatpush3.bf16.msra.mxu0 %v4498_v49 }
 0x6ca   : > { %4408 = vmatprep.subr.bf16.mxu0 %v4615_v50  ;;  %v3619_v18 = vmul.f32 %v3618_v54, %v5987_v31 }
 0x6cc   : > { %4397 = vmatmul.mubr.msk.bf16.vlgmr.msra.gmra.mxu0 %vm404_vm0, %v3472_v62  ;;  %v3620_v34 = vpack.c.bf16 %v3619_v18, %v3619_v18 }
 0x6cd   : > { %4409 = vmatpush3.bf16.msra.mxu0 %v4499_v60  ;;  %4412 = vmatprep.mubr.msk.bf16.mxu0 %vm4616_vm3, %v4615_v50 }
 0x6ce   : > { %4410 = vmatprep.subr.bf16.mxu0 %v4615_v50 }
 0x6d1   : > { %4411 = vmatpush3.bf16.msra.mxu0 %v4500_v36 }
 0x6d4   : > { %4413 = vmatmul.mubr.msk.bf16.vlgmr.msra.gmra.mxu0 %vm404_vm0, %v3620_v34 }
 0x6d9   : > { %v1293_v23 = vpop.xlane.xlu0 %1292 }
 0x6da   : > { %vm1315_vm10 = vcmp.ge.f32.partialorder %v1293_v23, 1.0 }
 0x6db   : > { %v6052_v43 = vsel %vm1315_vm10, %v5781_v37, %v5773_v33  ;;  %v6056_v29 = vsel %vm1315_vm10, %v5777_v46, %v5781_v37 }
 0x6dc   : > { %v1339_v14 = vadd.f32 %v6056_v29, %v6052_v43 }
 0x6de   : > { %v6060_v31 = vmul.f32 0.5, %v1339_v14 }
 0x6e0   : > { %v1355_v50 = vsub.f32 %v4806_v4, %v6060_v31 }
 0x6e1   : > { %v1296_v32 = vpop.xlane.xlu1 %1295 }
 0x6e2   : > { %vm1316_vm3 = vcmp.ge.f32.partialorder %v1296_v32, 1.0  ;;  %v1363_v9 = vmax.f32 %v1355_v50, 0.0 }
 0x6e3   : > { %v6066_v40 = vsel %vm1316_vm3, %v5805_v44, %v5787_v21  ;;  %v6070_v33 = vsel %vm1316_vm3, %v5791_v48, %v5805_v44 }
 0x6e4   : > { %v1340_v46 = vadd.f32 %v6070_v33, %v6066_v40  ;;  %v1299_v37 = vpop.xlane.xlu0 %1298  ;;  %v1371_v28 = vmul.f32 %v1363_v9, %v1363_v9 }
 0x6e5   : > { %vm1317_vm11 = vcmp.ge.f32.partialorder %v1299_v37, 1.0 }
 0x6e6   : > { %v6074_v52 = vmul.f32 0.5, %v1340_v46  ;;  %v6078_v19 = vsel %vm1317_vm11, %v5808_v27, %v5797_v11  ;;  %v6082_v21 = vsel %vm1317_vm11, %v5801_v57, %v5808_v27  ;;  %v1379_v45 = vsel %vm610_vm2, %v1371_v28, 0.0 }
 0x6e7   : > { %v1341_v48 = vadd.f32 %v6082_v21, %v6078_v19  ;;  %v1302_v44 = vpop.xlane.xlu1 %1301  ;;  %1380 = vadd.xlane.f32.xlu0 %v1379_v45 }
 0x6e8   : > { %vm1318_vm12 = vcmp.ge.f32.partialorder %v1302_v44, 1.0  ;;  %v1305_v2 = vpop.xlane.xlu0 %1304  ;;  %v1356_v17 = vsub.f32 %v4809_v15, %v6074_v52 }
 0x6e9   : > { %v6089_v8 = vmul.f32 0.5, %v1341_v48  ;;  %v6093_v11 = vsel %vm1318_vm12, %v5834_v0, %v5812_v47  ;;  %v6097_v57 = vsel %vm1318_vm12, %v5816_v24, %v5834_v0  ;;  %vm1319_vm13 = vcmp.ge.f32.partialorder %v1305_v2, 1.0 }
 0x6ea   : > { %v1342_v27 = vadd.f32 %v6097_v57, %v6093_v11  ;;  %v6103_v53 = vsel %vm1319_vm13, %v5836_v20, %v5822_v42  ;;  %v6107_v30 = vsel %vm1319_vm13, %v5826_v1, %v5836_v20  ;;  %v1364_v6 = vmax.f32 %v1356_v17, 0.0 }
 0x6eb   : > { %v1343_v47 = vadd.f32 %v6107_v30, %v6103_v53  ;;  %v1308_v61 = vpop.xlane.xlu1 %1307  ;;  %v1357_v24 = vsub.f32 %v4811_v16, %v6089_v8  ;;  %vm3712_vm12 = vcmask 1043456   ;;  %vm3714_vm13 = vcmask 1045504  }
 0x6ec   : > { %v6113_v0 = vmul.f32 0.5, %v1342_v27  ;;  %vm1320_vm14 = vcmp.ge.f32.partialorder %v1308_v61, 1.0  ;;  %v1311_v35 = vpop.xlane.xlu0 %1310  ;;  %v1372_v10 = vmul.f32 %v1364_v6, %v1364_v6 }
 0x6ed   : > { %v6115_v49 = vmul.f32 0.5, %v1343_v47  ;;  %v6119_v42 = vsel %vm1320_vm14, %v5862_v63, %v5840_v12  ;;  %v6123_v1 = vsel %vm1320_vm14, %v5844_v7, %v5862_v63  ;;  %vm1321_vm15 = vcmp.ge.f32.partialorder %v1311_v35, 1.0 }
 0x6ee   : > { %v1344_v20 = vadd.f32 %v6123_v1, %v6119_v42  ;;  %v6129_v55 = vsel %vm1321_vm15, %v5865_v51, %v5850_v56  ;;  %v6133_v5 = vsel %vm1321_vm15, %v5854_v3, %v5865_v51  ;;  %v1382_v60 = vsel %vm610_vm2, %v1372_v10, 0.0 }
 0x6ef   : > { %v1345_v12 = vadd.f32 %v6133_v5, %v6129_v55  ;;  %v1314_v62 = vpop.xlane.xlu1 %1313  ;;  %1383 = vadd.xlane.f32.xlu1 %v1382_v60  ;;  %v1365_v7 = vmax.f32 %v1357_v24, 0.0  ;;  %v1358_v63 = vsub.f32 %v4815_v25, %v6113_v0  ;;  %v1359_v54 = vsub.f32 %v4817_v26, %v6115_v49 }
 0x6f0   : > { %v6142_v56 = vmul.f32 0.5, %v1344_v20  ;;  %vm1322_vm1 = vcmp.ge.f32.partialorder %v1314_v62, 1.0 }
 0x6f1   : > { %v6144_v36 = vmul.f32 0.5, %v1345_v12  ;;  %v6148_v3 = vsel %vm1322_vm1, %v5882_v22, %v5869_v59  ;;  %v6152_v51 = vsel %vm1322_vm1, %v5873_v58, %v5882_v22  ;;  %v1373_v18 = vmul.f32 %v1365_v7, %v1365_v7 }
 0x6f2   : > { %v1346_v34 = vadd.f32 %v6152_v51, %v6148_v3  ;;  %v1366_v23 = vmax.f32 %v1358_v63, 0.0  ;;  %v1367_v14 = vmax.f32 %v1359_v54, 0.0  ;;  %v1360_v50 = vsub.f32 %v4822_v38, %v6142_v56 }
 0x6f3   : > { %v1385_v32 = vsel %vm610_vm2, %v1373_v18, 0.0  ;;  %v1361_v9 = vsub.f32 %v4824_v39, %v6144_v36 }
 0x6f4   : > { %v6161_v59 = vmul.f32 0.5, %v1346_v34  ;;  %1386 = vadd.xlane.f32.xlu0 %v1385_v32  ;;  %v1374_v46 = vmul.f32 %v1366_v23, %v1366_v23  ;;  %v1375_v58 = vmul.f32 %v1367_v14, %v1367_v14  ;;  %v1368_v22 = vmax.f32 %v1360_v50, 0.0 }
 0x6f5   : > { %v1369_v37 = vmax.f32 %v1361_v9, 0.0 }
 0x6f6   : > { %v1388_v28 = vsel %vm610_vm2, %v1374_v46, 0.0  ;;  %v1391_v45 = vsel %vm610_vm2, %v1375_v58, 0.0  ;;  %v1376_v48 = vmul.f32 %v1368_v22, %v1368_v22  ;;  %v1362_v44 = vsub.f32 %v4830_v13, %v6161_v59 }
 0x6f7   : > { %1389 = vadd.xlane.f32.xlu1 %v1388_v28  ;;  %v1377_v2 = vmul.f32 %v1369_v37, %v1369_v37 }
 0x6f8   : > { %1392 = vadd.xlane.f32.xlu0 %v1391_v45  ;;  %v1394_v17 = vsel %vm610_vm2, %v1376_v48, 0.0  ;;  %v1370_v27 = vmax.f32 %v1362_v44, 0.0 }
 0x6f9   : > { %v1397_v6 = vsel %vm610_vm2, %v1377_v2, 0.0 }
 0x6fa   : > { %v1378_v47 = vmul.f32 %v1370_v27, %v1370_v27 }
 0x6fb   : > { %1395 = vadd.xlane.f32.xlu1 %v1394_v17 }
 0x6fc   : > { %1398 = vadd.xlane.f32.xlu0 %v1397_v6  ;;  %v1400_v61 = vsel %vm610_vm2, %v1378_v47, 0.0 }
 0x6ff   : > { %1401 = vadd.xlane.f32.xlu1 %v1400_v61 }
 0x75c   : > { %v6170_v24 = vpop.f32.mrf.mxu0 }
 0x75e   : > { %v4302_v35 = vpop.f32.mrf.mxu0 }
 0x760   : > { %v2655_v10 = vpop.f32.mrf.mxu0 }
 0x762   : > { %v4303_v20 = vpop.f32.mrf.mxu0 }
 0x764   : > { %v6172_v60 = vpop.f32.mrf.mxu0 }
 0x766   : > { %v4318_v12 = vpop.f32.mrf.mxu0 }
 0x768   : > { %v2802_v62 = vpop.f32.mrf.mxu0 }
 0x76a   : > { %v4319_v7 = vpop.f32.mrf.mxu0 }
 0x76c   : > { %v6174_v63 = vpop.f32.mrf.mxu0 }
 0x76e   : > { %v4334_v54 = vpop.f32.mrf.mxu0 }
 0x770   : > { %v1381_v18 = vpop.xlane.xlu0 %1380  ;;  %v2949_v34 = vpop.f32.mrf.mxu0 }
 0x771   : > { %vm1403_vm4 = vcmp.ge.f32.partialorder %v1381_v18, 1.0 }
 0x772   : > { %v6178_v23 = vsel %vm1403_vm4, %v6060_v31, %v6052_v43  ;;  %v6182_v14 = vsel %vm1403_vm4, %v6056_v29, %v6060_v31  ;;  %v4335_v32 = vpop.f32.mrf.mxu0 }
 0x773   : > { %v1427_v50 = vadd.f32 %v6182_v14, %v6178_v23 }
 0x774   : > { %v6188_v46 = vpop.f32.mrf.mxu0 }
 0x775   : > { %v6186_v9 = vmul.f32 0.5, %v1427_v50 }
 0x776   : > { %v4350_v58 = vpop.f32.mrf.mxu0 }
 0x777   : > { %v1443_v22 = vsub.f32 %v4806_v4, %v6186_v9 }
 0x778   : > { %v1384_v37 = vpop.xlane.xlu1 %1383  ;;  %v3097_v43 = vpop.f32.mrf.mxu0 }
 0x779   : > { %vm1404_vm5 = vcmp.ge.f32.partialorder %v1384_v37, 1.0  ;;  %v1451_v28 = vmax.f32 %v1443_v22, 0.0 }
 0x77a   : > { %v6194_v29 = vsel %vm1404_vm5, %v6074_v52, %v6066_v40  ;;  %v6198_v31 = vsel %vm1404_vm5, %v6070_v33, %v6074_v52  ;;  %v4351_v44 = vpop.f32.mrf.mxu0 }
 0x77b   : > { %v1428_v45 = vadd.f32 %v6198_v31, %v6194_v29  ;;  %v1459_v48 = vmul.f32 %v1451_v28, %v1451_v28 }
 0x77c   : > { %v6205_v6 = vpop.f32.mrf.mxu0 }
 0x77d   : > { %v6202_v2 = vmul.f32 0.5, %v1428_v45  ;;  %v1387_v17 = vpop.xlane.xlu0 %1386  ;;  %v1467_v27 = vsel %vm610_vm2, %v1459_v48, 0.0 }
 0x77e   : > { %vm1405_vm6 = vcmp.ge.f32.partialorder %v1387_v17, 1.0  ;;  %1468 = vadd.xlane.f32.xlu0 %v1467_v27  ;;  %v4366_v47 = vpop.f32.mrf.mxu0 }
 0x77f   : > { %v6209_v40 = vsel %vm1405_vm6, %v6089_v8, %v6078_v19  ;;  %v6213_v33 = vsel %vm1405_vm6, %v6082_v21, %v6089_v8  ;;  %v1444_v52 = vsub.f32 %v4809_v15, %v6202_v2 }
 0x780   : > { %v1429_v61 = vadd.f32 %v6213_v33, %v6209_v40  ;;  %v1390_v35 = vpop.xlane.xlu1 %1389  ;;  %v3244_v12 = vpop.f32.mrf.mxu0 }
 0x781   : > { %vm1406_vm7 = vcmp.ge.f32.partialorder %v1390_v35, 1.0  ;;  %v1393_v10 = vpop.xlane.xlu0 %1392  ;;  %v1452_v20 = vmax.f32 %v1444_v52, 0.0 }
 0x782   : > { %v6219_v62 = vmul.f32 0.5, %v1429_v61  ;;  %v6223_v19 = vsel %vm1406_vm7, %v6113_v0, %v6093_v11  ;;  %v6227_v21 = vsel %vm1406_vm7, %v6097_v57, %v6113_v0  ;;  %vm1407_vm8 = vcmp.ge.f32.partialorder %v1393_v10, 1.0  ;;  %v4367_v18 = vpop.f32.mrf.mxu0 }
 0x783   : > { %v1430_v8 = vadd.f32 %v6227_v21, %v6223_v19  ;;  %v6233_v7 = vsel %vm1407_vm8, %v6115_v49, %v6103_v53  ;;  %v6237_v54 = vsel %vm1407_vm8, %v6107_v30, %v6115_v49  ;;  %v1460_v50 = vmul.f32 %v1452_v20, %v1452_v20 }
 0x784   : > { %v1431_v11 = vadd.f32 %v6237_v54, %v6233_v7  ;;  %v1396_v34 = vpop.xlane.xlu1 %1395  ;;  %v1445_v57 = vsub.f32 %v4811_v16, %v6219_v62  ;;  %v3388_v58 = vpop.f32.mrf.mxu0 }
 0x785   : > { %v6243_v0 = vmul.f32 0.5, %v1430_v8  ;;  %vm1408_vm10 = vcmp.ge.f32.partialorder %v1396_v34, 1.0  ;;  %v1399_v32 = vpop.xlane.xlu0 %1398  ;;  %v1470_v28 = vsel %vm610_vm2, %v1460_v50, 0.0  ;;  %v4034_v34 = vld [vmem:[%s6761_s10 + $0x4] ss:$0 sm:$0xff] }
 0x786   : > { %v6245_v53 = vmul.f32 0.5, %v1431_v11  ;;  %v6249_v30 = vsel %vm1408_vm10, %v6142_v56, %v6119_v42  ;;  %v6253_v49 = vsel %vm1408_vm10, %v6123_v1, %v6142_v56  ;;  %vm1409_vm3 = vcmp.ge.f32.partialorder %v1399_v32, 1.0  ;;  %v4382_v42 = vpop.f32.mrf.mxu0  ;;  %1471 = vadd.xlane.f32.xlu1 %v1470_v28  ;;  %v4052_v28 = vld [vmem:[%s6761_s10 + $0x5] ss:$0 sm:$0xff] }
 0x787   : > { %v1432_v22 = vadd.f32 %v6253_v49, %v6249_v30  ;;  %v6259_v37 = vsel %vm1409_vm3, %v6144_v36, %v6129_v55  ;;  %v6263_v43 = vsel %vm1409_vm3, %v6133_v5, %v6144_v36  ;;  %v1453_v56 = vmax.f32 %v1445_v57, 0.0 }
 0x788   : > { %v1433_v45 = vadd.f32 %v6263_v43, %v6259_v37  ;;  %v1402_v1 = vpop.xlane.xlu1 %1401  ;;  %v1446_v48 = vsub.f32 %v4815_v25, %v6243_v0  ;;  %v1447_v55 = vsub.f32 %v4817_v26, %v6245_v53  ;;  %v3391_v5 = vpop.f32.mrf.mxu0 }
 0x789   : > { %v6272_v44 = vmul.f32 0.5, %v1432_v22  ;;  %vm1410_vm11 = vcmp.ge.f32.partialorder %v1402_v1, 1.0  ;;  %v1461_v52 = vmul.f32 %v1453_v56, %v1453_v56  ;;  %v3962_v1 = vld [vmem:[%s6761_s10] ss:$0 sm:$0xff]  ;;  %v3980_v5 = vld [vmem:[%s6761_s10 + $0x1] ss:$0 sm:$0xff] }
 0x78a   : > { %v6274_v36 = vmul.f32 0.5, %v1433_v45  ;;  %v6278_v17 = vsel %vm1410_vm11, %v6161_v59, %v6148_v3  ;;  %v6282_v27 = vsel %vm1410_vm11, %v6152_v51, %v6161_v59  ;;  %v1454_v61 = vmax.f32 %v1446_v48, 0.0  ;;  %v4383_v10 = vpop.f32.mrf.mxu0  ;;  %v4016_v51 = vld [vmem:[%s6761_s10 + $0x3] ss:$0 sm:$0xff] }
 0x78b   : > { %v1434_v47 = vadd.f32 %v6282_v27, %v6278_v17  ;;  %v1455_v35 = vmax.f32 %v1447_v55, 0.0  ;;  %v1473_v20 = vsel %vm610_vm2, %v1461_v52, 0.0  ;;  %v1448_v12 = vsub.f32 %v4822_v38, %v6272_v44 }
 0x78c   : > { %v1449_v3 = vsub.f32 %v4824_v39, %v6274_v36  ;;  %1474 = vadd.xlane.f32.xlu0 %v1473_v20  ;;  %v1462_v8 = vmul.f32 %v1454_v61, %v1454_v61  ;;  %v3535_v11 = vpop.f32.mrf.mxu0  ;;  %v3095_v56 = vadd.f32 %v4016_v51, %v6188_v46  ;;  %v3242_v52 = vadd.f32 %v4034_v34, %v6205_v6  ;;  %v3998_v46 = vld [vmem:[%s6761_s10 + $0x2] ss:$0 sm:$0xff]  ;;  %v4088_v6 = vld [vmem:[%s6761_s10 + $0x7] ss:$0 sm:$0xff] }
 0x78d   : > { %v6294_v59 = vmul.f32 0.5, %v1434_v47  ;;  %v1463_v18 = vmul.f32 %v1455_v35, %v1455_v35  ;;  %v1456_v50 = vmax.f32 %v1448_v12, 0.0  ;;  %v3389_v35 = vadd.f32 %v4052_v28, %v3388_v58 }
 0x78e   : > { %v1457_v57 = vmax.f32 %v1449_v3, 0.0  ;;  %v1476_v32 = vsel %vm610_vm2, %v1462_v8, 0.0  ;;  %v4398_v45 = vpop.f32.mrf.mxu0  ;;  %v2653_v12 = vadd.f32 %v3962_v1, %v6170_v24  ;;  %v2800_v8 = vadd.f32 %v3980_v5, %v6172_v60  ;;  %v4070_v24 = vld [vmem:[%s6761_s10 + $0x6] ss:$0 sm:$0xff] }
 0x78f   : > { %v1479_v22 = vsel %vm610_vm2, %v1463_v18, 0.0  ;;  %v1450_v42 = vsub.f32 %v4830_v13, %v6294_v59  ;;  %1477 = vadd.xlane.f32.xlu1 %v1476_v32  ;;  %v1464_v48 = vmul.f32 %v1456_v50, %v1456_v50  ;;  %v3699_v18 = vrot.slane %v3095_v56, 6 }
 0x790   : > { %v1465_v55 = vmul.f32 %v1457_v57, %v1457_v57  ;;  %1480 = vadd.xlane.f32.xlu0 %v1479_v22  ;;  %v3538_v61 = vpop.f32.mrf.mxu0  ;;  %v3702_v58 = vrot.slane %v3242_v52, 4  ;;  %v2947_v57 = vadd.f32 %v3998_v46, %v6174_v63  ;;  %v3705_v32 = vrot.slane %v3389_v35, 2 }
 0x791   : > { %v1458_v47 = vmax.f32 %v1450_v42, 0.0  ;;  %v1482_v10 = vsel %vm610_vm2, %v1464_v48, 0.0  ;;  %v3693_v28 = vrot.slane %v2653_v12, 4  ;;  %v3696_v45 = vrot.slane %v2800_v8, 2 }
 0x792   : > { %v1485_v20 = vsel %vm610_vm2, %v1465_v55, 0.0  ;;  %v4399_v51 = vpop.f32.mrf.mxu0  ;;  %v3716_v60 = vsel %vm3710_vm9, %v2947_v57, %v3699_v18  ;;  %v3536_v1 = vadd.f32 %v4070_v24, %v3535_v11 }
 0x793   : > { %v1466_v3 = vmul.f32 %v1458_v47, %v1458_v47  ;;  %1483 = vadd.xlane.f32.xlu1 %v1482_v10  ;;  %v3717_v48 = vsel %vm3712_vm12, %v3716_v60, %v3702_v58  ;;  %v3713_v47 = vsel %vm3712_vm12, %v5901_v41, %v3693_v28 }
 0x794   : > { %1486 = vadd.xlane.f32.xlu0 %v1485_v20  ;;  %v3683_v50 = vpop.f32.mrf.mxu0  ;;  %v3718_v52 = vsel %vm3714_vm13, %v3717_v48, %v3705_v32  ;;  %v3715_v35 = vsel %vm3714_vm13, %v3713_v47, %v3696_v45 }
 0x795   : > { %v1488_v34 = vsel %vm610_vm2, %v1466_v3, 0.0  ;;  %v3684_v22 = vadd.f32 %v4088_v6, %v3683_v50  ;;  %v3720_v20 = vpack.c.bf16 %v3718_v52, %v3715_v35 }
 0x796   : > { %v4414_v42 = vpop.f32.mrf.mxu0 }
 0x797   : > { %1489 = vadd.xlane.f32.xlu1 %v1488_v34  ;;  %v3708_v56 = vrot.slane %v3684_v22, 6 }
 0x798   : > { %v3686_v55 = vpop.f32.mrf.mxu0 }
 0x799   : > { %v3719_v5 = vsel %vm3710_vm9, %v3536_v1, %v3708_v56 }
 0x79a   : > { %v3721_v63 = vpack.c.bf16 %v3719_v5, %v3719_v5  ;;  %v4415_v61 = vpop.f32.mrf.mxu0 }
 0x79c   : > { %4432 = vmatprep.subr.msk.bf16.mxu1 %vm3710_vm9, %v3721_v63  ;;  %v3735_v10 = vsel %vm3710_vm9, %v3721_v63, 0 }
 0x79d   : > { %4417 = vmatpush3.bf16.msra.mxu1 %v3735_v10 }
 0x79e   : > { %4418 = vmatprep.subr.bf16.mxu1 %v3720_v20 }
 0x7a1   : > { %4419 = vmatpush3.bf16.msra.mxu1 %v3720_v20 }
 0x807   : > { %v1469_v11 = vpop.xlane.xlu0 %1468 }
 0x808   : > { %vm1491_vm14 = vcmp.ge.f32.partialorder %v1469_v11, 1.0 }
 0x809   : > { %v6336_v12 = vsel %vm1491_vm14, %v6186_v9, %v6178_v23  ;;  %v6340_v41 = vsel %vm1491_vm14, %v6182_v14, %v6186_v9 }
 0x80a   : > { %v1515_v46 = vadd.f32 %v6340_v41, %v6336_v12 }
 0x80c   : > { %v6344_v3 = vmul.f32 0.5, %v1515_v46 }
 0x80e   : > { %v1531_v51 = vsub.f32 %v4806_v4, %v6344_v3 }
 0x80f   : > { %v1472_v8 = vpop.xlane.xlu1 %1471 }
 0x810   : > { %v1539_v6 = vmax.f32 %v1531_v51, 0.0  ;;  %vm1492_vm9 = vcmp.ge.f32.partialorder %v1472_v8, 1.0 }
 0x811   : > { %v6350_v23 = vsel %vm1492_vm9, %v6202_v2, %v6194_v29  ;;  %v6354_v14 = vsel %vm1492_vm9, %v6198_v31, %v6202_v2 }
 0x812   : > { %v1547_v18 = vmul.f32 %v1539_v6, %v1539_v6  ;;  %v1516_v9 = vadd.f32 %v6354_v14, %v6350_v23 }
 0x814   : > { %v1555_v58 = vsel %vm610_vm2, %v1547_v18, 0.0  ;;  %v6359_v34 = vmul.f32 0.5, %v1516_v9 }
 0x815   : > { %1556 = vadd.xlane.f32.xlu0 %v1555_v58  ;;  %v1475_v24 = vpop.xlane.xlu0 %1474 }
 0x816   : > { %vm1493_vm15 = vcmp.ge.f32.partialorder %v1475_v24, 1.0  ;;  %v1532_v31 = vsub.f32 %v4809_v15, %v6359_v34 }
 0x817   : > { %v6363_v50 = vsel %vm1493_vm15, %v6219_v62, %v6209_v40  ;;  %v6367_v29 = vsel %vm1493_vm15, %v6213_v33, %v6219_v62 }
 0x818   : > { %v1517_v2 = vadd.f32 %v6367_v29, %v6363_v50  ;;  %v1478_v57 = vpop.xlane.xlu1 %1477  ;;  %v1540_v22 = vmax.f32 %v1532_v31, 0.0 }
 0x819   : > { %vm1494_vm1 = vcmp.ge.f32.partialorder %v1478_v57, 1.0  ;;  %v1481_v32 = vpop.xlane.xlu0 %1480 }
 0x81a   : > { %v6373_v28 = vmul.f32 0.5, %v1517_v2  ;;  %v6377_v40 = vsel %vm1494_vm1, %v6243_v0, %v6223_v19  ;;  %v6381_v33 = vsel %vm1494_vm1, %v6227_v21, %v6243_v0  ;;  %vm1495_vm4 = vcmp.ge.f32.partialorder %v1481_v32, 1.0 }
 0x81b   : > { %v1518_v62 = vadd.f32 %v6381_v33, %v6377_v40  ;;  %v6387_v42 = vsel %vm1495_vm4, %v6245_v53, %v6233_v7  ;;  %v6391_v45 = vsel %vm1495_vm4, %v6237_v54, %v6245_v53  ;;  %v1548_v60 = vmul.f32 %v1540_v22, %v1540_v22 }
 0x81c   : > { %v1519_v19 = vadd.f32 %v6391_v45, %v6387_v42  ;;  %v1484_v1 = vpop.xlane.xlu1 %1483  ;;  %v1533_v21 = vsub.f32 %v4811_v16, %v6373_v28 }
 0x81d   : > { %v6397_v0 = vmul.f32 0.5, %v1518_v62  ;;  %vm1496_vm5 = vcmp.ge.f32.partialorder %v1484_v1, 1.0  ;;  %v1487_v56 = vpop.xlane.xlu0 %1486  ;;  %v1558_v48 = vsel %vm610_vm2, %v1548_v60, 0.0 }
 0x81e   : > { %v6400_v7 = vmul.f32 0.5, %v1519_v19  ;;  %v6404_v54 = vsel %vm1496_vm5, %v6272_v44, %v6249_v30  ;;  %v6408_v53 = vsel %vm1496_vm5, %v6253_v49, %v6272_v44  ;;  %vm1497_vm6 = vcmp.ge.f32.partialorder %v1487_v56, 1.0  ;;  %1559 = vadd.xlane.f32.xlu1 %v1558_v48 }
 0x81f   : > { %v1520_v55 = vadd.f32 %v6408_v53, %v6404_v54  ;;  %v6414_v5 = vsel %vm1497_vm6, %v6274_v36, %v6259_v37  ;;  %v6418_v52 = vsel %vm1497_vm6, %v6263_v43, %v6274_v36  ;;  %v1541_v47 = vmax.f32 %v1533_v21, 0.0 }
 0x820   : > { %v1521_v30 = vadd.f32 %v6418_v52, %v6414_v5  ;;  %v1490_v63 = vpop.xlane.xlu1 %1489  ;;  %v1534_v49 = vsub.f32 %v4815_v25, %v6397_v0  ;;  %v1535_v44 = vsub.f32 %v4817_v26, %v6400_v7 }
 0x821   : > { %v6426_v61 = vmul.f32 0.5, %v1520_v55  ;;  %vm1498_vm7 = vcmp.ge.f32.partialorder %v1490_v63, 1.0  ;;  %v1549_v37 = vmul.f32 %v1541_v47, %v1541_v47 }
 0x822   : > { %v6428_v35 = vmul.f32 0.5, %v1521_v30  ;;  %v6432_v43 = vsel %vm1498_vm7, %v6294_v59, %v6278_v17  ;;  %v6436_v36 = vsel %vm1498_vm7, %v6282_v27, %v6294_v59  ;;  %v1542_v10 = vmax.f32 %v1534_v49, 0.0 }
 0x823   : > { %v1522_v20 = vadd.f32 %v6436_v36, %v6432_v43  ;;  %v1561_v11 = vsel %vm610_vm2, %v1549_v37, 0.0  ;;  %v1543_v46 = vmax.f32 %v1535_v44, 0.0  ;;  %v1536_v51 = vsub.f32 %v4822_v38, %v6426_v61 }
 0x824   : > { %1562 = vadd.xlane.f32.xlu0 %v1561_v11  ;;  %v1550_v6 = vmul.f32 %v1542_v10, %v1542_v10  ;;  %v1537_v17 = vsub.f32 %v4824_v39, %v6428_v35 }
 0x825   : > { %v6445_v8 = vmul.f32 0.5, %v1522_v20  ;;  %v1551_v18 = vmul.f32 %v1543_v46, %v1543_v46  ;;  %v1544_v27 = vmax.f32 %v1536_v51, 0.0 }
 0x826   : > { %v1564_v59 = vsel %vm610_vm2, %v1550_v6, 0.0  ;;  %v1545_v9 = vmax.f32 %v1537_v17, 0.0 }
 0x827   : > { %1565 = vadd.xlane.f32.xlu1 %v1564_v59  ;;  %v1567_v58 = vsel %vm610_vm2, %v1551_v18, 0.0  ;;  %v1552_v24 = vmul.f32 %v1544_v27, %v1544_v27  ;;  %v1538_v31 = vsub.f32 %v4830_v13, %v6445_v8 }
 0x828   : > { %1568 = vadd.xlane.f32.xlu0 %v1567_v58  ;;  %v1553_v2 = vmul.f32 %v1545_v9, %v1545_v9 }
 0x829   : > { %v1570_v57 = vsel %vm610_vm2, %v1552_v24, 0.0  ;;  %v1546_v32 = vmax.f32 %v1538_v31, 0.0 }
 0x82a   : > { %v1573_v22 = vsel %vm610_vm2, %v1553_v2, 0.0 }
 0x82b   : > { %1571 = vadd.xlane.f32.xlu1 %v1570_v57  ;;  %v1554_v62 = vmul.f32 %v1546_v32, %v1546_v32 }
 0x82c   : > { %1574 = vadd.xlane.f32.xlu0 %v1573_v22 }
 0x82d   : > { %v1576_v60 = vsel %vm610_vm2, %v1554_v62, 0.0 }
 0x82f   : > { %1577 = vadd.xlane.f32.xlu1 %v1576_v60 }
 0x89e   : > { %v1557_v19 = vpop.xlane.xlu0 %1556 }
 0x89f   : > { %vm1579_vm8 = vcmp.ge.f32.partialorder %v1557_v19, 1.0 }
 0x8a0   : > { %v6456_v1 = vsel %vm1579_vm8, %v6344_v3, %v6336_v12  ;;  %v6460_v21 = vsel %vm1579_vm8, %v6340_v41, %v6344_v3 }
 0x8a1   : > { %v1603_v56 = vadd.f32 %v6460_v21, %v6456_v1 }
 0x8a3   : > { %v6464_v48 = vmul.f32 0.5, %v1603_v56 }
 0x8a5   : > { %v1619_v55 = vsub.f32 %v4806_v4, %v6464_v48 }
 0x8a7   : > { %v1627_v47 = vmax.f32 %v1619_v55, 0.0  ;;  %v1560_v30 = vpop.xlane.xlu1 %1559 }
 0x8a8   : > { %vm1580_vm10 = vcmp.ge.f32.partialorder %v1560_v30, 1.0 }
 0x8a9   : > { %v1635_v63 = vmul.f32 %v1627_v47, %v1627_v47  ;;  %v6470_v12 = vsel %vm1580_vm10, %v6359_v34, %v6350_v23  ;;  %v6474_v41 = vsel %vm1580_vm10, %v6354_v14, %v6359_v34 }
 0x8aa   : > { %v1604_v3 = vadd.f32 %v6474_v41, %v6470_v12 }
 0x8ab   : > { %v1643_v49 = vsel %vm610_vm2, %v1635_v63, 0.0 }
 0x8ac   : > { %1644 = vadd.xlane.f32.xlu0 %v1643_v49  ;;  %v6479_v44 = vmul.f32 0.5, %v1604_v3 }
 0x8ad   : > { %v1563_v37 = vpop.xlane.xlu0 %1562 }
 0x8ae   : > { %vm1581_vm3 = vcmp.ge.f32.partialorder %v1563_v37, 1.0  ;;  %v1620_v10 = vsub.f32 %v4809_v15, %v6479_v44 }
 0x8af   : > { %v6485_v23 = vsel %vm1581_vm3, %v6373_v28, %v6363_v50  ;;  %v6489_v14 = vsel %vm1581_vm3, %v6367_v29, %v6373_v28 }
 0x8b0   : > { %v1605_v34 = vadd.f32 %v6489_v14, %v6485_v23  ;;  %v1566_v20 = vpop.xlane.xlu1 %1565  ;;  %v1628_v11 = vmax.f32 %v1620_v10, 0.0 }
 0x8b1   : > { %vm1582_vm11 = vcmp.ge.f32.partialorder %v1566_v20, 1.0  ;;  %v1569_v46 = vpop.xlane.xlu0 %1568 }
 0x8b2   : > { %v6493_v51 = vmul.f32 0.5, %v1605_v34  ;;  %v6497_v6 = vsel %vm1582_vm11, %v6397_v0, %v6377_v40  ;;  %v6501_v50 = vsel %vm1582_vm11, %v6381_v33, %v6397_v0  ;;  %vm1583_vm12 = vcmp.ge.f32.partialorder %v1569_v46, 1.0 }
 0x8b3   : > { %v1606_v29 = vadd.f32 %v6501_v50, %v6497_v6  ;;  %v6507_v28 = vsel %vm1583_vm12, %v6400_v7, %v6387_v42  ;;  %v6511_v17 = vsel %vm1583_vm12, %v6391_v45, %v6400_v7  ;;  %v1636_v18 = vmul.f32 %v1628_v11, %v1628_v11 }
 0x8b4   : > { %v1607_v40 = vadd.f32 %v6511_v17, %v6507_v28  ;;  %v1572_v27 = vpop.xlane.xlu1 %1571  ;;  %v1621_v33 = vsub.f32 %v4811_v16, %v6493_v51 }
 0x8b5   : > { %v6517_v0 = vmul.f32 0.5, %v1606_v29  ;;  %vm1584_vm13 = vcmp.ge.f32.partialorder %v1572_v27, 1.0  ;;  %v1575_v59 = vpop.xlane.xlu0 %1574  ;;  %v1646_v9 = vsel %vm610_vm2, %v1636_v18, 0.0 }
 0x8b6   : > { %v6520_v42 = vmul.f32 0.5, %v1607_v40  ;;  %v6524_v45 = vsel %vm1584_vm13, %v6426_v61, %v6404_v54  ;;  %v6528_v7 = vsel %vm1584_vm13, %v6408_v53, %v6426_v61  ;;  %vm1585_vm14 = vcmp.ge.f32.partialorder %v1575_v59, 1.0  ;;  %1647 = vadd.xlane.f32.xlu1 %v1646_v9 }
 0x8b7   : > { %v1608_v58 = vadd.f32 %v6528_v7, %v6524_v45  ;;  %v6534_v24 = vsel %vm1585_vm14, %v6428_v35, %v6414_v5  ;;  %v6538_v31 = vsel %vm1585_vm14, %v6418_v52, %v6428_v35  ;;  %v1629_v2 = vmax.f32 %v1621_v33, 0.0 }
 0x8b8   : > { %v1609_v54 = vadd.f32 %v6538_v31, %v6534_v24  ;;  %v1578_v57 = vpop.xlane.xlu1 %1577  ;;  %v1622_v53 = vsub.f32 %v4815_v25, %v6517_v0  ;;  %v1623_v61 = vsub.f32 %v4817_v26, %v6520_v42 }
 0x8b9   : > { %v6546_v32 = vmul.f32 0.5, %v1608_v58  ;;  %vm1586_vm9 = vcmp.ge.f32.partialorder %v1578_v57, 1.0  ;;  %v1637_v5 = vmul.f32 %v1629_v2, %v1629_v2 }
 0x8ba   : > { %v6548_v22 = vmul.f32 0.5, %v1609_v54  ;;  %v6552_v52 = vsel %vm1586_vm9, %v6445_v8, %v6432_v43  ;;  %v6556_v35 = vsel %vm1586_vm9, %v6436_v36, %v6445_v8  ;;  %v1630_v62 = vmax.f32 %v1622_v53, 0.0 }
 0x8bb   : > { %v1610_v60 = vadd.f32 %v6556_v35, %v6552_v52  ;;  %v1649_v19 = vsel %vm610_vm2, %v1637_v5, 0.0  ;;  %v1631_v56 = vmax.f32 %v1623_v61, 0.0  ;;  %v1624_v55 = vsub.f32 %v4822_v38, %v6546_v32 }
 0x8bc   : > { %1650 = vadd.xlane.f32.xlu0 %v1649_v19  ;;  %v1638_v47 = vmul.f32 %v1630_v62, %v1630_v62  ;;  %v1625_v43 = vsub.f32 %v4824_v39, %v6548_v22 }
 0x8bd   : > { %v6565_v30 = vmul.f32 0.5, %v1610_v60  ;;  %v1639_v63 = vmul.f32 %v1631_v56, %v1631_v56  ;;  %v1632_v36 = vmax.f32 %v1624_v55, 0.0 }
 0x8be   : > { %v1652_v8 = vsel %vm610_vm2, %v1638_v47, 0.0  ;;  %v1633_v3 = vmax.f32 %v1625_v43, 0.0 }
 0x8bf   : > { %1653 = vadd.xlane.f32.xlu1 %v1652_v8  ;;  %v1655_v49 = vsel %vm610_vm2, %v1639_v63, 0.0  ;;  %v1640_v37 = vmul.f32 %v1632_v36, %v1632_v36  ;;  %v1626_v10 = vsub.f32 %v4830_v13, %v6565_v30 }
 0x8c0   : > { %1656 = vadd.xlane.f32.xlu0 %v1655_v49  ;;  %v1641_v34 = vmul.f32 %v1633_v3, %v1633_v3 }
 0x8c1   : > { %v1658_v20 = vsel %vm610_vm2, %v1640_v37, 0.0  ;;  %v1634_v11 = vmax.f32 %v1626_v10, 0.0 }
 0x8c2   : > { %v1661_v46 = vsel %vm610_vm2, %v1641_v34, 0.0 }
 0x8c3   : > { %1659 = vadd.xlane.f32.xlu1 %v1658_v20  ;;  %v1642_v29 = vmul.f32 %v1634_v11, %v1634_v11 }
 0x8c4   : > { %1662 = vadd.xlane.f32.xlu0 %v1661_v46 }
 0x8c5   : > { %v1664_v18 = vsel %vm610_vm2, %v1642_v29, 0.0 }
 0x8c7   : > { %1665 = vadd.xlane.f32.xlu1 %v1664_v18 }
 0x935   : > { %v1645_v40 = vpop.xlane.xlu0 %1644 }
 0x936   : > { %vm1667_vm15 = vcmp.ge.f32.partialorder %v1645_v40, 1.0 }
 0x937   : > { %v1675_v27 = vsel %vm1667_vm15, %v6464_v48, %v6456_v1  ;;  %v1683_v33 = vsel %vm1667_vm15, %v6460_v21, %v6464_v48 }
 0x938   : > { %v1691_v59 = vadd.f32 %v1683_v33, %v1675_v27 }
 0x93a   : > { %v6578_v9 = vmul.f32 0.5, %v1691_v59 }
 0x93c   : > { %v1707_v58 = vsub.f32 %v4806_v4, %v6578_v9 }
 0x93e   : > { %v6582_v2 = vmax.f32 %v1707_v58, 0.0 }
 0x93f   : > { %v1648_v54 = vpop.xlane.xlu1 %1647 }
 0x940   : > { %v1763_v57 = vsel %vm610_vm2, %v6582_v2, 0.0  ;;  %vm1668_vm1 = vcmp.ge.f32.partialorder %v1648_v54, 1.0 }
 0x941   : > { %1764 = vadd.xlane.f32.xlu0 %v1763_v57  ;;  %v1676_v1 = vsel %vm1668_vm1, %v6479_v44, %v6470_v12  ;;  %v1684_v21 = vsel %vm1668_vm1, %v6474_v41, %v6479_v44 }
 0x942   : > { %v1692_v48 = vadd.f32 %v1684_v21, %v1676_v1  ;;  %v1723_v1 = vmul.f32 %v6582_v2, %v6582_v2 }
 0x944   : > { %v6590_v53 = vmul.f32 0.5, %v1692_v48 }
 0x945   : > { %v1651_v61 = vpop.xlane.xlu0 %1650 }
 0x946   : > { %vm1669_vm4 = vcmp.ge.f32.partialorder %v1651_v61, 1.0  ;;  %v1708_v5 = vsub.f32 %v4809_v15, %v6590_v53  ;;  %v1731_v61 = vsel %vm610_vm2, %v1723_v1, 0.0 }
 0x947   : > { %v1677_v62 = vsel %vm1669_vm4, %v6493_v51, %v6485_v23  ;;  %v1685_v60 = vsel %vm1669_vm4, %v6489_v14, %v6493_v51 }
 0x948   : > { %v1693_v19 = vadd.f32 %v1685_v60, %v1677_v62  ;;  %v1654_v56 = vpop.xlane.xlu1 %1653  ;;  %v1716_v12 = vmax.f32 %v1708_v5, 0.0 }
 0x949   : > { %vm1670_vm5 = vcmp.ge.f32.partialorder %v1654_v56, 1.0  ;;  %v1657_v55 = vpop.xlane.xlu0 %1656 }
 0x94a   : > { %v6598_v41 = vmul.f32 0.5, %v1693_v19  ;;  %v1678_v44 = vsel %vm1670_vm5, %v6517_v0, %v6497_v6  ;;  %v1686_v47 = vsel %vm1670_vm5, %v6501_v50, %v6517_v0  ;;  %vm1671_vm6 = vcmp.ge.f32.partialorder %v1657_v55, 1.0 }
 0x94b   : > { %v1694_v43 = vadd.f32 %v1686_v47, %v1678_v44  ;;  %v1679_v23 = vsel %vm1671_vm6, %v6520_v42, %v6507_v28  ;;  %v1687_v14 = vsel %vm1671_vm6, %v6511_v17, %v6520_v42  ;;  %v1766_v51 = vsel %vm610_vm2, %v1716_v12, 0.0 }
 0x94c   : > { %v1695_v63 = vadd.f32 %v1687_v14, %v1679_v23  ;;  %v1660_v36 = vpop.xlane.xlu1 %1659  ;;  %1767 = vadd.xlane.f32.xlu1 %v1766_v51  ;;  %v1709_v8 = vsub.f32 %v4811_v16, %v6598_v41  ;;  %v1724_v48 = vmul.f32 %v1716_v12, %v1716_v12 }
 0x94d   : > { %v6611_v6 = vmul.f32 0.5, %v1694_v43  ;;  %vm1672_vm7 = vcmp.ge.f32.partialorder %v1660_v36, 1.0  ;;  %v1663_v50 = vpop.xlane.xlu0 %1662 }
 0x94e   : > { %v6613_v0 = vmul.f32 0.5, %v1695_v63  ;;  %v1680_v28 = vsel %vm1672_vm7, %v6546_v32, %v6524_v45  ;;  %v1688_v17 = vsel %vm1672_vm7, %v6528_v7, %v6546_v32  ;;  %vm1673_vm8 = vcmp.ge.f32.partialorder %v1663_v50, 1.0 }
 0x94f   : > { %v1696_v42 = vadd.f32 %v1688_v17, %v1680_v28  ;;  %v1681_v3 = vsel %vm1673_vm8, %v6548_v22, %v6534_v24  ;;  %v1689_v49 = vsel %vm1673_vm8, %v6538_v31, %v6548_v22  ;;  %v1717_v37 = vmax.f32 %v1709_v8, 0.0 }
 0x950   : > { %v1697_v10 = vadd.f32 %v1689_v49, %v1681_v3  ;;  %v1666_v34 = vpop.xlane.xlu1 %1665  ;;  %v1710_v20 = vsub.f32 %v4815_v25, %v6611_v6  ;;  %v1711_v45 = vsub.f32 %v4817_v26, %v6613_v0  ;;  %v1734_v62 = vsel %vm610_vm2, %v1724_v48, 0.0 }
 0x951   : > { %v6627_v11 = vmul.f32 0.5, %v1696_v42  ;;  %vm1674_vm10 = vcmp.ge.f32.partialorder %v1666_v34, 1.0  ;;  %v1769_v7 = vsel %vm610_vm2, %v1717_v37, 0.0  ;;  %v1725_v5 = vmul.f32 %v1717_v37, %v1717_v37 }
 0x952   : > { %v6630_v32 = vmul.f32 0.5, %v1697_v10  ;;  %v1682_v24 = vsel %vm1674_vm10, %v6565_v30, %v6552_v52  ;;  %v1690_v31 = vsel %vm1674_vm10, %v6556_v35, %v6565_v30  ;;  %1770 = vadd.xlane.f32.xlu0 %v1769_v7  ;;  %v1718_v22 = vmax.f32 %v1710_v20, 0.0 }
 0x953   : > { %v1698_v46 = vadd.f32 %v1690_v31, %v1682_v24  ;;  %v1719_v29 = vmax.f32 %v1711_v45, 0.0  ;;  %v1712_v18 = vsub.f32 %v4822_v38, %v6627_v11  ;;  %v1737_v19 = vsel %vm610_vm2, %v1725_v5, 0.0 }
 0x954   : > { %v1772_v40 = vsel %vm610_vm2, %v1718_v22, 0.0  ;;  %v1713_v27 = vsub.f32 %v4824_v39, %v6630_v32  ;;  %v1726_v60 = vmul.f32 %v1718_v22, %v1718_v22 }
 0x955   : > { %v6641_v33 = vmul.f32 0.5, %v1698_v46  ;;  %1773 = vadd.xlane.f32.xlu1 %v1772_v40  ;;  %v1775_v52 = vsel %vm610_vm2, %v1719_v29, 0.0  ;;  %v1720_v59 = vmax.f32 %v1712_v18, 0.0  ;;  %v1727_v56 = vmul.f32 %v1719_v29, %v1719_v29 }
 0x956   : > { %1776 = vadd.xlane.f32.xlu0 %v1775_v52  ;;  %v1721_v35 = vmax.f32 %v1713_v27, 0.0  ;;  %v1740_v55 = vsel %vm610_vm2, %v1726_v60, 0.0 }
 0x957   : > { %v1778_v30 = vsel %vm610_vm2, %v1720_v59, 0.0  ;;  %v1714_v58 = vsub.f32 %v4830_v13, %v6641_v33  ;;  %v1728_v2 = vmul.f32 %v1720_v59, %v1720_v59  ;;  %v1743_v44 = vsel %vm610_vm2, %v1727_v56, 0.0 }
 0x958   : > { %v1781_v54 = vsel %vm610_vm2, %v1721_v35, 0.0  ;;  %v1729_v12 = vmul.f32 %v1721_v35, %v1721_v35 }
 0x959   : > { %1779 = vadd.xlane.f32.xlu1 %v1778_v30  ;;  %v1722_v57 = vmax.f32 %v1714_v58, 0.0  ;;  %v1746_v47 = vsel %vm610_vm2, %v1728_v2, 0.0 }
 0x95a   : > { %1782 = vadd.xlane.f32.xlu0 %v1781_v54  ;;  %v1749_v23 = vsel %vm610_vm2, %v1729_v12, 0.0 }
 0x95b   : > { %v1784_v21 = vsel %vm610_vm2, %v1722_v57, 0.0  ;;  %v1730_v43 = vmul.f32 %v1722_v57, %v1722_v57 }
 0x95d   : > { %1785 = vadd.xlane.f32.xlu1 %v1784_v21  ;;  %v1752_v14 = vsel %vm610_vm2, %v1730_v43, 0.0 }
 0x95e   : > { %1732 = vadd.xlane.f32.xlu0 %v1731_v61 }
 0x961   : > { %1735 = vadd.xlane.f32.xlu1 %v1734_v62 }
 0x962   : > { %1738 = vadd.xlane.f32.xlu0 %v1737_v19 }
 0x965   : > { %1741 = vadd.xlane.f32.xlu1 %v1740_v55 }
 0x966   : > { %1744 = vadd.xlane.f32.xlu0 %v1743_v44 }
 0x969   : > { %1747 = vadd.xlane.f32.xlu1 %v1746_v47 }
 0x96a   : > { %1750 = vadd.xlane.f32.xlu0 %v1749_v23 }
 0x96d   : > { %1753 = vadd.xlane.f32.xlu1 %v1752_v14 }
 0x9ca   : > { %v1765_v51 = vpop.xlane.xlu0 %1764 }
 0x9cb   : > { %v1787_v63 = vmul.f32 2.0, %v1765_v51 }
 0x9cd   : > { %v1795_v8 = vmax.f32 %v1787_v63, 1e-30 }
 0x9cf   : > { %4565 = vrcp.f32 %v1795_v8 }
 0x9d5   : > { %v1768_v36 = vpop.xlane.xlu1 %1767 }
 0x9d6   : > { %v1788_v50 = vmul.f32 2.0, %v1768_v36 }
 0x9d8   : > { %v1796_v28 = vmax.f32 %v1788_v50, 1e-30 }
 0x9da   : > { %4567 = vrcp.f32 %v1796_v28 }
 0x9db   : > { %v1771_v17 = vpop.xlane.xlu0 %1770 }
 0x9dc   : > { %v1789_v42 = vmul.f32 2.0, %v1771_v17  ;;  %v4566_v40 = vpop.eup %4565 }
 0x9de   : > { %v1797_v3 = vmax.f32 %v1789_v42, 1e-30  ;;  %v1774_v49 = vpop.xlane.xlu1 %1773 }
 0x9df   : > { %v1790_v37 = vmul.f32 2.0, %v1774_v49  ;;  %v1777_v10 = vpop.xlane.xlu0 %1776 }
 0x9e0   : > { %4569 = vrcp.f32 %v1797_v3  ;;  %v1791_v34 = vmul.f32 2.0, %v1777_v10 }
 0x9e1   : > { %v1798_v20 = vmax.f32 %v1790_v37, 1e-30 }
 0x9e2   : > { %v1799_v45 = vmax.f32 %v1791_v34, 1e-30  ;;  %v1780_v7 = vpop.xlane.xlu1 %1779 }
 0x9e3   : > { %4571 = vrcp.f32 %v1798_v20  ;;  %v1792_v24 = vmul.f32 2.0, %v1780_v7  ;;  %v1783_v31 = vpop.xlane.xlu0 %1782 }
 0x9e4   : > { %4573 = vrcp.f32 %v1799_v45  ;;  %v1793_v22 = vmul.f32 2.0, %v1783_v31 }
 0x9e5   : > { %v1800_v46 = vmax.f32 %v1792_v24, 1e-30 }
 0x9e6   : > { %v1801_v29 = vmax.f32 %v1793_v22, 1e-30  ;;  %v1786_v18 = vpop.xlane.xlu1 %1785 }
 0x9e7   : > { %4575 = vrcp.f32 %v1800_v46  ;;  %v1794_v27 = vmul.f32 2.0, %v1786_v18  ;;  %v1733_v52 = vpop.xlane.xlu0 %1732  ;;  %v4568_v30 = vpop.eup %4567 }
 0x9e8   : > { %4577 = vrcp.f32 %v1801_v29  ;;  %v3888_v59 = vadd.f32 -1.0, %v1733_v52 }
 0x9e9   : > { %v1802_v35 = vmax.f32 %v1794_v27, 1e-30 }
 0x9ea   : > { %v1804_v58 = vmul.f32 %v4566_v40, %v3888_v59  ;;  %v1736_v54 = vpop.xlane.xlu1 %1735 }
 0x9eb   : > { %4579 = vrcp.f32 %v1802_v35  ;;  %v3889_v57 = vadd.f32 -1.0, %v1736_v54  ;;  %v1739_v1 = vpop.xlane.xlu0 %1738 }
 0x9ec   : > { %v6660_v21 = vadd.f32 %v1804_v58, %v6578_v9  ;;  %v3890_v48 = vadd.f32 -1.0, %v1739_v1 }
 0x9ed   : > { %v4570_v61 = vpop.eup %4569  ;;  %v1806_v5 = vmul.f32 %v4568_v30, %v3889_v57 }
 0x9ee   : > { %v1808_v62 = vmul.f32 %v4570_v61, %v3890_v48  ;;  %v1742_v60 = vpop.xlane.xlu1 %1741  ;;  %v1827_v19 = vsub.f32 %v4806_v4, %v6660_v21 }
 0x9ef   : > { %v6665_v56 = vadd.f32 %v1806_v5, %v6590_v53  ;;  %v3891_v55 = vadd.f32 -1.0, %v1742_v60  ;;  %v1745_v2 = vpop.xlane.xlu0 %1744 }
 0x9f0   : > { %v4572_v44 = vpop.eup %4571  ;;  %v6668_v12 = vadd.f32 %v1808_v62, %v6598_v41  ;;  %v3892_v47 = vadd.f32 -1.0, %v1745_v2  ;;  %v1835_v9 = vmax.f32 %v1827_v19, 0.0 }
 0x9f1   : > { %v4574_v43 = vpop.eup %4573  ;;  %v1810_v23 = vmul.f32 %v4572_v44, %v3891_v55  ;;  %v1828_v14 = vsub.f32 %v4809_v15, %v6665_v56 }
 0x9f2   : > { %v1812_v51 = vmul.f32 %v4574_v43, %v3892_v47  ;;  %v1748_v63 = vpop.xlane.xlu1 %1747  ;;  %v1883_v36 = vsel %vm610_vm2, %v1835_v9, 0.0  ;;  %v1829_v53 = vsub.f32 %v4811_v16, %v6668_v12  ;;  %v1843_v1 = vmul.f32 %v1835_v9, %v1835_v9 }
 0x9f3   : > { %v6676_v8 = vadd.f32 %v1810_v23, %v6611_v6  ;;  %v3893_v50 = vadd.f32 -1.0, %v1748_v63  ;;  %1884 = vadd.xlane.f32.xlu0 %v1883_v36  ;;  %v1751_v41 = vpop.xlane.xlu0 %1750  ;;  %v1836_v28 = vmax.f32 %v1828_v14, 0.0 }
 0x9f4   : > { %v4576_v17 = vpop.eup %4575  ;;  %v6679_v42 = vadd.f32 %v1812_v51, %v6613_v0  ;;  %v3894_v3 = vadd.f32 -1.0, %v1751_v41  ;;  %v1837_v49 = vmax.f32 %v1829_v53, 0.0 }
 0x9f5   : > { %v4578_v37 = vpop.eup %4577  ;;  %v1814_v10 = vmul.f32 %v4576_v17, %v3893_v50  ;;  %v1886_v34 = vsel %vm610_vm2, %v1836_v28, 0.0  ;;  %v1830_v20 = vsub.f32 %v4815_v25, %v6676_v8  ;;  %v1844_v5 = vmul.f32 %v1836_v28, %v1836_v28 }
 0x9f6   : > { %v1816_v45 = vmul.f32 %v4578_v37, %v3894_v3  ;;  %1887 = vadd.xlane.f32.xlu1 %v1886_v34  ;;  %v1754_v6 = vpop.xlane.xlu1 %1753  ;;  %v1889_v7 = vsel %vm610_vm2, %v1837_v49, 0.0  ;;  %v1831_v24 = vsub.f32 %v4817_v26, %v6679_v42  ;;  %v1845_v62 = vmul.f32 %v1837_v49, %v1837_v49 }
 0x9f7   : > { %v6688_v0 = vadd.f32 %v1814_v10, %v6627_v11  ;;  %v3895_v31 = vadd.f32 -1.0, %v1754_v6  ;;  %1890 = vadd.xlane.f32.xlu0 %v1889_v7  ;;  %v1838_v22 = vmax.f32 %v1830_v20, 0.0  ;;  %v1854_v60 = vsel %vm610_vm2, %v1844_v5, 0.0 }
 0x9f8   : > { %v4580_v46 = vpop.eup %4579  ;;  %v6691_v29 = vadd.f32 %v1816_v45, %v6630_v32  ;;  %v1839_v18 = vmax.f32 %v1831_v24, 0.0  ;;  %v1857_v55 = vsel %vm610_vm2, %v1845_v62, 0.0 }
 0x9f9   : > { %v1818_v40 = vmul.f32 %v4580_v46, %v3895_v31  ;;  %v1892_v27 = vsel %vm610_vm2, %v1838_v22, 0.0  ;;  %v1832_v52 = vsub.f32 %v4822_v38, %v6688_v0  ;;  %v1846_v19 = vmul.f32 %v1838_v22, %v1838_v22 }
 0x9fa   : > { %1893 = vadd.xlane.f32.xlu1 %v1892_v27  ;;  %v1895_v59 = vsel %vm610_vm2, %v1839_v18, 0.0  ;;  %v1833_v11 = vsub.f32 %v4824_v39, %v6691_v29  ;;  %v1847_v2 = vmul.f32 %v1839_v18, %v1839_v18 }
 0x9fb   : > { %v6700_v35 = vadd.f32 %v1818_v40, %v6641_v33  ;;  %1896 = vadd.xlane.f32.xlu0 %v1895_v59  ;;  %v1840_v30 = vmax.f32 %v1832_v52, 0.0  ;;  %v1851_v33 = vsel %vm610_vm2, %v1843_v1, 0.0  ;;  %v1860_v44 = vsel %vm610_vm2, %v1846_v19, 0.0 }
 0x9fc   : > { %v1841_v32 = vmax.f32 %v1833_v11, 0.0  ;;  %v1863_v9 = vsel %vm610_vm2, %v1847_v2, 0.0 }
 0x9fd   : > { %v1898_v58 = vsel %vm610_vm2, %v1840_v30, 0.0  ;;  %v1834_v54 = vsub.f32 %v4830_v13, %v6700_v35  ;;  %v1848_v47 = vmul.f32 %v1840_v30, %v1840_v30 }
 0x9fe   : > { %1899 = vadd.xlane.f32.xlu1 %v1898_v58  ;;  %v1901_v57 = vsel %vm610_vm2, %v1841_v32, 0.0  ;;  %v1849_v43 = vmul.f32 %v1841_v32, %v1841_v32 }
 0x9ff   : > { %1902 = vadd.xlane.f32.xlu0 %v1901_v57  ;;  %v1842_v48 = vmax.f32 %v1834_v54, 0.0  ;;  %v1866_v23 = vsel %vm610_vm2, %v1848_v47, 0.0 }
 0xa00   : > { %v1869_v51 = vsel %vm610_vm2, %v1849_v43, 0.0 }
 0xa01   : > { %v1904_v61 = vsel %vm610_vm2, %v1842_v48, 0.0  ;;  %v1850_v14 = vmul.f32 %v1842_v48, %v1842_v48 }
 0xa02   : > { %1905 = vadd.xlane.f32.xlu1 %v1904_v61 }
 0xa03   : > { %1852 = vadd.xlane.f32.xlu0 %v1851_v33  ;;  %v1872_v63 = vsel %vm610_vm2, %v1850_v14, 0.0 }
 0xa06   : > { %1855 = vadd.xlane.f32.xlu1 %v1854_v60 }
 0xa07   : > { %1858 = vadd.xlane.f32.xlu0 %v1857_v55 }
 0xa0a   : > { %1861 = vadd.xlane.f32.xlu1 %v1860_v44 }
 0xa0b   : > { %1864 = vadd.xlane.f32.xlu0 %v1863_v9 }
 0xa0e   : > { %1867 = vadd.xlane.f32.xlu1 %v1866_v23 }
 0xa0f   : > { %1870 = vadd.xlane.f32.xlu0 %v1869_v51 }
 0xa12   : > { %1873 = vadd.xlane.f32.xlu1 %v1872_v63 }
 0xa7c   : > { %v1885_v36 = vpop.xlane.xlu0 %1884 }
 0xa7d   : > { %v1907_v53 = vmul.f32 2.0, %v1885_v36 }
 0xa7f   : > { %v1915_v50 = vmax.f32 %v1907_v53, 1e-30  ;;  %v1888_v41 = vpop.xlane.xlu1 %1887 }
 0xa80   : > { %v1908_v28 = vmul.f32 2.0, %v1888_v41  ;;  %v1891_v17 = vpop.xlane.xlu0 %1890 }
 0xa81   : > { %4581 = vrcp.f32 %v1915_v50  ;;  %v1909_v3 = vmul.f32 2.0, %v1891_v17 }
 0xa82   : > { %v1916_v49 = vmax.f32 %v1908_v28, 1e-30 }
 0xa83   : > { %v1917_v37 = vmax.f32 %v1909_v3, 1e-30  ;;  %v1894_v10 = vpop.xlane.xlu1 %1893 }
 0xa84   : > { %4583 = vrcp.f32 %v1916_v49  ;;  %v1910_v34 = vmul.f32 2.0, %v1894_v10  ;;  %v1897_v20 = vpop.xlane.xlu0 %1896 }
 0xa85   : > { %4585 = vrcp.f32 %v1917_v37  ;;  %v1911_v45 = vmul.f32 2.0, %v1897_v20 }
 0xa86   : > { %v1918_v6 = vmax.f32 %v1910_v34, 1e-30 }
 0xa87   : > { %v1919_v7 = vmax.f32 %v1911_v45, 1e-30  ;;  %v1900_v24 = vpop.xlane.xlu1 %1899 }
 0xa88   : > { %4587 = vrcp.f32 %v1918_v6  ;;  %v1912_v31 = vmul.f32 2.0, %v1900_v24  ;;  %v1903_v22 = vpop.xlane.xlu0 %1902 }
 0xa89   : > { %4589 = vrcp.f32 %v1919_v7  ;;  %v1913_v46 = vmul.f32 2.0, %v1903_v22 }
 0xa8a   : > { %v1920_v18 = vmax.f32 %v1912_v31, 1e-30 }
 0xa8b   : > { %v1921_v40 = vmax.f32 %v1913_v46, 1e-30  ;;  %v1906_v27 = vpop.xlane.xlu1 %1905 }
 0xa8c   : > { %4591 = vrcp.f32 %v1920_v18  ;;  %v1914_v52 = vmul.f32 2.0, %v1906_v27  ;;  %v1853_v59 = vpop.xlane.xlu0 %1852 }
 0xa8d   : > { %4593 = vrcp.f32 %v1921_v40  ;;  %v3896_v11 = vadd.f32 -1.0, %v1853_v59 }
 0xa8e   : > { %v4582_v30 = vpop.eup %4581  ;;  %v1922_v32 = vmax.f32 %v1914_v52, 1e-30 }
 0xa8f   : > { %v1924_v58 = vmul.f32 %v4582_v30, %v3896_v11  ;;  %v1856_v54 = vpop.xlane.xlu1 %1855 }
 0xa90   : > { %4595 = vrcp.f32 %v1922_v32  ;;  %v3897_v57 = vadd.f32 -1.0, %v1856_v54  ;;  %v1859_v1 = vpop.xlane.xlu0 %1858 }
 0xa91   : > { %v4584_v48 = vpop.eup %4583  ;;  %v1939_v61 = vadd.f32 %v1924_v58, %v6660_v21  ;;  %v3898_v5 = vadd.f32 -1.0, %v1859_v1 }
 0xa92   : > { %v4586_v33 = vpop.eup %4585  ;;  %v1926_v62 = vmul.f32 %v4584_v48, %v3897_v57 }
 0xa93   : > { %v1947_v60 = vsub.f32 %v4806_v4, %v1939_v61  ;;  %v1928_v19 = vmul.f32 %v4586_v33, %v3898_v5  ;;  %v1862_v55 = vpop.xlane.xlu1 %1861 }
 0xa94   : > { %v1940_v2 = vadd.f32 %v1926_v62, %v6665_v56  ;;  %v3899_v44 = vadd.f32 -1.0, %v1862_v55  ;;  %v1865_v47 = vpop.xlane.xlu0 %1864 }
 0xa95   : > { %v4588_v9 = vpop.eup %4587  ;;  %v1941_v43 = vadd.f32 %v1928_v19, %v6668_v12  ;;  %v3900_v23 = vadd.f32 -1.0, %v1865_v47  ;;  %v1955_v51 = vmax.f32 %v1947_v60, 0.0 }
 0xa96   : > { %v4590_v14 = vpop.eup %4589  ;;  %v1948_v63 = vsub.f32 %v4809_v15, %v1940_v2  ;;  %v1930_v21 = vmul.f32 %v4588_v9, %v3899_v44 }
 0xa97   : > { %v1949_v36 = vsub.f32 %v4811_v16, %v1941_v43  ;;  %v1932_v53 = vmul.f32 %v4590_v14, %v3900_v23  ;;  %v1868_v50 = vpop.xlane.xlu1 %1867  ;;  %v1963_v10 = vmul.f32 %v1955_v51, %v1955_v51 }
 0xa98   : > { %v1956_v4 = vmax.f32 %v1948_v63, 0.0  ;;  %v1942_v41 = vadd.f32 %v1930_v21, %v6676_v8  ;;  %v3901_v28 = vadd.f32 -1.0, %v1868_v50  ;;  %v1871_v56 = vpop.xlane.xlu0 %1870 }
 0xa99   : > { %v4592_v17 = vpop.eup %4591  ;;  %v1957_v3 = vmax.f32 %v1949_v36, 0.0  ;;  %v1943_v49 = vadd.f32 %v1932_v53, %v6679_v42  ;;  %v3902_v12 = vadd.f32 -1.0, %v1871_v56 }
 0xa9a   : > { %v4594_v37 = vpop.eup %4593  ;;  %v1964_v34 = vmul.f32 %v1956_v4, %v1956_v4  ;;  %v1950_v15 = vsub.f32 %v4815_v25, %v1942_v41  ;;  %v1934_v20 = vmul.f32 %v4592_v17, %v3901_v28 }
 0xa9b   : > { %v1951_v16 = vsub.f32 %v4817_v26, %v1943_v49  ;;  %v1936_v45 = vmul.f32 %v4594_v37, %v3902_v12  ;;  %v1874_v6 = vpop.xlane.xlu1 %1873  ;;  %v1965_v46 = vmul.f32 %v1957_v3, %v1957_v3 }
 0xa9c   : > { %v1958_v7 = vmax.f32 %v1950_v15, 0.0  ;;  %v1944_v8 = vadd.f32 %v1934_v20, %v6688_v0  ;;  %v3903_v24 = vadd.f32 -1.0, %v1874_v6  ;;  %v1971_v31 = vpack.c.bf16 %v1964_v34, %v1963_v10 }
 0xa9d   : > { %v4596_v22 = vpop.eup %4595  ;;  %v1945_v42 = vadd.f32 %v1936_v45, %v6691_v29  ;;  %v1959_v40 = vmax.f32 %v1951_v16, 0.0 }
 0xa9e   : > { %v1966_v18 = vmul.f32 %v1958_v7, %v1958_v7  ;;  %v1952_v27 = vsub.f32 %v4822_v38, %v1944_v8  ;;  %v1938_v52 = vmul.f32 %v4596_v22, %v3903_v24  ;;  %4420 = vmatprep.mubr.msk.bf16.mxu1 %vm610_vm2, %v1971_v31 }
 0xa9f   : > { %v1953_v25 = vsub.f32 %v4824_v39, %v1945_v42  ;;  %v1967_v11 = vmul.f32 %v1959_v40, %v1959_v40 }
 0xaa0   : > { %v1972_v26 = vpack.c.bf16 %v1966_v18, %v1965_v46  ;;  %v1960_v59 = vmax.f32 %v1952_v27, 0.0  ;;  %v1946_v0 = vadd.f32 %v1938_v52, %v6700_v35 }
 0xaa1   : > { %v1961_v32 = vmax.f32 %v1953_v25, 0.0 }
 0xaa2   : > { %v1968_v30 = vmul.f32 %v1960_v59, %v1960_v59  ;;  %v1954_v58 = vsub.f32 %v4830_v13, %v1946_v0  ;;  %4421 = vmatmul.mubr.msk.bf16.vlgmr.msra.gmra.mxu1 %vm610_vm2, %v1972_v26 }
 0xaa3   : > { %v1969_v38 = vmul.f32 %v1961_v32, %v1961_v32 }
 0xaa4   : > { %v1962_v29 = vmax.f32 %v1954_v58, 0.0  ;;  %v1973_v54 = vpack.c.bf16 %v1968_v30, %v1967_v11 }
 0xaa6   : > { %v1970_v57 = vmul.f32 %v1962_v29, %v1962_v29  ;;  %4424 = vmatprep.mubr.msk.bf16.mxu1 %vm610_vm2, %v1973_v54 }
 0xaa8   : > { %v1974_v1 = vpack.c.bf16 %v1970_v57, %v1969_v38 }
 0xaaa   : > { %4425 = vmatmul.mubr.msk.bf16.gmra.mxu1 %vm610_vm2, %v1974_v1 }
 0xb62   : > { %v4422_v39 = vpop.f32.mrf.mxu1 }
 0xb63   : > { %3804 = vst.msk [vmem:[%s386_s14 + $0x10] sm:$0xff] %vm404_vm0, %v4422_v39 }
 0xb64   : > { %v3771_v13 = vpop.f32.mrf.mxu1 }
 0xb65   : > { %3802 = vst.msk [vmem:[%s386_s14] sm:$0xff] %vm404_vm0, %v3771_v13 }
 0xb66   : > { %v4423_v35 = vpop.f32.mrf.mxu1 }
 0xb67   : > { %3805 = vst.msk [vmem:[%s386_s14 + $0x18] sm:$0xff] %vm404_vm0, %v4423_v35 }
 0xb68   : > { %v3774_v48 = vpop.f32.mrf.mxu1 }
 0xb69   : > { %3803 = vst.msk [vmem:[%s386_s14 + $0x8] sm:$0xff] %vm404_vm0, %v3774_v48 }
 0xb6a   : > { %v4426_v61 = vpop.f32.mrf.mxu1 }
 0xb6b   : > { %3808 = vst.msk [vmem:[%s386_s14 + $0x30] sm:$0xff] %vm404_vm0, %v4426_v61 }
 0xb6c   : > { %v3787_v5 = vpop.f32.mrf.mxu1 }
 0xb6d   : > { %3806 = vst.msk [vmem:[%s386_s14 + $0x20] sm:$0xff] %vm404_vm0, %v3787_v5 }
 0xb6e   : > { %v4427_v33 = vpop.f32.mrf.mxu1 }
 0xb6f   : > { %3809 = vst.msk [vmem:[%s386_s14 + $0x38] sm:$0xff] %vm404_vm0, %v4427_v33 }
 0xb70   : > { %v3790_v62 = vpop.f32.mrf.mxu1 }
 0xb71   : > { %3807 = vst.msk [vmem:[%s386_s14 + $0x28] sm:$0xff] %vm404_vm0, %v3790_v62 }
 0xb72 PF: > { %s21_s17 = sadd.s32 1, %s4611_s17  }
 0xb73   : > { %p18_p4 = scmp.ge.s32.totalorder %s21_s17, 4  }
 0xb75   :  { %20 = sbr.rel (!%p18_p4) target bundleno = 1 (0x1), region = 126 }

</bundles_post_ra>
